<compile_context>
chip_gen: v6e
topology: v6e:2x2x1
jax: 0.10.0
libtpu: 0.0.40
codegen_flags: <defaults>
</compile_context>

<pallas_src>
import functools

import jax
import jax.numpy as jnp
from jax.experimental import pallas as pl
from jax.experimental.pallas import tpu as pltpu

EPS = 1e-12                      # torch.nn.functional.normalize default eps
_VMEM_LIMIT = 64 * 1024 * 1024   # fits v7x (64 MiB physical), raises v5e's 16 MiB default


def _fused_mp_kernel(adj_ref, x_ref, h_ref, hping_ref, acc_ref, ss_ref, *,
                     n, block_rows, block_cols):
    """All `order` message-passing iterations in one grid: grid = (order, i, k).

    h_t = diag(1/max(||adj_row||,eps)) @ adj @ h_{t-1} + x, with h kept
    VMEM-resident in a ping-pong scratch (flattened to (2n, feat)) so it never
    round-trips HBM between iterations. Row L2 norms are recomputed per (t, i)
    from the streamed adj tiles (free: the pass is HBM-bound on adj).
    """
    t = pl.program_id(0)
    i = pl.program_id(1)
    k = pl.program_id(2)
    nt = pl.num_programs(0)
    nk = pl.num_programs(2)
    prev = jax.lax.rem(t + 1, 2)   # slot holding h_{t-1}
    cur = jax.lax.rem(t, 2)        # slot receiving h_t

    # One-time: seed the "previous h" slot (slot 1) with x before iteration 0.
    @pl.when((t == 0) & (i == 0) & (k == 0))
    def _():
        hping_ref[pl.ds(n, n), :] = x_ref[...]

    @pl.when(k == 0)
    def _():
        acc_ref[...] = jnp.zeros_like(acc_ref)
        ss_ref[...] = jnp.zeros_like(ss_ref)

    a = adj_ref[...]
    col = pl.multiple_of(prev * n + k * block_cols, block_cols)
    hk = hping_ref[pl.ds(col, block_cols), :]
    acc_ref[...] += jnp.dot(a, hk.astype(a.dtype),
                            preferred_element_type=jnp.float32)
    a32 = a.astype(jnp.float32)
    ss_ref[...] += jnp.sum(a32 * a32, axis=1, keepdims=True)

    @pl.when(k == nk - 1)
    def _():
        # 1/max(||row||, eps) == rsqrt(max(sum_sq, eps^2)) — EUP op, no divide;
        # diag(inv) @ adj @ h == inv * (adj @ h): adj_n never materialized.
        inv = jax.lax.rsqrt(jnp.maximum(ss_ref[...], EPS * EPS))
        row = pl.multiple_of(i * block_rows, block_rows)
        newh = inv * acc_ref[...] + x_ref[pl.ds(row, block_rows), :]
        dst = pl.multiple_of(cur * n + i * block_rows, block_rows)
        hping_ref[pl.ds(dst, block_rows), :] = newh

    @pl.when((k == nk - 1) & (t == nt - 1))
    def _():
        src = pl.multiple_of(cur * n + i * block_rows, block_rows)
        h_ref[...] = hping_ref[pl.ds(src, block_rows), :]


def _znorm_dec_kernel(z_ref, w1_ref, b1_ref, w2_ref, b2_ref, zn_ref, xp_ref):
    """Row-normalize z and run the 2-layer decoder MLP on a row block."""
    z = z_ref[...]
    inv = jax.lax.rsqrt(jnp.maximum(jnp.sum(z * z, axis=1, keepdims=True),
                                    EPS * EPS))
    zn_ref[...] = z * inv
    h = jnp.maximum(z, 0.0)                                    # relu
    h = jnp.tanh(jnp.dot(h, w1_ref[...],
                         preferred_element_type=jnp.float32) + b1_ref[...])
    xp_ref[...] = jax.nn.sigmoid(
        jnp.dot(h, w2_ref[...], preferred_element_type=jnp.float32) + b2_ref[...])


def _a_pred_kernel(zn_ref, a_ref, *, tile):
    """a_pred[i,j] tile = sigmoid(zn_i @ zn_j^T); zn stays fully VMEM-resident."""
    i = pl.program_id(0)
    j = pl.program_id(1)
    zi = zn_ref[pl.ds(pl.multiple_of(i * tile, tile), tile), :]
    zj = zn_ref[pl.ds(pl.multiple_of(j * tile, tile), tile), :]
    s = jax.lax.dot_general(zi, zj,
                            dimension_numbers=(((1,), (1,)), ((), ())),
                            preferred_element_type=jnp.float32)
    a_ref[...] = jax.nn.sigmoid(s)


def gnn_forward(x, adj, params, order, *, block_rows=256, block_cols=1024,
                dec_rows=512, a_tile=256, adj_dtype=jnp.float32):
    """GNN forward pass as a pipeline of tiled Pallas TPU kernels."""
    n, feat = x.shape
    assert adj.shape == (n, n)

    block_rows = min(block_rows, n)
    block_cols = min(block_cols, n)
    dec_rows = min(dec_rows, n)
    a_tile = min(a_tile, n)
    assert n % block_rows == 0 and n % block_cols == 0
    assert n % dec_rows == 0 and n % a_tile == 0

    # PyTorch nn.Linear stores weight as (out, in); pre-transpose in JAX glue so
    # the kernels do row-vector @ (in, out) matmuls on the MXU directly.
    w1t = params["w1"].T                 # (latent_dim, hidden_dim)
    b1 = params["b1"].reshape(1, -1)     # (1, hidden_dim)
    w2t = params["w2"].T                 # (hidden_dim, feat_dim)
    b2 = params["b2"].reshape(1, -1)     # (1, feat_dim)
    latent, hidden = w1t.shape
    assert latent == feat  # reference decoder only type-checks in this case

    nbi = n // block_rows
    nbk = n // block_cols

    # Optional bf16 adj in HBM (v6e/v7x): halves the dominant adj read traffic.
    # Under jit this cast fuses; f32 default keeps the 1e-4 check below tight.
    adj_c = adj.astype(adj_dtype)

    if order >= 1:
        # --- all `order` message-passing iterations, one fused pallas_call ---
        z = pl.pallas_call(
            functools.partial(_fused_mp_kernel, n=n,
                              block_rows=block_rows, block_cols=block_cols),
            out_shape=jax.ShapeDtypeStruct((n, feat), jnp.float32),
            grid_spec=pltpu.PrefetchScalarGridSpec(
                num_scalar_prefetch=0,
                grid=(order, nbi, nbk),
                in_specs=[
                    pl.BlockSpec((block_rows, block_cols),
                                 lambda t, i, k: (i, k)),          # adj stream
                    pl.BlockSpec((n, feat), lambda t, i, k: (0, 0)),  # x resident
                ],
                out_specs=pl.BlockSpec((block_rows, feat),
                                       lambda t, i, k: (i, 0)),
                scratch_shapes=[
                    pltpu.VMEM((2 * n, feat), jnp.float32),   # ping-pong h
                    pltpu.VMEM((block_rows, feat), jnp.float32),
                    pltpu.VMEM((block_rows, 1), jnp.float32),
                ]),
            compiler_params=pltpu.CompilerParams(
                # The ping-pong carry makes every axis order-dependent.
                dimension_semantics=("arbitrary", "arbitrary", "arbitrary"),
                vmem_limit_bytes=_VMEM_LIMIT),
        )(adj_c, x)
    else:
        z = x.astype(jnp.float32)

    # --- z_norm + decoder MLP, fat row blocks; small weights stay resident ---
    zn, x_pred = pl.pallas_call(
        _znorm_dec_kernel,
        out_shape=(jax.ShapeDtypeStruct((n, feat), jnp.float32),
                   jax.ShapeDtypeStruct((n, feat), jnp.float32)),
        grid_spec=pltpu.PrefetchScalarGridSpec(
            num_scalar_prefetch=0, grid=(n // dec_rows,),
            in_specs=[pl.BlockSpec((dec_rows, feat), lambda i: (i, 0)),
                      pl.BlockSpec((latent, hidden), lambda i: (0, 0)),
                      pl.BlockSpec((1, hidden), lambda i: (0, 0)),
                      pl.BlockSpec((hidden, feat), lambda i: (0, 0)),
                      pl.BlockSpec((1, feat), lambda i: (0, 0))],
            out_specs=(pl.BlockSpec((dec_rows, feat), lambda i: (i, 0)),
                       pl.BlockSpec((dec_rows, feat), lambda i: (i, 0)))),
        compiler_params=pltpu.CompilerParams(
            dimension_semantics=("parallel",),
            vmem_limit_bytes=_VMEM_LIMIT),
    )(z, w1t, b1, w2t, b2)

    # --- a_pred = sigmoid(zn @ zn^T): zn resident, (a_tile, a_tile) output tiles ---
    a_pred = pl.pallas_call(
        functools.partial(_a_pred_kernel, tile=a_tile),
        out_shape=jax.ShapeDtypeStruct((n, n), jnp.float32),
        grid_spec=pltpu.PrefetchScalarGridSpec(
            num_scalar_prefetch=0, grid=(n // a_tile, n // a_tile),
            in_specs=[pl.BlockSpec((n, feat), lambda i, j: (0, 0))],
            out_specs=pl.BlockSpec((a_tile, a_tile), lambda i, j: (i, j))),
        compiler_params=pltpu.CompilerParams(
            dimension_semantics=("parallel", "parallel"),
            vmem_limit_bytes=_VMEM_LIMIT),
    )(zn)
    # TODO(synk): a_pred is symmetric; an upper-triangle block schedule would
    # halve MXU/EUP work but the pass is output-write bound, so it is skipped.

    return zn, a_pred, x_pred


def gnn_forward_ref(x, adj, params, order):
    """Plain-JAX reference mirroring the PyTorch module, for correctness check."""
    adj_n = adj / jnp.maximum(jnp.linalg.norm(adj, axis=1, keepdims=True), EPS)
    h = x
    for _ in range(order):
        h = adj_n @ h + x
    z = h
    zn = z / jnp.maximum(jnp.linalg.norm(z, axis=1, keepdims=True), EPS)
    a_pred = jax.nn.sigmoid(zn @ zn.T)
    hdec = jnp.maximum(z, 0.0)
    hdec = jnp.tanh(hdec @ params["w1"].T + params["b1"])
    x_pred = jax.nn.sigmoid(hdec @ params["w2"].T + params["b2"])
    return zn, a_pred, x_pred


def init_params(key, feat_dim, hidden_dim, latent_dim):
    """Deterministic decoder params (PyTorch nn.Linear-style uniform init)."""
    k1, k2, k3, k4 = jax.random.split(key, 4)
    lim1 = 1.0 / jnp.sqrt(latent_dim)
    lim2 = 1.0 / jnp.sqrt(hidden_dim)
    return {
        "w1": jax.random.uniform(k1, (hidden_dim, latent_dim), jnp.float32, -lim1, lim1),
        "b1": jax.random.uniform(k2, (hidden_dim,), jnp.float32, -lim1, lim1),
        "w2": jax.random.uniform(k3, (feat_dim, hidden_dim), jnp.float32, -lim2, lim2),
        "b2": jax.random.uniform(k4, (feat_dim,), jnp.float32, -lim2, lim2),
    }


if __name__ == "__main__":
    # Lane-dense small shapes: FEAT == LATENT (decoder requirement), dims = 128.
    N = 512          # number of nodes
    FEAT = 128       # feat_dim == latent_dim
    HIDDEN = 128     # hidden_dim
    LATENT = 128
    ORDER = 3

    key = jax.random.PRNGKey(0)
    kx, ka, kp = jax.random.split(key, 3)

    x = jax.random.normal(kx, (N, FEAT), jnp.float32)
    adj = jnp.abs(jax.random.normal(ka, (N, N), jnp.float32))  # dense, non-negative
    params = init_params(kp, FEAT, HIDDEN, LATENT)

    fwd = jax.jit(gnn_forward,
                  static_argnames=("order", "block_rows", "block_cols",
                                   "dec_rows", "a_tile", "adj_dtype"))
    z_norm, a_pred, x_pred = fwd(x, adj, params, order=ORDER)
    jax.block_until_ready((z_norm, a_pred, x_pred))

    # Correctness check against a plain-JAX mirror of the PyTorch forward.
    z_exp, a_exp, x_exp = gnn_forward_ref(x, adj, params, ORDER)
    assert z_norm.shape == (N, FEAT) and a_pred.shape == (N, N) and x_pred.shape == (N, FEAT)
    assert jnp.allclose(z_norm, z_exp, atol=1e-4, rtol=1e-4)
    assert jnp.allclose(a_pred, a_exp, atol=1e-4, rtol=1e-4)
    # x_pred feeds relu(z) (|z| ~ O(1e2) after 3 positive-adjacency hops) through
    # two more matmuls; f32-MXU accumulation-order differences show near 1e-4,
    # so this output uses a slightly looser tolerance.
    assert jnp.allclose(x_pred, x_exp, atol=1e-3, rtol=1e-3)

    # TODO(synk): on v6e/v7x pass adj_dtype=jnp.bfloat16 (and relax tolerances
    # to ~1e-2) to halve adj HBM traffic and use the native bf16 MXU path.
    print("KERNEL_OK")
</pallas_src>

<mosaic_0001>
module attributes {stable_mosaic.version = 11 : i64} {
  func.func @_znorm_dec_kernel(%arg0: i32, %arg1: memref<512x128xf32, #tpu.memory_space<vmem>>, %arg2: memref<128x128xf32, #tpu.memory_space<vmem>>, %arg3: memref<1x128xf32, #tpu.memory_space<vmem>>, %arg4: memref<128x128xf32, #tpu.memory_space<vmem>>, %arg5: memref<1x128xf32, #tpu.memory_space<vmem>>, %arg6: memref<512x128xf32, #tpu.memory_space<vmem>>, %arg7: memref<512x128xf32, #tpu.memory_space<vmem>>) attributes {dimension_semantics = [#tpu.dimension_semantics<parallel>], iteration_bounds = array<i64: 1>, scalar_prefetch = 0 : i64, scratch_operands = 0 : i64, tpu.core_type = #tpu.core_type<tc>, window_params = [{transform_indices = @transform_0, window_bounds = array<i64: 512, 128>}, {pipeline_mode = #tpu.pipeline_mode<synchronous>, transform_indices = @transform_1, window_bounds = array<i64: 128, 128>}, {pipeline_mode = #tpu.pipeline_mode<synchronous>, transform_indices = @transform_2, window_bounds = array<i64: 1, 128>}, {pipeline_mode = #tpu.pipeline_mode<synchronous>, transform_indices = @transform_3, window_bounds = array<i64: 128, 128>}, {pipeline_mode = #tpu.pipeline_mode<synchronous>, transform_indices = @transform_4, window_bounds = array<i64: 1, 128>}, {transform_indices = @transform_5, window_bounds = array<i64: 512, 128>}, {transform_indices = @transform_6, window_bounds = array<i64: 512, 128>}]} {
    %c0 = arith.constant 0 : index
    %c0_0 = arith.constant 0 : index
    %0 = vector.load %arg1[%c0, %c0_0] : memref<512x128xf32, #tpu.memory_space<vmem>>, vector<512x128xf32>
    %1 = arith.mulf %0, %0 : vector<512x128xf32>
    %cst = arith.constant dense<0.000000e+00> : vector<512xf32>
    %2 = vector.multi_reduction <add>, %1, %cst [1] : vector<512x128xf32> to vector<512xf32>
    %3 = vector.shape_cast %2 : vector<512xf32> to vector<512x1xf32>
    %cst_1 = arith.constant 1.000000e-24 : f32
    %4 = vector.broadcast %cst_1 : f32 to vector<512x1xf32>
    %5 = arith.maximumf %3, %4 : vector<512x1xf32>
    %6 = math.rsqrt %5 : vector<512x1xf32>
    %7 = vector.broadcast %6 : vector<512x1xf32> to vector<512x128xf32>
    %8 = arith.mulf %0, %7 : vector<512x128xf32>
    %c0_2 = arith.constant 0 : index
    %c0_3 = arith.constant 0 : index
    %9 = vector.load %arg6[%c0_2, %c0_3] : memref<512x128xf32, #tpu.memory_space<vmem>>, vector<512x128xf32>
    tpu.vector_store %arg6[%c0_2, %c0_3], %8 {strides = array<i32>} : memref<512x128xf32, #tpu.memory_space<vmem>>, vector<512x128xf32>,
    %cst_4 = arith.constant 0.000000e+00 : f32
    %10 = vector.broadcast %cst_4 : f32 to vector<512x128xf32>
    %11 = arith.maximumf %0, %10 : vector<512x128xf32>
    %c0_5 = arith.constant 0 : index
    %c0_6 = arith.constant 0 : index
    %12 = vector.load %arg2[%c0_5, %c0_6] : memref<128x128xf32, #tpu.memory_space<vmem>>, vector<128x128xf32>
    %cst_7 = arith.constant dense<0.000000e+00> : vector<512x128xf32>
    %13 = tpu.matmul %11, %12, %cst_7 {dimension_numbers = #tpu.dot_dimension_numbers<[1], [0], [0], [1], [0, 0, 1, 1], [], []>} : vector<512x128xf32>, vector<128x128xf32>, vector<512x128xf32> -> vector<512x128xf32>
    %c0_8 = arith.constant 0 : index
    %c0_9 = arith.constant 0 : index
    %14 = vector.load %arg3[%c0_8, %c0_9] : memref<1x128xf32, #tpu.memory_space<vmem>>, vector<1x128xf32>
    %15 = vector.broadcast %14 : vector<1x128xf32> to vector<512x128xf32>
    %16 = arith.addf %13, %15 : vector<512x128xf32>
    %17 = math.tanh %16 : vector<512x128xf32>
    %c0_10 = arith.constant 0 : index
    %c0_11 = arith.constant 0 : index
    %18 = vector.load %arg4[%c0_10, %c0_11] : memref<128x128xf32, #tpu.memory_space<vmem>>, vector<128x128xf32>
    %cst_12 = arith.constant dense<0.000000e+00> : vector<512x128xf32>
    %19 = tpu.matmul %17, %18, %cst_12 {dimension_numbers = #tpu.dot_dimension_numbers<[1], [0], [0], [1], [0, 0, 1, 1], [], []>} : vector<512x128xf32>, vector<128x128xf32>, vector<512x128xf32> -> vector<512x128xf32>
    %c0_13 = arith.constant 0 : index
    %c0_14 = arith.constant 0 : index
    %20 = vector.load %arg5[%c0_13, %c0_14] : memref<1x128xf32, #tpu.memory_space<vmem>>, vector<1x128xf32>
    %21 = vector.broadcast %20 : vector<1x128xf32> to vector<512x128xf32>
    %22 = arith.addf %19, %21 : vector<512x128xf32>
    %23 = arith.negf %22 : vector<512x128xf32>
    %24 = math.exp %23 : vector<512x128xf32>
    %cst_15 = arith.constant 1.000000e+00 : f32
    %25 = vector.broadcast %cst_15 : f32 to vector<512x128xf32>
    %26 = arith.addf %25, %24 : vector<512x128xf32>
    %27 = arith.divf %25, %26 : vector<512x128xf32>
    %c0_16 = arith.constant 0 : index
    %c0_17 = arith.constant 0 : index
    %28 = vector.load %arg7[%c0_16, %c0_17] : memref<512x128xf32, #tpu.memory_space<vmem>>, vector<512x128xf32>
    tpu.vector_store %arg7[%c0_16, %c0_17], %27 {strides = array<i32>} : memref<512x128xf32, #tpu.memory_space<vmem>>, vector<512x128xf32>,
    return
  }
  func.func @transform_0(%arg0: i32) -> (i32, i32) {
    %c0_i32 = arith.constant 0 : i32
    %c0_i32_0 = arith.constant 0 : i32
    return %arg0, %c0_i32 : i32, i32
  }
  func.func @transform_1(%arg0: i32) -> (i32, i32) {
    %c0_i32 = arith.constant 0 : i32
    %c0_i32_0 = arith.constant 0 : i32
    %c0_i32_1 = arith.constant 0 : i32
    return %c0_i32, %c0_i32_0 : i32, i32
  }
  func.func @transform_2(%arg0: i32) -> (i32, i32) {
    %c0_i32 = arith.constant 0 : i32
    %c0_i32_0 = arith.constant 0 : i32
    %c0_i32_1 = arith.constant 0 : i32
    return %c0_i32, %c0_i32_0 : i32, i32
  }
  func.func @transform_3(%arg0: i32) -> (i32, i32) {
    %c0_i32 = arith.constant 0 : i32
    %c0_i32_0 = arith.constant 0 : i32
    %c0_i32_1 = arith.constant 0 : i32
    return %c0_i32, %c0_i32_0 : i32, i32
  }
  func.func @transform_4(%arg0: i32) -> (i32, i32) {
    %c0_i32 = arith.constant 0 : i32
    %c0_i32_0 = arith.constant 0 : i32
    %c0_i32_1 = arith.constant 0 : i32
    return %c0_i32, %c0_i32_0 : i32, i32
  }
  func.func @transform_5(%arg0: i32) -> (i32, i32) {
    %c0_i32 = arith.constant 0 : i32
    %c0_i32_0 = arith.constant 0 : i32
    return %arg0, %c0_i32 : i32, i32
  }
  func.func @transform_6(%arg0: i32) -> (i32, i32) {
    %c0_i32 = arith.constant 0 : i32
    %c0_i32_0 = arith.constant 0 : i32
    return %arg0, %c0_i32 : i32, i32
  }
}

module attributes {stable_mosaic.version = 11 : i64} {
  func.func @_fused_mp_kernel(%arg0: i32, %arg1: i32, %arg2: i32, %arg3: memref<256x512xf32, #tpu.memory_space<vmem>>, %arg4: memref<512x128xf32, #tpu.memory_space<vmem>>, %arg5: memref<256x128xf32, #tpu.memory_space<vmem>>, %arg6: memref<1024x128xf32, #tpu.memory_space<vmem>>, %arg7: memref<256x128xf32, #tpu.memory_space<vmem>>, %arg8: memref<256x1xf32, #tpu.memory_space<vmem>>) attributes {dimension_semantics = [#tpu.dimension_semantics<arbitrary>, #tpu.dimension_semantics<arbitrary>, #tpu.dimension_semantics<arbitrary>], iteration_bounds = array<i64: 3, 2, 1>, scalar_prefetch = 0 : i64, scratch_operands = 3 : i64, tpu.core_type = #tpu.core_type<tc>, window_params = [{transform_indices = @transform_0, window_bounds = array<i64: 256, 512>}, {pipeline_mode = #tpu.pipeline_mode<synchronous>, transform_indices = @transform_1, window_bounds = array<i64: 512, 128>}, {transform_indices = @transform_2, window_bounds = array<i64: 256, 128>}]} {
    %c1_i32 = arith.constant 1 : i32
    %0 = arith.addi %arg0, %c1_i32 : i32
    %c2_i32 = arith.constant 2 : i32
    %1 = arith.remsi %0, %c2_i32 : i32
    %c2_i32_0 = arith.constant 2 : i32
    %2 = arith.remsi %arg0, %c2_i32_0 : i32
    %c0_i32 = arith.constant 0 : i32
    %3 = arith.cmpi eq, %arg0, %c0_i32 : i32
    %c0_i32_1 = arith.constant 0 : i32
    %4 = arith.cmpi eq, %arg1, %c0_i32_1 : i32
    %5 = arith.andi %3, %4 : i1
    %c0_i32_2 = arith.constant 0 : i32
    %6 = arith.cmpi eq, %arg2, %c0_i32_2 : i32
    %7 = arith.andi %5, %6 : i1
    %8 = arith.extui %7 : i1 to i32
    %c0_i32_3 = arith.constant 0 : i32
    %9 = arith.cmpi ne, %8, %c0_i32_3 : i32
    scf.if %9 {
      %c0_23 = arith.constant 0 : index
      %c0_24 = arith.constant 0 : index
      %38 = vector.load %arg4[%c0_23, %c0_24] : memref<512x128xf32, #tpu.memory_space<vmem>>, vector<512x128xf32>
      %c512 = arith.constant 512 : index
      %c0_25 = arith.constant 0 : index
      %39 = vector.load %arg6[%c512, %c0_25] : memref<1024x128xf32, #tpu.memory_space<vmem>>, vector<512x128xf32>
      tpu.vector_store %arg6[%c512, %c0_25], %38 {strides = array<i32>} : memref<1024x128xf32, #tpu.memory_space<vmem>>, vector<512x128xf32>,
    } else {
    }
    %c0_i32_4 = arith.constant 0 : i32
    %10 = arith.cmpi eq, %arg2, %c0_i32_4 : i32
    %11 = arith.extui %10 : i1 to i32
    %c0_i32_5 = arith.constant 0 : i32
    %12 = arith.cmpi ne, %11, %c0_i32_5 : i32
    scf.if %12 {
      %cst_23 = arith.constant 0.000000e+00 : f32
      %38 = vector.broadcast %cst_23 : f32 to vector<256x128xf32>
      %c0_24 = arith.constant 0 : index
      %c0_25 = arith.constant 0 : index
      %39 = vector.load %arg7[%c0_24, %c0_25] : memref<256x128xf32, #tpu.memory_space<vmem>>, vector<256x128xf32>
      tpu.vector_store %arg7[%c0_24, %c0_25], %38 {strides = array<i32>} : memref<256x128xf32, #tpu.memory_space<vmem>>, vector<256x128xf32>,
      %cst_26 = arith.constant 0.000000e+00 : f32
      %40 = vector.broadcast %cst_26 : f32 to vector<256x1xf32>
      %c0_27 = arith.constant 0 : index
      %c0_28 = arith.constant 0 : index
      %41 = vector.load %arg8[%c0_27, %c0_28] : memref<256x1xf32, #tpu.memory_space<vmem>>, vector<256x1xf32>
      tpu.vector_store %arg8[%c0_27, %c0_28], %40 {strides = array<i32>} : memref<256x1xf32, #tpu.memory_space<vmem>>, vector<256x1xf32>,
    } else {
    }
    %c0 = arith.constant 0 : index
    %c0_6 = arith.constant 0 : index
    %13 = vector.load %arg3[%c0, %c0_6] : memref<256x512xf32, #tpu.memory_space<vmem>>, vector<256x512xf32>
    %c512_i32 = arith.constant 512 : i32
    %14 = arith.muli %1, %c512_i32 : i32
    %c512_i32_7 = arith.constant 512 : i32
    %15 = arith.muli %arg2, %c512_i32_7 : i32
    %16 = arith.addi %14, %15 : i32
    %17 = tpu.assume_multiple %16, 512 : i32
    %18 = arith.index_cast %17 : i32 to index
    %c0_8 = arith.constant 0 : index
    %19 = vector.load %arg6[%18, %c0_8] : memref<1024x128xf32, #tpu.memory_space<vmem>>, vector<512x128xf32>
    %c0_9 = arith.constant 0 : index
    %c0_10 = arith.constant 0 : index
    %20 = vector.load %arg7[%c0_9, %c0_10] : memref<256x128xf32, #tpu.memory_space<vmem>>, vector<256x128xf32>
    %cst = arith.constant dense<0.000000e+00> : vector<256x128xf32>
    %21 = tpu.matmul %13, %19, %cst {dimension_numbers = #tpu.dot_dimension_numbers<[1], [0], [0], [1], [0, 0, 1, 1], [], []>} : vector<256x512xf32>, vector<512x128xf32>, vector<256x128xf32> -> vector<256x128xf32>
    %22 = arith.addf %20, %21 : vector<256x128xf32>
    %c0_11 = arith.constant 0 : index
    %c0_12 = arith.constant 0 : index
    %23 = vector.load %arg7[%c0_11, %c0_12] : memref<256x128xf32, #tpu.memory_space<vmem>>, vector<256x128xf32>
    tpu.vector_store %arg7[%c0_11, %c0_12], %22 {strides = array<i32>} : memref<256x128xf32, #tpu.memory_space<vmem>>, vector<256x128xf32>,
    %c0_13 = arith.constant 0 : index
    %c0_14 = arith.constant 0 : index
    %24 = vector.load %arg8[%c0_13, %c0_14] : memref<256x1xf32, #tpu.memory_space<vmem>>, vector<256x1xf32>
    %25 = arith.mulf %13, %13 : vector<256x512xf32>
    %cst_15 = arith.constant dense<0.000000e+00> : vector<256xf32>
    %26 = vector.multi_reduction <add>, %25, %cst_15 [1] : vector<256x512xf32> to vector<256xf32>
    %27 = vector.shape_cast %26 : vector<256xf32> to vector<256x1xf32>
    %28 = arith.addf %24, %27 : vector<256x1xf32>
    %c0_16 = arith.constant 0 : index
    %c0_17 = arith.constant 0 : index
    %29 = vector.load %arg8[%c0_16, %c0_17] : memref<256x1xf32, #tpu.memory_space<vmem>>, vector<256x1xf32>
    tpu.vector_store %arg8[%c0_16, %c0_17], %28 {strides = array<i32>} : memref<256x1xf32, #tpu.memory_space<vmem>>, vector<256x1xf32>,
    %c0_i32_18 = arith.constant 0 : i32
    %30 = arith.cmpi eq, %arg2, %c0_i32_18 : i32
    %31 = arith.extui %30 : i1 to i32
    %c0_i32_19 = arith.constant 0 : i32
    %32 = arith.cmpi ne, %31, %c0_i32_19 : i32
    scf.if %32 {
      %c0_23 = arith.constant 0 : index
      %c0_24 = arith.constant 0 : index
      %38 = vector.load %arg8[%c0_23, %c0_24] : memref<256x1xf32, #tpu.memory_space<vmem>>, vector<256x1xf32>
      %cst_25 = arith.constant 1.000000e-24 : f32
      %39 = vector.broadcast %cst_25 : f32 to vector<256x1xf32>
      %40 = arith.maximumf %38, %39 : vector<256x1xf32>
      %41 = math.rsqrt %40 : vector<256x1xf32>
      %c256_i32 = arith.constant 256 : i32
      %42 = arith.muli %arg1, %c256_i32 : i32
      %43 = tpu.assume_multiple %42, 256 : i32
      %c0_26 = arith.constant 0 : index
      %c0_27 = arith.constant 0 : index
      %44 = vector.load %arg7[%c0_26, %c0_27] : memref<256x128xf32, #tpu.memory_space<vmem>>, vector<256x128xf32>
      %45 = vector.broadcast %41 : vector<256x1xf32> to vector<256x128xf32>
      %46 = arith.mulf %45, %44 : vector<256x128xf32>
      %47 = arith.index_cast %43 : i32 to index
      %c0_28 = arith.constant 0 : index
      %48 = vector.load %arg4[%47, %c0_28] : memref<512x128xf32, #tpu.memory_space<vmem>>, vector<256x128xf32>
      %49 = arith.addf %46, %48 : vector<256x128xf32>
      %c512_i32_29 = arith.constant 512 : i32
      %50 = arith.muli %2, %c512_i32_29 : i32
      %c256_i32_30 = arith.constant 256 : i32
      %51 = arith.muli %arg1, %c256_i32_30 : i32
      %52 = arith.addi %50, %51 : i32
      %53 = tpu.assume_multiple %52, 256 : i32
      %54 = arith.index_cast %53 : i32 to index
      %c0_31 = arith.constant 0 : index
      %55 = vector.load %arg6[%54, %c0_31] : memref<1024x128xf32, #tpu.memory_space<vmem>>, vector<256x128xf32>
      tpu.vector_store %arg6[%54, %c0_31], %49 {strides = array<i32>} : memref<1024x128xf32, #tpu.memory_space<vmem>>, vector<256x128xf32>,
    } else {
    }
    %c0_i32_20 = arith.constant 0 : i32
    %33 = arith.cmpi eq, %arg2, %c0_i32_20 : i32
    %c2_i32_21 = arith.constant 2 : i32
    %34 = arith.cmpi eq, %arg0, %c2_i32_21 : i32
    %35 = arith.andi %33, %34 : i1
    %36 = arith.extui %35 : i1 to i32
    %c0_i32_22 = arith.constant 0 : i32
    %37 = arith.cmpi ne, %36, %c0_i32_22 : i32
    scf.if %37 {
      %c512_i32_23 = arith.constant 512 : i32
      %38 = arith.muli %2, %c512_i32_23 : i32
      %c256_i32 = arith.constant 256 : i32
      %39 = arith.muli %arg1, %c256_i32 : i32
      %40 = arith.addi %38, %39 : i32
      %41 = tpu.assume_multiple %40, 256 : i32
      %42 = arith.index_cast %41 : i32 to index
      %c0_24 = arith.constant 0 : index
      %43 = vector.load %arg6[%42, %c0_24] : memref<1024x128xf32, #tpu.memory_space<vmem>>, vector<256x128xf32>
      %c0_25 = arith.constant 0 : index
      %c0_26 = arith.constant 0 : index
      %44 = vector.load %arg5[%c0_25, %c0_26] : memref<256x128xf32, #tpu.memory_space<vmem>>, vector<256x128xf32>
      tpu.vector_store %arg5[%c0_25, %c0_26], %43 {strides = array<i32>} : memref<256x128xf32, #tpu.memory_space<vmem>>, vector<256x128xf32>,
    } else {
    }
    return
  }
  func.func @transform_0(%arg0: i32, %arg1: i32, %arg2: i32) -> (i32, i32) {
    %c0_i32 = arith.constant 0 : i32
    return %arg1, %arg2 : i32, i32
  }
  func.func @transform_1(%arg0: i32, %arg1: i32, %arg2: i32) -> (i32, i32) {
    %c0_i32 = arith.constant 0 : i32
    %c0_i32_0 = arith.constant 0 : i32
    %c0_i32_1 = arith.constant 0 : i32
    return %c0_i32, %c0_i32_0 : i32, i32
  }
  func.func @transform_2(%arg0: i32, %arg1: i32, %arg2: i32) -> (i32, i32) {
    %c0_i32 = arith.constant 0 : i32
    %c0_i32_0 = arith.constant 0 : i32
    return %arg1, %c0_i32 : i32, i32
  }
}

module attributes {stable_mosaic.version = 11 : i64} {
  func.func @_a_pred_kernel(%arg0: i32, %arg1: i32, %arg2: memref<512x128xf32, #tpu.memory_space<vmem>>, %arg3: memref<256x256xf32, #tpu.memory_space<vmem>>) attributes {dimension_semantics = [#tpu.dimension_semantics<parallel>, #tpu.dimension_semantics<parallel>], iteration_bounds = array<i64: 2, 2>, scalar_prefetch = 0 : i64, scratch_operands = 0 : i64, tpu.core_type = #tpu.core_type<tc>, window_params = [{pipeline_mode = #tpu.pipeline_mode<synchronous>, transform_indices = @transform_0, window_bounds = array<i64: 512, 128>}, {transform_indices = @transform_1, window_bounds = array<i64: 256, 256>}]} {
    %c256_i32 = arith.constant 256 : i32
    %0 = arith.muli %arg0, %c256_i32 : i32
    %1 = tpu.assume_multiple %0, 256 : i32
    %2 = arith.index_cast %1 : i32 to index
    %c0 = arith.constant 0 : index
    %3 = vector.load %arg2[%2, %c0] : memref<512x128xf32, #tpu.memory_space<vmem>>, vector<256x128xf32>
    %c256_i32_0 = arith.constant 256 : i32
    %4 = arith.muli %arg1, %c256_i32_0 : i32
    %5 = tpu.assume_multiple %4, 256 : i32
    %6 = arith.index_cast %5 : i32 to index
    %c0_1 = arith.constant 0 : index
    %7 = vector.load %arg2[%6, %c0_1] : memref<512x128xf32, #tpu.memory_space<vmem>>, vector<256x128xf32>
    %cst = arith.constant dense<0.000000e+00> : vector<256x256xf32>
    %8 = tpu.matmul %3, %7, %cst {dimension_numbers = #tpu.dot_dimension_numbers<[1], [1], [0], [0], [0, 0, 1, 0], [], []>} : vector<256x128xf32>, vector<256x128xf32>, vector<256x256xf32> -> vector<256x256xf32>
    %9 = arith.negf %8 : vector<256x256xf32>
    %10 = math.exp %9 : vector<256x256xf32>
    %cst_2 = arith.constant 1.000000e+00 : f32
    %11 = vector.broadcast %cst_2 : f32 to vector<256x256xf32>
    %12 = arith.addf %11, %10 : vector<256x256xf32>
    %13 = arith.divf %11, %12 : vector<256x256xf32>
    %c0_3 = arith.constant 0 : index
    %c0_4 = arith.constant 0 : index
    %14 = vector.load %arg3[%c0_3, %c0_4] : memref<256x256xf32, #tpu.memory_space<vmem>>, vector<256x256xf32>
    tpu.vector_store %arg3[%c0_3, %c0_4], %13 {strides = array<i32>} : memref<256x256xf32, #tpu.memory_space<vmem>>, vector<256x256xf32>,
    return
  }
  func.func @transform_0(%arg0: i32, %arg1: i32) -> (i32, i32) {
    %c0_i32 = arith.constant 0 : i32
    %c0_i32_0 = arith.constant 0 : i32
    %c0_i32_1 = arith.constant 0 : i32
    return %c0_i32, %c0_i32_0 : i32, i32
  }
  func.func @transform_1(%arg0: i32, %arg1: i32) -> (i32, i32) {
    %c0_i32 = arith.constant 0 : i32
    return %arg0, %arg1 : i32, i32
  }
}

</mosaic_0001>

<bundles_post_ra>
// kernel: gnn_forward.5
= control target key start
LH: loop header
LB: loop body
LE: loop exit
PB: predicated region body
PF: predicated region fallthrough
CT: control target
= control target key end

     0   :  { %6 = vsyncpa [#allocation3], 0  ;;  %s1901_s0 = inlined_call_operand.vmem [shape: f32[512,128], index: 0, kind: input, shape index: {}]   ;;  %s1902_s1 = inlined_call_operand.hbm [shape: f32[512,512], index: 1, kind: output, shape index: {}]  }
   0x1   :  { %8 = vsyncpa [#allocation3 + $0x1], 0  ;;  %s1614_s6 = smov 0   ;;  %s1616_s7 = smov 0  }
   0x2   :  { %s1618_s8 = smov 0   ;;  %s1620_s9 = smov 0  }
   0x3   :  { %s1622_s10 = smov 0   ;;  %s1624_s11 = smov 0  }
   0x4   :  { %s1626_s12 = smov 0   ;;  %s1628_s13 = smov 0  }
   0x5 LB: > { %s969_s14 = sadd.s32 4294967295, %s1598_s13   ;;  %s970_s15 = sadd.s32 4294967294, %s1598_s13   ;;  %s1598_s13 = sphi %s1628_s13, %s14_s13   ;;  %s1594_s12 = sphi %s1626_s12, %s1911_s12   ;;  %s1590_s11 = sphi %s1624_s11, %s1910_s11   ;;  %s1586_s10 = sphi %s1622_s10, %s1909_s10   ;;  %s1582_s9 = sphi %s1620_s9, %s1908_s9   ;;  %s1578_s8 = sphi %s1618_s8, %s1907_s8   ;;  %s1574_s7 = sphi %s1616_s7, %s1906_s7   ;;  %s1570_s6 = sphi %s1614_s6, %s1905_s6  }
   0x6   : > { %s23_s16 = sadd.s32 1, %s1590_s11  ;;  %s26_s17 = sadd.s32 1, %s1594_s12 }
   0x7   : > { %p24_p0 = scmp.ge.s32.totalorder %s23_s16, 2  ;;  %p66_p1 = scmp.ne.s32.totalorder %s1578_s8, %s1574_s7 }
   0x8   : > { %p67_p2 = scmp.eq.s32.totalorder %s969_s14, 3  ;;  %p72_p5 = scmp.ne.s32.totalorder %s1574_s7, %s1570_s6 }
   0x9   : > { %s1913_s16 = smov (%p24_p0, %s23_s16), 0  ;;  %s1915_s17 = smov (!%p24_p0, %s26_s17), %s1594_s12 }
   0xa   : > { %s52_s18 = ssub.s32 %s1590_s11, %s1913_s16  ;;  %p1665_p3 = por %p67_p2, %p66_p1 }
   0xb   : > { %p28_p4 = scmp.ge.s32.totalorder %s1915_s17, 2  ;;  %p73_p6 = scmp.eq.s32.totalorder %s970_s15, 3 }
   0xc   : > { %p972_p7 = scmp.ge.s32.totalorder %s1598_s13, 1  ;;  %p94_p9 = scmp.lt.s32.totalorder %s1598_s13, 5 }
   0xd   : > { %s1917_s17 = smov (%p28_p4, %s1915_s17), 0  ;;  %p1674_p8 = por %p73_p6, %p72_p5 }
   0xe   : > { %s51_s21 = ssub.s32 %s1594_s12, %s1917_s17  ;;  %s56_s22 = sadd.s32 1, %s1578_s8 }
   0xf   : > { %s53_s23 = sor.u32 %s52_s18, %s51_s21  ;;  %p95_p10 = pnand %p972_p7, %p94_p9 }
  0x10   : > { %p54_p11 = scmp.eq.s32.totalorder %s53_s23, 0  ;;  %s975_s25 = sshll.u32 (!%p95_p10), %s1582_s9, 8 }
  0x11   : > { %98 = sbr.rel (%p95_p10) target bundleno = 438 (0x1b6), region = 24  ;;  %s1689_s28 = scalar_lea.vmem (!%p95_p10), %s1901_s0, %s975_s25 }
  0x12   : > { %s1683_s24 = scalar_select %p54_p11, %s1578_s8, %s56_s22  }
  0x13   : > { %s974_s29 = sshll.u32 (!%p95_p10), %s1586_s10, 8  ;;  %s106_s4 = sand.u32 (!%p95_p10), 1, %s1574_s7  }
  0x14   : > { %s1701_s3 = scalar_lea.vmem (!%p95_p10), %s1901_s0, %s974_s29  ;;  %s973_s5 = sshll.u32 (!%p95_p10), %s106_s4, 9 }
  0x15   : > { %s1772_s14 = scalar_lea.vmem (!%p95_p10), [#allocation2], %s973_s5  ;;  %s1042_s15 = sshll.u32 (!%p95_p10), %s1582_s9, 1 }
  0x16   : > { %v178_v0 = vld [vmem:[%s1689_s28 + $0xf8] sm:$0xff]  ;;  %v177_v2 = vld [vmem:[%s1689_s28 + $0xf0] sm:$0xff]  ;;  %v176_v4 = vld [vmem:[%s1689_s28 + $0xe8] sm:$0xff]  ;;  %s1047_s18 = sshll.u32 %s1586_s10, 7  ;;  %s901_s10 = sshll.u32 %s1772_s14, 4  ;;  %s1843_s10 = int_to_ptr.vmem [resolvable:$true] %s901_s10 }
  0x17   : > { %v162_v1 = vld [vmem:[%s1689_s28 + $0x78] sm:$0xff]  ;;  %1048 = vmatprep.subr.mxu0 %v178_v0  ;;  %1144 = vmatprep.subr.mxu1 %v178_v0  ;;  %v161_v3 = vld [vmem:[%s1689_s28 + $0x70] sm:$0xff]  ;;  %v160_v5 = vld [vmem:[%s1689_s28 + $0x68] sm:$0xff]  ;;  %s898_s21 = sadd.s32 %s1047_s18, %s1042_s15  ;;  %s1850_s26 = scalar_lea.sflag [#allocation3], %s106_s4 }
  0x18   : > { %1049 = vmatpush3.xpose.msra.mxu0 %v162_v1  ;;  %1160 = vmatpush3.xpose.msra.mxu1 %v162_v1  ;;  %v175_v6 = vld [vmem:[%s1689_s28 + $0xe0] sm:$0xff]  ;;  %v174_v10 = vld [vmem:[%s1689_s28 + $0xd8] sm:$0xff]  ;;  %v173_v12 = vld [vmem:[%s1689_s28 + $0xd0] sm:$0xff]  ;;  %s1044_s9 = sshll.u32 %s898_s21, 7  ;;  %s1506_s27 = scalar_lea.vmem %s1843_s10, 8192 }
  0x19   : > { %1050 = vmatprep.subr.mxu0 %v177_v2  ;;  %1145 = vmatprep.subr.mxu1 %v177_v2  ;;  %v1705_v7 = vld [vmem:[%s1701_s3] sm:$0xff]  ;;  %v158_v11 = vld [vmem:[%s1689_s28 + $0x58] sm:$0xff]  ;;  %v157_v13 = vld [vmem:[%s1689_s28 + $0x50] sm:$0xff]  ;;  %s1840_s25 = scalar_lea.hbm %s1902_s1, %s1044_s9  ;;  %p1507_p12 = scmp.ne.s32.totalorder %s1843_s10, %s1506_s27 }
  0x1a   : > { %v159_v8 = vld [vmem:[%s1689_s28 + $0x60] sm:$0xff]  ;;  %1080 = vmatprep.mubr.f32.mxu0 %v1705_v7  ;;  %v172_v14 = vld [vmem:[%s1689_s28 + $0xc8] sm:$0xff]  ;;  %v170_v18 = vld [vmem:[%s1689_s28 + $0xb8] sm:$0xff] }
  0x1b   : > { %v1709_v9 = vld [vmem:[%s1701_s3 + $0x80] sm:$0xff]  ;;  %v156_v15 = vld [vmem:[%s1689_s28 + $0x48] sm:$0xff]  ;;  %v154_v19 = vld [vmem:[%s1689_s28 + $0x38] sm:$0xff]  ;;  %p1508_p13 = pnand %p1507_p12, %p1665_p3 }
  0x1c   : > { %1051 = vmatpush3.xpose.msra.mxu0 %v161_v3  ;;  %1161 = vmatpush3.xpose.msra.mxu1 %v161_v3  ;;  %v171_v16 = vld [vmem:[%s1689_s28 + $0xc0] sm:$0xff]  ;;  %v169_v20 = vld [vmem:[%s1689_s28 + $0xb0] sm:$0xff]  ;;  %v168_v22 = vld [vmem:[%s1689_s28 + $0xa8] sm:$0xff] }
  0x1d   : > { %1052 = vmatprep.subr.mxu0 %v176_v4  ;;  %1146 = vmatprep.subr.mxu1 %v176_v4  ;;  %v155_v17 = vld [vmem:[%s1689_s28 + $0x40] sm:$0xff]  ;;  %v153_v21 = vld [vmem:[%s1689_s28 + $0x30] sm:$0xff]  ;;  %v152_v23 = vld [vmem:[%s1689_s28 + $0x28] sm:$0xff]  ;;  %p1509_p0 = pneg %p1508_p13 }
  0x1e   : > { %1112 = vmatprep.mubr.f32.mxu1 %v1709_v9  ;;  %v167_v24 = vld [vmem:[%s1689_s28 + $0xa0] sm:$0xff]  ;;  %v166_v26 = vld [vmem:[%s1689_s28 + $0x98] sm:$0xff]  ;;  %v165_v28 = vld [vmem:[%s1689_s28 + $0x90] sm:$0xff] }
  0x1f   : > { %v151_v25 = vld [vmem:[%s1689_s28 + $0x20] sm:$0xff]  ;;  %v150_v27 = vld [vmem:[%s1689_s28 + $0x18] sm:$0xff]  ;;  %v149_v29 = vld [vmem:[%s1689_s28 + $0x10] sm:$0xff] }
  0x20   : > { %1053 = vmatpush3.xpose.msra.mxu0 %v160_v5  ;;  %1162 = vmatpush3.xpose.msra.mxu1 %v160_v5  ;;  %v164_v30 = vld [vmem:[%s1689_s28 + $0x88] sm:$0xff]  ;;  %v163_v32 = vld [vmem:[%s1689_s28 + $0x80] sm:$0xff]  ;;  %v115_v36 = vld [vmem:[%s1701_s3 + $0x10] sm:$0xff] }
  0x21   : > { %1054 = vmatprep.subr.mxu0 %v175_v6  ;;  %1147 = vmatprep.subr.mxu1 %v175_v6  ;;  %v148_v31 = vld [vmem:[%s1689_s28 + $0x8] sm:$0xff]  ;;  %v147_v33 = vld [vmem:[%s1689_s28] sm:$0xff]  ;;  %v131_v37 = vld [vmem:[%s1701_s3 + $0x90] sm:$0xff]  ;;  %s1600_s28 = smov [#allocation2]  }
  0x22   : > { %v114_v34 = vld [vmem:[%s1701_s3 + $0x8] sm:$0xff]  ;;  %v116_v38 = vld [vmem:[%s1701_s3 + $0x18] sm:$0xff]  ;;  %v117_v40 = vld [vmem:[%s1701_s3 + $0x20] sm:$0xff]  ;;  %s1510_s29 = sshll.u32 %s1600_s28, 4  ;;  %s1511_s29 = int_to_ptr.vmem [resolvable:$false] %s1510_s29 }
  0x23   : > { %v130_v35 = vld [vmem:[%s1701_s3 + $0x88] sm:$0xff]  ;;  %v132_v39 = vld [vmem:[%s1701_s3 + $0x98] sm:$0xff]  ;;  %v133_v41 = vld [vmem:[%s1701_s3 + $0xa0] sm:$0xff]  ;;  %s1512_s30 = scalar_lea.vmem %s1511_s29, 16384  ;;  %p1513_p1 = scmp.lt.s32.totalorder %s1843_s10, %s1511_s29 }
  0x24   : > { %1055 = vmatpush3.xpose.msra.mxu0 %v159_v8  ;;  %1163 = vmatpush3.xpose.msra.mxu1 %v159_v8  ;;  %v118_v42 = vld [vmem:[%s1701_s3 + $0x28] sm:$0xff]  ;;  %v119_v44 = vld [vmem:[%s1701_s3 + $0x30] sm:$0xff]  ;;  %v120_v46 = vld [vmem:[%s1701_s3 + $0x38] sm:$0xff]  ;;  %p1514_p2 = scmp.lt.s32.totalorder %s1512_s30, %s1506_s27 }
  0x25   : > { %1056 = vmatprep.subr.mxu0 %v174_v10  ;;  %1148 = vmatprep.subr.mxu1 %v174_v10  ;;  %v134_v43 = vld [vmem:[%s1701_s3 + $0xa8] sm:$0xff]  ;;  %v135_v45 = vld [vmem:[%s1701_s3 + $0xb0] sm:$0xff]  ;;  %v136_v47 = vld [vmem:[%s1701_s3 + $0xb8] sm:$0xff] }
  0x26   : > { %v121_v48 = vld [vmem:[%s1701_s3 + $0x40] sm:$0xff]  ;;  %v122_v50 = vld [vmem:[%s1701_s3 + $0x48] sm:$0xff]  ;;  %v123_v52 = vld [vmem:[%s1701_s3 + $0x50] sm:$0xff]  ;;  %p1515_p4 = por %p1514_p2, %p1513_p1 }
  0x27   : > { %v137_v49 = vld [vmem:[%s1701_s3 + $0xc0] sm:$0xff]  ;;  %v138_v51 = vld [vmem:[%s1701_s3 + $0xc8] sm:$0xff]  ;;  %v139_v53 = vld [vmem:[%s1701_s3 + $0xd0] sm:$0xff] }
  0x28   : > { %1057 = vmatpush3.xpose.msra.mxu0 %v158_v11  ;;  %1164 = vmatpush3.xpose.msra.mxu1 %v158_v11  ;;  %v124_v54 = vld [vmem:[%s1701_s3 + $0x58] sm:$0xff]  ;;  %v125_v56 = vld [vmem:[%s1701_s3 + $0x60] sm:$0xff]  ;;  %v126_v58 = vld [vmem:[%s1701_s3 + $0x68] sm:$0xff]  ;;  %p1516_p5 = pnand %p1515_p4, %p1509_p0 }
  0x29   : > { %1058 = vmatprep.subr.mxu0 %v173_v12  ;;  %1149 = vmatprep.subr.mxu1 %v173_v12  ;;  %v140_v55 = vld [vmem:[%s1701_s3 + $0xd8] sm:$0xff]  ;;  %v141_v57 = vld [vmem:[%s1701_s3 + $0xe0] sm:$0xff]  ;;  %v142_v59 = vld [vmem:[%s1701_s3 + $0xe8] sm:$0xff] }
  0x2a   : > { %v127_v60 = vld [vmem:[%s1701_s3 + $0x70] sm:$0xff]  ;;  %v128_v62 = vld [vmem:[%s1701_s3 + $0x78] sm:$0xff] }
  0x2b   : > { %v143_v61 = vld [vmem:[%s1701_s3 + $0xf0] sm:$0xff]  ;;  %v144_v63 = vld [vmem:[%s1701_s3 + $0xf8] sm:$0xff] }
  0x2c   : > { %1059 = vmatpush3.xpose.msra.mxu0 %v157_v13  ;;  %1165 = vmatpush3.xpose.msra.mxu1 %v157_v13 }
  0x2d   : > { %1060 = vmatprep.subr.mxu0 %v172_v14  ;;  %1150 = vmatprep.subr.mxu1 %v172_v14 }
  0x30   : > { %1061 = vmatpush3.xpose.msra.mxu0 %v156_v15  ;;  %1166 = vmatpush3.xpose.msra.mxu1 %v156_v15 }
  0x31   : > { %1062 = vmatprep.subr.mxu0 %v171_v16  ;;  %1151 = vmatprep.subr.mxu1 %v171_v16 }
  0x34   : > { %1063 = vmatpush3.xpose.msra.mxu0 %v155_v17  ;;  %1167 = vmatpush3.xpose.msra.mxu1 %v155_v17 }
  0x35   : > { %1064 = vmatprep.subr.mxu0 %v170_v18  ;;  %1152 = vmatprep.subr.mxu1 %v170_v18 }
  0x38   : > { %1065 = vmatpush3.xpose.msra.mxu0 %v154_v19  ;;  %1168 = vmatpush3.xpose.msra.mxu1 %v154_v19 }
  0x39   : > { %1066 = vmatprep.subr.mxu0 %v169_v20  ;;  %1153 = vmatprep.subr.mxu1 %v169_v20 }
  0x3c   : > { %1067 = vmatpush3.xpose.msra.mxu0 %v153_v21  ;;  %1169 = vmatpush3.xpose.msra.mxu1 %v153_v21 }
  0x3d   : > { %1068 = vmatprep.subr.mxu0 %v168_v22  ;;  %1154 = vmatprep.subr.mxu1 %v168_v22 }
  0x40   : > { %1069 = vmatpush3.xpose.msra.mxu0 %v152_v23  ;;  %1170 = vmatpush3.xpose.msra.mxu1 %v152_v23 }
  0x41   : > { %1070 = vmatprep.subr.mxu0 %v167_v24  ;;  %1155 = vmatprep.subr.mxu1 %v167_v24 }
  0x44   : > { %1071 = vmatpush3.xpose.msra.mxu0 %v151_v25  ;;  %1171 = vmatpush3.xpose.msra.mxu1 %v151_v25 }
  0x45   : > { %1072 = vmatprep.subr.mxu0 %v166_v26  ;;  %1156 = vmatprep.subr.mxu1 %v166_v26 }
  0x48   : > { %1073 = vmatpush3.xpose.msra.mxu0 %v150_v27  ;;  %1172 = vmatpush3.xpose.msra.mxu1 %v150_v27 }
  0x49   : > { %1074 = vmatprep.subr.mxu0 %v165_v28  ;;  %1157 = vmatprep.subr.mxu1 %v165_v28 }
  0x4c   : > { %1075 = vmatpush3.xpose.msra.mxu0 %v149_v29  ;;  %1173 = vmatpush3.xpose.msra.mxu1 %v149_v29 }
  0x4d   : > { %1076 = vmatprep.subr.mxu0 %v164_v30  ;;  %1158 = vmatprep.subr.mxu1 %v164_v30 }
  0x50   : > { %1077 = vmatpush3.xpose.msra.mxu0 %v148_v31  ;;  %1174 = vmatpush3.xpose.msra.mxu1 %v148_v31 }
  0x51   : > { %1078 = vmatprep.subr.mxu0 %v163_v32  ;;  %1159 = vmatprep.subr.mxu1 %v163_v32 }
  0x54   : > { %1079 = vmatpush3.xpose.msra.mxu0 %v147_v33  ;;  %1175 = vmatpush3.xpose.msra.mxu1 %v147_v33 }
  0x57   : > { %1081 = vmatmul.mubr.f32.vlgmr.msra.gmra.mxu0 %v1705_v7  ;;  %1113 = vmatmul.mubr.f32.vlgmr.msra.gmra.mxu1 %v1709_v9 }
  0x58   : > { %1082 = vmatprep.mubr.f32.mxu0 %v114_v34  ;;  %1114 = vmatprep.mubr.f32.mxu1 %v130_v35 }
  0x5b   : > { %1083 = vmatmul.mubr.f32.gmra.mxu0 %v114_v34  ;;  %1115 = vmatmul.mubr.f32.gmra.mxu1 %v130_v35 }
  0x5c   : > { %1084 = vmatprep.mubr.f32.mxu0 %v115_v36  ;;  %1116 = vmatprep.mubr.f32.mxu1 %v131_v37 }
  0x5f   : > { %1085 = vmatmul.mubr.f32.gmra.mxu0 %v115_v36  ;;  %1117 = vmatmul.mubr.f32.gmra.mxu1 %v131_v37 }
  0x60   : > { %1086 = vmatprep.mubr.f32.mxu0 %v116_v38  ;;  %1118 = vmatprep.mubr.f32.mxu1 %v132_v39 }
  0x63   : > { %1087 = vmatmul.mubr.f32.gmra.mxu0 %v116_v38  ;;  %1119 = vmatmul.mubr.f32.gmra.mxu1 %v132_v39 }
  0x64   : > { %1088 = vmatprep.mubr.f32.mxu0 %v117_v40  ;;  %1120 = vmatprep.mubr.f32.mxu1 %v133_v41 }
  0x67   : > { %1089 = vmatmul.mubr.f32.gmra.mxu0 %v117_v40  ;;  %1121 = vmatmul.mubr.f32.gmra.mxu1 %v133_v41 }
  0x68   : > { %1090 = vmatprep.mubr.f32.mxu0 %v118_v42  ;;  %1122 = vmatprep.mubr.f32.mxu1 %v134_v43 }
  0x6b   : > { %1091 = vmatmul.mubr.f32.gmra.mxu0 %v118_v42  ;;  %1123 = vmatmul.mubr.f32.gmra.mxu1 %v134_v43 }
  0x6c   : > { %1092 = vmatprep.mubr.f32.mxu0 %v119_v44  ;;  %1124 = vmatprep.mubr.f32.mxu1 %v135_v45 }
  0x6f   : > { %1093 = vmatmul.mubr.f32.gmra.mxu0 %v119_v44  ;;  %1125 = vmatmul.mubr.f32.gmra.mxu1 %v135_v45 }
  0x70   : > { %1094 = vmatprep.mubr.f32.mxu0 %v120_v46  ;;  %1126 = vmatprep.mubr.f32.mxu1 %v136_v47 }
  0x73   : > { %1095 = vmatmul.mubr.f32.gmra.mxu0 %v120_v46  ;;  %1127 = vmatmul.mubr.f32.gmra.mxu1 %v136_v47 }
  0x74   : > { %1096 = vmatprep.mubr.f32.mxu0 %v121_v48  ;;  %1128 = vmatprep.mubr.f32.mxu1 %v137_v49 }
  0x77   : > { %1097 = vmatmul.mubr.f32.gmra.mxu0 %v121_v48  ;;  %1129 = vmatmul.mubr.f32.gmra.mxu1 %v137_v49 }
  0x78   : > { %1098 = vmatprep.mubr.f32.mxu0 %v122_v50  ;;  %1130 = vmatprep.mubr.f32.mxu1 %v138_v51 }
  0x7b   : > { %1099 = vmatmul.mubr.f32.gmra.mxu0 %v122_v50  ;;  %1131 = vmatmul.mubr.f32.gmra.mxu1 %v138_v51 }
  0x7c   : > { %1100 = vmatprep.mubr.f32.mxu0 %v123_v52  ;;  %1132 = vmatprep.mubr.f32.mxu1 %v139_v53 }
  0x7f   : > { %1101 = vmatmul.mubr.f32.gmra.mxu0 %v123_v52  ;;  %1133 = vmatmul.mubr.f32.gmra.mxu1 %v139_v53 }
  0x80   : > { %1102 = vmatprep.mubr.f32.mxu0 %v124_v54  ;;  %1134 = vmatprep.mubr.f32.mxu1 %v140_v55 }
  0x83   : > { %1103 = vmatmul.mubr.f32.gmra.mxu0 %v124_v54  ;;  %1135 = vmatmul.mubr.f32.gmra.mxu1 %v140_v55 }
  0x84   : > { %1104 = vmatprep.mubr.f32.mxu0 %v125_v56  ;;  %1136 = vmatprep.mubr.f32.mxu1 %v141_v57 }
  0x87   : > { %1105 = vmatmul.mubr.f32.gmra.mxu0 %v125_v56  ;;  %1137 = vmatmul.mubr.f32.gmra.mxu1 %v141_v57 }
  0x88   : > { %1106 = vmatprep.mubr.f32.mxu0 %v126_v58  ;;  %1138 = vmatprep.mubr.f32.mxu1 %v142_v59 }
  0x8b   : > { %1107 = vmatmul.mubr.f32.gmra.mxu0 %v126_v58  ;;  %1139 = vmatmul.mubr.f32.gmra.mxu1 %v142_v59 }
  0x8c   : > { %1108 = vmatprep.mubr.f32.mxu0 %v127_v60  ;;  %1140 = vmatprep.mubr.f32.mxu1 %v143_v61 }
  0x8f   : > { %1109 = vmatmul.mubr.f32.gmra.mxu0 %v127_v60  ;;  %1141 = vmatmul.mubr.f32.gmra.mxu1 %v143_v61 }
  0x90   : > { %1110 = vmatprep.mubr.f32.mxu0 %v128_v62  ;;  %1142 = vmatprep.mubr.f32.mxu1 %v144_v63 }
  0x93   : > { %1111 = vmatmul.mubr.f32.gmra.mxu0 %v128_v62  ;;  %1143 = vmatmul.mubr.f32.gmra.mxu1 %v144_v63 }
 0x117   : > { %v245_v0 = vpop.f32.mrf.mxu0  ;;  %v341_v1 = vpop.f32.mrf.mxu1 }
 0x118   : > { %v976_v2 = vmul.f32 -1.442695, %v245_v0  ;;  %v1008_v3 = vmul.f32 -1.442695, %v341_v1 }
 0x119   : > { %v247_v4 = vpop.f32.mrf.mxu0  ;;  %v343_v5 = vpop.f32.mrf.mxu1 }
 0x11a   : > { %1250 = vpow2.f32 %v976_v2  ;;  %v977_v6 = vmul.f32 -1.442695, %v247_v4  ;;  %v1009_v7 = vmul.f32 -1.442695, %v343_v5 }
 0x11b   : > { %1252 = vpow2.f32 %v1008_v3  ;;  %v251_v8 = vpop.f32.mrf.mxu0  ;;  %v347_v9 = vpop.f32.mrf.mxu1 }
 0x11c   : > { %1254 = vpow2.f32 %v977_v6  ;;  %v978_v10 = vmul.f32 -1.442695, %v251_v8  ;;  %v1010_v11 = vmul.f32 -1.442695, %v347_v9 }
 0x11d   : > { %1256 = vpow2.f32 %v1009_v7  ;;  %v253_v12 = vpop.f32.mrf.mxu0  ;;  %v349_v13 = vpop.f32.mrf.mxu1 }
 0x11e   : > { %1258 = vpow2.f32 %v978_v10  ;;  %v979_v14 = vmul.f32 -1.442695, %v253_v12  ;;  %v1011_v15 = vmul.f32 -1.442695, %v349_v13 }
 0x11f   : > { %1260 = vpow2.f32 %v1010_v11  ;;  %v257_v16 = vpop.f32.mrf.mxu0  ;;  %v353_v17 = vpop.f32.mrf.mxu1 }
 0x120   : > { %1262 = vpow2.f32 %v979_v14  ;;  %v980_v18 = vmul.f32 -1.442695, %v257_v16  ;;  %v1012_v19 = vmul.f32 -1.442695, %v353_v17 }
 0x121   : > { %1264 = vpow2.f32 %v1011_v15  ;;  %v259_v20 = vpop.f32.mrf.mxu0  ;;  %v355_v21 = vpop.f32.mrf.mxu1 }
 0x122   : > { %1266 = vpow2.f32 %v980_v18  ;;  %v981_v22 = vmul.f32 -1.442695, %v259_v20  ;;  %v1013_v23 = vmul.f32 -1.442695, %v355_v21 }
 0x123   : > { %1268 = vpow2.f32 %v1012_v19  ;;  %v263_v24 = vpop.f32.mrf.mxu0  ;;  %v359_v25 = vpop.f32.mrf.mxu1 }
 0x124   : > { %1270 = vpow2.f32 %v981_v22  ;;  %v982_v26 = vmul.f32 -1.442695, %v263_v24  ;;  %v1014_v27 = vmul.f32 -1.442695, %v359_v25 }
 0x125   : > { %1272 = vpow2.f32 %v1013_v23  ;;  %v265_v28 = vpop.f32.mrf.mxu0  ;;  %v361_v29 = vpop.f32.mrf.mxu1 }
 0x126   : > { %1274 = vpow2.f32 %v982_v26  ;;  %v983_v30 = vmul.f32 -1.442695, %v265_v28  ;;  %v1015_v31 = vmul.f32 -1.442695, %v361_v29 }
 0x127   : > { %v1251_v32 = vpop.eup %1250  ;;  %1276 = vpow2.f32 %v1014_v27  ;;  %v269_v33 = vpop.f32.mrf.mxu0 }
 0x128   : > { %v365_v34 = vpop.f32.mrf.mxu1  ;;  %v1253_v35 = vpop.eup %1252  ;;  %v628_v36 = vadd.f32 1.0, %v1251_v32  ;;  %1278 = vpow2.f32 %v983_v30  ;;  %v984_v8 = vmul.f32 -1.442695, %v269_v33 }
 0x129   : > { %v1255_v37 = vpop.eup %1254  ;;  %v660_v38 = vadd.f32 1.0, %v1253_v35  ;;  %1280 = vpow2.f32 %v1015_v31  ;;  %v271_v39 = vpop.f32.mrf.mxu0  ;;  %v1016_v12 = vmul.f32 -1.442695, %v365_v34 }
 0x12a   : > { %v1257_v40 = vpop.eup %1256  ;;  %1282 = vrcp.f32 %v628_v36  ;;  %v629_v41 = vadd.f32 1.0, %v1255_v37  ;;  %v367_v42 = vpop.f32.mrf.mxu1  ;;  %v985_v14 = vmul.f32 -1.442695, %v271_v39 }
 0x12b   : > { %v1259_v43 = vpop.eup %1258  ;;  %1284 = vrcp.f32 %v660_v38  ;;  %v661_v44 = vadd.f32 1.0, %v1257_v40  ;;  %v275_v49 = vpop.f32.mrf.mxu0  ;;  %v1017_v16 = vmul.f32 -1.442695, %v367_v42 }
 0x12c   : > { %v1261_v45 = vpop.eup %1260  ;;  %1286 = vrcp.f32 %v629_v41  ;;  %v630_v46 = vadd.f32 1.0, %v1259_v43  ;;  %v371_v52 = vpop.f32.mrf.mxu1  ;;  %v986_v19 = vmul.f32 -1.442695, %v275_v49 }
 0x12d   : > { %v1263_v47 = vpop.eup %1262  ;;  %1288 = vrcp.f32 %v661_v44  ;;  %v662_v48 = vadd.f32 1.0, %v1261_v45  ;;  %v277_v59 = vpop.f32.mrf.mxu0  ;;  %v1018_v22 = vmul.f32 -1.442695, %v371_v52 }
 0x12e   : > { %v1265_v50 = vpop.eup %1264  ;;  %1290 = vrcp.f32 %v630_v46  ;;  %v631_v51 = vadd.f32 1.0, %v1263_v47  ;;  %v373_v62 = vpop.f32.mrf.mxu1  ;;  %v987_v24 = vmul.f32 -1.442695, %v277_v59 }
 0x12f   : > { %v1267_v53 = vpop.eup %1266  ;;  %1292 = vrcp.f32 %v662_v48  ;;  %v663_v54 = vadd.f32 1.0, %v1265_v50  ;;  %v281_v5 = vpop.f32.mrf.mxu0  ;;  %v1019_v26 = vmul.f32 -1.442695, %v373_v62 }
 0x130   : > { %v1269_v55 = vpop.eup %1268  ;;  %1294 = vrcp.f32 %v631_v51  ;;  %v632_v56 = vadd.f32 1.0, %v1267_v53  ;;  %v377_v9 = vpop.f32.mrf.mxu1  ;;  %v988_v29 = vmul.f32 -1.442695, %v281_v5 }
 0x131   : > { %v1271_v57 = vpop.eup %1270  ;;  %1296 = vrcp.f32 %v663_v54  ;;  %v664_v58 = vadd.f32 1.0, %v1269_v55  ;;  %v283_v17 = vpop.f32.mrf.mxu0  ;;  %v1020_v32 = vmul.f32 -1.442695, %v377_v9 }
 0x132   : > { %v1273_v60 = vpop.eup %1272  ;;  %1298 = vrcp.f32 %v632_v56  ;;  %v633_v61 = vadd.f32 1.0, %v1271_v57  ;;  %v379_v20 = vpop.f32.mrf.mxu1  ;;  %v989_v34 = vmul.f32 -1.442695, %v283_v17 }
 0x133   : > { %v1275_v63 = vpop.eup %1274  ;;  %1300 = vrcp.f32 %v664_v58  ;;  %v665_v0 = vadd.f32 1.0, %v1273_v60  ;;  %v287_v27 = vpop.f32.mrf.mxu0  ;;  %v1021_v36 = vmul.f32 -1.442695, %v379_v20 }
 0x134   : > { %v1277_v1 = vpop.eup %1276  ;;  %1302 = vrcp.f32 %v633_v61  ;;  %v634_v2 = vadd.f32 1.0, %v1275_v63  ;;  %v383_v30 = vpop.f32.mrf.mxu1  ;;  %v990_v39 = vmul.f32 -1.442695, %v287_v27 }
 0x135   : > { %v1279_v3 = vpop.eup %1278  ;;  %1304 = vrcp.f32 %v665_v0  ;;  %v666_v4 = vadd.f32 1.0, %v1277_v1  ;;  %v289_v37 = vpop.f32.mrf.mxu0  ;;  %v1022_v42 = vmul.f32 -1.442695, %v383_v30 }
 0x136   : > { %v1281_v6 = vpop.eup %1280  ;;  %1306 = vrcp.f32 %v634_v2  ;;  %v635_v7 = vadd.f32 1.0, %v1279_v3  ;;  %v385_v40 = vpop.f32.mrf.mxu1  ;;  %v991_v44 = vmul.f32 -1.442695, %v289_v37 }
 0x137   : > { %v1283_v10 = vpop.eup %1282  ;;  %1308 = vrcp.f32 %v666_v4  ;;  %v667_v11 = vadd.f32 1.0, %v1281_v6  ;;  %v1023_v46 = vmul.f32 -1.442695, %v385_v40  ;;  %v293_v47 = vpop.f32.mrf.mxu0 }
 0x138   : > { %v1285_v13 = vpop.eup %1284  ;;  %820 = vst [vmem:[%s1772_s14] sm:$0xff] %v1283_v10  ;;  %1310 = vrcp.f32 %v635_v7  ;;  %v389_v49 = vpop.f32.mrf.mxu1 }
 0x139   : > { %v1287_v15 = vpop.eup %1286  ;;  %852 = vst [vmem:[%s1772_s14 + $0x100] sm:$0xff] %v1285_v13  ;;  %1312 = vrcp.f32 %v667_v11  ;;  %v295_v55 = vpop.f32.mrf.mxu0 }
 0x13a   : > { %v1289_v18 = vpop.eup %1288  ;;  %821 = vst [vmem:[%s1772_s14 + $0x8] sm:$0xff] %v1287_v15  ;;  %1314 = vpow2.f32 %v984_v8  ;;  %v391_v58 = vpop.f32.mrf.mxu1  ;;  %v993_v30 = vmul.f32 -1.442695, %v295_v55 }
 0x13b   : > { %v1291_v21 = vpop.eup %1290  ;;  %853 = vst [vmem:[%s1772_s14 + $0x108] sm:$0xff] %v1289_v18  ;;  %1316 = vpow2.f32 %v1016_v12  ;;  %v299_v1 = vpop.f32.mrf.mxu0 }
 0x13c   : > { %v1293_v23 = vpop.eup %1292  ;;  %822 = vst [vmem:[%s1772_s14 + $0x10] sm:$0xff] %v1291_v21  ;;  %1318 = vpow2.f32 %v985_v14  ;;  %v395_v4 = vpop.f32.mrf.mxu1 }
 0x13d   : > { %v1295_v25 = vpop.eup %1294  ;;  %854 = vst [vmem:[%s1772_s14 + $0x110] sm:$0xff] %v1293_v23  ;;  %1320 = vpow2.f32 %v1017_v16  ;;  %v301_v11 = vpop.f32.mrf.mxu0 }
 0x13e   : > { %v1297_v28 = vpop.eup %1296  ;;  %823 = vst [vmem:[%s1772_s14 + $0x18] sm:$0xff] %v1295_v25  ;;  %1322 = vpow2.f32 %v986_v19  ;;  %v397_v14 = vpop.f32.mrf.mxu1  ;;  %v995_v40 = vmul.f32 -1.442695, %v301_v11 }
 0x13f   : > { %v1299_v31 = vpop.eup %1298  ;;  %855 = vst [vmem:[%s1772_s14 + $0x118] sm:$0xff] %v1297_v28  ;;  %1324 = vpow2.f32 %v1018_v22  ;;  %v305_v21 = vpop.f32.mrf.mxu0  ;;  %v1024_v28 = vmul.f32 -1.442695, %v389_v49 }
 0x140   : > { %v1301_v33 = vpop.eup %1300  ;;  %824 = vst [vmem:[%s1772_s14 + $0x20] sm:$0xff] %v1299_v31  ;;  %1326 = vpow2.f32 %v987_v24  ;;  %v992_v24 = vmul.f32 -1.442695, %v293_v47  ;;  %v401_v25 = vpop.f32.mrf.mxu1 }
 0x141   : > { %v1303_v35 = vpop.eup %1302  ;;  %856 = vst [vmem:[%s1772_s14 + $0x120] sm:$0xff] %v1301_v33  ;;  %1328 = vpow2.f32 %v1019_v26  ;;  %v307_v33 = vpop.f32.mrf.mxu0 }
 0x142   : > { %v1305_v38 = vpop.eup %1304  ;;  %825 = vst [vmem:[%s1772_s14 + $0x28] sm:$0xff] %v1303_v35  ;;  %1330 = vpow2.f32 %v988_v29  ;;  %v994_v35 = vmul.f32 -1.442695, %v299_v1 }
 0x143   : > { %v1307_v41 = vpop.eup %1306  ;;  %857 = vst [vmem:[%s1772_s14 + $0x128] sm:$0xff] %v1305_v38  ;;  %1332 = vpow2.f32 %v1020_v32  ;;  %v1025_v32 = vmul.f32 -1.442695, %v391_v58  ;;  %v1026_v38 = vmul.f32 -1.442695, %v395_v4 }
 0x144   : > { %v1309_v43 = vpop.eup %1308  ;;  %826 = vst [vmem:[%s1772_s14 + $0x30] sm:$0xff] %v1307_v41  ;;  %1334 = vpow2.f32 %v989_v34 }
 0x145   : > { %v1311_v45 = vpop.eup %1310  ;;  %858 = vst [vmem:[%s1772_s14 + $0x130] sm:$0xff] %v1309_v43  ;;  %1336 = vpow2.f32 %v1021_v36  ;;  %v403_v36 = vpop.f32.mrf.mxu1 }
 0x146   : > { %v1313_v48 = vpop.eup %1312  ;;  %827 = vst [vmem:[%s1772_s14 + $0x38] sm:$0xff] %v1311_v45  ;;  %1338 = vpow2.f32 %v990_v39  ;;  %v311_v43 = vpop.f32.mrf.mxu0  ;;  %v996_v45 = vmul.f32 -1.442695, %v305_v21 }
 0x147   : > { %v1315_v50 = vpop.eup %1314  ;;  %859 = vst [vmem:[%s1772_s14 + $0x138] sm:$0xff] %v1313_v48  ;;  %1340 = vpow2.f32 %v1022_v42  ;;  %v1027_v42 = vmul.f32 -1.442695, %v397_v14  ;;  %v1028_v48 = vmul.f32 -1.442695, %v401_v25 }
 0x148   : > { %v1317_v51 = vpop.eup %1316  ;;  %v636_v52 = vadd.f32 1.0, %v1315_v50  ;;  %1342 = vpow2.f32 %v991_v44  ;;  %v997_v50 = vmul.f32 -1.442695, %v307_v33  ;;  %v998_v55 = vmul.f32 -1.442695, %v311_v43 }
 0x149   : > { %v1319_v53 = vpop.eup %1318  ;;  %v668_v54 = vadd.f32 1.0, %v1317_v51  ;;  %1344 = vpow2.f32 %v1023_v46  ;;  %v407_v46 = vpop.f32.mrf.mxu1 }
 0x14a   : > { %v1321_v56 = vpop.eup %1320  ;;  %1346 = vrcp.f32 %v636_v52  ;;  %v637_v57 = vadd.f32 1.0, %v1319_v53  ;;  %v1029_v52 = vmul.f32 -1.442695, %v403_v36  ;;  %v313_v53 = vpop.f32.mrf.mxu0  ;;  %v1030_v58 = vmul.f32 -1.442695, %v407_v46 }
 0x14b   : > { %v1323_v59 = vpop.eup %1322  ;;  %1348 = vrcp.f32 %v668_v54  ;;  %v669_v60 = vadd.f32 1.0, %v1321_v56  ;;  %v409_v56 = vpop.f32.mrf.mxu1 }
 0x14c   : > { %v1325_v61 = vpop.eup %1324  ;;  %1350 = vrcp.f32 %v637_v57  ;;  %v638_v62 = vadd.f32 1.0, %v1323_v59 }
 0x14d   : > { %v1327_v63 = vpop.eup %1326  ;;  %1352 = vrcp.f32 %v669_v60  ;;  %v670_v0 = vadd.f32 1.0, %v1325_v61  ;;  %v999_v60 = vmul.f32 -1.442695, %v313_v53  ;;  %v413_v1 = vpop.f32.mrf.mxu1 }
 0x14e   : > { %v1329_v2 = vpop.eup %1328  ;;  %1354 = vrcp.f32 %v638_v62  ;;  %v639_v3 = vadd.f32 1.0, %v1327_v63  ;;  %v1031_v62 = vmul.f32 -1.442695, %v409_v56  ;;  %v317_v63 = vpop.f32.mrf.mxu0 }
 0x14f   : > { %v1331_v5 = vpop.eup %1330  ;;  %1356 = vrcp.f32 %v670_v0  ;;  %v671_v6 = vadd.f32 1.0, %v1329_v2 }
 0x150   : > { %v1333_v7 = vpop.eup %1332  ;;  %1358 = vrcp.f32 %v639_v3  ;;  %v640_v8 = vadd.f32 1.0, %v1331_v5 }
 0x151   : > { %v1335_v9 = vpop.eup %1334  ;;  %1360 = vrcp.f32 %v671_v6  ;;  %v672_v10 = vadd.f32 1.0, %v1333_v7  ;;  %v319_v7 = vpop.f32.mrf.mxu0 }
 0x152   : > { %v1337_v12 = vpop.eup %1336  ;;  %1362 = vrcp.f32 %v640_v8  ;;  %v641_v13 = vadd.f32 1.0, %v1335_v9  ;;  %v1001_v46 = vmul.f32 -1.442695, %v319_v7 }
 0x153   : > { %v1339_v15 = vpop.eup %1338  ;;  %1364 = vrcp.f32 %v672_v10  ;;  %v673_v16 = vadd.f32 1.0, %v1337_v12  ;;  %v415_v10 = vpop.f32.mrf.mxu1 }
 0x154   : > { %v1341_v17 = vpop.eup %1340  ;;  %1366 = vrcp.f32 %v641_v13  ;;  %v642_v18 = vadd.f32 1.0, %v1339_v15 }
 0x155   : > { %v1343_v19 = vpop.eup %1342  ;;  %1368 = vrcp.f32 %v673_v16  ;;  %v674_v20 = vadd.f32 1.0, %v1341_v17  ;;  %v323_v17 = vpop.f32.mrf.mxu0 }
 0x156   : > { %v1345_v22 = vpop.eup %1344  ;;  %1370 = vrcp.f32 %v642_v18  ;;  %v643_v23 = vadd.f32 1.0, %v1343_v19 }
 0x157   : > { %v1347_v26 = vpop.eup %1346  ;;  %1372 = vrcp.f32 %v674_v20  ;;  %v675_v27 = vadd.f32 1.0, %v1345_v22  ;;  %v419_v20 = vpop.f32.mrf.mxu1 }
 0x158   : > { %v1349_v29 = vpop.eup %1348  ;;  %828 = vst [vmem:[%s1772_s14 + $0x40] sm:$0xff] %v1347_v26  ;;  %1374 = vrcp.f32 %v643_v23 }
 0x159   : > { %v1351_v31 = vpop.eup %1350  ;;  %860 = vst [vmem:[%s1772_s14 + $0x140] sm:$0xff] %v1349_v29  ;;  %1376 = vrcp.f32 %v675_v27  ;;  %v325_v27 = vpop.f32.mrf.mxu0 }
 0x15a   : > { %v1353_v34 = vpop.eup %1352  ;;  %829 = vst [vmem:[%s1772_s14 + $0x48] sm:$0xff] %v1351_v31  ;;  %1378 = vpow2.f32 %v992_v24  ;;  %v1003_v56 = vmul.f32 -1.442695, %v325_v27 }
 0x15b   : > { %v1355_v37 = vpop.eup %1354  ;;  %861 = vst [vmem:[%s1772_s14 + $0x148] sm:$0xff] %v1353_v34  ;;  %1380 = vpow2.f32 %v1024_v28 }
 0x15c   : > { %v1357_v39 = vpop.eup %1356  ;;  %830 = vst [vmem:[%s1772_s14 + $0x50] sm:$0xff] %v1355_v37  ;;  %1382 = vpow2.f32 %v993_v30  ;;  %v421_v30 = vpop.f32.mrf.mxu1 }
 0x15d   : > { %v1359_v41 = vpop.eup %1358  ;;  %862 = vst [vmem:[%s1772_s14 + $0x150] sm:$0xff] %v1357_v39  ;;  %1384 = vpow2.f32 %v1025_v32  ;;  %v329_v37 = vpop.f32.mrf.mxu0 }
 0x15e   : > { %v1361_v44 = vpop.eup %1360  ;;  %831 = vst [vmem:[%s1772_s14 + $0x58] sm:$0xff] %v1359_v41  ;;  %1386 = vpow2.f32 %v994_v35  ;;  %v425_v41 = vpop.f32.mrf.mxu1 }
 0x15f   : > { %v1363_v47 = vpop.eup %1362  ;;  %863 = vst [vmem:[%s1772_s14 + $0x158] sm:$0xff] %v1361_v44  ;;  %1388 = vpow2.f32 %v1026_v38  ;;  %v1032_v44 = vmul.f32 -1.442695, %v413_v1 }
 0x160   : > { %v1365_v49 = vpop.eup %1364  ;;  %832 = vst [vmem:[%s1772_s14 + $0x60] sm:$0xff] %v1363_v47  ;;  %1390 = vpow2.f32 %v995_v40  ;;  %v1000_v40 = vmul.f32 -1.442695, %v317_v63 }
 0x161   : > { %v1367_v51 = vpop.eup %1366  ;;  %864 = vst [vmem:[%s1772_s14 + $0x160] sm:$0xff] %v1365_v49  ;;  %1392 = vpow2.f32 %v1027_v42  ;;  %v331_v49 = vpop.f32.mrf.mxu0 }
 0x162   : > { %v1369_v54 = vpop.eup %1368  ;;  %833 = vst [vmem:[%s1772_s14 + $0x68] sm:$0xff] %v1367_v51  ;;  %1394 = vpow2.f32 %v996_v45  ;;  %v1002_v51 = vmul.f32 -1.442695, %v323_v17 }
 0x163   : > { %v1371_v57 = vpop.eup %1370  ;;  %865 = vst [vmem:[%s1772_s14 + $0x168] sm:$0xff] %v1369_v54  ;;  %1396 = vpow2.f32 %v1028_v48  ;;  %v1033_v48 = vmul.f32 -1.442695, %v415_v10  ;;  %v1034_v54 = vmul.f32 -1.442695, %v419_v20 }
 0x164   : > { %v1373_v59 = vpop.eup %1372  ;;  %834 = vst [vmem:[%s1772_s14 + $0x70] sm:$0xff] %v1371_v57  ;;  %1398 = vpow2.f32 %v997_v50 }
 0x165   : > { %v1375_v61 = vpop.eup %1374  ;;  %866 = vst [vmem:[%s1772_s14 + $0x170] sm:$0xff] %v1373_v59  ;;  %1400 = vpow2.f32 %v1029_v52  ;;  %v427_v52 = vpop.f32.mrf.mxu1 }
 0x166   : > { %v1377_v0 = vpop.eup %1376  ;;  %835 = vst [vmem:[%s1772_s14 + $0x78] sm:$0xff] %v1375_v61  ;;  %1402 = vpow2.f32 %v998_v55  ;;  %v335_v59 = vpop.f32.mrf.mxu0  ;;  %v1004_v61 = vmul.f32 -1.442695, %v329_v37 }
 0x167   : > { %v1379_v2 = vpop.eup %1378  ;;  %867 = vst [vmem:[%s1772_s14 + $0x178] sm:$0xff] %v1377_v0  ;;  %1404 = vpow2.f32 %v1030_v58  ;;  %v1035_v58 = vmul.f32 -1.442695, %v421_v30  ;;  %v1036_v0 = vmul.f32 -1.442695, %v425_v41 }
 0x168   : > { %v1381_v3 = vpop.eup %1380  ;;  %v644_v4 = vadd.f32 1.0, %v1379_v2  ;;  %1406 = vpow2.f32 %v999_v60  ;;  %v1005_v2 = vmul.f32 -1.442695, %v331_v49  ;;  %v1006_v7 = vmul.f32 -1.442695, %v335_v59 }
 0x169   : > { %v1383_v5 = vpop.eup %1382  ;;  %v676_v6 = vadd.f32 1.0, %v1381_v3  ;;  %1408 = vpow2.f32 %v1031_v62  ;;  %v431_v62 = vpop.f32.mrf.mxu1 }
 0x16a   : > { %v1385_v8 = vpop.eup %1384  ;;  %1410 = vrcp.f32 %v644_v4  ;;  %v645_v9 = vadd.f32 1.0, %v1383_v5  ;;  %v1037_v4 = vmul.f32 -1.442695, %v427_v52  ;;  %v337_v5 = vpop.f32.mrf.mxu0  ;;  %v1038_v10 = vmul.f32 -1.442695, %v431_v62 }
 0x16b   : > { %v1387_v11 = vpop.eup %1386  ;;  %1412 = vrcp.f32 %v676_v6  ;;  %v677_v12 = vadd.f32 1.0, %v1385_v8  ;;  %v433_v8 = vpop.f32.mrf.mxu1 }
 0x16c   : > { %v1389_v13 = vpop.eup %1388  ;;  %1414 = vrcp.f32 %v645_v9  ;;  %v646_v14 = vadd.f32 1.0, %v1387_v11 }
 0x16d   : > { %v1391_v15 = vpop.eup %1390  ;;  %1416 = vrcp.f32 %v677_v12  ;;  %v678_v16 = vadd.f32 1.0, %v1389_v13  ;;  %v1007_v12 = vmul.f32 -1.442695, %v337_v5 }
 0x16e   : > { %v1393_v18 = vpop.eup %1392  ;;  %1418 = vrcp.f32 %v646_v14  ;;  %v647_v19 = vadd.f32 1.0, %v1391_v15  ;;  %v1039_v14 = vmul.f32 -1.442695, %v433_v8 }
 0x16f   : > { %v1395_v21 = vpop.eup %1394  ;;  %1420 = vrcp.f32 %v678_v16  ;;  %v679_v22 = vadd.f32 1.0, %v1393_v18 }
 0x170   : > { %v1397_v23 = vpop.eup %1396  ;;  %1422 = vrcp.f32 %v647_v19  ;;  %v648_v24 = vadd.f32 1.0, %v1395_v21 }
 0x171   : > { %v1399_v25 = vpop.eup %1398  ;;  %1424 = vrcp.f32 %v679_v22  ;;  %v680_v26 = vadd.f32 1.0, %v1397_v23 }
 0x172   : > { %v1401_v28 = vpop.eup %1400  ;;  %1426 = vrcp.f32 %v648_v24  ;;  %v649_v29 = vadd.f32 1.0, %v1399_v25 }
 0x173   : > { %v1403_v31 = vpop.eup %1402  ;;  %1428 = vrcp.f32 %v680_v26  ;;  %v681_v32 = vadd.f32 1.0, %v1401_v28 }
 0x174   : > { %v1405_v33 = vpop.eup %1404  ;;  %1430 = vrcp.f32 %v649_v29  ;;  %v650_v34 = vadd.f32 1.0, %v1403_v31 }
 0x175   : > { %v1407_v35 = vpop.eup %1406  ;;  %1432 = vrcp.f32 %v681_v32  ;;  %v682_v36 = vadd.f32 1.0, %v1405_v33 }
 0x176   : > { %v1409_v38 = vpop.eup %1408  ;;  %1434 = vrcp.f32 %v650_v34  ;;  %v651_v39 = vadd.f32 1.0, %v1407_v35 }
 0x177   : > { %v1411_v42 = vpop.eup %1410  ;;  %1436 = vrcp.f32 %v682_v36  ;;  %v683_v43 = vadd.f32 1.0, %v1409_v38 }
 0x178   : > { %v1413_v45 = vpop.eup %1412  ;;  %836 = vst [vmem:[%s1772_s14 + $0x80] sm:$0xff] %v1411_v42  ;;  %1438 = vrcp.f32 %v651_v39 }
 0x179   : > { %v1415_v47 = vpop.eup %1414  ;;  %868 = vst [vmem:[%s1772_s14 + $0x180] sm:$0xff] %v1413_v45  ;;  %1440 = vrcp.f32 %v683_v43 }
 0x17a   : > { %v1417_v50 = vpop.eup %1416  ;;  %837 = vst [vmem:[%s1772_s14 + $0x88] sm:$0xff] %v1415_v47  ;;  %1442 = vpow2.f32 %v1000_v40 }
 0x17b   : > { %v1419_v53 = vpop.eup %1418  ;;  %869 = vst [vmem:[%s1772_s14 + $0x188] sm:$0xff] %v1417_v50  ;;  %1444 = vpow2.f32 %v1032_v44 }
 0x17c   : > { %v1421_v55 = vpop.eup %1420  ;;  %838 = vst [vmem:[%s1772_s14 + $0x90] sm:$0xff] %v1419_v53  ;;  %1446 = vpow2.f32 %v1001_v46 }
 0x17d   : > { %v1423_v57 = vpop.eup %1422  ;;  %870 = vst [vmem:[%s1772_s14 + $0x190] sm:$0xff] %v1421_v55  ;;  %1448 = vpow2.f32 %v1033_v48 }
 0x17e   : > { %v1425_v60 = vpop.eup %1424  ;;  %839 = vst [vmem:[%s1772_s14 + $0x98] sm:$0xff] %v1423_v57  ;;  %1450 = vpow2.f32 %v1002_v51 }
 0x17f   : > { %v1427_v63 = vpop.eup %1426  ;;  %871 = vst [vmem:[%s1772_s14 + $0x198] sm:$0xff] %v1425_v60  ;;  %1452 = vpow2.f32 %v1034_v54 }
 0x180   : > { %v1429_v1 = vpop.eup %1428  ;;  %840 = vst [vmem:[%s1772_s14 + $0xa0] sm:$0xff] %v1427_v63  ;;  %1454 = vpow2.f32 %v1003_v56 }
 0x181   : > { %v1431_v3 = vpop.eup %1430  ;;  %872 = vst [vmem:[%s1772_s14 + $0x1a0] sm:$0xff] %v1429_v1  ;;  %1456 = vpow2.f32 %v1035_v58 }
 0x182   : > { %v1433_v6 = vpop.eup %1432  ;;  %841 = vst [vmem:[%s1772_s14 + $0xa8] sm:$0xff] %v1431_v3  ;;  %1458 = vpow2.f32 %v1004_v61 }
 0x183   : > { %v1435_v9 = vpop.eup %1434  ;;  %873 = vst [vmem:[%s1772_s14 + $0x1a8] sm:$0xff] %v1433_v6  ;;  %1460 = vpow2.f32 %v1036_v0 }
 0x184   : > { %v1437_v11 = vpop.eup %1436  ;;  %842 = vst [vmem:[%s1772_s14 + $0xb0] sm:$0xff] %v1435_v9  ;;  %1462 = vpow2.f32 %v1005_v2 }
 0x185   : > { %v1439_v13 = vpop.eup %1438  ;;  %874 = vst [vmem:[%s1772_s14 + $0x1b0] sm:$0xff] %v1437_v11  ;;  %1464 = vpow2.f32 %v1037_v4 }
 0x186   : > { %v1441_v15 = vpop.eup %1440  ;;  %843 = vst [vmem:[%s1772_s14 + $0xb8] sm:$0xff] %v1439_v13  ;;  %1466 = vpow2.f32 %v1006_v7 }
 0x187   : > { %v1443_v16 = vpop.eup %1442  ;;  %875 = vst [vmem:[%s1772_s14 + $0x1b8] sm:$0xff] %v1441_v15  ;;  %1468 = vpow2.f32 %v1038_v10 }
 0x188   : > { %v1445_v17 = vpop.eup %1444  ;;  %v652_v18 = vadd.f32 1.0, %v1443_v16  ;;  %1470 = vpow2.f32 %v1007_v12 }
 0x189   : > { %v1447_v19 = vpop.eup %1446  ;;  %v684_v20 = vadd.f32 1.0, %v1445_v17  ;;  %1472 = vpow2.f32 %v1039_v14 }
 0x18a   : > { %v1449_v21 = vpop.eup %1448  ;;  %1474 = vrcp.f32 %v652_v18  ;;  %v653_v22 = vadd.f32 1.0, %v1447_v19 }
 0x18b   : > { %v1451_v23 = vpop.eup %1450  ;;  %1476 = vrcp.f32 %v684_v20  ;;  %v685_v24 = vadd.f32 1.0, %v1449_v21 }
 0x18c   : > { %v1453_v25 = vpop.eup %1452  ;;  %1478 = vrcp.f32 %v653_v22  ;;  %v654_v26 = vadd.f32 1.0, %v1451_v23 }
 0x18d   : > { %v1455_v27 = vpop.eup %1454  ;;  %1480 = vrcp.f32 %v685_v24  ;;  %v686_v28 = vadd.f32 1.0, %v1453_v25 }
 0x18e   : > { %v1457_v29 = vpop.eup %1456  ;;  %1482 = vrcp.f32 %v654_v26  ;;  %v655_v30 = vadd.f32 1.0, %v1455_v27 }
 0x18f   : > { %v1459_v31 = vpop.eup %1458  ;;  %1484 = vrcp.f32 %v686_v28  ;;  %v687_v32 = vadd.f32 1.0, %v1457_v29 }
 0x190   : > { %v1461_v33 = vpop.eup %1460  ;;  %1486 = vrcp.f32 %v655_v30  ;;  %v656_v34 = vadd.f32 1.0, %v1459_v31 }
 0x191   : > { %v1463_v35 = vpop.eup %1462  ;;  %1488 = vrcp.f32 %v687_v32  ;;  %v688_v36 = vadd.f32 1.0, %v1461_v33 }
 0x192   : > { %v1465_v37 = vpop.eup %1464  ;;  %1490 = vrcp.f32 %v656_v34  ;;  %v657_v38 = vadd.f32 1.0, %v1463_v35 }
 0x193   : > { %v1467_v39 = vpop.eup %1466  ;;  %1492 = vrcp.f32 %v688_v36  ;;  %v689_v40 = vadd.f32 1.0, %v1465_v37 }
 0x194   : > { %v1469_v41 = vpop.eup %1468  ;;  %1494 = vrcp.f32 %v657_v38  ;;  %v658_v42 = vadd.f32 1.0, %v1467_v39 }
 0x195   : > { %v1471_v43 = vpop.eup %1470  ;;  %1496 = vrcp.f32 %v689_v40  ;;  %v690_v44 = vadd.f32 1.0, %v1469_v41 }
 0x196   : > { %v1473_v45 = vpop.eup %1472  ;;  %1498 = vrcp.f32 %v658_v42  ;;  %v659_v46 = vadd.f32 1.0, %v1471_v43 }
 0x197   : > { %v1475_v47 = vpop.eup %1474  ;;  %1500 = vrcp.f32 %v690_v44  ;;  %v691_v48 = vadd.f32 1.0, %v1473_v45 }
 0x198   : > { %v1477_v49 = vpop.eup %1476  ;;  %844 = vst [vmem:[%s1772_s14 + $0xc0] sm:$0xff] %v1475_v47  ;;  %1502 = vrcp.f32 %v659_v46 }
 0x199   : > { %v1479_v50 = vpop.eup %1478  ;;  %876 = vst [vmem:[%s1772_s14 + $0x1c0] sm:$0xff] %v1477_v49  ;;  %1504 = vrcp.f32 %v691_v48 }
 0x19a   : > { %v1481_v51 = vpop.eup %1480  ;;  %845 = vst [vmem:[%s1772_s14 + $0xc8] sm:$0xff] %v1479_v50 }
 0x19b   : > { %v1483_v52 = vpop.eup %1482  ;;  %877 = vst [vmem:[%s1772_s14 + $0x1c8] sm:$0xff] %v1481_v51 }
 0x19c   : > { %v1485_v53 = vpop.eup %1484  ;;  %846 = vst [vmem:[%s1772_s14 + $0xd0] sm:$0xff] %v1483_v52 }
 0x19d   : > { %v1487_v54 = vpop.eup %1486  ;;  %878 = vst [vmem:[%s1772_s14 + $0x1d0] sm:$0xff] %v1485_v53 }
 0x19e   : > { %v1489_v55 = vpop.eup %1488  ;;  %847 = vst [vmem:[%s1772_s14 + $0xd8] sm:$0xff] %v1487_v54 }
 0x19f   : > { %v1491_v56 = vpop.eup %1490  ;;  %879 = vst [vmem:[%s1772_s14 + $0x1d8] sm:$0xff] %v1489_v55 }
 0x1a0   : > { %v1493_v57 = vpop.eup %1492  ;;  %848 = vst [vmem:[%s1772_s14 + $0xe0] sm:$0xff] %v1491_v56 }
 0x1a1   : > { %v1495_v58 = vpop.eup %1494  ;;  %880 = vst [vmem:[%s1772_s14 + $0x1e0] sm:$0xff] %v1493_v57 }
 0x1a2   : > { %v1497_v59 = vpop.eup %1496  ;;  %849 = vst [vmem:[%s1772_s14 + $0xe8] sm:$0xff] %v1495_v58 }
 0x1a3   : > { %v1499_v60 = vpop.eup %1498  ;;  %881 = vst [vmem:[%s1772_s14 + $0x1e8] sm:$0xff] %v1497_v59 }
 0x1a4   : > { %v1501_v61 = vpop.eup %1500  ;;  %850 = vst [vmem:[%s1772_s14 + $0xf0] sm:$0xff] %v1499_v60 }
 0x1a5   : > { %v1503_v62 = vpop.eup %1502  ;;  %882 = vst [vmem:[%s1772_s14 + $0x1f0] sm:$0xff] %v1501_v61 }
 0x1a6   : > { %v1505_v63 = vpop.eup %1504  ;;  %851 = vst [vmem:[%s1772_s14 + $0xf8] sm:$0xff] %v1503_v62 }
 0x1a7   : > { %883 = vst [vmem:[%s1772_s14 + $0x1f8] sm:$0xff] %v1505_v63 }
 0x1a8   : > { %1519 = shalt.err (!%p1516_p5)
}
 0x1a9   : > { %s1520_s2 = scalar_lea.hbm %s1840_s25, 8192  ;;  %s1524_s5 = scalar_lea.hbm %s1902_s1, 32768 }
 0x1aa   : > { %p1521_p6 = scmp.ne.s32.totalorder %s1840_s25, %s1520_s2  ;;  %p1525_p10 = scmp.lt.s32.totalorder %s1840_s25, %s1902_s1 }
 0x1ab   : > { %p1526_p11 = scmp.lt.s32.totalorder %s1524_s5, %s1520_s2 }
 0x1ac   : > { %p1522_p7 = pnand %p1521_p6, %p1665_p3 }
 0x1ad   : > { %p1527_p12 = por %p1526_p11, %p1525_p10 }
 0x1ae   : > { %p1523_p9 = pneg %p1522_p7 }
 0x1b0   : > { %p1528_p13 = pnand %p1527_p12, %p1523_p9 }
 0x1b2   : > { %1531 = shalt.err (!%p1528_p13)
}
 0x1b3   : > { %s1601_s18 = smov 256   ;;  %s1602_s21 = smov 512  }
 0x1b4   : > { %s1603_s9 = smov 16  }
 0x1b5   : > { %1176 = dma.vmem_to_hbm [thread:$0]  (%p1665_p3), %s1843_s10, 8192, %s1840_s25, %s1850_s26, %s1601_s18, %s1602_s21, %s1603_s9  }
 0x1b6 PF: > { %p1182_p0 = scmp.ge.s32.totalorder %s1598_s13, 2  ;;  %s916_s22 = sand.u32 1, %s1570_s6  }
 0x1b7   : > { %s917_s23 = scalar_lea.sflag [#allocation3], %s916_s22 }
 0x1b8   : > { %p1179_p1 = pnand %p1182_p0, %p1674_p8 }
 0x1ba   : > { %p1180_p2 = pneg %p1179_p1 }
 0x1bc   : > { %1565 = dma.done.wait (%p1180_p2), %s917_s23, 8192  }
 0x1bd   : > { %1567 = vsyncadd (%p1180_p2), %s917_s23, 4294959104  ;;  %s14_s13 = sadd.s32 1, %s1598_s13   ;;  %s1905_s6 = smov %s1574_s7 }
 0x1be   : > { %p11_p4 = scmp.ge.s32.totalorder %s14_s13, 6   ;;  %s1906_s7 = smov %s1578_s8 }
 0x1bf   : > { %s1907_s8 = smov %s1683_s24  ;;  %s1908_s9 = smov %s1590_s11 }
 0x1c0   : > { %s1909_s10 = smov %s1594_s12  ;;  %s1910_s11 = smov %s1913_s16 }
 0x1c1   : > { %s1911_s12 = smov %s1917_s17  ;;  %13 = sbr.rel (!%p11_p4) target bundleno = 5 (0x5), region = 58 }
 0x1c6   :  { %922 = vsyncpa [#allocation3], 1 }
 0x1c7   :  { %924 = vsyncpa [#allocation3 + $0x1], 1 }

// kernel: gnn_forward.4
= control target key start
LH: loop header
LB: loop body
LE: loop exit
PB: predicated region body
PF: predicated region fallthrough
CT: control target
= control target key end

     0   :  { %s4207_s0 = inlined_call_operand.vmem [shape: f32[512,128], index: 0, kind: input, shape index: {}]   ;;  %s4208_s1 = inlined_call_operand.vmem [shape: f32[128,128], index: 1, kind: input, shape index: {}]   ;;  %s4209_s2 = inlined_call_operand.vmem [shape: f32[1,128], index: 2, kind: input, shape index: {}]   ;;  %s4210_s3 = inlined_call_operand.vmem [shape: f32[128,128], index: 3, kind: input, shape index: {}]   ;;  %s4211_s4 = inlined_call_operand.vmem [shape: f32[1,128], index: 4, kind: input, shape index: {}]   ;;  %s4212_s5 = inlined_call_operand.vmem [shape: f32[512,128], index: 5, kind: output, shape index: {0}]   ;;  %s4213_s6 = inlined_call_operand.hbm [shape: f32[512,128], index: 6, kind: output, shape index: {1}]  }
   0x1   :  { %v614_v0 = vld [vmem:[%s4208_s1 + $0x78] sm:$0xff]  ;;  %v613_v1 = vld [vmem:[%s4208_s1 + $0x70] sm:$0xff]  ;;  %v612_v2 = vld [vmem:[%s4208_s1 + $0x68] sm:$0xff] }
   0x2   :  { %2173 = vmatprep.subr.mxu0 %v614_v0  ;;  %v611_v3 = vld [vmem:[%s4208_s1 + $0x60] sm:$0xff]  ;;  %v610_v5 = vld [vmem:[%s4208_s1 + $0x58] sm:$0xff]  ;;  %v609_v7 = vld [vmem:[%s4208_s1 + $0x50] sm:$0xff] }
   0x3   :  { %2174 = vmatpush3.msra.mxu0 %v614_v0  ;;  %v3084_v4 = vld [vmem:[%s4207_s0] sm:$0xff]  ;;  %v608_v8 = vld [vmem:[%s4208_s1 + $0x48] sm:$0xff]  ;;  %v606_v10 = vld [vmem:[%s4208_s1 + $0x38] sm:$0xff] }
   0x4   :  { %2175 = vmatprep.subr.mxu0 %v613_v1  ;;  %v535_v6 = vmax.f32 %v3084_v4, 0.0  ;;  %v607_v9 = vld [vmem:[%s4208_s1 + $0x40] sm:$0xff]  ;;  %v605_v11 = vld [vmem:[%s4208_s1 + $0x30] sm:$0xff]  ;;  %v604_v12 = vld [vmem:[%s4208_s1 + $0x28] sm:$0xff] }
   0x5   :  { %2176 = vmatpush3.msra.mxu0 %v613_v1  ;;  %v603_v13 = vld [vmem:[%s4208_s1 + $0x20] sm:$0xff]  ;;  %v602_v14 = vld [vmem:[%s4208_s1 + $0x18] sm:$0xff]  ;;  %v601_v15 = vld [vmem:[%s4208_s1 + $0x10] sm:$0xff] }
   0x6   :  { %2177 = vmatprep.subr.mxu0 %v612_v2  ;;  %2205 = vmatprep.mubr.f32.mxu0 %v535_v6  ;;  %v600_v16 = vld [vmem:[%s4208_s1 + $0x8] sm:$0xff]  ;;  %v3128_v18 = vld [vmem:[%s4207_s0 + $0x10] sm:$0xff] }
   0x7   :  { %2178 = vmatpush3.msra.mxu0 %v612_v2  ;;  %v3123_v17 = vld [vmem:[%s4207_s0 + $0x8] sm:$0xff] }
   0x8   :  { %2179 = vmatprep.subr.mxu0 %v611_v3 }
   0x9   :  { %2180 = vmatpush3.msra.mxu0 %v611_v3 }
   0xa   :  { %2181 = vmatprep.subr.mxu0 %v610_v5 }
   0xb   :  { %2182 = vmatpush3.msra.mxu0 %v610_v5 }
   0xc   :  { %2183 = vmatprep.subr.mxu0 %v609_v7 }
   0xd   :  { %2184 = vmatpush3.msra.mxu0 %v609_v7 }
   0xe   :  { %2185 = vmatprep.subr.mxu0 %v608_v8 }
   0xf   :  { %2186 = vmatpush3.msra.mxu0 %v608_v8 }
  0x10   :  { %2187 = vmatprep.subr.mxu0 %v607_v9 }
  0x11   :  { %2188 = vmatpush3.msra.mxu0 %v607_v9 }
  0x12   :  { %2189 = vmatprep.subr.mxu0 %v606_v10 }
  0x13   :  { %2190 = vmatpush3.msra.mxu0 %v606_v10 }
  0x14   :  { %2191 = vmatprep.subr.mxu0 %v605_v11 }
  0x15   :  { %2192 = vmatpush3.msra.mxu0 %v605_v11 }
  0x16   :  { %2193 = vmatprep.subr.mxu0 %v604_v12 }
  0x17   :  { %2194 = vmatpush3.msra.mxu0 %v604_v12 }
  0x18   :  { %2195 = vmatprep.subr.mxu0 %v603_v13 }
  0x19   :  { %2196 = vmatpush3.msra.mxu0 %v603_v13 }
  0x1a   :  { %2197 = vmatprep.subr.mxu0 %v602_v14 }
  0x1b   :  { %2198 = vmatpush3.msra.mxu0 %v602_v14 }
  0x1c   :  { %2199 = vmatprep.subr.mxu0 %v601_v15 }
  0x1d   :  { %12 = vsyncpa [#allocation3], 0  ;;  %2200 = vmatpush3.msra.mxu0 %v601_v15  ;;  %v599_v19 = vld [vmem:[%s4208_s1] sm:$0xff]  ;;  %v536_v20 = vmax.f32 %v3123_v17, 0.0  ;;  %v1086_v21 = vld [vmem:[%s4210_s3 + $0x78] sm:$0xff]  ;;  %v537_v23 = vmax.f32 %v3128_v18, 0.0 }
  0x1e   :  { %2201 = vmatprep.subr.mxu0 %v600_v16  ;;  %v1085_v22 = vld [vmem:[%s4210_s3 + $0x70] sm:$0xff]  ;;  %v3144_v24 = vld [vmem:[%s4207_s0 + $0x18] sm:$0xff]  ;;  %2301 = vmatprep.subr.mxu1 %v1086_v21  ;;  %v3149_v25 = vld [vmem:[%s4207_s0 + $0x20] sm:$0xff]  ;;  %s3031_s29 = smov [#allocation2]  }
  0x1f   :  { %2202 = vmatpush3.msra.mxu0 %v600_v16  ;;  %2302 = vmatpush3.msra.mxu1 %v1086_v21  ;;  %v1084_v26 = vld [vmem:[%s4210_s3 + $0x68] sm:$0xff]  ;;  %v538_v27 = vmax.f32 %v3144_v24, 0.0  ;;  %v1083_v28 = vld [vmem:[%s4210_s3 + $0x60] sm:$0xff]  ;;  %v539_v29 = vmax.f32 %v3149_v25, 0.0  ;;  %v3167_v31 = vld [vmem:[%s4207_s0 + $0x30] sm:$0xff]  ;;  %s1934_s30 = sshll.u32 %s3031_s29, 4  ;;  %s1935_s30 = int_to_ptr.vmem [resolvable:$true] %s1934_s30 }
  0x20   :  { %2203 = vmatprep.subr.mxu0 %v599_v19  ;;  %2303 = vmatprep.subr.mxu1 %v1085_v22  ;;  %v3162_v30 = vld [vmem:[%s4207_s0 + $0x28] sm:$0xff]  ;;  %v1082_v32 = vld [vmem:[%s4210_s3 + $0x58] sm:$0xff]  ;;  %v1081_v34 = vld [vmem:[%s4210_s3 + $0x50] sm:$0xff]  ;;  %v541_v35 = vmax.f32 %v3167_v31, 0.0  ;;  %p3014_p1 = scmp.lt.s32.totalorder %s1935_s30, %s1935_s30 }
  0x21   :  { %2204 = vmatpush3.msra.mxu0 %v599_v19  ;;  %2304 = vmatpush3.msra.mxu1 %v1085_v22  ;;  %v540_v33 = vmax.f32 %v3162_v30, 0.0  ;;  %v3180_v36 = vld [vmem:[%s4207_s0 + $0x38] sm:$0xff]  ;;  %v3185_v37 = vld [vmem:[%s4207_s0 + $0x40] sm:$0xff]  ;;  %v3192_v40 = vld [vmem:[%s4207_s0 + $0x48] sm:$0xff] }
  0x22   :  { %2206 = vmatmul.mubr.f32.vlgmr.msra.gmra.mxu0 %v536_v20  ;;  %2305 = vmatprep.subr.mxu1 %v1084_v26  ;;  %v542_v38 = vmax.f32 %v3180_v36, 0.0  ;;  %v543_v39 = vmax.f32 %v3185_v37, 0.0  ;;  %v3197_v41 = vld [vmem:[%s4207_s0 + $0x50] sm:$0xff]  ;;  %v544_v42 = vmax.f32 %v3192_v40, 0.0  ;;  %v3204_v44 = vld [vmem:[%s4207_s0 + $0x58] sm:$0xff]  ;;  %v3209_v45 = vld [vmem:[%s4207_s0 + $0x60] sm:$0xff] }
  0x23   :  { %2208 = vmatprep.mubr.f32.mxu0 %v537_v23  ;;  %2306 = vmatpush3.msra.mxu1 %v1084_v26  ;;  %v545_v43 = vmax.f32 %v3197_v41, 0.0  ;;  %v546_v46 = vmax.f32 %v3204_v44, 0.0  ;;  %v547_v47 = vmax.f32 %v3209_v45, 0.0  ;;  %v3216_v48 = vld [vmem:[%s4207_s0 + $0x68] sm:$0xff]  ;;  %v3221_v49 = vld [vmem:[%s4207_s0 + $0x70] sm:$0xff]  ;;  %v3228_v52 = vld [vmem:[%s4207_s0 + $0x78] sm:$0xff] }
  0x24   :  { %2307 = vmatprep.subr.mxu1 %v1083_v28  ;;  %v548_v50 = vmax.f32 %v3216_v48, 0.0  ;;  %v549_v51 = vmax.f32 %v3221_v49, 0.0  ;;  %v3233_v53 = vld [vmem:[%s4207_s0 + $0x80] sm:$0xff]  ;;  %v550_v54 = vmax.f32 %v3228_v52, 0.0  ;;  %v3240_v56 = vld [vmem:[%s4207_s0 + $0x88] sm:$0xff]  ;;  %v3245_v57 = vld [vmem:[%s4207_s0 + $0x90] sm:$0xff] }
  0x25   :  { %2308 = vmatpush3.msra.mxu1 %v1083_v28  ;;  %v551_v55 = vmax.f32 %v3233_v53, 0.0  ;;  %v552_v58 = vmax.f32 %v3240_v56, 0.0  ;;  %v553_v59 = vmax.f32 %v3245_v57, 0.0  ;;  %v3252_v60 = vld [vmem:[%s4207_s0 + $0x98] sm:$0xff]  ;;  %v3257_v61 = vld [vmem:[%s4207_s0 + $0xa0] sm:$0xff]  ;;  %v3264_v0 = vld [vmem:[%s4207_s0 + $0xa8] sm:$0xff] }
  0x26   :  { %2209 = vmatmul.mubr.f32.gmra.mxu0 %v538_v27  ;;  %2309 = vmatprep.subr.mxu1 %v1082_v32  ;;  %v554_v62 = vmax.f32 %v3252_v60, 0.0  ;;  %v555_v63 = vmax.f32 %v3257_v61, 0.0  ;;  %v3269_v1 = vld [vmem:[%s4207_s0 + $0xb0] sm:$0xff]  ;;  %v556_v2 = vmax.f32 %v3264_v0, 0.0  ;;  %v3276_v5 = vld [vmem:[%s4207_s0 + $0xb8] sm:$0xff]  ;;  %v3281_v6 = vld [vmem:[%s4207_s0 + $0xc0] sm:$0xff] }
  0x27   :  { %2211 = vmatprep.mubr.f32.mxu0 %v539_v29  ;;  %2310 = vmatpush3.msra.mxu1 %v1082_v32  ;;  %v557_v3 = vmax.f32 %v3269_v1, 0.0  ;;  %v558_v7 = vmax.f32 %v3276_v5, 0.0  ;;  %v559_v8 = vmax.f32 %v3281_v6, 0.0  ;;  %v3288_v9 = vld [vmem:[%s4207_s0 + $0xc8] sm:$0xff]  ;;  %v3293_v10 = vld [vmem:[%s4207_s0 + $0xd0] sm:$0xff]  ;;  %v3300_v13 = vld [vmem:[%s4207_s0 + $0xd8] sm:$0xff] }
  0x28   :  { %2311 = vmatprep.subr.mxu1 %v1081_v34  ;;  %v560_v11 = vmax.f32 %v3288_v9, 0.0  ;;  %v561_v12 = vmax.f32 %v3293_v10, 0.0  ;;  %v3305_v14 = vld [vmem:[%s4207_s0 + $0xe0] sm:$0xff]  ;;  %v562_v15 = vmax.f32 %v3300_v13, 0.0  ;;  %v3312_v19 = vld [vmem:[%s4207_s0 + $0xe8] sm:$0xff]  ;;  %v3317_v20 = vld [vmem:[%s4207_s0 + $0xf0] sm:$0xff] }
  0x29   :  { %2312 = vmatpush3.msra.mxu1 %v1081_v34  ;;  %v563_v16 = vmax.f32 %v3305_v14, 0.0  ;;  %v564_v21 = vmax.f32 %v3312_v19, 0.0  ;;  %v565_v22 = vmax.f32 %v3317_v20, 0.0  ;;  %v3324_v23 = vld [vmem:[%s4207_s0 + $0xf8] sm:$0xff]  ;;  %v3329_v26 = vld [vmem:[%s4207_s0 + $0x100] sm:$0xff]  ;;  %v3336_v29 = vld [vmem:[%s4207_s0 + $0x108] sm:$0xff] }
  0x2a   :  { %2212 = vmatmul.mubr.f32.gmra.mxu0 %v540_v33  ;;  %v566_v27 = vmax.f32 %v3324_v23, 0.0  ;;  %v567_v28 = vmax.f32 %v3329_v26, 0.0  ;;  %v3341_v32 = vld [vmem:[%s4207_s0 + $0x110] sm:$0xff]  ;;  %v568_v33 = vmax.f32 %v3336_v29, 0.0 }
  0x2b   :  { %2214 = vmatprep.mubr.f32.mxu0 %v541_v35  ;;  %v569_v34 = vmax.f32 %v3341_v32, 0.0  ;;  %v3348_v35 = vld [vmem:[%s4207_s0 + $0x118] sm:$0xff] }
  0x2e   :  { %2215 = vmatmul.mubr.f32.gmra.mxu0 %v542_v38  ;;  %v3353_v38 = vld [vmem:[%s4207_s0 + $0x120] sm:$0xff] }
  0x2f   :  { %2217 = vmatprep.mubr.f32.mxu0 %v543_v39  ;;  %v1080_v39 = vld [vmem:[%s4210_s3 + $0x48] sm:$0xff] }
  0x30   :  { %2313 = vmatprep.subr.mxu1 %v1080_v39 }
  0x31   :  { %2314 = vmatpush3.msra.mxu1 %v1080_v39  ;;  %v3435_v39 = vld [vmem:[%s4207_s0 + $0x168] sm:$0xff] }
  0x32   :  { %2218 = vmatmul.mubr.f32.gmra.mxu0 %v544_v42  ;;  %v570_v42 = vmax.f32 %v3348_v35, 0.0 }
  0x33   :  { %2220 = vmatprep.mubr.f32.mxu0 %v545_v43  ;;  %v571_v43 = vmax.f32 %v3353_v38, 0.0 }
  0x36   :  { %2221 = vmatmul.mubr.f32.gmra.mxu0 %v546_v46  ;;  %v3363_v46 = vld [vmem:[%s4207_s0 + $0x128] sm:$0xff] }
  0x37   :  { %2223 = vmatprep.mubr.f32.mxu0 %v547_v47  ;;  %v1079_v47 = vld [vmem:[%s4210_s3 + $0x40] sm:$0xff] }
  0x38   :  { %2315 = vmatprep.subr.mxu1 %v1079_v47 }
  0x39   :  { %2316 = vmatpush3.msra.mxu1 %v1079_v47  ;;  %v580_v47 = vmax.f32 %v3435_v39, 0.0 }
  0x3a   :  { %2224 = vmatmul.mubr.f32.gmra.mxu0 %v548_v50  ;;  %v3371_v50 = vld [vmem:[%s4207_s0 + $0x130] sm:$0xff] }
  0x3b   :  { %2226 = vmatprep.mubr.f32.mxu0 %v549_v51  ;;  %v1078_v51 = vld [vmem:[%s4210_s3 + $0x38] sm:$0xff] }
  0x3c   :  { %2317 = vmatprep.subr.mxu1 %v1078_v51 }
  0x3d   :  { %2318 = vmatpush3.msra.mxu1 %v1078_v51 }
  0x3e   :  { %2227 = vmatmul.mubr.f32.gmra.mxu0 %v550_v54  ;;  %v572_v54 = vmax.f32 %v3363_v46, 0.0 }
  0x3f   :  { %2229 = vmatprep.mubr.f32.mxu0 %v551_v55  ;;  %v573_v55 = vmax.f32 %v3371_v50, 0.0 }
  0x42   :  { %2230 = vmatmul.mubr.f32.gmra.mxu0 %v552_v58  ;;  %v3381_v58 = vld [vmem:[%s4207_s0 + $0x138] sm:$0xff] }
  0x43   :  { %2232 = vmatprep.mubr.f32.mxu0 %v553_v59  ;;  %v1077_v59 = vld [vmem:[%s4210_s3 + $0x30] sm:$0xff] }
  0x44   :  { %2319 = vmatprep.subr.mxu1 %v1077_v59 }
  0x45   :  { %2320 = vmatpush3.msra.mxu1 %v1077_v59 }
  0x46   :  { %2233 = vmatmul.mubr.f32.gmra.mxu0 %v554_v62  ;;  %v3389_v62 = vld [vmem:[%s4207_s0 + $0x140] sm:$0xff] }
  0x47   :  { %2235 = vmatprep.mubr.f32.mxu0 %v555_v63  ;;  %v1076_v63 = vld [vmem:[%s4210_s3 + $0x28] sm:$0xff] }
  0x48   :  { %2321 = vmatprep.subr.mxu1 %v1076_v63 }
  0x49   :  { %2322 = vmatpush3.msra.mxu1 %v1076_v63 }
  0x4a   :  { %2236 = vmatmul.mubr.f32.gmra.mxu0 %v556_v2  ;;  %v574_v2 = vmax.f32 %v3381_v58, 0.0 }
  0x4b   :  { %2238 = vmatprep.mubr.f32.mxu0 %v557_v3  ;;  %v575_v3 = vmax.f32 %v3389_v62, 0.0 }
  0x4e   :  { %2239 = vmatmul.mubr.f32.gmra.mxu0 %v558_v7  ;;  %v3399_v7 = vld [vmem:[%s4207_s0 + $0x148] sm:$0xff] }
  0x4f   :  { %2241 = vmatprep.mubr.f32.mxu0 %v559_v8  ;;  %v1075_v8 = vld [vmem:[%s4210_s3 + $0x20] sm:$0xff] }
  0x50   :  { %2323 = vmatprep.subr.mxu1 %v1075_v8 }
  0x51   :  { %2324 = vmatpush3.msra.mxu1 %v1075_v8 }
  0x52   :  { %2242 = vmatmul.mubr.f32.gmra.mxu0 %v560_v11  ;;  %v3407_v11 = vld [vmem:[%s4207_s0 + $0x150] sm:$0xff] }
  0x53   :  { %2244 = vmatprep.mubr.f32.mxu0 %v561_v12  ;;  %v1074_v12 = vld [vmem:[%s4210_s3 + $0x18] sm:$0xff] }
  0x54   :  { %2325 = vmatprep.subr.mxu1 %v1074_v12 }
  0x55   :  { %2326 = vmatpush3.msra.mxu1 %v1074_v12 }
  0x56   :  { %2245 = vmatmul.mubr.f32.gmra.mxu0 %v562_v15  ;;  %v576_v15 = vmax.f32 %v3399_v7, 0.0 }
  0x57   :  { %2247 = vmatprep.mubr.f32.mxu0 %v563_v16  ;;  %v577_v16 = vmax.f32 %v3407_v11, 0.0 }
  0x5a   :  { %2248 = vmatmul.mubr.f32.gmra.mxu0 %v564_v21  ;;  %v3417_v21 = vld [vmem:[%s4207_s0 + $0x158] sm:$0xff] }
  0x5b   :  { %2250 = vmatprep.mubr.f32.mxu0 %v565_v22  ;;  %v1073_v22 = vld [vmem:[%s4210_s3 + $0x10] sm:$0xff] }
  0x5c   :  { %2327 = vmatprep.subr.mxu1 %v1073_v22 }
  0x5d   :  { %2328 = vmatpush3.msra.mxu1 %v1073_v22 }
  0x5e   :  { %2251 = vmatmul.mubr.f32.gmra.mxu0 %v566_v27  ;;  %v3425_v27 = vld [vmem:[%s4207_s0 + $0x160] sm:$0xff] }
  0x5f   :  { %2253 = vmatprep.mubr.f32.mxu0 %v567_v28  ;;  %v1072_v28 = vld [vmem:[%s4210_s3 + $0x8] sm:$0xff] }
  0x60   :  { %2329 = vmatprep.subr.mxu1 %v1072_v28 }
  0x61   :  { %2330 = vmatpush3.msra.mxu1 %v1072_v28 }
  0x62   :  { %2254 = vmatmul.mubr.f32.gmra.mxu0 %v568_v33  ;;  %v578_v33 = vmax.f32 %v3417_v21, 0.0 }
  0x63   :  { %2256 = vmatprep.mubr.f32.mxu0 %v569_v34  ;;  %v579_v34 = vmax.f32 %v3425_v27, 0.0 }
  0x66   :  { %2257 = vmatmul.mubr.f32.gmra.mxu0 %v570_v42  ;;  %v1071_v42 = vld [vmem:[%s4210_s3] sm:$0xff] }
  0x67   :  { %2259 = vmatprep.mubr.f32.mxu0 %v571_v43  ;;  %v3443_v43 = vld [vmem:[%s4207_s0 + $0x170] sm:$0xff]  ;;  %2331 = vmatprep.subr.mxu1 %v1071_v42 }
  0x68   :  { %2332 = vmatpush3.msra.mxu1 %v1071_v42  ;;  %v581_v51 = vmax.f32 %v3443_v43, 0.0 }
  0x6a   :  { %2260 = vmatmul.mubr.f32.gmra.mxu0 %v572_v54  ;;  %v3450_v54 = vld [vmem:[%s4207_s0 + $0x178] sm:$0xff] }
  0x6b   :  { %2262 = vmatprep.mubr.f32.mxu0 %v573_v55  ;;  %v3455_v55 = vld [vmem:[%s4207_s0 + $0x180] sm:$0xff]  ;;  %v582_v59 = vmax.f32 %v3450_v54, 0.0 }
  0x6c   :  { %v583_v63 = vmax.f32 %v3455_v55, 0.0 }
  0x6e   :  { %2263 = vmatmul.mubr.f32.gmra.mxu0 %v574_v2  ;;  %v3462_v2 = vld [vmem:[%s4207_s0 + $0x188] sm:$0xff] }
  0x6f   :  { %2265 = vmatprep.mubr.f32.mxu0 %v575_v3  ;;  %v3467_v3 = vld [vmem:[%s4207_s0 + $0x190] sm:$0xff]  ;;  %v584_v8 = vmax.f32 %v3462_v2, 0.0 }
  0x70   :  { %v585_v12 = vmax.f32 %v3467_v3, 0.0 }
  0x72   :  { %2266 = vmatmul.mubr.f32.gmra.mxu0 %v576_v15  ;;  %v3474_v15 = vld [vmem:[%s4207_s0 + $0x198] sm:$0xff] }
  0x73   :  { %2268 = vmatprep.mubr.f32.mxu0 %v577_v16  ;;  %v3479_v16 = vld [vmem:[%s4207_s0 + $0x1a0] sm:$0xff]  ;;  %v586_v22 = vmax.f32 %v3474_v15, 0.0 }
  0x74   :  { %v587_v28 = vmax.f32 %v3479_v16, 0.0 }
  0x76   :  { %2269 = vmatmul.mubr.f32.gmra.mxu0 %v578_v33  ;;  %v3486_v33 = vld [vmem:[%s4207_s0 + $0x1a8] sm:$0xff] }
  0x77   :  { %2271 = vmatprep.mubr.f32.mxu0 %v579_v34  ;;  %v3491_v34 = vld [vmem:[%s4207_s0 + $0x1b0] sm:$0xff]  ;;  %v588_v42 = vmax.f32 %v3486_v33, 0.0 }
  0x78   :  { %4221 = vst [vmem:[#allocation5_spill] sm:$0xff] %v3491_v34 }
  0x7a   :  { %2272 = vmatmul.mubr.f32.gmra.mxu0 %v580_v47  ;;  %v589_v47 = vmax.f32 %v3491_v34, 0.0 }
  0x7b   :  { %2274 = vmatprep.mubr.f32.mxu0 %v581_v51  ;;  %v3498_v51 = vld [vmem:[%s4207_s0 + $0x1b8] sm:$0xff] }
  0x7e   :  { %2275 = vmatmul.mubr.f32.gmra.mxu0 %v582_v59  ;;  %v3503_v59 = vld [vmem:[%s4207_s0 + $0x1c0] sm:$0xff] }
  0x7f   :  { %2277 = vmatprep.mubr.f32.mxu0 %v583_v63  ;;  %4222 = vst [vmem:[#allocation6_spill] sm:$0xff] %v3503_v59  ;;  %v590_v63 = vmax.f32 %v3498_v51, 0.0 }
  0x82   :  { %2278 = vmatmul.mubr.f32.gmra.mxu0 %v584_v8  ;;  %v591_v8 = vmax.f32 %v3503_v59, 0.0  ;;  %v3527_v59 = vld [vmem:[%s4207_s0 + $0x1e0] sm:$0xff] }
  0x83   :  { %2280 = vmatprep.mubr.f32.mxu0 %v585_v12  ;;  %v3510_v12 = vld [vmem:[%s4207_s0 + $0x1c8] sm:$0xff]  ;;  %4226 = vst [vmem:[#allocation10_spill] sm:$0xff] %v3527_v59 }
  0x84   :  { %4223 = vst [vmem:[#allocation7_spill] sm:$0xff] %v3510_v12 }
  0x86   :  { %2281 = vmatmul.mubr.f32.gmra.mxu0 %v586_v22  ;;  %v3515_v22 = vld [vmem:[%s4207_s0 + $0x1d0] sm:$0xff] }
  0x87   :  { %2283 = vmatprep.mubr.f32.mxu0 %v587_v28  ;;  %4224 = vst [vmem:[#allocation8_spill] sm:$0xff] %v3515_v22  ;;  %v592_v28 = vmax.f32 %v3510_v12, 0.0 }
  0x8a   :  { %2284 = vmatmul.mubr.f32.gmra.mxu0 %v588_v42  ;;  %v593_v42 = vmax.f32 %v3515_v22, 0.0  ;;  %v3539_v22 = vld [vmem:[%s4207_s0 + $0x1f0] sm:$0xff] }
  0x8b   :  { %2286 = vmatprep.mubr.f32.mxu0 %v589_v47  ;;  %v3522_v47 = vld [vmem:[%s4207_s0 + $0x1d8] sm:$0xff]  ;;  %4227 = vst [vmem:[#allocation11_spill] sm:$0xff] %v3539_v22 }
  0x8c   :  { %4225 = vst [vmem:[#allocation9_spill] sm:$0xff] %v3522_v47  ;;  %v594_v34 = vmax.f32 %v3522_v47, 0.0  ;;  %v89_v47 = vmul.f32 %v3128_v18, %v3128_v18  ;;  %v93_v18 = vmul.f32 %v3167_v31, %v3167_v31  ;;  %v100_v31 = vmul.f32 %v3216_v48, %v3216_v48 }
  0x8e   :  { %2287 = vmatmul.mubr.f32.gmra.mxu0 %v590_v63  ;;  %v595_v63 = vmax.f32 %v3527_v59, 0.0  ;;  %155 = vadd.xlane.f32.xlu1 %v89_v47 }
  0x8f   :  { %2289 = vmatprep.mubr.f32.mxu0 %v591_v8  ;;  %v3534_v8 = vld [vmem:[%s4207_s0 + $0x1e8] sm:$0xff] }
  0x90   :  { %v596_v12 = vmax.f32 %v3534_v8, 0.0 }
  0x92   :  { %2290 = vmatmul.mubr.f32.gmra.mxu0 %v592_v28  ;;  %v597_v28 = vmax.f32 %v3539_v22, 0.0  ;;  %v88_v22 = vmul.f32 %v3123_v17, %v3123_v17  ;;  %v96_v17 = vmul.f32 %v3192_v40, %v3192_v40  ;;  %v101_v40 = vmul.f32 %v3221_v49, %v3221_v49 }
  0x93   :  { %2292 = vmatprep.mubr.f32.mxu0 %v593_v42  ;;  %v3546_v42 = vld [vmem:[%s4207_s0 + $0x1f8] sm:$0xff]  ;;  %v105_v49 = vmul.f32 %v3245_v57, %v3245_v57 }
  0x94   :  { %v598_v59 = vmax.f32 %v3546_v42, 0.0 }
  0x96   :  { %2293 = vmatmul.mubr.f32.gmra.mxu0 %v594_v34  ;;  %v87_v34 = vmul.f32 %v3084_v4, %v3084_v4  ;;  %v94_v4 = vmul.f32 %v3180_v36, %v3180_v36  ;;  %v99_v36 = vmul.f32 %v3209_v45, %v3209_v45  ;;  %v3588_v45 = vld [vmem:[%s4209_s2] ss:$0 sm:$0xff] }
  0x97   :  { %2295 = vmatprep.mubr.f32.mxu0 %v595_v63  ;;  %v90_v63 = vmul.f32 %v3144_v24, %v3144_v24  ;;  %v95_v24 = vmul.f32 %v3185_v37, %v3185_v37  ;;  %v102_v37 = vmul.f32 %v3228_v52, %v3228_v52  ;;  %v106_v52 = vmul.f32 %v3252_v60, %v3252_v60 }
  0x98   :  { %151 = vadd.xlane.f32.xlu0 %v87_v34  ;;  %v107_v34 = vmul.f32 %v3257_v61, %v3257_v61 }
  0x99   :  { %157 = vadd.xlane.f32.xlu1 %v90_v63 }
  0x9a   :  { %2296 = vmatmul.mubr.f32.gmra.mxu0 %v596_v12  ;;  %v92_v12 = vmul.f32 %v3162_v30, %v3162_v30  ;;  %v97_v30 = vmul.f32 %v3197_v41, %v3197_v41  ;;  %v104_v41 = vmul.f32 %v3240_v56, %v3240_v56 }
  0x9b   :  { %2298 = vmatprep.mubr.f32.mxu0 %v597_v28  ;;  %v108_v28 = vmul.f32 %v3264_v0, %v3264_v0 }
  0x9c   :  { %153 = vadd.xlane.f32.xlu0 %v88_v22 }
  0x9d   :  { %161 = vadd.xlane.f32.xlu1 %v92_v12 }
  0x9e   :  { %2299 = vmatmul.mubr.f32.gmra.mxu0 %v598_v59  ;;  %v91_v59 = vmul.f32 %v3149_v25, %v3149_v25  ;;  %v98_v25 = vmul.f32 %v3204_v44, %v3204_v44  ;;  %v103_v44 = vmul.f32 %v3233_v53, %v3233_v53 }
  0xa0   :  { %159 = vadd.xlane.f32.xlu0 %v91_v59  ;;  %v110_v59 = vmul.f32 %v3276_v5, %v3276_v5 }
  0xa1   :  { %165 = vadd.xlane.f32.xlu1 %v94_v4  ;;  %v109_v4 = vmul.f32 %v3269_v1, %v3269_v1 }
  0xa4   :  { %163 = vadd.xlane.f32.xlu0 %v93_v18 }
  0xa5   :  { %169 = vadd.xlane.f32.xlu1 %v96_v17 }
  0xa8   :  { %167 = vadd.xlane.f32.xlu0 %v95_v24  ;;  %v112_v24 = vmul.f32 %v3288_v9, %v3288_v9 }
  0xa9   :  { %173 = vadd.xlane.f32.xlu1 %v98_v25  ;;  %v111_v25 = vmul.f32 %v3281_v6, %v3281_v6 }
  0xac   :  { %171 = vadd.xlane.f32.xlu0 %v97_v30 }
  0xad   :  { %177 = vadd.xlane.f32.xlu1 %v100_v31 }
  0xb0   :  { %175 = vadd.xlane.f32.xlu0 %v99_v36  ;;  %v114_v36 = vmul.f32 %v3300_v13, %v3300_v13 }
  0xb1   :  { %181 = vadd.xlane.f32.xlu1 %v102_v37  ;;  %v113_v37 = vmul.f32 %v3293_v10, %v3293_v10 }
  0xb4   :  { %179 = vadd.xlane.f32.xlu0 %v101_v40 }
  0xb5   :  { %185 = vadd.xlane.f32.xlu1 %v104_v41  ;;  %v116_v41 = vmul.f32 %v3312_v19, %v3312_v19  ;;  %v118_v19 = vmul.f32 %v3324_v23, %v3324_v23  ;;  %v120_v23 = vmul.f32 %v3336_v29, %v3336_v29  ;;  %v122_v29 = vmul.f32 %v3348_v35, %v3348_v35 }
  0xb6   :  { %v124_v35 = vmul.f32 %v3363_v46, %v3363_v46  ;;  %v126_v46 = vmul.f32 %v3381_v58, %v3381_v58  ;;  %v128_v58 = vmul.f32 %v3399_v7, %v3399_v7  ;;  %v130_v7 = vmul.f32 %v3417_v21, %v3417_v21 }
  0xb7   :  { %v132_v21 = vmul.f32 %v3435_v39, %v3435_v39  ;;  %v134_v39 = vmul.f32 %v3450_v54, %v3450_v54  ;;  %v136_v54 = vmul.f32 %v3462_v2, %v3462_v2  ;;  %v138_v2 = vmul.f32 %v3474_v15, %v3474_v15 }
  0xb8   :  { %183 = vadd.xlane.f32.xlu0 %v103_v44  ;;  %v115_v44 = vmul.f32 %v3305_v14, %v3305_v14  ;;  %v117_v14 = vmul.f32 %v3317_v20, %v3317_v20  ;;  %v119_v20 = vmul.f32 %v3329_v26, %v3329_v26  ;;  %v121_v26 = vmul.f32 %v3341_v32, %v3341_v32 }
  0xb9   :  { %189 = vadd.xlane.f32.xlu1 %v106_v52  ;;  %v123_v32 = vmul.f32 %v3353_v38, %v3353_v38  ;;  %v125_v38 = vmul.f32 %v3371_v50, %v3371_v50  ;;  %v127_v50 = vmul.f32 %v3389_v62, %v3389_v62  ;;  %v129_v62 = vmul.f32 %v3407_v11, %v3407_v11 }
  0xba   :  { %v131_v11 = vmul.f32 %v3425_v27, %v3425_v27  ;;  %v133_v27 = vmul.f32 %v3443_v43, %v3443_v43  ;;  %v135_v43 = vmul.f32 %v3455_v55, %v3455_v55  ;;  %v137_v55 = vmul.f32 %v3467_v3, %v3467_v3 }
  0xbb   :  { %v140_v15 = vmul.f32 %v3486_v33, %v3486_v33  ;;  %v139_v3 = vmul.f32 %v3479_v16, %v3479_v16  ;;  %v142_v33 = vmul.f32 %v3498_v51, %v3498_v51 }
  0xbc   :  { %187 = vadd.xlane.f32.xlu0 %v105_v49 }
  0xbd   :  { %193 = vadd.xlane.f32.xlu1 %v108_v28 }
  0xc0   :  { %191 = vadd.xlane.f32.xlu0 %v107_v34 }
  0xc1   :  { %197 = vadd.xlane.f32.xlu1 %v110_v59 }
  0xc4   :  { %195 = vadd.xlane.f32.xlu0 %v109_v4 }
  0xc5   :  { %201 = vadd.xlane.f32.xlu1 %v112_v24 }
  0xc8   :  { %199 = vadd.xlane.f32.xlu0 %v111_v25 }
  0xc9   :  { %205 = vadd.xlane.f32.xlu1 %v114_v36 }
  0xcc   :  { %203 = vadd.xlane.f32.xlu0 %v113_v37 }
  0xcd   :  { %209 = vadd.xlane.f32.xlu1 %v116_v41 }
  0xd0   :  { %207 = vadd.xlane.f32.xlu0 %v115_v44 }
  0xd1   :  { %213 = vadd.xlane.f32.xlu1 %v118_v19 }
  0xd4   :  { %211 = vadd.xlane.f32.xlu0 %v117_v14 }
  0xd5   :  { %217 = vadd.xlane.f32.xlu1 %v120_v23 }
  0xd8   :  { %215 = vadd.xlane.f32.xlu0 %v119_v20 }
  0xd9   :  { %221 = vadd.xlane.f32.xlu1 %v122_v29 }
  0xdc   :  { %219 = vadd.xlane.f32.xlu0 %v121_v26 }
  0xdd   :  { %225 = vadd.xlane.f32.xlu1 %v124_v35 }
  0xe0   :  { %223 = vadd.xlane.f32.xlu0 %v123_v32 }
  0xe1   :  { %229 = vadd.xlane.f32.xlu1 %v126_v46 }
  0xe2   :  { %v2207_v48 = vpop.f32.mrf.mxu0 }
  0xe3   :  { %v694_v22 = vadd.f32 %v2207_v48, %v3588_v45 }
  0xe4   :  { %v688_v56 = vpop.f32.mrf.mxu0  ;;  %227 = vadd.xlane.f32.xlu0 %v125_v38 }
  0xe5   :  { %v689_v53 = vadd.f32 %v3588_v45, %v688_v56  ;;  %233 = vadd.xlane.f32.xlu1 %v128_v58 }
  0xe6   :  { %v2210_v47 = vpop.f32.mrf.mxu0 }
  0xe7   :  { %2432 = vtanh.f32 %v689_v53  ;;  %v704_v60 = vadd.f32 %v2210_v47, %v3588_v45 }
  0xe8   :  { %2434 = vtanh.f32 %v694_v22  ;;  %v698_v63 = vpop.f32.mrf.mxu0  ;;  %231 = vadd.xlane.f32.xlu0 %v127_v50 }
  0xe9   :  { %v699_v57 = vadd.f32 %v3588_v45, %v698_v63  ;;  %237 = vadd.xlane.f32.xlu1 %v130_v7 }
  0xea   :  { %v2213_v12 = vpop.f32.mrf.mxu0 }
  0xeb   :  { %2436 = vtanh.f32 %v699_v57  ;;  %v714_v61 = vadd.f32 %v2213_v12, %v3588_v45 }
  0xec   :  { %2438 = vtanh.f32 %v704_v60  ;;  %v708_v0 = vpop.f32.mrf.mxu0  ;;  %235 = vadd.xlane.f32.xlu0 %v129_v62 }
  0xed   :  { %v709_v18 = vadd.f32 %v3588_v45, %v708_v0  ;;  %241 = vadd.xlane.f32.xlu1 %v132_v21  ;;  %v4232_v21 = vld [vmem:[#allocation8_spill] sm:$0xff] }
  0xee   :  { %v2216_v17 = vpop.f32.mrf.mxu0 }
  0xef   :  { %2440 = vtanh.f32 %v709_v18  ;;  %v724_v1 = vadd.f32 %v2216_v17, %v3588_v45 }
  0xf0   :  { %2442 = vtanh.f32 %v714_v61  ;;  %v718_v5 = vpop.f32.mrf.mxu0  ;;  %239 = vadd.xlane.f32.xlu0 %v131_v11  ;;  %v145_v11 = vmul.f32 %v4232_v21, %v4232_v21 }
  0xf1   :  { %v719_v30 = vadd.f32 %v3588_v45, %v718_v5  ;;  %245 = vadd.xlane.f32.xlu1 %v134_v39 }
  0xf2   :  { %v2219_v31 = vpop.f32.mrf.mxu0 }
  0xf3   :  { %2444 = vtanh.f32 %v719_v30  ;;  %v734_v6 = vadd.f32 %v2219_v31, %v3588_v45 }
  0xf4   :  { %v2433_v9 = vpop.eup %2432  ;;  %2446 = vtanh.f32 %v724_v1  ;;  %v728_v40 = vpop.f32.mrf.mxu0  ;;  %243 = vadd.xlane.f32.xlu0 %v133_v27 }
  0xf5   :  { %v2435_v48 = vpop.eup %2434  ;;  %v729_v13 = vadd.f32 %v3588_v45, %v728_v40  ;;  %2333 = vmatprep.mubr.f32.mxu1 %v2433_v9  ;;  %249 = vadd.xlane.f32.xlu1 %v136_v54 }
  0xf6   :  { %v2222_v52 = vpop.f32.mrf.mxu0  ;;  %2334 = vmatmul.mubr.f32.vlgmr.msra.gmra.mxu1 %v2435_v48 }
  0xf7   :  { %2448 = vtanh.f32 %v729_v13  ;;  %v744_v49 = vadd.f32 %v2222_v52, %v3588_v45 }
  0xf8   :  { %v2437_v10 = vpop.eup %2436  ;;  %2450 = vtanh.f32 %v734_v6  ;;  %v738_v22 = vpop.f32.mrf.mxu0  ;;  %247 = vadd.xlane.f32.xlu0 %v135_v43 }
  0xf9   :  { %v2439_v56 = vpop.eup %2438  ;;  %v739_v53 = vadd.f32 %v3588_v45, %v738_v22  ;;  %2336 = vmatprep.mubr.f32.mxu1 %v2437_v10  ;;  %253 = vadd.xlane.f32.xlu1 %v138_v2 }
  0xfa   :  { %v2225_v47 = vpop.f32.mrf.mxu0  ;;  %2337 = vmatmul.mubr.f32.gmra.mxu1 %v2439_v56 }
  0xfb   :  { %2452 = vtanh.f32 %v739_v53  ;;  %v754_v34 = vadd.f32 %v2225_v47, %v3588_v45 }
  0xfc   :  { %v2441_v28 = vpop.eup %2440  ;;  %2454 = vtanh.f32 %v744_v49  ;;  %v748_v60 = vpop.f32.mrf.mxu0  ;;  %251 = vadd.xlane.f32.xlu0 %v137_v55 }
  0xfd   :  { %v2443_v63 = vpop.eup %2442  ;;  %v749_v57 = vadd.f32 %v3588_v45, %v748_v60  ;;  %2339 = vmatprep.mubr.f32.mxu1 %v2441_v28  ;;  %257 = vadd.xlane.f32.xlu1 %v140_v15 }
  0xfe   :  { %v2228_v12 = vpop.f32.mrf.mxu0  ;;  %2340 = vmatmul.mubr.f32.gmra.mxu1 %v2443_v63 }
  0xff   :  { %2456 = vtanh.f32 %v749_v57  ;;  %v764_v4 = vadd.f32 %v2228_v12, %v3588_v45 }
 0x100   :  { %v2445_v59 = vpop.eup %2444  ;;  %2458 = vtanh.f32 %v754_v34  ;;  %v758_v61 = vpop.f32.mrf.mxu0  ;;  %255 = vadd.xlane.f32.xlu0 %v139_v3 }
 0x101   :  { %v2447_v0 = vpop.eup %2446  ;;  %v759_v18 = vadd.f32 %v3588_v45, %v758_v61  ;;  %2342 = vmatprep.mubr.f32.mxu1 %v2445_v59  ;;  %261 = vadd.xlane.f32.xlu1 %v142_v33 }
 0x102   :  { %v2231_v17 = vpop.f32.mrf.mxu0  ;;  %2343 = vmatmul.mubr.f32.gmra.mxu1 %v2447_v0 }
 0x103   :  { %2460 = vtanh.f32 %v759_v18  ;;  %v774_v25 = vadd.f32 %v2231_v17, %v3588_v45 }
 0x104   :  { %v2449_v24 = vpop.eup %2448  ;;  %2462 = vtanh.f32 %v764_v4  ;;  %v768_v1 = vpop.f32.mrf.mxu0 }
 0x105   :  { %v2451_v5 = vpop.eup %2450  ;;  %v769_v30 = vadd.f32 %v3588_v45, %v768_v1  ;;  %2345 = vmatprep.mubr.f32.mxu1 %v2449_v24 }
 0x106   :  { %v2234_v31 = vpop.f32.mrf.mxu0  ;;  %2346 = vmatmul.mubr.f32.gmra.mxu1 %v2451_v5 }
 0x107   :  { %2464 = vtanh.f32 %v769_v30  ;;  %v784_v37 = vadd.f32 %v2234_v31, %v3588_v45 }
 0x108   :  { %v2453_v36 = vpop.eup %2452  ;;  %2466 = vtanh.f32 %v774_v25  ;;  %v778_v9 = vpop.f32.mrf.mxu0 }
 0x109   :  { %v2455_v6 = vpop.eup %2454  ;;  %v779_v40 = vadd.f32 %v3588_v45, %v778_v9  ;;  %2348 = vmatprep.mubr.f32.mxu1 %v2453_v36 }
 0x10a   :  { %v2237_v41 = vpop.f32.mrf.mxu0  ;;  %2349 = vmatmul.mubr.f32.gmra.mxu1 %v2455_v6 }
 0x10b   :  { %2468 = vtanh.f32 %v779_v40  ;;  %v794_v48 = vadd.f32 %v2237_v41, %v3588_v45 }
 0x10c   :  { %v2457_v44 = vpop.eup %2456  ;;  %2470 = vtanh.f32 %v784_v37  ;;  %v788_v13 = vpop.f32.mrf.mxu0 }
 0x10d   :  { %v2459_v52 = vpop.eup %2458  ;;  %v789_v10 = vadd.f32 %v3588_v45, %v788_v13  ;;  %2351 = vmatprep.mubr.f32.mxu1 %v2457_v44 }
 0x10e   :  { %v2240_v49 = vpop.f32.mrf.mxu0  ;;  %2352 = vmatmul.mubr.f32.gmra.mxu1 %v2459_v52 }
 0x10f   :  { %2472 = vtanh.f32 %v789_v10  ;;  %v804_v19 = vadd.f32 %v2240_v49, %v3588_v45 }
 0x110   :  { %v2461_v22 = vpop.eup %2460  ;;  %2474 = vtanh.f32 %v794_v48  ;;  %v798_v14 = vpop.f32.mrf.mxu0  ;;  %v4228_v48 = vld [vmem:[#allocation5_spill] sm:$0xff] }
 0x111   :  { %v2463_v56 = vpop.eup %2462  ;;  %v799_v53 = vadd.f32 %v3588_v45, %v798_v14  ;;  %2354 = vmatprep.mubr.f32.mxu1 %v2461_v22  ;;  %v141_v16 = vmul.f32 %v4228_v48, %v4228_v48  ;;  %v4229_v22 = vld [vmem:[#allocation7_spill] sm:$0xff] }
 0x112   :  { %v2243_v47 = vpop.f32.mrf.mxu0  ;;  %2355 = vmatmul.mubr.f32.gmra.mxu1 %v2463_v56  ;;  %v144_v51 = vmul.f32 %v4229_v22, %v4229_v22 }
 0x113   :  { %2476 = vtanh.f32 %v799_v53  ;;  %v814_v34 = vadd.f32 %v2243_v47, %v3588_v45  ;;  %259 = vadd.xlane.f32.xlu0 %v141_v16 }
 0x114   :  { %v2465_v28 = vpop.eup %2464  ;;  %2478 = vtanh.f32 %v804_v19  ;;  %v808_v60 = vpop.f32.mrf.mxu0  ;;  %v4230_v19 = vld [vmem:[#allocation6_spill] sm:$0xff]  ;;  %265 = vadd.xlane.f32.xlu1 %v144_v51 }
 0x115   :  { %v2467_v23 = vpop.eup %2466  ;;  %v809_v20 = vadd.f32 %v3588_v45, %v808_v60  ;;  %2357 = vmatprep.mubr.f32.mxu1 %v2465_v28  ;;  %v143_v14 = vmul.f32 %v4230_v19, %v4230_v19 }
 0x116   :  { %v2246_v63 = vpop.f32.mrf.mxu0  ;;  %2358 = vmatmul.mubr.f32.gmra.mxu1 %v2467_v23 }
 0x117   :  { %2480 = vtanh.f32 %v809_v20  ;;  %v824_v12 = vadd.f32 %v2246_v63, %v3588_v45  ;;  %263 = vadd.xlane.f32.xlu0 %v143_v14 }
 0x118   :  { %v2469_v57 = vpop.eup %2468  ;;  %2482 = vtanh.f32 %v814_v34  ;;  %v818_v59 = vpop.f32.mrf.mxu0  ;;  %v4231_v34 = vld [vmem:[#allocation9_spill] sm:$0xff] }
 0x119   :  { %v2471_v4 = vpop.eup %2470  ;;  %v819_v61 = vadd.f32 %v3588_v45, %v818_v59  ;;  %2360 = vmatprep.mubr.f32.mxu1 %v2469_v57  ;;  %v146_v60 = vmul.f32 %v4231_v34, %v4231_v34 }
 0x11a   :  { %v2249_v29 = vpop.f32.mrf.mxu0  ;;  %2361 = vmatmul.mubr.f32.gmra.mxu1 %v2471_v4 }
 0x11b   :  { %2484 = vtanh.f32 %v819_v61  ;;  %v834_v0 = vadd.f32 %v2249_v29, %v3588_v45  ;;  %269 = vadd.xlane.f32.xlu1 %v146_v60  ;;  %267 = vadd.xlane.f32.xlu0 %v145_v11  ;;  %v148_v61 = vmul.f32 %v3534_v8, %v3534_v8  ;;  %v4233_v29 = vld [vmem:[#allocation10_spill] sm:$0xff]  ;;  %v150_v8 = vmul.f32 %v3546_v42, %v3546_v42 }
 0x11c   :  { %v2473_v26 = vpop.eup %2472  ;;  %2486 = vtanh.f32 %v824_v12  ;;  %v828_v18 = vpop.f32.mrf.mxu0 }
 0x11d   :  { %v2475_v17 = vpop.eup %2474  ;;  %v829_v24 = vadd.f32 %v3588_v45, %v828_v18  ;;  %2363 = vmatprep.mubr.f32.mxu1 %v2473_v26  ;;  %v147_v26 = vmul.f32 %v4233_v29, %v4233_v29 }
 0x11e   :  { %v2252_v25 = vpop.f32.mrf.mxu0  ;;  %2364 = vmatmul.mubr.f32.gmra.mxu1 %v2475_v17 }
 0x11f   :  { %2488 = vtanh.f32 %v829_v24  ;;  %v844_v35 = vadd.f32 %v2252_v25, %v3588_v45  ;;  %273 = vadd.xlane.f32.xlu1 %v148_v61  ;;  %271 = vadd.xlane.f32.xlu0 %v147_v26  ;;  %v4234_v25 = vld [vmem:[#allocation11_spill] sm:$0xff] }
 0x120   :  { %v2477_v1 = vpop.eup %2476  ;;  %2490 = vtanh.f32 %v834_v0  ;;  %v838_v32 = vpop.f32.mrf.mxu0 }
 0x121   :  { %v2479_v5 = vpop.eup %2478  ;;  %v839_v30 = vadd.f32 %v3588_v45, %v838_v32  ;;  %2366 = vmatprep.mubr.f32.mxu1 %v2477_v1  ;;  %v149_v1 = vmul.f32 %v4234_v25, %v4234_v25 }
 0x122   :  { %v2255_v31 = vpop.f32.mrf.mxu0  ;;  %2367 = vmatmul.mubr.f32.gmra.mxu1 %v2479_v5 }
 0x123   :  { %2492 = vtanh.f32 %v839_v30  ;;  %v854_v37 = vadd.f32 %v2255_v31, %v3588_v45  ;;  %277 = vadd.xlane.f32.xlu1 %v150_v8  ;;  %275 = vadd.xlane.f32.xlu0 %v149_v1 }
 0x124   :  { %v2481_v36 = vpop.eup %2480  ;;  %2494 = vtanh.f32 %v844_v35  ;;  %v848_v9 = vpop.f32.mrf.mxu0 }
 0x125   :  { %v2483_v46 = vpop.eup %2482  ;;  %v849_v38 = vadd.f32 %v3588_v45, %v848_v9  ;;  %2369 = vmatprep.mubr.f32.mxu1 %v2481_v36 }
 0x126   :  { %v2258_v6 = vpop.f32.mrf.mxu0  ;;  %2370 = vmatmul.mubr.f32.gmra.mxu1 %v2483_v46 }
 0x127   :  { %2496 = vtanh.f32 %v849_v38  ;;  %v864_v41 = vadd.f32 %v2258_v6, %v3588_v45 }
 0x128   :  { %v2485_v40 = vpop.eup %2484  ;;  %2498 = vtanh.f32 %v854_v37  ;;  %v858_v44 = vpop.f32.mrf.mxu0 }
 0x129   :  { %v2487_v13 = vpop.eup %2486  ;;  %v859_v58 = vadd.f32 %v3588_v45, %v858_v44  ;;  %2372 = vmatprep.mubr.f32.mxu1 %v2485_v40 }
 0x12a   :  { %v2261_v50 = vpop.f32.mrf.mxu0  ;;  %2373 = vmatmul.mubr.f32.gmra.mxu1 %v2487_v13 }
 0x12b   :  { %2500 = vtanh.f32 %v859_v58  ;;  %v874_v10 = vadd.f32 %v2261_v50, %v3588_v45  ;;  %v156_v50 = vpop.xlane.xlu1 %155 }
 0x12c   :  { %v2489_v52 = vpop.eup %2488  ;;  %2502 = vtanh.f32 %v864_v41  ;;  %v868_v49 = vpop.f32.mrf.mxu0 }
 0x12d   :  { %v2491_v7 = vpop.eup %2490  ;;  %v869_v62 = vadd.f32 %v3588_v45, %v868_v49  ;;  %2375 = vmatprep.mubr.f32.mxu1 %v2489_v52  ;;  %v152_v49 = vpop.xlane.xlu0 %151 }
 0x12e   :  { %v2264_v56 = vpop.f32.mrf.mxu0  ;;  %2376 = vmatmul.mubr.f32.gmra.mxu1 %v2491_v7  ;;  %v279_v19 = vmax.f32 %v152_v49, 1e-24 }
 0x12f   :  { %2504 = vtanh.f32 %v869_v62  ;;  %v884_v47 = vadd.f32 %v2264_v56, %v3588_v45  ;;  %v158_v56 = vpop.xlane.xlu1 %157 }
 0x130   :  { %v2493_v53 = vpop.eup %2492  ;;  %2506 = vtanh.f32 %v874_v10  ;;  %v878_v28 = vpop.f32.mrf.mxu0  ;;  %v281_v10 = vmax.f32 %v156_v50, 1e-24 }
 0x131   :  { %v2495_v23 = vpop.eup %2494  ;;  %v879_v20 = vadd.f32 %v3588_v45, %v878_v28  ;;  %2378 = vmatprep.mubr.f32.mxu1 %v2493_v53  ;;  %v154_v28 = vpop.xlane.xlu0 %153 }
 0x132   :  { %v2267_v63 = vpop.f32.mrf.mxu0  ;;  %2379 = vmatmul.mubr.f32.gmra.mxu1 %v2495_v23  ;;  %v280_v21 = vmax.f32 %v154_v28, 1e-24 }
 0x133   :  { %2508 = vtanh.f32 %v879_v20  ;;  %v894_v12 = vadd.f32 %v2267_v63, %v3588_v45  ;;  %v162_v63 = vpop.xlane.xlu1 %161 }
 0x134   :  { %v2497_v57 = vpop.eup %2496  ;;  %2510 = vtanh.f32 %v884_v47  ;;  %v888_v59 = vpop.f32.mrf.mxu0  ;;  %v282_v47 = vmax.f32 %v158_v56, 1e-24 }
 0x135   :  { %v2499_v39 = vpop.eup %2498  ;;  %v889_v27 = vadd.f32 %v3588_v45, %v888_v59  ;;  %2381 = vmatprep.mubr.f32.mxu1 %v2497_v57  ;;  %v160_v59 = vpop.xlane.xlu0 %159 }
 0x136   :  { %v2270_v4 = vpop.f32.mrf.mxu0  ;;  %2382 = vmatmul.mubr.f32.gmra.mxu1 %v2499_v39 }
 0x137   :  { %2512 = vtanh.f32 %v889_v27  ;;  %v904_v18 = vadd.f32 %v2270_v4, %v3588_v45  ;;  %v283_v4 = vmax.f32 %v160_v59, 1e-24 }
 0x138   :  { %v2501_v0 = vpop.eup %2500  ;;  %2514 = vtanh.f32 %v894_v12  ;;  %v898_v54 = vpop.f32.mrf.mxu0  ;;  %v284_v12 = vmax.f32 %v162_v63, 1e-24 }
 0x139   :  { %v2503_v43 = vpop.eup %2502  ;;  %v899_v17 = vadd.f32 %v3588_v45, %v898_v54  ;;  %2384 = vmatprep.mubr.f32.mxu1 %v2501_v0  ;;  %v166_v0 = vpop.xlane.xlu1 %165 }
 0x13a   :  { %v2273_v24 = vpop.f32.mrf.mxu0  ;;  %2385 = vmatmul.mubr.f32.gmra.mxu1 %v2503_v43  ;;  %v286_v54 = vmax.f32 %v166_v0, 1e-24  ;;  %v164_v43 = vpop.xlane.xlu0 %163  ;;  %v2951_v0 = vld [vmem:[%s4207_s0 + $0x30] sm:$0xff] }
 0x13b   :  { %2516 = vtanh.f32 %v899_v17  ;;  %v914_v32 = vadd.f32 %v2273_v24, %v3588_v45  ;;  %v285_v8 = vmax.f32 %v164_v43, 1e-24 }
 0x13c   :  { %v2505_v35 = vpop.eup %2504  ;;  %2518 = vtanh.f32 %v904_v18  ;;  %v908_v2 = vpop.f32.mrf.mxu0 }
 0x13d   :  { %v2507_v55 = vpop.eup %2506  ;;  %v909_v5 = vadd.f32 %v3588_v45, %v908_v2  ;;  %2387 = vmatprep.mubr.f32.mxu1 %v2505_v35  ;;  %v170_v2 = vpop.xlane.xlu1 %169 }
 0x13e   :  { %v2276_v30 = vpop.f32.mrf.mxu0  ;;  %2388 = vmatmul.mubr.f32.gmra.mxu1 %v2507_v55 }
 0x13f   :  { %2520 = vtanh.f32 %v909_v5  ;;  %v924_v42 = vadd.f32 %v2276_v30, %v3588_v45  ;;  %v288_v30 = vmax.f32 %v170_v2, 1e-24 }
 0x140   :  { %v2509_v31 = vpop.eup %2508  ;;  %2522 = vtanh.f32 %v914_v32  ;;  %v918_v36 = vpop.f32.mrf.mxu0 }
 0x141   :  { %v2511_v37 = vpop.eup %2510  ;;  %v919_v9 = vadd.f32 %v3588_v45, %v918_v36  ;;  %2390 = vmatprep.mubr.f32.mxu1 %v2509_v31  ;;  %v168_v31 = vpop.xlane.xlu0 %167 }
 0x142   :  { %v2279_v15 = vpop.f32.mrf.mxu0  ;;  %2391 = vmatmul.mubr.f32.gmra.mxu1 %v2511_v37  ;;  %v2944_v37 = vld [vmem:[%s4207_s0 + $0x10] sm:$0xff] }
 0x143   :  { %2524 = vtanh.f32 %v919_v9  ;;  %v934_v46 = vadd.f32 %v2279_v15, %v3588_v45  ;;  %v287_v15 = vmax.f32 %v168_v31, 1e-24 }
 0x144   :  { %v2513_v3 = vpop.eup %2512  ;;  %2526 = vtanh.f32 %v924_v42  ;;  %v928_v38 = vpop.f32.mrf.mxu0 }
 0x145   :  { %v2515_v6 = vpop.eup %2514  ;;  %v929_v40 = vadd.f32 %v3588_v45, %v928_v38  ;;  %2393 = vmatprep.mubr.f32.mxu1 %v2513_v3 }
 0x146   :  { %v2282_v41 = vpop.f32.mrf.mxu0  ;;  %2394 = vmatmul.mubr.f32.gmra.mxu1 %v2515_v6 }
 0x147   :  { %2528 = vtanh.f32 %v929_v40  ;;  %v944_v33 = vadd.f32 %v2282_v41, %v3588_v45  ;;  %v2945_v40 = vld [vmem:[%s4207_s0] sm:$0xff] }
 0x148   :  { %v2517_v44 = vpop.eup %2516  ;;  %2530 = vtanh.f32 %v934_v46  ;;  %v938_v48 = vpop.f32.mrf.mxu0 }
 0x149   :  { %v2519_v16 = vpop.eup %2518  ;;  %v939_v13 = vadd.f32 %v3588_v45, %v938_v48  ;;  %2396 = vmatprep.mubr.f32.mxu1 %v2517_v44  ;;  %v174_v44 = vpop.xlane.xlu1 %173 }
 0x14a   :  { %v2285_v58 = vpop.f32.mrf.mxu0  ;;  %2397 = vmatmul.mubr.f32.gmra.mxu1 %v2519_v16  ;;  %v290_v16 = vmax.f32 %v174_v44, 1e-24 }
 0x14b   :  { %2532 = vtanh.f32 %v939_v13  ;;  %v954_v52 = vadd.f32 %v2285_v58, %v3588_v45  ;;  %v172_v13 = vpop.xlane.xlu0 %171 }
 0x14c   :  { %v2521_v22 = vpop.eup %2520  ;;  %2534 = vtanh.f32 %v944_v33  ;;  %v948_v51 = vpop.f32.mrf.mxu0  ;;  %v289_v49 = vmax.f32 %v172_v13, 1e-24 }
 0x14d   :  { %v2523_v14 = vpop.eup %2522  ;;  %2536 = vtanh.f32 %v954_v52  ;;  %v949_v7 = vadd.f32 %v3588_v45, %v948_v51  ;;  %2399 = vmatprep.mubr.f32.mxu1 %v2521_v22  ;;  %v2946_v52 = vld [vmem:[%s4207_s0 + $0x18] sm:$0xff] }
 0x14e   :  { %v2288_v62 = vpop.f32.mrf.mxu0  ;;  %2400 = vmatmul.mubr.f32.gmra.mxu1 %v2523_v14  ;;  %2538 = vrsqrt.f32 %v281_v10  ;;  %v2947_v14 = vld [vmem:[%s4207_s0 + $0x8] sm:$0xff] }
 0x14f   :  { %2540 = vtanh.f32 %v949_v7  ;;  %v964_v53 = vadd.f32 %v2288_v62, %v3588_v45  ;;  %v178_v62 = vpop.xlane.xlu1 %177 }
 0x150   :  { %v2525_v34 = vpop.eup %2524  ;;  %v958_v60 = vpop.f32.mrf.mxu0  ;;  %2542 = vrsqrt.f32 %v279_v19 }
 0x151   :  { %v2527_v11 = vpop.eup %2526  ;;  %2544 = vtanh.f32 %v964_v53  ;;  %v959_v23 = vadd.f32 %v3588_v45, %v958_v60  ;;  %2402 = vmatprep.mubr.f32.mxu1 %v2525_v34  ;;  %v292_v53 = vmax.f32 %v178_v62, 1e-24  ;;  %v2959_v62 = vld [vmem:[%s4207_s0 + $0x70] sm:$0xff] }
 0x152   :  { %v2291_v20 = vpop.f32.mrf.mxu0  ;;  %2403 = vmatmul.mubr.f32.gmra.mxu1 %v2527_v11  ;;  %2546 = vrsqrt.f32 %v282_v47  ;;  %v176_v47 = vpop.xlane.xlu0 %175 }
 0x153   :  { %2548 = vtanh.f32 %v959_v23  ;;  %v974_v57 = vadd.f32 %v2291_v20, %v3588_v45  ;;  %v291_v60 = vmax.f32 %v176_v47, 1e-24  ;;  %v2949_v23 = vld [vmem:[%s4207_s0 + $0x20] sm:$0xff]  ;;  %v182_v63 = vpop.xlane.xlu1 %181 }
 0x154   :  { %v2529_v39 = vpop.eup %2528  ;;  %v968_v27 = vpop.f32.mrf.mxu0  ;;  %2550 = vrsqrt.f32 %v280_v21 }
 0x155   :  { %v2531_v61 = vpop.eup %2530  ;;  %2552 = vtanh.f32 %v974_v57  ;;  %v969_v29 = vadd.f32 %v3588_v45, %v968_v27  ;;  %2405 = vmatprep.mubr.f32.mxu1 %v2529_v39  ;;  %v2950_v27 = vld [vmem:[%s4207_s0 + $0x38] sm:$0xff] }
 0x156   :  { %v2294_v26 = vpop.f32.mrf.mxu0  ;;  %2406 = vmatmul.mubr.f32.gmra.mxu1 %v2531_v61  ;;  %2554 = vrsqrt.f32 %v284_v12  ;;  %v294_v12 = vmax.f32 %v182_v63, 1e-24  ;;  %v180_v59 = vpop.xlane.xlu0 %179 }
 0x157   :  { %2556 = vtanh.f32 %v969_v29  ;;  %v984_v18 = vadd.f32 %v2294_v26, %v3588_v45  ;;  %v293_v61 = vmax.f32 %v180_v59, 1e-24 }
 0x158   :  { %v2533_v17 = vpop.eup %2532  ;;  %v978_v24 = vpop.f32.mrf.mxu0  ;;  %2558 = vrsqrt.f32 %v283_v4 }
 0x159   :  { %v2535_v25 = vpop.eup %2534  ;;  %2560 = vtanh.f32 %v984_v18  ;;  %v979_v1 = vadd.f32 %v3588_v45, %v978_v24  ;;  %2408 = vmatprep.mubr.f32.mxu1 %v2533_v17 }
 0x15a   :  { %v2537_v35 = vpop.eup %2536  ;;  %v2297_v32 = vpop.f32.mrf.mxu0  ;;  %2409 = vmatmul.mubr.f32.gmra.mxu1 %v2535_v25  ;;  %2562 = vrsqrt.f32 %v286_v54  ;;  %v2952_v25 = vld [vmem:[%s4207_s0 + $0x48] sm:$0xff] }
 0x15b   :  { %v2539_v55 = vpop.eup %2538  ;;  %2564 = vtanh.f32 %v979_v1  ;;  %v994_v5 = vadd.f32 %v2297_v32, %v3588_v45  ;;  %v186_v54 = vpop.xlane.xlu1 %185 }
 0x15c   :  { %v2541_v42 = vpop.eup %2540  ;;  %v988_v36 = vpop.f32.mrf.mxu0  ;;  %v409_v9 = vmul.f32 %v2944_v37, %v2539_v55  ;;  %2566 = vrsqrt.f32 %v285_v8  ;;  %v296_v17 = vmax.f32 %v186_v54, 1e-24  ;;  %v2953_v55 = vld [vmem:[%s4207_s0 + $0x40] sm:$0xff] }
 0x15d   :  { %v2543_v3 = vpop.eup %2542  ;;  %2568 = vtanh.f32 %v994_v5  ;;  %v989_v46 = vadd.f32 %v3588_v45, %v988_v36  ;;  %2411 = vmatprep.mubr.f32.mxu1 %v2541_v42  ;;  %v184_v24 = vpop.xlane.xlu0 %183 }
 0x15e   :  { %v2545_v38 = vpop.eup %2544  ;;  %v2300_v6 = vpop.f32.mrf.mxu0  ;;  %2412 = vmatmul.mubr.f32.gmra.mxu1 %v2537_v35  ;;  %473 = vst [vmem:[%s4212_s5 + $0x10] sm:$0xff] %v409_v9  ;;  %v407_v41 = vmul.f32 %v2945_v40, %v2543_v3  ;;  %2570 = vrsqrt.f32 %v288_v30  ;;  %v295_v35 = vmax.f32 %v184_v24, 1e-24  ;;  %v2954_v9 = vld [vmem:[%s4207_s0 + $0x58] sm:$0xff] }
 0x15f   :  { %v2547_v33 = vpop.eup %2546  ;;  %2572 = vtanh.f32 %v989_v46  ;;  %v1004_v48 = vadd.f32 %v2300_v6, %v3588_v45  ;;  %v190_v30 = vpop.xlane.xlu1 %189  ;;  %v2955_v6 = vld [vmem:[%s4207_s0 + $0x50] sm:$0xff] }
 0x160   :  { %v2549_v58 = vpop.eup %2548  ;;  %v998_v50 = vpop.f32.mrf.mxu0  ;;  %471 = vst [vmem:[%s4212_s5] sm:$0xff] %v407_v41  ;;  %v410_v10 = vmul.f32 %v2946_v52, %v2547_v33  ;;  %2574 = vrsqrt.f32 %v287_v15  ;;  %v298_v42 = vmax.f32 %v190_v30, 1e-24  ;;  %v2956_v33 = vld [vmem:[%s4207_s0 + $0x68] sm:$0xff]  ;;  %v2966_v30 = vld [vmem:[%s4207_s0 + $0xb8] sm:$0xff] }
 0x161   :  { %v2551_v22 = vpop.eup %2550  ;;  %2576 = vtanh.f32 %v1004_v48  ;;  %v999_v51 = vadd.f32 %v3588_v45, %v998_v50  ;;  %2414 = vmatprep.mubr.f32.mxu1 %v2549_v58  ;;  %v2948_v45 = vld [vmem:[%s4207_s0 + $0x28] sm:$0xff]  ;;  %v188_v36 = vpop.xlane.xlu0 %187  ;;  %v2957_v58 = vld [vmem:[%s4207_s0 + $0x60] sm:$0xff] }
 0x162   :  { %v2553_v19 = vpop.eup %2552  ;;  %2415 = vmatmul.mubr.f32.gmra.mxu1 %v2545_v38  ;;  %474 = vst [vmem:[%s4212_s5 + $0x18] sm:$0xff] %v410_v10  ;;  %v408_v7 = vmul.f32 %v2947_v14, %v2551_v22  ;;  %2578 = vrsqrt.f32 %v290_v16  ;;  %v297_v3 = vmax.f32 %v188_v36, 1e-24 }
 0x163   :  { %v2555_v56 = vpop.eup %2554  ;;  %2580 = vtanh.f32 %v999_v51  ;;  %v194_v41 = vpop.xlane.xlu1 %193  ;;  %v2958_v51 = vld [vmem:[%s4207_s0 + $0x78] sm:$0xff] }
 0x164   :  { %v2557_v28 = vpop.eup %2556  ;;  %472 = vst [vmem:[%s4212_s5 + $0x8] sm:$0xff] %v408_v7  ;;  %v412_v34 = vmul.f32 %v2948_v45, %v2555_v56  ;;  %2582 = vrsqrt.f32 %v289_v49  ;;  %v300_v16 = vmax.f32 %v194_v41, 1e-24 }
 0x165   :  { %v2559_v21 = vpop.eup %2558  ;;  %2417 = vmatprep.mubr.f32.mxu1 %v2557_v28  ;;  %2584 = vrsqrt.f32 %v292_v53  ;;  %v192_v13 = vpop.xlane.xlu0 %191 }
 0x166   :  { %v2561_v11 = vpop.eup %2560  ;;  %2418 = vmatmul.mubr.f32.gmra.mxu1 %v2553_v19  ;;  %476 = vst [vmem:[%s4212_s5 + $0x28] sm:$0xff] %v412_v34  ;;  %v411_v20 = vmul.f32 %v2949_v23, %v2559_v21  ;;  %2586 = vrsqrt.f32 %v291_v60  ;;  %v299_v52 = vmax.f32 %v192_v13, 1e-24  ;;  %v2960_v34 = vld [vmem:[%s4207_s0 + $0x88] sm:$0xff]  ;;  %v2961_v23 = vld [vmem:[%s4207_s0 + $0x80] sm:$0xff] }
 0x167   :  { %v2563_v57 = vpop.eup %2562  ;;  %2588 = vrsqrt.f32 %v294_v12  ;;  %v198_v49 = vpop.xlane.xlu1 %197 }
 0x168   :  { %v2565_v39 = vpop.eup %2564  ;;  %475 = vst [vmem:[%s4212_s5 + $0x20] sm:$0xff] %v411_v20  ;;  %v414_v4 = vmul.f32 %v2950_v27, %v2563_v57  ;;  %2590 = vrsqrt.f32 %v293_v61  ;;  %v302_v14 = vmax.f32 %v198_v49, 1e-24 }
 0x169   :  { %v2567_v29 = vpop.eup %2566  ;;  %2420 = vmatprep.mubr.f32.mxu1 %v2565_v39  ;;  %2592 = vrsqrt.f32 %v296_v17  ;;  %v196_v7 = vpop.xlane.xlu0 %195  ;;  %v2962_v39 = vld [vmem:[%s4207_s0 + $0x98] sm:$0xff]  ;;  %v2964_v17 = vld [vmem:[%s4207_s0 + $0xa8] sm:$0xff] }
 0x16a   :  { %v2569_v26 = vpop.eup %2568  ;;  %2421 = vmatmul.mubr.f32.gmra.mxu1 %v2561_v11  ;;  %478 = vst [vmem:[%s4212_s5 + $0x38] sm:$0xff] %v414_v4  ;;  %v413_v18 = vmul.f32 %v2951_v0, %v2567_v29  ;;  %2594 = vrsqrt.f32 %v295_v35  ;;  %v301_v53 = vmax.f32 %v196_v7, 1e-24  ;;  %v2963_v29 = vld [vmem:[%s4207_s0 + $0x90] sm:$0xff] }
 0x16b   :  { %v2571_v43 = vpop.eup %2570  ;;  %2596 = vrsqrt.f32 %v298_v42  ;;  %v202_v28 = vpop.xlane.xlu1 %201 }
 0x16c   :  { %v2573_v8 = vpop.eup %2572  ;;  %477 = vst [vmem:[%s4212_s5 + $0x30] sm:$0xff] %v413_v18  ;;  %v416_v1 = vmul.f32 %v2952_v25, %v2571_v43  ;;  %2598 = vrsqrt.f32 %v297_v3  ;;  %v304_v21 = vmax.f32 %v202_v28, 1e-24 }
 0x16d   :  { %v2575_v32 = vpop.eup %2574  ;;  %2423 = vmatprep.mubr.f32.mxu1 %v2573_v8  ;;  %2600 = vrsqrt.f32 %v300_v16  ;;  %v200_v11 = vpop.xlane.xlu0 %199 }
 0x16e   :  { %v2577_v2 = vpop.eup %2576  ;;  %2424 = vmatmul.mubr.f32.gmra.mxu1 %v2569_v26  ;;  %480 = vst [vmem:[%s4212_s5 + $0x48] sm:$0xff] %v416_v1  ;;  %v415_v5 = vmul.f32 %v2953_v55, %v2575_v32  ;;  %2602 = vrsqrt.f32 %v299_v52  ;;  %v303_v63 = vmax.f32 %v200_v11, 1e-24  ;;  %v2965_v1 = vld [vmem:[%s4207_s0 + $0xa0] sm:$0xff]  ;;  %v2970_v52 = vld [vmem:[%s4207_s0 + $0xd8] sm:$0xff] }
 0x16f   :  { %v2579_v31 = vpop.eup %2578  ;;  %2604 = vrsqrt.f32 %v302_v14  ;;  %v206_v12 = vpop.xlane.xlu1 %205 }
 0x170   :  { %v2581_v37 = vpop.eup %2580  ;;  %479 = vst [vmem:[%s4212_s5 + $0x40] sm:$0xff] %v415_v5  ;;  %v418_v15 = vmul.f32 %v2954_v9, %v2579_v31  ;;  %2606 = vrsqrt.f32 %v301_v53  ;;  %v306_v4 = vmax.f32 %v206_v12, 1e-24  ;;  %v2972_v53 = vld [vmem:[%s4207_s0 + $0xe8] sm:$0xff] }
 0x171   :  { %v2583_v46 = vpop.eup %2582  ;;  %2426 = vmatprep.mubr.f32.mxu1 %v2581_v37  ;;  %2608 = vrsqrt.f32 %v304_v21  ;;  %v204_v61 = vpop.xlane.xlu0 %203  ;;  %v2967_v37 = vld [vmem:[%s4207_s0 + $0xb0] sm:$0xff] }
 0x172   :  { %v2585_v38 = vpop.eup %2584  ;;  %2427 = vmatmul.mubr.f32.gmra.mxu1 %v2577_v2  ;;  %482 = vst [vmem:[%s4212_s5 + $0x58] sm:$0xff] %v418_v15  ;;  %v417_v40 = vmul.f32 %v2955_v6, %v2583_v46  ;;  %2610 = vrsqrt.f32 %v303_v63  ;;  %v305_v0 = vmax.f32 %v204_v61, 1e-24  ;;  %v2968_v6 = vld [vmem:[%s4207_s0 + $0xc8] sm:$0xff]  ;;  %v2974_v63 = vld [vmem:[%s4207_s0 + $0xf8] sm:$0xff] }
 0x173   :  { %v2587_v44 = vpop.eup %2586  ;;  %v420_v48 = vmul.f32 %v2956_v33, %v2585_v38  ;;  %2612 = vrsqrt.f32 %v306_v4  ;;  %v210_v54 = vpop.xlane.xlu1 %209  ;;  %v2969_v33 = vld [vmem:[%s4207_s0 + $0xc0] sm:$0xff] }
 0x174   :  { %481 = vst [vmem:[%s4212_s5 + $0x50] sm:$0xff] %v417_v40  ;;  %v419_v50 = vmul.f32 %v2957_v58, %v2587_v44  ;;  %v2589_v10 = vpop.eup %2588  ;;  %2614 = vrsqrt.f32 %v305_v0  ;;  %v308_v8 = vmax.f32 %v210_v54, 1e-24  ;;  %v2976_v0 = vld [vmem:[%s4207_s0 + $0x108] sm:$0xff] }
 0x175   :  { %484 = vst [vmem:[%s4212_s5 + $0x68] sm:$0xff] %v420_v48  ;;  %v2591_v22 = vpop.eup %2590  ;;  %v422_v19 = vmul.f32 %v2958_v51, %v2589_v10  ;;  %v208_v25 = vpop.xlane.xlu0 %207  ;;  %v2971_v51 = vld [vmem:[%s4207_s0 + $0xd0] sm:$0xff] }
 0x176   :  { %483 = vst [vmem:[%s4212_s5 + $0x60] sm:$0xff] %v419_v50  ;;  %v421_v56 = vmul.f32 %v2959_v62, %v2591_v22  ;;  %v2593_v47 = vpop.eup %2592  ;;  %v307_v32 = vmax.f32 %v208_v25, 1e-24  ;;  %2616 = vrsqrt.f32 %v308_v8 }
 0x177   :  { %486 = vst [vmem:[%s4212_s5 + $0x78] sm:$0xff] %v422_v19  ;;  %v2595_v45 = vpop.eup %2594  ;;  %v424_v60 = vmul.f32 %v2960_v34, %v2593_v47  ;;  %v214_v55 = vpop.xlane.xlu1 %213  ;;  %v2973_v34 = vld [vmem:[%s4207_s0 + $0xe0] sm:$0xff] }
 0x178   :  { %485 = vst [vmem:[%s4212_s5 + $0x70] sm:$0xff] %v421_v56  ;;  %v423_v20 = vmul.f32 %v2961_v23, %v2595_v45  ;;  %v2597_v57 = vpop.eup %2596  ;;  %2618 = vrsqrt.f32 %v307_v32  ;;  %v310_v42 = vmax.f32 %v214_v55, 1e-24  ;;  %v2978_v32 = vld [vmem:[%s4207_s0 + $0x118] sm:$0xff] }
 0x179   :  { %488 = vst [vmem:[%s4212_s5 + $0x88] sm:$0xff] %v424_v60  ;;  %v2599_v59 = vpop.eup %2598  ;;  %v426_v27 = vmul.f32 %v2962_v39, %v2597_v57  ;;  %v212_v36 = vpop.xlane.xlu0 %211  ;;  %v2975_v39 = vld [vmem:[%s4207_s0 + $0xf0] sm:$0xff] }
 0x17a   :  { %487 = vst [vmem:[%s4212_s5 + $0x80] sm:$0xff] %v423_v20  ;;  %v425_v26 = vmul.f32 %v2963_v29, %v2599_v59  ;;  %v2601_v18 = vpop.eup %2600  ;;  %v309_v15 = vmax.f32 %v212_v36, 1e-24  ;;  %2620 = vrsqrt.f32 %v310_v42 }
 0x17b   :  { %490 = vst [vmem:[%s4212_s5 + $0x98] sm:$0xff] %v426_v27  ;;  %v2603_v43 = vpop.eup %2602  ;;  %v428_v24 = vmul.f32 %v2964_v17, %v2601_v18  ;;  %v218_v46 = vpop.xlane.xlu1 %217  ;;  %v2977_v17 = vld [vmem:[%s4207_s0 + $0x100] sm:$0xff] }
 0x17c   :  { %489 = vst [vmem:[%s4212_s5 + $0x90] sm:$0xff] %v425_v26  ;;  %v427_v35 = vmul.f32 %v2965_v1, %v2603_v43  ;;  %v2605_v2 = vpop.eup %2604  ;;  %2622 = vrsqrt.f32 %v309_v15  ;;  %v312_v41 = vmax.f32 %v218_v46, 1e-24  ;;  %v2980_v15 = vld [vmem:[%s4207_s0 + $0x128] sm:$0xff] }
 0x17d   :  { %492 = vst [vmem:[%s4212_s5 + $0xa8] sm:$0xff] %v428_v24  ;;  %v2607_v5 = vpop.eup %2606  ;;  %v430_v31 = vmul.f32 %v2966_v30, %v2605_v2  ;;  %v216_v44 = vpop.xlane.xlu0 %215  ;;  %v2979_v30 = vld [vmem:[%s4207_s0 + $0x110] sm:$0xff] }
 0x17e   :  { %491 = vst [vmem:[%s4212_s5 + $0xa0] sm:$0xff] %v427_v35  ;;  %v429_v9 = vmul.f32 %v2967_v37, %v2607_v5  ;;  %v2609_v3 = vpop.eup %2608  ;;  %v311_v16 = vmax.f32 %v216_v44, 1e-24  ;;  %2624 = vrsqrt.f32 %v312_v41 }
 0x17f   :  { %494 = vst [vmem:[%s4212_s5 + $0xb8] sm:$0xff] %v430_v31  ;;  %v2611_v38 = vpop.eup %2610  ;;  %v432_v40 = vmul.f32 %v2968_v6, %v2609_v3  ;;  %v222_v58 = vpop.xlane.xlu1 %221  ;;  %v2981_v6 = vld [vmem:[%s4207_s0 + $0x120] sm:$0xff] }
 0x180   :  { %493 = vst [vmem:[%s4212_s5 + $0xb0] sm:$0xff] %v429_v9  ;;  %v431_v48 = vmul.f32 %v2969_v33, %v2611_v38  ;;  %v2613_v13 = vpop.eup %2612  ;;  %2626 = vrsqrt.f32 %v311_v16  ;;  %v314_v49 = vmax.f32 %v222_v58, 1e-24  ;;  %v2982_v16 = vld [vmem:[%s4207_s0 + $0x138] sm:$0xff] }
 0x181   :  { %496 = vst [vmem:[%s4212_s5 + $0xc8] sm:$0xff] %v432_v40  ;;  %v2615_v50 = vpop.eup %2614  ;;  %v434_v10 = vmul.f32 %v2970_v52, %v2613_v13  ;;  %v220_v22 = vpop.xlane.xlu0 %219  ;;  %v2983_v52 = vld [vmem:[%s4207_s0 + $0x130] sm:$0xff] }
 0x182   :  { %495 = vst [vmem:[%s4212_s5 + $0xc0] sm:$0xff] %v431_v48  ;;  %v433_v19 = vmul.f32 %v2971_v51, %v2615_v50  ;;  %v313_v14 = vmax.f32 %v220_v22, 1e-24  ;;  %2628 = vrsqrt.f32 %v314_v49 }
 0x183   :  { %498 = vst [vmem:[%s4212_s5 + $0xd8] sm:$0xff] %v434_v10  ;;  %v2617_v7 = vpop.eup %2616  ;;  %v226_v62 = vpop.xlane.xlu1 %225 }
 0x184   :  { %497 = vst [vmem:[%s4212_s5 + $0xd0] sm:$0xff] %v433_v19  ;;  %2630 = vrsqrt.f32 %v313_v14  ;;  %v436_v47 = vmul.f32 %v2972_v53, %v2617_v7  ;;  %v316_v28 = vmax.f32 %v226_v62, 1e-24  ;;  %v2984_v14 = vld [vmem:[%s4207_s0 + $0x148] sm:$0xff]  ;;  %v2985_v53 = vld [vmem:[%s4207_s0 + $0x140] sm:$0xff] }
 0x185   :  { %v2619_v56 = vpop.eup %2618  ;;  %v224_v45 = vpop.xlane.xlu0 %223 }
 0x186   :  { %v435_v60 = vmul.f32 %v2973_v34, %v2619_v56  ;;  %v315_v21 = vmax.f32 %v224_v45, 1e-24  ;;  %500 = vst [vmem:[%s4212_s5 + $0xe8] sm:$0xff] %v436_v47  ;;  %2632 = vrsqrt.f32 %v316_v28 }
 0x187   :  { %v2621_v11 = vpop.eup %2620  ;;  %v230_v23 = vpop.xlane.xlu1 %229 }
 0x188   :  { %499 = vst [vmem:[%s4212_s5 + $0xe0] sm:$0xff] %v435_v60  ;;  %2634 = vrsqrt.f32 %v315_v21  ;;  %v438_v57 = vmul.f32 %v2974_v63, %v2621_v11  ;;  %v318_v12 = vmax.f32 %v230_v23, 1e-24  ;;  %v2986_v21 = vld [vmem:[%s4207_s0 + $0x158] sm:$0xff]  ;;  %v2987_v63 = vld [vmem:[%s4207_s0 + $0x150] sm:$0xff] }
 0x189   :  { %v2623_v20 = vpop.eup %2622  ;;  %v228_v59 = vpop.xlane.xlu0 %227 }
 0x18a   :  { %v437_v27 = vmul.f32 %v2975_v39, %v2623_v20  ;;  %v317_v4 = vmax.f32 %v228_v59, 1e-24  ;;  %502 = vst [vmem:[%s4212_s5 + $0xf8] sm:$0xff] %v438_v57  ;;  %2636 = vrsqrt.f32 %v318_v12 }
 0x18b   :  { %v2625_v61 = vpop.eup %2624  ;;  %v234_v29 = vpop.xlane.xlu1 %233 }
 0x18c   :  { %501 = vst [vmem:[%s4212_s5 + $0xf0] sm:$0xff] %v437_v27  ;;  %2638 = vrsqrt.f32 %v317_v4  ;;  %v440_v18 = vmul.f32 %v2976_v0, %v2625_v61  ;;  %v320_v54 = vmax.f32 %v234_v29, 1e-24  ;;  %v2988_v4 = vld [vmem:[%s4207_s0 + $0x168] sm:$0xff]  ;;  %v4016_v0 = vld [vmem:[%s4211_s4] ss:$0 sm:$0xff] }
 0x18d   :  { %v2627_v26 = vpop.eup %2626  ;;  %v232_v43 = vpop.xlane.xlu0 %231 }
 0x18e   :  { %v439_v24 = vmul.f32 %v2977_v17, %v2627_v26  ;;  %v319_v8 = vmax.f32 %v232_v43, 1e-24  ;;  %504 = vst [vmem:[%s4212_s5 + $0x108] sm:$0xff] %v440_v18  ;;  %2640 = vrsqrt.f32 %v320_v54  ;;  %v2989_v18 = vld [vmem:[%s4207_s0 + $0x160] sm:$0xff] }
 0x18f   :  { %v2629_v25 = vpop.eup %2628  ;;  %v238_v1 = vpop.xlane.xlu1 %237 }
 0x190   :  { %503 = vst [vmem:[%s4212_s5 + $0x100] sm:$0xff] %v439_v24  ;;  %2642 = vrsqrt.f32 %v319_v8  ;;  %v442_v2 = vmul.f32 %v2978_v32, %v2629_v25  ;;  %v322_v55 = vmax.f32 %v238_v1, 1e-24 }
 0x191   :  { %v2631_v35 = vpop.eup %2630  ;;  %v236_v5 = vpop.xlane.xlu0 %235 }
 0x192   :  { %v441_v31 = vmul.f32 %v2979_v30, %v2631_v35  ;;  %v321_v42 = vmax.f32 %v236_v5, 1e-24  ;;  %506 = vst [vmem:[%s4212_s5 + $0x118] sm:$0xff] %v442_v2  ;;  %2644 = vrsqrt.f32 %v322_v55  ;;  %v2990_v35 = vld [vmem:[%s4207_s0 + $0x178] sm:$0xff]  ;;  %v2991_v30 = vld [vmem:[%s4207_s0 + $0x170] sm:$0xff] }
 0x193   :  { %v2633_v36 = vpop.eup %2632  ;;  %v242_v37 = vpop.xlane.xlu1 %241 }
 0x194   :  { %505 = vst [vmem:[%s4212_s5 + $0x110] sm:$0xff] %v441_v31  ;;  %2646 = vrsqrt.f32 %v321_v42  ;;  %v444_v3 = vmul.f32 %v2980_v15, %v2633_v36  ;;  %v324_v46 = vmax.f32 %v242_v37, 1e-24 }
 0x195   :  { %v2635_v9 = vpop.eup %2634  ;;  %v240_v38 = vpop.xlane.xlu0 %239 }
 0x196   :  { %v443_v40 = vmul.f32 %v2981_v6, %v2635_v9  ;;  %v323_v41 = vmax.f32 %v240_v38, 1e-24  ;;  %508 = vst [vmem:[%s4212_s5 + $0x128] sm:$0xff] %v444_v3  ;;  %2648 = vrsqrt.f32 %v324_v46 }
 0x197   :  { %v2637_v44 = vpop.eup %2636  ;;  %v246_v33 = vpop.xlane.xlu1 %245 }
 0x198   :  { %507 = vst [vmem:[%s4212_s5 + $0x120] sm:$0xff] %v443_v40  ;;  %2650 = vrsqrt.f32 %v323_v41  ;;  %v446_v13 = vmul.f32 %v2982_v16, %v2637_v44  ;;  %v326_v58 = vmax.f32 %v246_v33, 1e-24  ;;  %v2992_v40 = vld [vmem:[%s4207_s0 + $0x188] sm:$0xff] }
 0x199   :  { %v2639_v48 = vpop.eup %2638  ;;  %v244_v50 = vpop.xlane.xlu0 %243 }
 0x19a   :  { %v445_v10 = vmul.f32 %v2983_v52, %v2639_v48  ;;  %v325_v49 = vmax.f32 %v244_v50, 1e-24  ;;  %510 = vst [vmem:[%s4212_s5 + $0x138] sm:$0xff] %v446_v13  ;;  %2652 = vrsqrt.f32 %v326_v58  ;;  %v2993_v48 = vld [vmem:[%s4207_s0 + $0x180] sm:$0xff] }
 0x19b   :  { %v2641_v22 = vpop.eup %2640  ;;  %v250_v51 = vpop.xlane.xlu1 %249 }
 0x19c   :  { %509 = vst [vmem:[%s4212_s5 + $0x130] sm:$0xff] %v445_v10  ;;  %2654 = vrsqrt.f32 %v325_v49  ;;  %v448_v7 = vmul.f32 %v2984_v14, %v2641_v22  ;;  %v328_v62 = vmax.f32 %v250_v51, 1e-24 }
 0x19d   :  { %v2643_v19 = vpop.eup %2642  ;;  %v248_v56 = vpop.xlane.xlu0 %247 }
 0x19e   :  { %v447_v47 = vmul.f32 %v2985_v53, %v2643_v19  ;;  %v327_v28 = vmax.f32 %v248_v56, 1e-24  ;;  %512 = vst [vmem:[%s4212_s5 + $0x148] sm:$0xff] %v448_v7  ;;  %2656 = vrsqrt.f32 %v328_v62  ;;  %v2994_v7 = vld [vmem:[%s4207_s0 + $0x198] sm:$0xff] }
 0x19f   :  { %v2645_v45 = vpop.eup %2644  ;;  %v254_v34 = vpop.xlane.xlu1 %253 }
 0x1a0   :  { %511 = vst [vmem:[%s4212_s5 + $0x140] sm:$0xff] %v447_v47  ;;  %2658 = vrsqrt.f32 %v327_v28  ;;  %v450_v11 = vmul.f32 %v2986_v21, %v2645_v45  ;;  %v330_v23 = vmax.f32 %v254_v34, 1e-24  ;;  %v2995_v47 = vld [vmem:[%s4207_s0 + $0x190] sm:$0xff] }
 0x1a1   :  { %v2647_v60 = vpop.eup %2646  ;;  %v252_v20 = vpop.xlane.xlu0 %251 }
 0x1a2   :  { %v449_v57 = vmul.f32 %v2987_v63, %v2647_v60  ;;  %v329_v12 = vmax.f32 %v252_v20, 1e-24  ;;  %514 = vst [vmem:[%s4212_s5 + $0x158] sm:$0xff] %v450_v11  ;;  %2660 = vrsqrt.f32 %v330_v23 }
 0x1a3   :  { %v2649_v59 = vpop.eup %2648  ;;  %v258_v39 = vpop.xlane.xlu1 %257 }
 0x1a4   :  { %513 = vst [vmem:[%s4212_s5 + $0x150] sm:$0xff] %v449_v57  ;;  %2662 = vrsqrt.f32 %v329_v12  ;;  %v452_v61 = vmul.f32 %v2988_v4, %v2649_v59  ;;  %v332_v29 = vmax.f32 %v258_v39, 1e-24  ;;  %v2996_v59 = vld [vmem:[%s4207_s0 + $0x1a8] sm:$0xff] }
 0x1a5   :  { %v2651_v27 = vpop.eup %2650  ;;  %v256_v26 = vpop.xlane.xlu0 %255 }
 0x1a6   :  { %v451_v54 = vmul.f32 %v2989_v18, %v2651_v27  ;;  %v331_v43 = vmax.f32 %v256_v26, 1e-24  ;;  %516 = vst [vmem:[%s4212_s5 + $0x168] sm:$0xff] %v452_v61  ;;  %2664 = vrsqrt.f32 %v332_v29  ;;  %v2997_v61 = vld [vmem:[%s4207_s0 + $0x1a0] sm:$0xff] }
 0x1a7   :  { %v2653_v17 = vpop.eup %2652  ;;  %v262_v8 = vpop.xlane.xlu1 %261 }
 0x1a8   :  { %515 = vst [vmem:[%s4212_s5 + $0x160] sm:$0xff] %v451_v54  ;;  %2666 = vrsqrt.f32 %v331_v43  ;;  %v454_v32 = vmul.f32 %v2990_v35, %v2653_v17  ;;  %v334_v2 = vmax.f32 %v262_v8, 1e-24 }
 0x1a9   :  { %v2655_v25 = vpop.eup %2654  ;;  %v260_v55 = vpop.xlane.xlu0 %259 }
 0x1aa   :  { %v453_v31 = vmul.f32 %v2991_v30, %v2655_v25  ;;  %v333_v42 = vmax.f32 %v260_v55, 1e-24  ;;  %518 = vst [vmem:[%s4212_s5 + $0x178] sm:$0xff] %v454_v32  ;;  %2668 = vrsqrt.f32 %v334_v2  ;;  %v2998_v32 = vld [vmem:[%s4207_s0 + $0x1b8] sm:$0xff]  ;;  %v2999_v30 = vld [vmem:[%s4207_s0 + $0x1b0] sm:$0xff] }
 0x1ab   :  { %v2657_v9 = vpop.eup %2656  ;;  %v266_v3 = vpop.xlane.xlu1 %265 }
 0x1ac   :  { %517 = vst [vmem:[%s4212_s5 + $0x170] sm:$0xff] %v453_v31  ;;  %2670 = vrsqrt.f32 %v333_v42  ;;  %v456_v41 = vmul.f32 %v2992_v40, %v2657_v9  ;;  %v336_v13 = vmax.f32 %v266_v3, 1e-24 }
 0x1ad   :  { %v2659_v46 = vpop.eup %2658  ;;  %v264_v44 = vpop.xlane.xlu0 %263 }
 0x1ae   :  { %v455_v16 = vmul.f32 %v2993_v48, %v2659_v46  ;;  %v335_v58 = vmax.f32 %v264_v44, 1e-24  ;;  %520 = vst [vmem:[%s4212_s5 + $0x188] sm:$0xff] %v456_v41 }
 0x1af   :  { %v2661_v10 = vpop.eup %2660  ;;  %v270_v22 = vpop.xlane.xlu1 %269 }
 0x1b0   :  { %519 = vst [vmem:[%s4212_s5 + $0x180] sm:$0xff] %v455_v16  ;;  %v458_v62 = vmul.f32 %v2994_v7, %v2661_v10  ;;  %v338_v45 = vmax.f32 %v270_v22, 1e-24 }
 0x1b1   :  { %v2663_v51 = vpop.eup %2662  ;;  %v268_v56 = vpop.xlane.xlu0 %267 }
 0x1b2   :  { %v457_v28 = vmul.f32 %v2995_v47, %v2663_v51  ;;  %v337_v34 = vmax.f32 %v268_v56, 1e-24  ;;  %522 = vst [vmem:[%s4212_s5 + $0x198] sm:$0xff] %v458_v62 }
 0x1b3   :  { %v2665_v11 = vpop.eup %2664  ;;  %v274_v20 = vpop.xlane.xlu1 %273 }
 0x1b4   :  { %521 = vst [vmem:[%s4212_s5 + $0x190] sm:$0xff] %v457_v28  ;;  %v460_v39 = vmul.f32 %v2996_v59, %v2665_v11  ;;  %v340_v26 = vmax.f32 %v274_v20, 1e-24 }
 0x1b5   :  { %v2667_v63 = vpop.eup %2666  ;;  %v272_v27 = vpop.xlane.xlu0 %271 }
 0x1b6   :  { %v2335_v24 = vpop.f32.mrf.mxu1  ;;  %v459_v29 = vmul.f32 %v2997_v61, %v2667_v63  ;;  %v339_v18 = vmax.f32 %v272_v27, 1e-24  ;;  %524 = vst [vmem:[%s4212_s5 + $0x1a8] sm:$0xff] %v460_v39 }
 0x1b7   :  { %v1166_v1 = vadd.f32 %v2335_v24, %v4016_v0  ;;  %v2669_v17 = vpop.eup %2668  ;;  %v278_v8 = vpop.xlane.xlu1 %277 }
 0x1b8   :  { %v1160_v5 = vpop.f32.mrf.mxu1  ;;  %523 = vst [vmem:[%s4212_s5 + $0x1a0] sm:$0xff] %v459_v29  ;;  %v462_v2 = vmul.f32 %v2998_v32, %v2669_v17  ;;  %v342_v42 = vmax.f32 %v278_v8, 1e-24 }
 0x1b9   :  { %v1950_v36 = vmul.f32 -1.442695, %v1166_v1  ;;  %v1161_v37 = vadd.f32 %v4016_v0, %v1160_v5  ;;  %v2671_v25 = vpop.eup %2670 }
 0x1ba   :  { %v2338_v15 = vpop.f32.mrf.mxu1  ;;  %v461_v31 = vmul.f32 %v2999_v30, %v2671_v25  ;;  %526 = vst [vmem:[%s4212_s5 + $0x1b8] sm:$0xff] %v462_v2 }
 0x1bb   :  { %2672 = vpow2.f32 %v1950_v36  ;;  %v1949_v38 = vmul.f32 -1.442695, %v1161_v37  ;;  %v1176_v6 = vadd.f32 %v2338_v15, %v4016_v0 }
 0x1bc   :  { %v1170_v33 = vpop.f32.mrf.mxu1  ;;  %525 = vst [vmem:[%s4212_s5 + $0x1b0] sm:$0xff] %v461_v31 }
 0x1bd   :  { %2674 = vpow2.f32 %v1949_v38  ;;  %v1952_v50 = vmul.f32 -1.442695, %v1176_v6  ;;  %v1171_v52 = vadd.f32 %v4016_v0, %v1170_v33  ;;  %v3000_v33 = vld [vmem:[%s4207_s0 + $0x1c8] sm:$0xff] }
 0x1be   :  { %v2341_v49 = vpop.f32.mrf.mxu1  ;;  %2676 = vrsqrt.f32 %v336_v13 }
 0x1bf   :  { %2678 = vpow2.f32 %v1952_v50  ;;  %v1951_v19 = vmul.f32 -1.442695, %v1171_v52  ;;  %v1186_v14 = vadd.f32 %v2341_v49, %v4016_v0  ;;  %v3001_v49 = vld [vmem:[%s4207_s0 + $0x1c0] sm:$0xff] }
 0x1c0   :  { %v1180_v53 = vpop.f32.mrf.mxu1  ;;  %2680 = vrsqrt.f32 %v335_v58 }
 0x1c1   :  { %2682 = vpow2.f32 %v1951_v19  ;;  %v1954_v60 = vmul.f32 -1.442695, %v1186_v14  ;;  %v1181_v21 = vadd.f32 %v4016_v0, %v1180_v53  ;;  %v3002_v53 = vld [vmem:[%s4207_s0 + $0x1d8] sm:$0xff] }
 0x1c2   :  { %v2344_v23 = vpop.f32.mrf.mxu1  ;;  %2684 = vrsqrt.f32 %v338_v45 }
 0x1c3   :  { %2686 = vpow2.f32 %v1954_v60  ;;  %v1953_v57 = vmul.f32 -1.442695, %v1181_v21  ;;  %v1196_v12 = vadd.f32 %v2344_v23, %v4016_v0  ;;  %v3003_v23 = vld [vmem:[%s4207_s0 + $0x1d0] sm:$0xff] }
 0x1c4   :  { %v1190_v4 = vpop.f32.mrf.mxu1  ;;  %2688 = vrsqrt.f32 %v337_v34 }
 0x1c5   :  { %2690 = vpow2.f32 %v1953_v57  ;;  %v1956_v54 = vmul.f32 -1.442695, %v1196_v12  ;;  %v1191_v43 = vadd.f32 %v4016_v0, %v1190_v4  ;;  %v3004_v4 = vld [vmem:[%s4207_s0 + $0x1e8] sm:$0xff] }
 0x1c6   :  { %v2347_v24 = vpop.f32.mrf.mxu1  ;;  %2692 = vrsqrt.f32 %v340_v26 }
 0x1c7   :  { %2694 = vpow2.f32 %v1956_v54  ;;  %v1955_v1 = vmul.f32 -1.442695, %v1191_v43  ;;  %v1206_v35 = vadd.f32 %v2347_v24, %v4016_v0  ;;  %v3005_v24 = vld [vmem:[%s4207_s0 + $0x1e0] sm:$0xff] }
 0x1c8   :  { %v2673_v55 = vpop.eup %2672  ;;  %v1200_v5 = vpop.f32.mrf.mxu1  ;;  %2696 = vrsqrt.f32 %v339_v18 }
 0x1c9   :  { %v1672_v36 = vadd.f32 1.0, %v2673_v55  ;;  %2698 = vpow2.f32 %v1955_v1  ;;  %v1958_v37 = vmul.f32 -1.442695, %v1206_v35  ;;  %v1201_v9 = vadd.f32 %v4016_v0, %v1200_v5  ;;  %v3006_v5 = vld [vmem:[%s4207_s0 + $0x1f8] sm:$0xff] }
 0x1ca   :  { %v2675_v15 = vpop.eup %2674  ;;  %v2350_v3 = vpop.f32.mrf.mxu1  ;;  %2700 = vrsqrt.f32 %v342_v42 }
 0x1cb   :  { %v2677_v46 = vpop.eup %2676  ;;  %2702 = vrcp.f32 %v1672_v36  ;;  %v1671_v38 = vadd.f32 1.0, %v2675_v15  ;;  %v1957_v6 = vmul.f32 -1.442695, %v1201_v9  ;;  %v1216_v40 = vadd.f32 %v2350_v3, %v4016_v0 }
 0x1cc   :  { %v2679_v41 = vpop.eup %2678  ;;  %2704 = vpow2.f32 %v1958_v37  ;;  %v1210_v44 = vpop.f32.mrf.mxu1  ;;  %v464_v48 = vmul.f32 %v3000_v33, %v2677_v46 }
 0x1cd   :  { %v2681_v16 = vpop.eup %2680  ;;  %2706 = vrcp.f32 %v1671_v38  ;;  %v1674_v13 = vadd.f32 1.0, %v2679_v41  ;;  %v1960_v58 = vmul.f32 -1.442695, %v1216_v40  ;;  %v1211_v50 = vadd.f32 %v4016_v0, %v1210_v44 }
 0x1ce   :  { %v2683_v52 = vpop.eup %2682  ;;  %2708 = vpow2.f32 %v1957_v6  ;;  %v2353_v10 = vpop.f32.mrf.mxu1  ;;  %528 = vst [vmem:[%s4212_s5 + $0x1c8] sm:$0xff] %v464_v48  ;;  %v463_v22 = vmul.f32 %v3001_v49, %v2681_v16 }
 0x1cf   :  { %v2685_v51 = vpop.eup %2684  ;;  %2710 = vrcp.f32 %v1674_v13  ;;  %v1673_v19 = vadd.f32 1.0, %v2683_v52  ;;  %v1959_v14 = vmul.f32 -1.442695, %v1211_v50  ;;  %v1226_v7 = vadd.f32 %v2353_v10, %v4016_v0 }
 0x1d0   :  { %v2687_v62 = vpop.eup %2686  ;;  %2712 = vpow2.f32 %v1960_v58  ;;  %v1220_v56 = vpop.f32.mrf.mxu1  ;;  %527 = vst [vmem:[%s4212_s5 + $0x1c0] sm:$0xff] %v463_v22  ;;  %v466_v47 = vmul.f32 %v3002_v53, %v2685_v51 }
 0x1d1   :  { %v2689_v28 = vpop.eup %2688  ;;  %2714 = vrcp.f32 %v1673_v19  ;;  %v1676_v45 = vadd.f32 1.0, %v2687_v62  ;;  %v1962_v34 = vmul.f32 -1.442695, %v1226_v7  ;;  %v1221_v60 = vadd.f32 %v4016_v0, %v1220_v56 }
 0x1d2   :  { %v2691_v21 = vpop.eup %2690  ;;  %2716 = vpow2.f32 %v1959_v14  ;;  %v2356_v11 = vpop.f32.mrf.mxu1  ;;  %530 = vst [vmem:[%s4212_s5 + $0x1d8] sm:$0xff] %v466_v47  ;;  %v465_v20 = vmul.f32 %v3003_v23, %v2689_v28 }
 0x1d3   :  { %v2693_v63 = vpop.eup %2692  ;;  %2718 = vrcp.f32 %v1676_v45  ;;  %v1675_v57 = vadd.f32 1.0, %v2691_v21  ;;  %v1961_v12 = vmul.f32 -1.442695, %v1221_v60  ;;  %v1236_v59 = vadd.f32 %v2356_v11, %v4016_v0 }
 0x1d4   :  { %v2695_v39 = vpop.eup %2694  ;;  %2720 = vpow2.f32 %v1962_v34  ;;  %v1230_v27 = vpop.f32.mrf.mxu1  ;;  %529 = vst [vmem:[%s4212_s5 + $0x1d0] sm:$0xff] %v465_v20  ;;  %v468_v61 = vmul.f32 %v3004_v4, %v2693_v63 }
 0x1d5   :  { %v2697_v29 = vpop.eup %2696  ;;  %2722 = vrcp.f32 %v1675_v57  ;;  %v1678_v26 = vadd.f32 1.0, %v2695_v39  ;;  %v1964_v18 = vmul.f32 -1.442695, %v1236_v59  ;;  %v1231_v54 = vadd.f32 %v4016_v0, %v1230_v27 }
 0x1d6   :  { %v2699_v43 = vpop.eup %2698  ;;  %2724 = vpow2.f32 %v1961_v12  ;;  %v2359_v17 = vpop.f32.mrf.mxu1  ;;  %532 = vst [vmem:[%s4212_s5 + $0x1e8] sm:$0xff] %v468_v61  ;;  %v467_v8 = vmul.f32 %v3005_v24, %v2697_v29 }
 0x1d7   :  { %v2701_v25 = vpop.eup %2700  ;;  %2726 = vrcp.f32 %v1678_v26  ;;  %v1677_v1 = vadd.f32 1.0, %v2699_v43  ;;  %v1963_v35 = vmul.f32 -1.442695, %v1231_v54  ;;  %v1246_v32 = vadd.f32 %v2359_v17, %v4016_v0 }
 0x1d8   :  { %v2703_v2 = vpop.eup %2702  ;;  %2728 = vpow2.f32 %v1964_v18  ;;  %v1240_v55 = vpop.f32.mrf.mxu1  ;;  %531 = vst [vmem:[%s4212_s5 + $0x1e0] sm:$0xff] %v467_v8  ;;  %v470_v30 = vmul.f32 %v3006_v5, %v2701_v25 }
 0x1d9   :  { %v2705_v31 = vpop.eup %2704  ;;  %1864 = vst [vmem:[#allocation2 + $0x8] sm:$0xff] %v2703_v2  ;;  %2730 = vrcp.f32 %v1677_v1  ;;  %v1966_v42 = vmul.f32 -1.442695, %v1246_v32  ;;  %v1241_v36 = vadd.f32 %v4016_v0, %v1240_v55 }
 0x1da   :  { %v2707_v37 = vpop.eup %2706  ;;  %v1680_v9 = vadd.f32 1.0, %v2705_v31  ;;  %2732 = vpow2.f32 %v1963_v35  ;;  %v2362_v15 = vpop.f32.mrf.mxu1  ;;  %534 = vst [vmem:[%s4212_s5 + $0x1f8] sm:$0xff] %v470_v30 }
 0x1db   :  { %v2709_v3 = vpop.eup %2708  ;;  %1863 = vst [vmem:[#allocation2] sm:$0xff] %v2707_v37  ;;  %2734 = vpow2.f32 %v1966_v42  ;;  %v1965_v46 = vmul.f32 -1.442695, %v1241_v36  ;;  %v1256_v38 = vadd.f32 %v2362_v15, %v4016_v0 }
 0x1dc   :  { %v2711_v6 = vpop.eup %2710  ;;  %2736 = vrcp.f32 %v1680_v9  ;;  %v1679_v40 = vadd.f32 1.0, %v2709_v3  ;;  %v1250_v41 = vpop.f32.mrf.mxu1 }
 0x1dd   :  { %v2713_v44 = vpop.eup %2712  ;;  %1866 = vst [vmem:[#allocation2 + $0x18] sm:$0xff] %v2711_v6  ;;  %2738 = vpow2.f32 %v1965_v46  ;;  %v1968_v33 = vmul.f32 -1.442695, %v1256_v38  ;;  %v1251_v48 = vadd.f32 %v4016_v0, %v1250_v41 }
 0x1de   :  { %v2715_v16 = vpop.eup %2714  ;;  %2740 = vrcp.f32 %v1679_v40  ;;  %v1682_v13 = vadd.f32 1.0, %v2713_v44  ;;  %v2365_v58 = vpop.f32.mrf.mxu1 }
 0x1df   :  { %v2717_v50 = vpop.eup %2716  ;;  %1865 = vst [vmem:[#allocation2 + $0x10] sm:$0xff] %v2715_v16  ;;  %2742 = vpow2.f32 %v1968_v33  ;;  %v1967_v52 = vmul.f32 -1.442695, %v1251_v48  ;;  %v1266_v10 = vadd.f32 %v2365_v58, %v4016_v0 }
 0x1e0   :  { %v2719_v49 = vpop.eup %2718  ;;  %2744 = vrcp.f32 %v1682_v13  ;;  %v1681_v22 = vadd.f32 1.0, %v2717_v50  ;;  %v1260_v51 = vpop.f32.mrf.mxu1 }
 0x1e1   :  { %v2721_v19 = vpop.eup %2720  ;;  %1868 = vst [vmem:[#allocation2 + $0x28] sm:$0xff] %v2719_v49  ;;  %2746 = vpow2.f32 %v1967_v52  ;;  %v1970_v14 = vmul.f32 -1.442695, %v1266_v10  ;;  %v1261_v7 = vadd.f32 %v4016_v0, %v1260_v51 }
 0x1e2   :  { %v2723_v62 = vpop.eup %2722  ;;  %2748 = vrcp.f32 %v1681_v22  ;;  %v1684_v56 = vadd.f32 1.0, %v2721_v19  ;;  %v2368_v53 = vpop.f32.mrf.mxu1 }
 0x1e3   :  { %v2725_v47 = vpop.eup %2724  ;;  %1867 = vst [vmem:[#allocation2 + $0x20] sm:$0xff] %v2723_v62  ;;  %2750 = vpow2.f32 %v1970_v14  ;;  %v1969_v28 = vmul.f32 -1.442695, %v1261_v7  ;;  %v1276_v45 = vadd.f32 %v2368_v53, %v4016_v0 }
 0x1e4   :  { %v2727_v34 = vpop.eup %2726  ;;  %2752 = vrcp.f32 %v1684_v56  ;;  %v1683_v60 = vadd.f32 1.0, %v2725_v47  ;;  %v1270_v21 = vpop.f32.mrf.mxu1 }
 0x1e5   :  { %v2729_v11 = vpop.eup %2728  ;;  %1870 = vst [vmem:[#allocation2 + $0x38] sm:$0xff] %v2727_v34  ;;  %2754 = vpow2.f32 %v1969_v28  ;;  %v1972_v23 = vmul.f32 -1.442695, %v1276_v45  ;;  %v1271_v20 = vadd.f32 %v4016_v0, %v1270_v21 }
 0x1e6   :  { %v2731_v63 = vpop.eup %2730  ;;  %2756 = vrcp.f32 %v1683_v60  ;;  %v1686_v57 = vadd.f32 1.0, %v2729_v11  ;;  %v2371_v12 = vpop.f32.mrf.mxu1 }
 0x1e7   :  { %v2733_v59 = vpop.eup %2732  ;;  %1869 = vst [vmem:[#allocation2 + $0x30] sm:$0xff] %v2731_v63  ;;  %2758 = vpow2.f32 %v1972_v23  ;;  %v1971_v39 = vmul.f32 -1.442695, %v1271_v20  ;;  %v1286_v27 = vadd.f32 %v2371_v12, %v4016_v0 }
 0x1e8   :  { %v2735_v4 = vpop.eup %2734  ;;  %2760 = vrcp.f32 %v1686_v57  ;;  %v1685_v61 = vadd.f32 1.0, %v2733_v59  ;;  %v1280_v29 = vpop.f32.mrf.mxu1 }
 0x1e9   :  { %v2737_v26 = vpop.eup %2736  ;;  %v1688_v18 = vadd.f32 1.0, %v2735_v4  ;;  %2762 = vpow2.f32 %v1971_v39  ;;  %v1974_v54 = vmul.f32 -1.442695, %v1286_v27  ;;  %v1281_v43 = vadd.f32 %v4016_v0, %v1280_v29 }
 0x1ea   :  { %v2739_v17 = vpop.eup %2738  ;;  %1872 = vst [vmem:[#allocation2 + $0x48] sm:$0xff] %v2737_v26  ;;  %2764 = vrcp.f32 %v1685_v61  ;;  %v2374_v24 = vpop.f32.mrf.mxu1 }
 0x1eb   :  { %v2741_v8 = vpop.eup %2740  ;;  %2766 = vrcp.f32 %v1688_v18  ;;  %v1687_v25 = vadd.f32 1.0, %v2739_v17  ;;  %v1973_v1 = vmul.f32 -1.442695, %v1281_v43  ;;  %v1296_v35 = vadd.f32 %v2374_v24, %v4016_v0 }
 0x1ec   :  { %v2743_v32 = vpop.eup %2742  ;;  %1871 = vst [vmem:[#allocation2 + $0x40] sm:$0xff] %v2741_v8  ;;  %2768 = vpow2.f32 %v1974_v54  ;;  %v1290_v2 = vpop.f32.mrf.mxu1 }
 0x1ed   :  { %v2745_v55 = vpop.eup %2744  ;;  %2770 = vrcp.f32 %v1687_v25  ;;  %v1690_v5 = vadd.f32 1.0, %v2743_v32  ;;  %v1976_v30 = vmul.f32 -1.442695, %v1296_v35  ;;  %v1291_v31 = vadd.f32 %v4016_v0, %v1290_v2 }
 0x1ee   :  { %v2747_v42 = vpop.eup %2746  ;;  %1874 = vst [vmem:[#allocation2 + $0x58] sm:$0xff] %v2745_v55  ;;  %2772 = vpow2.f32 %v1973_v1  ;;  %v2377_v36 = vpop.f32.mrf.mxu1 }
 0x1ef   :  { %v2749_v37 = vpop.eup %2748  ;;  %2774 = vrcp.f32 %v1690_v5  ;;  %v1689_v9 = vadd.f32 1.0, %v2747_v42  ;;  %v1975_v15 = vmul.f32 -1.442695, %v1291_v31  ;;  %v1306_v3 = vadd.f32 %v2377_v36, %v4016_v0 }
 0x1f0   :  { %v2751_v46 = vpop.eup %2750  ;;  %1873 = vst [vmem:[#allocation2 + $0x50] sm:$0xff] %v2749_v37  ;;  %2776 = vpow2.f32 %v1976_v30  ;;  %v1300_v38 = vpop.f32.mrf.mxu1 }
 0x1f1   :  { %v2753_v6 = vpop.eup %2752  ;;  %2778 = vrcp.f32 %v1689_v9  ;;  %v1692_v40 = vadd.f32 1.0, %v2751_v46  ;;  %v1978_v41 = vmul.f32 -1.442695, %v1306_v3  ;;  %v1301_v44 = vadd.f32 %v4016_v0, %v1300_v38 }
 0x1f2   :  { %v2755_v33 = vpop.eup %2754  ;;  %1876 = vst [vmem:[#allocation2 + $0x68] sm:$0xff] %v2753_v6  ;;  %2780 = vpow2.f32 %v1975_v15  ;;  %v2380_v48 = vpop.f32.mrf.mxu1 }
 0x1f3   :  { %v2757_v16 = vpop.eup %2756  ;;  %2782 = vrcp.f32 %v1692_v40  ;;  %v1691_v13 = vadd.f32 1.0, %v2755_v33  ;;  %v1977_v58 = vmul.f32 -1.442695, %v1301_v44  ;;  %v1316_v50 = vadd.f32 %v2380_v48, %v4016_v0 }
 0x1f4   :  { %v2759_v52 = vpop.eup %2758  ;;  %1875 = vst [vmem:[#allocation2 + $0x60] sm:$0xff] %v2757_v16  ;;  %2784 = vpow2.f32 %v1978_v41  ;;  %v1310_v10 = vpop.f32.mrf.mxu1 }
 0x1f5   :  { %v2761_v49 = vpop.eup %2760  ;;  %2786 = vrcp.f32 %v1691_v13  ;;  %v1694_v22 = vadd.f32 1.0, %v2759_v52  ;;  %v1980_v51 = vmul.f32 -1.442695, %v1316_v50  ;;  %v1311_v19 = vadd.f32 %v4016_v0, %v1310_v10 }
 0x1f6   :  { %v2763_v14 = vpop.eup %2762  ;;  %1878 = vst [vmem:[#allocation2 + $0x78] sm:$0xff] %v2761_v49  ;;  %2788 = vpow2.f32 %v1977_v58  ;;  %v2383_v7 = vpop.f32.mrf.mxu1 }
 0x1f7   :  { %v2765_v62 = vpop.eup %2764  ;;  %2790 = vrcp.f32 %v1694_v22  ;;  %v1693_v56 = vadd.f32 1.0, %v2763_v14  ;;  %v1979_v53 = vmul.f32 -1.442695, %v1311_v19  ;;  %v1326_v47 = vadd.f32 %v2383_v7, %v4016_v0 }
 0x1f8   :  { %v2767_v28 = vpop.eup %2766  ;;  %1877 = vst [vmem:[#allocation2 + $0x70] sm:$0xff] %v2765_v62  ;;  %2792 = vpow2.f32 %v1980_v51  ;;  %v1320_v45 = vpop.f32.mrf.mxu1 }
 0x1f9   :  { %v2769_v34 = vpop.eup %2768  ;;  %1880 = vst [vmem:[#allocation2 + $0x88] sm:$0xff] %v2767_v28  ;;  %2794 = vrcp.f32 %v1693_v56  ;;  %v1982_v60 = vmul.f32 -1.442695, %v1326_v47  ;;  %v1321_v21 = vadd.f32 %v4016_v0, %v1320_v45 }
 0x1fa   :  { %v2771_v11 = vpop.eup %2770  ;;  %v1696_v23 = vadd.f32 1.0, %v2769_v34  ;;  %2796 = vpow2.f32 %v1979_v53  ;;  %v2386_v20 = vpop.f32.mrf.mxu1 }
 0x1fb   :  { %v2773_v63 = vpop.eup %2772  ;;  %1879 = vst [vmem:[#allocation2 + $0x80] sm:$0xff] %v2771_v11  ;;  %2798 = vpow2.f32 %v1982_v60  ;;  %v1981_v57 = vmul.f32 -1.442695, %v1321_v21  ;;  %v1336_v12 = vadd.f32 %v2386_v20, %v4016_v0 }
 0x1fc   :  { %v2775_v59 = vpop.eup %2774  ;;  %2800 = vrcp.f32 %v1696_v23  ;;  %v1695_v39 = vadd.f32 1.0, %v2773_v63  ;;  %v1330_v27 = vpop.f32.mrf.mxu1 }
 0x1fd   :  { %v2777_v4 = vpop.eup %2776  ;;  %1882 = vst [vmem:[#allocation2 + $0x98] sm:$0xff] %v2775_v59  ;;  %2802 = vpow2.f32 %v1981_v57  ;;  %v1984_v61 = vmul.f32 -1.442695, %v1336_v12  ;;  %v1331_v29 = vadd.f32 %v4016_v0, %v1330_v27 }
 0x1fe   :  { %v2779_v26 = vpop.eup %2778  ;;  %2804 = vrcp.f32 %v1695_v39  ;;  %v1698_v18 = vadd.f32 1.0, %v2777_v4  ;;  %v2389_v54 = vpop.f32.mrf.mxu1 }
 0x1ff   :  { %v2781_v43 = vpop.eup %2780  ;;  %1881 = vst [vmem:[#allocation2 + $0x90] sm:$0xff] %v2779_v26  ;;  %2806 = vpow2.f32 %v1984_v61  ;;  %v1983_v17 = vmul.f32 -1.442695, %v1331_v29  ;;  %v1346_v24 = vadd.f32 %v2389_v54, %v4016_v0 }
 0x200   :  { %v2783_v8 = vpop.eup %2782  ;;  %2808 = vrcp.f32 %v1698_v18  ;;  %v1697_v25 = vadd.f32 1.0, %v2781_v43  ;;  %v1340_v1 = vpop.f32.mrf.mxu1 }
 0x201   :  { %v2785_v35 = vpop.eup %2784  ;;  %1884 = vst [vmem:[#allocation2 + $0xa8] sm:$0xff] %v2783_v8  ;;  %2810 = vpow2.f32 %v1983_v17  ;;  %v1986_v32 = vmul.f32 -1.442695, %v1346_v24  ;;  %v1341_v2 = vadd.f32 %v4016_v0, %v1340_v1 }
 0x202   :  { %v2787_v55 = vpop.eup %2786  ;;  %2812 = vrcp.f32 %v1697_v25  ;;  %v1700_v5 = vadd.f32 1.0, %v2785_v35  ;;  %v2392_v30 = vpop.f32.mrf.mxu1 }
 0x203   :  { %v2789_v31 = vpop.eup %2788  ;;  %1883 = vst [vmem:[#allocation2 + $0xa0] sm:$0xff] %v2787_v55  ;;  %2814 = vpow2.f32 %v1986_v32  ;;  %v1985_v42 = vmul.f32 -1.442695, %v1341_v2  ;;  %v1356_v36 = vadd.f32 %v2392_v30, %v4016_v0 }
 0x204   :  { %v2791_v37 = vpop.eup %2790  ;;  %2816 = vrcp.f32 %v1700_v5  ;;  %v1699_v9 = vadd.f32 1.0, %v2789_v31  ;;  %v1350_v15 = vpop.f32.mrf.mxu1 }
 0x205   :  { %v2793_v3 = vpop.eup %2792  ;;  %1886 = vst [vmem:[#allocation2 + $0xb8] sm:$0xff] %v2791_v37  ;;  %2818 = vpow2.f32 %v1985_v42  ;;  %v1988_v46 = vmul.f32 -1.442695, %v1356_v36  ;;  %v1351_v38 = vadd.f32 %v4016_v0, %v1350_v15 }
 0x206   :  { %v2795_v6 = vpop.eup %2794  ;;  %2820 = vrcp.f32 %v1699_v9  ;;  %v1702_v40 = vadd.f32 1.0, %v2793_v3  ;;  %v2395_v41 = vpop.f32.mrf.mxu1 }
 0x207   :  { %v2797_v44 = vpop.eup %2796  ;;  %1885 = vst [vmem:[#allocation2 + $0xb0] sm:$0xff] %v2795_v6  ;;  %2822 = vpow2.f32 %v1988_v46  ;;  %v1987_v33 = vmul.f32 -1.442695, %v1351_v38  ;;  %v1366_v48 = vadd.f32 %v2395_v41, %v4016_v0 }
 0x208   :  { %v2799_v16 = vpop.eup %2798  ;;  %2824 = vrcp.f32 %v1702_v40  ;;  %v1701_v13 = vadd.f32 1.0, %v2797_v44  ;;  %v1360_v58 = vpop.f32.mrf.mxu1 }
 0x209   :  { %v2801_v50 = vpop.eup %2800  ;;  %v1704_v52 = vadd.f32 1.0, %v2799_v16  ;;  %2826 = vpow2.f32 %v1987_v33  ;;  %v1990_v10 = vmul.f32 -1.442695, %v1366_v48  ;;  %v1361_v49 = vadd.f32 %v4016_v0, %v1360_v58 }
 0x20a   :  { %v2803_v22 = vpop.eup %2802  ;;  %1888 = vst [vmem:[#allocation2 + $0xc8] sm:$0xff] %v2801_v50  ;;  %2828 = vrcp.f32 %v1701_v13  ;;  %v2398_v51 = vpop.f32.mrf.mxu1 }
 0x20b   :  { %v2805_v19 = vpop.eup %2804  ;;  %2830 = vrcp.f32 %v1704_v52  ;;  %v1703_v14 = vadd.f32 1.0, %v2803_v22  ;;  %v1989_v7 = vmul.f32 -1.442695, %v1361_v49  ;;  %v1376_v62 = vadd.f32 %v2398_v51, %v4016_v0 }
 0x20c   :  { %v2807_v56 = vpop.eup %2806  ;;  %1887 = vst [vmem:[#allocation2 + $0xc0] sm:$0xff] %v2805_v19  ;;  %2832 = vpow2.f32 %v1990_v10  ;;  %v1370_v53 = vpop.f32.mrf.mxu1 }
 0x20d   :  { %v2809_v47 = vpop.eup %2808  ;;  %2834 = vrcp.f32 %v1703_v14  ;;  %v1706_v28 = vadd.f32 1.0, %v2807_v56  ;;  %v1992_v45 = vmul.f32 -1.442695, %v1376_v62  ;;  %v1371_v34 = vadd.f32 %v4016_v0, %v1370_v53 }
 0x20e   :  { %v2811_v60 = vpop.eup %2810  ;;  %1890 = vst [vmem:[#allocation2 + $0xd8] sm:$0xff] %v2809_v47  ;;  %2836 = vpow2.f32 %v1989_v7  ;;  %v2401_v21 = vpop.f32.mrf.mxu1 }
 0x20f   :  { %v2813_v11 = vpop.eup %2812  ;;  %2838 = vrcp.f32 %v1706_v28  ;;  %v1705_v23 = vadd.f32 1.0, %v2811_v60  ;;  %v1991_v20 = vmul.f32 -1.442695, %v1371_v34  ;;  %v1386_v63 = vadd.f32 %v2401_v21, %v4016_v0  ;;  %v4186_v21 = vld [vmem:[%s4211_s4] ss:$0 sm:$0xff] }
 0x210   :  { %v2815_v57 = vpop.eup %2814  ;;  %1889 = vst [vmem:[#allocation2 + $0xd0] sm:$0xff] %v2813_v11  ;;  %2840 = vpow2.f32 %v1992_v45  ;;  %v1380_v12 = vpop.f32.mrf.mxu1 }
 0x211   :  { %v2817_v59 = vpop.eup %2816  ;;  %2842 = vrcp.f32 %v1705_v23  ;;  %v1708_v39 = vadd.f32 1.0, %v2815_v57  ;;  %v1994_v27 = vmul.f32 -1.442695, %v1386_v63  ;;  %v1381_v4 = vadd.f32 %v4016_v0, %v1380_v12 }
 0x212   :  { %v2819_v61 = vpop.eup %2818  ;;  %1892 = vst [vmem:[#allocation2 + $0xe8] sm:$0xff] %v2817_v59  ;;  %2844 = vpow2.f32 %v1991_v20  ;;  %v2404_v29 = vpop.f32.mrf.mxu1 }
 0x213   :  { %v2821_v26 = vpop.eup %2820  ;;  %2846 = vrcp.f32 %v1708_v39  ;;  %v1707_v18 = vadd.f32 1.0, %v2819_v61  ;;  %v1993_v54 = vmul.f32 -1.442695, %v1381_v4  ;;  %v1396_v43 = vadd.f32 %v2404_v29, %v4016_v0 }
 0x214   :  { %v2823_v17 = vpop.eup %2822  ;;  %1891 = vst [vmem:[#allocation2 + $0xe0] sm:$0xff] %v2821_v26  ;;  %2848 = vpow2.f32 %v1994_v27  ;;  %v1390_v24 = vpop.f32.mrf.mxu1 }
 0x215   :  { %v2825_v8 = vpop.eup %2824  ;;  %2850 = vrcp.f32 %v1707_v18  ;;  %v1710_v25 = vadd.f32 1.0, %v2823_v17  ;;  %v1996_v1 = vmul.f32 -1.442695, %v1396_v43  ;;  %v1391_v35 = vadd.f32 %v4016_v0, %v1390_v24 }
 0x216   :  { %v2827_v32 = vpop.eup %2826  ;;  %1894 = vst [vmem:[#allocation2 + $0xf8] sm:$0xff] %v2825_v8  ;;  %2852 = vpow2.f32 %v1993_v54  ;;  %v2407_v2 = vpop.f32.mrf.mxu1 }
 0x217   :  { %v2829_v55 = vpop.eup %2828  ;;  %2854 = vrcp.f32 %v1710_v25  ;;  %v1709_v5 = vadd.f32 1.0, %v2827_v32  ;;  %v1995_v30 = vmul.f32 -1.442695, %v1391_v35  ;;  %v1406_v31 = vadd.f32 %v2407_v2, %v4016_v0 }
 0x218   :  { %v2831_v42 = vpop.eup %2830  ;;  %1893 = vst [vmem:[#allocation2 + $0xf0] sm:$0xff] %v2829_v55  ;;  %2856 = vpow2.f32 %v1996_v1  ;;  %v1400_v36 = vpop.f32.mrf.mxu1 }
 0x219   :  { %v2833_v37 = vpop.eup %2832  ;;  %1896 = vst [vmem:[#allocation2 + $0x108] sm:$0xff] %v2831_v42  ;;  %2858 = vrcp.f32 %v1709_v5  ;;  %v1998_v9 = vmul.f32 -1.442695, %v1406_v31  ;;  %v1401_v15 = vadd.f32 %v4016_v0, %v1400_v36 }
 0x21a   :  { %v2835_v3 = vpop.eup %2834  ;;  %v1712_v46 = vadd.f32 1.0, %v2833_v37  ;;  %2860 = vpow2.f32 %v1995_v30  ;;  %v2410_v38 = vpop.f32.mrf.mxu1 }
 0x21b   :  { %v2837_v6 = vpop.eup %2836  ;;  %1895 = vst [vmem:[#allocation2 + $0x100] sm:$0xff] %v2835_v3  ;;  %2862 = vpow2.f32 %v1998_v9  ;;  %v1997_v40 = vmul.f32 -1.442695, %v1401_v15  ;;  %v1416_v41 = vadd.f32 %v2410_v38, %v4016_v0 }
 0x21c   :  { %v2839_v44 = vpop.eup %2838  ;;  %2864 = vrcp.f32 %v1712_v46  ;;  %v1711_v33 = vadd.f32 1.0, %v2837_v6  ;;  %v1410_v48 = vpop.f32.mrf.mxu1 }
 0x21d   :  { %v2841_v16 = vpop.eup %2840  ;;  %1898 = vst [vmem:[#allocation2 + $0x118] sm:$0xff] %v2839_v44  ;;  %2866 = vpow2.f32 %v1997_v40  ;;  %v2000_v13 = vmul.f32 -1.442695, %v1416_v41  ;;  %v1411_v58 = vadd.f32 %v4016_v0, %v1410_v48 }
 0x21e   :  { %v2843_v50 = vpop.eup %2842  ;;  %2868 = vrcp.f32 %v1711_v33  ;;  %v1714_v52 = vadd.f32 1.0, %v2841_v16  ;;  %v2413_v10 = vpop.f32.mrf.mxu1 }
 0x21f   :  { %v2845_v49 = vpop.eup %2844  ;;  %1897 = vst [vmem:[#allocation2 + $0x110] sm:$0xff] %v2843_v50  ;;  %2870 = vpow2.f32 %v2000_v13  ;;  %v1999_v22 = vmul.f32 -1.442695, %v1411_v58  ;;  %v1426_v51 = vadd.f32 %v2413_v10, %v4016_v0 }
 0x220   :  { %v2847_v19 = vpop.eup %2846  ;;  %2872 = vrcp.f32 %v1714_v52  ;;  %v1713_v14 = vadd.f32 1.0, %v2845_v49  ;;  %v1420_v7 = vpop.f32.mrf.mxu1 }
 0x221   :  { %v2849_v62 = vpop.eup %2848  ;;  %1900 = vst [vmem:[#allocation2 + $0x128] sm:$0xff] %v2847_v19  ;;  %2874 = vpow2.f32 %v1999_v22  ;;  %v2002_v56 = vmul.f32 -1.442695, %v1426_v51  ;;  %v1421_v53 = vadd.f32 %v4016_v0, %v1420_v7  ;;  %v276_v19 = vpop.xlane.xlu0 %275 }
 0x222   :  { %v2851_v47 = vpop.eup %2850  ;;  %2876 = vrcp.f32 %v1713_v14  ;;  %v1716_v28 = vadd.f32 1.0, %v2849_v62  ;;  %v2416_v45 = vpop.f32.mrf.mxu1 }
 0x223   :  { %v2853_v34 = vpop.eup %2852  ;;  %1899 = vst [vmem:[#allocation2 + $0x120] sm:$0xff] %v2851_v47  ;;  %2878 = vpow2.f32 %v2002_v56  ;;  %v2001_v60 = vmul.f32 -1.442695, %v1421_v53  ;;  %v1436_v11 = vadd.f32 %v4186_v21, %v2416_v45 }
 0x224   :  { %v2855_v23 = vpop.eup %2854  ;;  %2880 = vrcp.f32 %v1716_v28  ;;  %v1715_v20 = vadd.f32 1.0, %v2853_v34  ;;  %v1430_v63 = vpop.f32.mrf.mxu1  ;;  %v341_v34 = vmax.f32 %v276_v19, 1e-24 }
 0x225   :  { %v2857_v0 = vpop.eup %2856  ;;  %1902 = vst [vmem:[#allocation2 + $0x138] sm:$0xff] %v2855_v23  ;;  %2882 = vpow2.f32 %v2001_v60  ;;  %v2004_v57 = vmul.f32 -1.442695, %v1436_v11  ;;  %v1431_v12 = vadd.f32 %v4186_v21, %v1430_v63 }
 0x226   :  { %v2859_v59 = vpop.eup %2858  ;;  %2884 = vrcp.f32 %v1715_v20  ;;  %v1718_v39 = vadd.f32 1.0, %v2857_v0  ;;  %v2419_v27 = vpop.f32.mrf.mxu1 }
 0x227   :  { %v2861_v4 = vpop.eup %2860  ;;  %1901 = vst [vmem:[#allocation2 + $0x130] sm:$0xff] %v2859_v59  ;;  %2886 = vpow2.f32 %v2004_v57  ;;  %v2003_v61 = vmul.f32 -1.442695, %v1431_v12  ;;  %v1446_v29 = vadd.f32 %v4186_v21, %v2419_v27 }
 0x228   :  { %v2863_v26 = vpop.eup %2862  ;;  %2888 = vrcp.f32 %v1718_v39  ;;  %v1717_v18 = vadd.f32 1.0, %v2861_v4  ;;  %v1440_v54 = vpop.f32.mrf.mxu1 }
 0x229   :  { %v2865_v43 = vpop.eup %2864  ;;  %v1720_v17 = vadd.f32 1.0, %v2863_v26  ;;  %2890 = vpow2.f32 %v2003_v61  ;;  %v2006_v24 = vmul.f32 -1.442695, %v1446_v29  ;;  %v1441_v8 = vadd.f32 %v4186_v21, %v1440_v54 }
 0x22a   :  { %v2867_v25 = vpop.eup %2866  ;;  %1904 = vst [vmem:[#allocation2 + $0x148] sm:$0xff] %v2865_v43  ;;  %2892 = vrcp.f32 %v1717_v18  ;;  %v2422_v1 = vpop.f32.mrf.mxu1 }
 0x22b   :  { %v2869_v35 = vpop.eup %2868  ;;  %2894 = vrcp.f32 %v1720_v17  ;;  %v1719_v32 = vadd.f32 1.0, %v2867_v25  ;;  %v2005_v2 = vmul.f32 -1.442695, %v1441_v8  ;;  %v1456_v55 = vadd.f32 %v4186_v21, %v2422_v1 }
 0x22c   :  { %v2871_v5 = vpop.eup %2870  ;;  %1903 = vst [vmem:[#allocation2 + $0x140] sm:$0xff] %v2869_v35  ;;  %2896 = vpow2.f32 %v2006_v24  ;;  %v1450_v30 = vpop.f32.mrf.mxu1 }
 0x22d   :  { %v2873_v31 = vpop.eup %2872  ;;  %2898 = vrcp.f32 %v1719_v32  ;;  %v1722_v42 = vadd.f32 1.0, %v2871_v5  ;;  %v2008_v36 = vmul.f32 -1.442695, %v1456_v55  ;;  %v1451_v37 = vadd.f32 %v4186_v21, %v1450_v30 }
 0x22e   :  { %v2875_v9 = vpop.eup %2874  ;;  %1906 = vst [vmem:[#allocation2 + $0x158] sm:$0xff] %v2873_v31  ;;  %2900 = vpow2.f32 %v2005_v2  ;;  %v2425_v15 = vpop.f32.mrf.mxu1  ;;  %v3008_v2 = vld [vmem:[%s4207_s0 + $0x1f0] sm:$0xff]  ;;  %s3009_s0 = scalar_lea.vmem %s1935_s30, 8192 }
 0x22f   :  { %v2877_v3 = vpop.eup %2876  ;;  %2902 = vrcp.f32 %v1722_v42  ;;  %v1721_v46 = vadd.f32 1.0, %v2875_v9  ;;  %v2007_v38 = vmul.f32 -1.442695, %v1451_v37  ;;  %v1466_v6 = vadd.f32 %v4186_v21, %v2425_v15  ;;  %p3010_p0 = scmp.ne.s32.totalorder %s1935_s30, %s3009_s0  ;;  %p3015_p2 = scmp.lt.s32.totalorder %s3009_s0, %s3009_s0 }
 0x230   :  { %v2879_v40 = vpop.eup %2878  ;;  %1905 = vst [vmem:[#allocation2 + $0x150] sm:$0xff] %v2877_v3  ;;  %2904 = vpow2.f32 %v2008_v36  ;;  %v1460_v41 = vpop.f32.mrf.mxu1 }
 0x231   :  { %v2881_v44 = vpop.eup %2880  ;;  %2906 = vrcp.f32 %v1721_v46  ;;  %v1724_v33 = vadd.f32 1.0, %v2879_v40  ;;  %v2010_v48 = vmul.f32 -1.442695, %v1466_v6  ;;  %v1461_v16 = vadd.f32 %v4186_v21, %v1460_v41  ;;  %p3016_p3 = por %p3015_p2, %p3014_p1 }
 0x232   :  { %v2883_v13 = vpop.eup %2882  ;;  %1908 = vst [vmem:[#allocation2 + $0x168] sm:$0xff] %v2881_v44  ;;  %2908 = vpow2.f32 %v2007_v38  ;;  %v2428_v58 = vpop.f32.mrf.mxu1 }
 0x233   :  { %v2885_v50 = vpop.eup %2884  ;;  %2910 = vrcp.f32 %v1724_v33  ;;  %v1723_v52 = vadd.f32 1.0, %v2883_v13  ;;  %v2009_v10 = vmul.f32 -1.442695, %v1461_v16  ;;  %v1476_v49 = vadd.f32 %v4186_v21, %v2428_v58  ;;  %p3017_p4 = pnand %p3016_p3, %p3010_p0 }
 0x234   :  { %v2887_v22 = vpop.eup %2886  ;;  %1907 = vst [vmem:[#allocation2 + $0x160] sm:$0xff] %v2885_v50  ;;  %2912 = vpow2.f32 %v2010_v48  ;;  %v1470_v51 = vpop.f32.mrf.mxu1 }
 0x235   :  { %v2889_v14 = vpop.eup %2888  ;;  %2914 = vrcp.f32 %v1723_v52  ;;  %v1726_v7 = vadd.f32 1.0, %v2887_v22  ;;  %v2012_v62 = vmul.f32 -1.442695, %v1476_v49  ;;  %v1471_v56 = vadd.f32 %v4186_v21, %v1470_v51 }
 0x236   :  { %v2891_v53 = vpop.eup %2890  ;;  %1910 = vst [vmem:[#allocation2 + $0x178] sm:$0xff] %v2889_v14  ;;  %2916 = vpow2.f32 %v2009_v10 }
 0x237   :  { %v2893_v47 = vpop.eup %2892  ;;  %2918 = vrcp.f32 %v1726_v7  ;;  %v1725_v28 = vadd.f32 1.0, %v2891_v53  ;;  %v2011_v45 = vmul.f32 -1.442695, %v1471_v56 }
 0x238   :  { %v2895_v60 = vpop.eup %2894  ;;  %1909 = vst [vmem:[#allocation2 + $0x170] sm:$0xff] %v2893_v47  ;;  %2920 = vpow2.f32 %v2012_v62 }
 0x239   :  { %v2897_v11 = vpop.eup %2896  ;;  %1912 = vst [vmem:[#allocation2 + $0x188] sm:$0xff] %v2895_v60  ;;  %2922 = vrcp.f32 %v1725_v28 }
 0x23a   :  { %v2899_v23 = vpop.eup %2898  ;;  %v1728_v20 = vadd.f32 1.0, %v2897_v11  ;;  %2924 = vpow2.f32 %v2011_v45 }
 0x23b   :  { %v2901_v63 = vpop.eup %2900  ;;  %1911 = vst [vmem:[#allocation2 + $0x180] sm:$0xff] %v2899_v23  ;;  %2926 = vrsqrt.f32 %v341_v34 }
 0x23c   :  { %v2903_v21 = vpop.eup %2902  ;;  %2928 = vrcp.f32 %v1728_v20  ;;  %v1727_v0 = vadd.f32 1.0, %v2901_v63 }
 0x23d   :  { %v2905_v57 = vpop.eup %2904  ;;  %1914 = vst [vmem:[#allocation2 + $0x198] sm:$0xff] %v2903_v21 }
 0x23e   :  { %v2907_v12 = vpop.eup %2906  ;;  %2930 = vrcp.f32 %v1727_v0  ;;  %v1730_v59 = vadd.f32 1.0, %v2905_v57 }
 0x23f   :  { %v2909_v39 = vpop.eup %2908  ;;  %1913 = vst [vmem:[#allocation2 + $0x190] sm:$0xff] %v2907_v12 }
 0x240   :  { %v2911_v27 = vpop.eup %2910  ;;  %2932 = vrcp.f32 %v1730_v59  ;;  %v1729_v4 = vadd.f32 1.0, %v2909_v39 }
 0x241   :  { %v2913_v61 = vpop.eup %2912  ;;  %1916 = vst [vmem:[#allocation2 + $0x1a8] sm:$0xff] %v2911_v27 }
 0x242   :  { %v2915_v29 = vpop.eup %2914  ;;  %2934 = vrcp.f32 %v1729_v4  ;;  %v1732_v26 = vadd.f32 1.0, %v2913_v61 }
 0x243   :  { %v2917_v18 = vpop.eup %2916  ;;  %1915 = vst [vmem:[#allocation2 + $0x1a0] sm:$0xff] %v2915_v29 }
 0x244   :  { %v2919_v54 = vpop.eup %2918  ;;  %2936 = vrcp.f32 %v1732_v26  ;;  %v1731_v43 = vadd.f32 1.0, %v2917_v18 }
 0x245   :  { %v2921_v17 = vpop.eup %2920  ;;  %1918 = vst [vmem:[#allocation2 + $0x1b8] sm:$0xff] %v2919_v54 }
 0x246   :  { %v2923_v24 = vpop.eup %2922  ;;  %2938 = vrcp.f32 %v1731_v43  ;;  %v1734_v8 = vadd.f32 1.0, %v2921_v17 }
 0x247   :  { %v2925_v25 = vpop.eup %2924  ;;  %1917 = vst [vmem:[#allocation2 + $0x1b0] sm:$0xff] %v2923_v24 }
 0x248   :  { %v2927_v1 = vpop.eup %2926  ;;  %2940 = vrcp.f32 %v1734_v8  ;;  %v1733_v35 = vadd.f32 1.0, %v2925_v25 }
 0x249   :  { %v2929_v32 = vpop.eup %2928  ;;  %v469_v55 = vmul.f32 %v3008_v2, %v2927_v1 }
 0x24a   :  { %1920 = vst [vmem:[#allocation2 + $0x1c8] sm:$0xff] %v2929_v32  ;;  %2942 = vrcp.f32 %v1733_v35 }
 0x24b   :  { %v2931_v5 = vpop.eup %2930  ;;  %533 = vst [vmem:[%s4212_s5 + $0x1f0] sm:$0xff] %v469_v55 }
 0x24c   :  { %1919 = vst [vmem:[#allocation2 + $0x1c0] sm:$0xff] %v2931_v5 }
 0x24d   :  { %v2933_v30 = vpop.eup %2932 }
 0x24e   :  { %1922 = vst [vmem:[#allocation2 + $0x1d8] sm:$0xff] %v2933_v30 }
 0x24f   :  { %v2935_v31 = vpop.eup %2934 }
 0x250   :  { %1921 = vst [vmem:[#allocation2 + $0x1d0] sm:$0xff] %v2935_v31 }
 0x251   :  { %v2937_v42 = vpop.eup %2936 }
 0x252   :  { %1924 = vst [vmem:[#allocation2 + $0x1e8] sm:$0xff] %v2937_v42 }
 0x253   :  { %v2939_v36 = vpop.eup %2938 }
 0x254   :  { %1923 = vst [vmem:[#allocation2 + $0x1e0] sm:$0xff] %v2939_v36 }
 0x255   :  { %v2941_v37 = vpop.eup %2940 }
 0x256   :  { %1926 = vst [vmem:[#allocation2 + $0x1f8] sm:$0xff] %v2941_v37 }
 0x257   :  { %v2943_v9 = vpop.eup %2942 }
 0x258   :  { %1925 = vst [vmem:[#allocation2 + $0x1f0] sm:$0xff] %v2943_v9 }
 0x259   :  { %3020 = shalt.err (!%p3017_p4)
}
 0x25a   :  { %s3032_s5 = smov 128   ;;  %s3033_s7 = smov 8  }
 0x25b   :  { %1940 = dma.vmem_to_hbm [thread:$0]  %s1935_s30, 8192, %s4213_s6, [#allocation3], %s3032_s5, %s3032_s5, %s3033_s7  }
 0x25c   :  { %3029 = dma.done.wait [#allocation3], 8192  }
 0x25d   :  { %3030 = vsyncadd [#allocation3], 4294959104 }
 0x25e   :  { %1946 = vsyncpa [#allocation3], 1 }

// kernel: gnn_forward.3
= control target key start
LH: loop header
LB: loop body
LE: loop exit
PB: predicated region body
PF: predicated region fallthrough
CT: control target
= control target key end

     0   :  { %7 = vsyncpa [#allocation6], 0  ;;  %s3820_s0 = inlined_call_operand.hbm [shape: f32[512,512], index: 0, kind: input, shape index: {}]   ;;  %s3821_s1 = inlined_call_operand.vmem [shape: f32[512,128], index: 1, kind: input, shape index: {}]   ;;  %s3822_s2 = inlined_call_operand.vmem [shape: f32[512,128], index: 2, kind: output, shape index: {}]  }
   0x1   :  { %9 = vsyncpa [#allocation6 + $0x1], 0  ;;  %s2446_s9 = smov 0   ;;  %s2448_s10 = smov 0  }
   0x2   :  { %s2450_s11 = smov 0   ;;  %s2452_s12 = smov 0  }
   0x3   :  { %s2454_s13 = smov 0   ;;  %s2456_s14 = smov 0  }
   0x4   :  { %s2458_s15 = smov 0   ;;  %s2460_s16 = smov 0  }
   0x5 LB: > { %s2132_s17 = sadd.s32 4294967295, %s2424_s16   ;;  %s30_s18 = sadd.s32 1, %s2416_s14  ;;  %s2424_s16 = sphi %s2460_s16, %s15_s16   ;;  %s2420_s15 = sphi %s2458_s15, %s3979_s15   ;;  %s2416_s14 = sphi %s2456_s14, %s3978_s14   ;;  %s2412_s13 = sphi %s2454_s13, %s3977_s13   ;;  %s2408_s12 = sphi %s2452_s12, %s3976_s12   ;;  %s2404_s11 = sphi %s2450_s11, %s3975_s11   ;;  %s2400_s10 = sphi %s2448_s10, %s3974_s10   ;;  %s2396_s9 = sphi %s2446_s9, %s3973_s9  }
   0x6   : > { %p32_p0 = scmp.ge.s32.totalorder %s30_s18, 2  ;;  %s34_s19 = sadd.s32 1, %s2420_s15 }
   0x7   : > { %s43_s20 = sadd.s32 1, %s2404_s11  ;;  %p50_p1 = scmp.ne.s32.totalorder %s2404_s11, %s2400_s10 }
   0x8   : > { %s3981_s18 = smov (%p32_p0, %s30_s18), 0  ;;  %s3983_s19 = smov (!%p32_p0, %s34_s19), %s2420_s15 }
   0x9   : > { %s38_s21 = ssub.s32 %s2416_s14, %s3981_s18  ;;  %p51_p2 = scmp.eq.s32.totalorder %s2424_s16, 0 }
   0xa   : > { %p36_p3 = scmp.ge.s32.totalorder %s3983_s19, 3  ;;  %p41_p4 = scmp.eq.s32.totalorder %s38_s21, 0 }
   0xb   : > { %p2496_p5 = por %p51_p2, %p50_p1  ;;  %p56_p6 = scmp.ne.s32.totalorder %s2400_s10, %s2396_s9 }
   0xc   : > { %s3985_s19 = smov (%p36_p3, %s3983_s19), 0  ;;  %p57_p7 = scmp.eq.s32.totalorder %s2132_s17, 0 }
   0xd   : > { %s2504_s23 = scalar_select %p41_p4, %s2404_s11, %s43_s20  }
   0xe   : > { %p2164_p8 = scmp.lt.s32.totalorder %s2424_s16, 6  ;;  %s130_s24 = sand.u32 1, %s2404_s11  }
   0xf   : > { %p2508_p9 = por %p57_p7, %p56_p6  ;;  %s2136_s26 = sshll.u32 %s130_s24, 10 }
  0x10   : > { %s2156_s27 = sshll.u32 %s2416_s14, 14  ;;  %s134_s3 = scalar_lea.vmem [#allocation5], %s2136_s26 }
  0x11   : > { %s143_s30 = scalar_lea.hbm %s3820_s0, %s2156_s27  ;;  %s144_s4 = sshll.u32 %s134_s3, 4  ;;  %s145_s4 = int_to_ptr.vmem [resolvable:$true] %s144_s4 }
  0x12   : > { %p2518_p10 = pnand %p2164_p8, %p2496_p5  ;;  %s131_s6 = scalar_lea.sflag [#allocation6], %s130_s24 }
  0x13   : > { %s2343_s7 = scalar_lea.vmem %s145_s4, 16384  ;;  %s2426_s8 = smov [#allocation5]  }
  0x14   : > { %p2332_p11 = pneg %p2518_p10  ;;  %p2344_p12 = scmp.ne.s32.totalorder %s145_s4, %s2343_s7 }
  0x15   : > { %s2348_s9 = sshll.u32 %s2426_s8, 4  ;;  %s2349_s9 = int_to_ptr.vmem [resolvable:$false] %s2348_s9 }
  0x16   : > { %p2346_p13 = pnand %p2344_p12, %p2332_p11  ;;  %s2350_s17 = scalar_lea.vmem %s2349_s9, 32768 }
  0x17   : > { %p2351_p1 = scmp.lt.s32.totalorder %s145_s4, %s2349_s9  ;;  %p2352_p2 = scmp.lt.s32.totalorder %s2350_s17, %s2343_s7 }
  0x18   : > { %p2347_p0 = pneg %p2346_p13 }
  0x19   : > { %p2353_p3 = por %p2352_p2, %p2351_p1 }
  0x1b   : > { %p2354_p4 = pnand %p2353_p3, %p2347_p0 }
  0x1d   : > { %2357 = shalt.err (!%p2354_p4)
}
  0x1e   : > { %s2427_s20 = smov 512   ;;  %s2428_s21 = smov 32  }
  0x1f   : > { %2163 = dma.hbm_to_vmem [thread:$0]  (!%p2518_p10), %s143_s30, 16384, %s145_s4, %s131_s6, %s2427_s20, %s2427_s20, %s2428_s21  }
  0x20   : > { %p2140_p5 = scmp.ge.s32.totalorder %s2424_s16, 1  ;;  %p152_p6 = scmp.lt.s32.totalorder %s2424_s16, 7 }
  0x22   : > { %p153_p7 = pnand %p2140_p5, %p152_p6 }
  0x24   : > { %156 = sbr.rel (%p153_p7) target bundleno = 512 (0x200), region = 28 }
  0x29   : > { %s158_s22 = sand.u32 1, %s2400_s10  }
  0x2a   : > { %s2141_s24 = sshll.u32 %s158_s22, 10  ;;  %s159_s26 = scalar_lea.sflag [#allocation6], %s158_s22 }
  0x2b   : > { %s2529_s27 = scalar_lea.vmem [#allocation5], %s2141_s24 }
  0x2c   : > { %2391 = dma.done.wait (%p2508_p9), %s159_s26, 16384  }
  0x2d   : > { %2393 = vsyncadd (%p2508_p9), %s159_s26, 4294950912  ;;  %s2142_s28 = sshll.u32 %s2408_s12, 5  ;;  %s191_s29 = sadd.s32 1, %s2412_s13 }
  0x2e   : > { %p186_p8 = scmp.lt.s32.totalorder %s2142_s28, 63  ;;  %p192_p10 = scmp.lt.s32.totalorder %s191_s29, 0 }
  0x2f   : > { %s193_s30 = ssub.s32 0, %s191_s29  ;;  %p198_p11 = scmp.lt.s32.totalorder %s2412_s13, 0 }
  0x30   : > { %s3987_s28 = smov (!%p186_p8, %s2142_s28), 63  ;;  %s2144_s3 = smin.u32 %s193_s30, %s191_s29 }
  0x31   : > { %s199_s4 = ssub.s32 0, %s2412_s13  ;;  %s2143_s5 = sshll.u32 %s3987_s28, 3 }
  0x32   : > { %s195_s25 = sand.u32 1, %s2144_s3   ;;  %s2542_s8 = scalar_lea.vmem %s3822_s2, %s2143_s5 }
  0x33   : > { %s196_s9 = ssub.s32 0, %s195_s25  ;;  %s2145_s17 = smin.u32 %s2412_s13, %s199_s4 }
  0x34   : > { %s3989_s9 = smov (!%p192_p10, %s196_s9), %s195_s25  ;;  %p204_p9 = scmp.eq.s32.totalorder %s2412_s13, 0 }
  0x35   : > { %s201_s20 = sand.u32 1, %s2145_s17   ;;  %p205_p12 = scmp.eq.s32.totalorder %s2408_s12, 0 }
  0x36   : > { %s202_s21 = ssub.s32 0, %s201_s20 }
  0x37   : > { %s3991_s21 = smov (!%p198_p11, %s202_s21), %s201_s20  ;;  %p206_p13 = pnand %p205_p12, %p204_p9 }
  0x39   : > { %212 = sbr.rel (%p206_p13) target bundleno = 95 (0x5f), region = 36 }
  0x3e   : > { %v213_v0 = vld [vmem:[%s3821_s1] sm:$0xff]  ;;  %v214_v1 = vld [vmem:[%s3821_s1 + $0x8] sm:$0xff]  ;;  %v215_v2 = vld [vmem:[%s3821_s1 + $0x10] sm:$0xff] }
  0x3f   : > { %277 = vst [vmem:[#allocation2 + $0x200] sm:$0xff] %v213_v0  ;;  %278 = vst [vmem:[#allocation2 + $0x208] sm:$0xff] %v214_v1  ;;  %v216_v3 = vld [vmem:[%s3821_s1 + $0x18] sm:$0xff]  ;;  %v217_v4 = vld [vmem:[%s3821_s1 + $0x20] sm:$0xff] }
  0x40   : > { %279 = vst [vmem:[#allocation2 + $0x210] sm:$0xff] %v215_v2  ;;  %v218_v5 = vld [vmem:[%s3821_s1 + $0x28] sm:$0xff]  ;;  %280 = vst [vmem:[#allocation2 + $0x218] sm:$0xff] %v216_v3  ;;  %v219_v6 = vld [vmem:[%s3821_s1 + $0x30] sm:$0xff] }
  0x41   : > { %281 = vst [vmem:[#allocation2 + $0x220] sm:$0xff] %v217_v4  ;;  %282 = vst [vmem:[#allocation2 + $0x228] sm:$0xff] %v218_v5  ;;  %v220_v7 = vld [vmem:[%s3821_s1 + $0x38] sm:$0xff]  ;;  %v221_v8 = vld [vmem:[%s3821_s1 + $0x40] sm:$0xff] }
  0x42   : > { %283 = vst [vmem:[#allocation2 + $0x230] sm:$0xff] %v219_v6  ;;  %284 = vst [vmem:[#allocation2 + $0x238] sm:$0xff] %v220_v7  ;;  %v222_v9 = vld [vmem:[%s3821_s1 + $0x48] sm:$0xff]  ;;  %v223_v10 = vld [vmem:[%s3821_s1 + $0x50] sm:$0xff] }
  0x43   : > { %285 = vst [vmem:[#allocation2 + $0x240] sm:$0xff] %v221_v8  ;;  %v224_v11 = vld [vmem:[%s3821_s1 + $0x58] sm:$0xff]  ;;  %286 = vst [vmem:[#allocation2 + $0x248] sm:$0xff] %v222_v9  ;;  %v225_v12 = vld [vmem:[%s3821_s1 + $0x60] sm:$0xff] }
  0x44   : > { %287 = vst [vmem:[#allocation2 + $0x250] sm:$0xff] %v223_v10  ;;  %288 = vst [vmem:[#allocation2 + $0x258] sm:$0xff] %v224_v11  ;;  %v226_v13 = vld [vmem:[%s3821_s1 + $0x68] sm:$0xff]  ;;  %v227_v14 = vld [vmem:[%s3821_s1 + $0x70] sm:$0xff] }
  0x45   : > { %289 = vst [vmem:[#allocation2 + $0x260] sm:$0xff] %v225_v12  ;;  %290 = vst [vmem:[#allocation2 + $0x268] sm:$0xff] %v226_v13  ;;  %v228_v15 = vld [vmem:[%s3821_s1 + $0x78] sm:$0xff]  ;;  %v229_v16 = vld [vmem:[%s3821_s1 + $0x80] sm:$0xff] }
  0x46   : > { %291 = vst [vmem:[#allocation2 + $0x270] sm:$0xff] %v227_v14  ;;  %v230_v17 = vld [vmem:[%s3821_s1 + $0x88] sm:$0xff]  ;;  %292 = vst [vmem:[#allocation2 + $0x278] sm:$0xff] %v228_v15  ;;  %v231_v18 = vld [vmem:[%s3821_s1 + $0x90] sm:$0xff] }
  0x47   : > { %293 = vst [vmem:[#allocation2 + $0x280] sm:$0xff] %v229_v16  ;;  %294 = vst [vmem:[#allocation2 + $0x288] sm:$0xff] %v230_v17  ;;  %v232_v19 = vld [vmem:[%s3821_s1 + $0x98] sm:$0xff]  ;;  %v233_v20 = vld [vmem:[%s3821_s1 + $0xa0] sm:$0xff] }
  0x48   : > { %295 = vst [vmem:[#allocation2 + $0x290] sm:$0xff] %v231_v18  ;;  %296 = vst [vmem:[#allocation2 + $0x298] sm:$0xff] %v232_v19  ;;  %v234_v21 = vld [vmem:[%s3821_s1 + $0xa8] sm:$0xff]  ;;  %v235_v22 = vld [vmem:[%s3821_s1 + $0xb0] sm:$0xff] }
  0x49   : > { %297 = vst [vmem:[#allocation2 + $0x2a0] sm:$0xff] %v233_v20  ;;  %v236_v23 = vld [vmem:[%s3821_s1 + $0xb8] sm:$0xff]  ;;  %298 = vst [vmem:[#allocation2 + $0x2a8] sm:$0xff] %v234_v21  ;;  %v237_v24 = vld [vmem:[%s3821_s1 + $0xc0] sm:$0xff] }
  0x4a   : > { %299 = vst [vmem:[#allocation2 + $0x2b0] sm:$0xff] %v235_v22  ;;  %300 = vst [vmem:[#allocation2 + $0x2b8] sm:$0xff] %v236_v23  ;;  %v238_v25 = vld [vmem:[%s3821_s1 + $0xc8] sm:$0xff]  ;;  %v239_v26 = vld [vmem:[%s3821_s1 + $0xd0] sm:$0xff] }
  0x4b   : > { %301 = vst [vmem:[#allocation2 + $0x2c0] sm:$0xff] %v237_v24  ;;  %302 = vst [vmem:[#allocation2 + $0x2c8] sm:$0xff] %v238_v25  ;;  %v240_v27 = vld [vmem:[%s3821_s1 + $0xd8] sm:$0xff]  ;;  %v241_v28 = vld [vmem:[%s3821_s1 + $0xe0] sm:$0xff] }
  0x4c   : > { %303 = vst [vmem:[#allocation2 + $0x2d0] sm:$0xff] %v239_v26  ;;  %v242_v29 = vld [vmem:[%s3821_s1 + $0xe8] sm:$0xff]  ;;  %304 = vst [vmem:[#allocation2 + $0x2d8] sm:$0xff] %v240_v27  ;;  %v243_v30 = vld [vmem:[%s3821_s1 + $0xf0] sm:$0xff] }
  0x4d   : > { %305 = vst [vmem:[#allocation2 + $0x2e0] sm:$0xff] %v241_v28  ;;  %306 = vst [vmem:[#allocation2 + $0x2e8] sm:$0xff] %v242_v29  ;;  %v244_v31 = vld [vmem:[%s3821_s1 + $0xf8] sm:$0xff]  ;;  %v245_v32 = vld [vmem:[%s3821_s1 + $0x100] sm:$0xff] }
  0x4e   : > { %307 = vst [vmem:[#allocation2 + $0x2f0] sm:$0xff] %v243_v30  ;;  %308 = vst [vmem:[#allocation2 + $0x2f8] sm:$0xff] %v244_v31  ;;  %v246_v33 = vld [vmem:[%s3821_s1 + $0x108] sm:$0xff]  ;;  %v247_v34 = vld [vmem:[%s3821_s1 + $0x110] sm:$0xff] }
  0x4f   : > { %309 = vst [vmem:[#allocation2 + $0x300] sm:$0xff] %v245_v32  ;;  %v248_v35 = vld [vmem:[%s3821_s1 + $0x118] sm:$0xff]  ;;  %310 = vst [vmem:[#allocation2 + $0x308] sm:$0xff] %v246_v33  ;;  %v249_v36 = vld [vmem:[%s3821_s1 + $0x120] sm:$0xff] }
  0x50   : > { %311 = vst [vmem:[#allocation2 + $0x310] sm:$0xff] %v247_v34  ;;  %312 = vst [vmem:[#allocation2 + $0x318] sm:$0xff] %v248_v35  ;;  %v250_v37 = vld [vmem:[%s3821_s1 + $0x128] sm:$0xff]  ;;  %v251_v38 = vld [vmem:[%s3821_s1 + $0x130] sm:$0xff] }
  0x51   : > { %313 = vst [vmem:[#allocation2 + $0x320] sm:$0xff] %v249_v36  ;;  %314 = vst [vmem:[#allocation2 + $0x328] sm:$0xff] %v250_v37  ;;  %v252_v39 = vld [vmem:[%s3821_s1 + $0x138] sm:$0xff]  ;;  %v253_v40 = vld [vmem:[%s3821_s1 + $0x140] sm:$0xff] }
  0x52   : > { %315 = vst [vmem:[#allocation2 + $0x330] sm:$0xff] %v251_v38  ;;  %v254_v41 = vld [vmem:[%s3821_s1 + $0x148] sm:$0xff]  ;;  %316 = vst [vmem:[#allocation2 + $0x338] sm:$0xff] %v252_v39  ;;  %v255_v42 = vld [vmem:[%s3821_s1 + $0x150] sm:$0xff] }
  0x53   : > { %317 = vst [vmem:[#allocation2 + $0x340] sm:$0xff] %v253_v40  ;;  %318 = vst [vmem:[#allocation2 + $0x348] sm:$0xff] %v254_v41  ;;  %v256_v43 = vld [vmem:[%s3821_s1 + $0x158] sm:$0xff]  ;;  %v257_v44 = vld [vmem:[%s3821_s1 + $0x160] sm:$0xff] }
  0x54   : > { %319 = vst [vmem:[#allocation2 + $0x350] sm:$0xff] %v255_v42  ;;  %320 = vst [vmem:[#allocation2 + $0x358] sm:$0xff] %v256_v43  ;;  %v258_v45 = vld [vmem:[%s3821_s1 + $0x168] sm:$0xff]  ;;  %v259_v46 = vld [vmem:[%s3821_s1 + $0x170] sm:$0xff] }
  0x55   : > { %321 = vst [vmem:[#allocation2 + $0x360] sm:$0xff] %v257_v44  ;;  %v260_v47 = vld [vmem:[%s3821_s1 + $0x178] sm:$0xff]  ;;  %322 = vst [vmem:[#allocation2 + $0x368] sm:$0xff] %v258_v45  ;;  %v261_v48 = vld [vmem:[%s3821_s1 + $0x180] sm:$0xff] }
  0x56   : > { %323 = vst [vmem:[#allocation2 + $0x370] sm:$0xff] %v259_v46  ;;  %324 = vst [vmem:[#allocation2 + $0x378] sm:$0xff] %v260_v47  ;;  %v262_v49 = vld [vmem:[%s3821_s1 + $0x188] sm:$0xff]  ;;  %v263_v50 = vld [vmem:[%s3821_s1 + $0x190] sm:$0xff] }
  0x57   : > { %325 = vst [vmem:[#allocation2 + $0x380] sm:$0xff] %v261_v48  ;;  %326 = vst [vmem:[#allocation2 + $0x388] sm:$0xff] %v262_v49  ;;  %v264_v51 = vld [vmem:[%s3821_s1 + $0x198] sm:$0xff]  ;;  %v265_v52 = vld [vmem:[%s3821_s1 + $0x1a0] sm:$0xff] }
  0x58   : > { %327 = vst [vmem:[#allocation2 + $0x390] sm:$0xff] %v263_v50  ;;  %v266_v53 = vld [vmem:[%s3821_s1 + $0x1a8] sm:$0xff]  ;;  %328 = vst [vmem:[#allocation2 + $0x398] sm:$0xff] %v264_v51  ;;  %v267_v54 = vld [vmem:[%s3821_s1 + $0x1b0] sm:$0xff] }
  0x59   : > { %329 = vst [vmem:[#allocation2 + $0x3a0] sm:$0xff] %v265_v52  ;;  %330 = vst [vmem:[#allocation2 + $0x3a8] sm:$0xff] %v266_v53  ;;  %v268_v55 = vld [vmem:[%s3821_s1 + $0x1b8] sm:$0xff]  ;;  %v269_v56 = vld [vmem:[%s3821_s1 + $0x1c0] sm:$0xff] }
  0x5a   : > { %331 = vst [vmem:[#allocation2 + $0x3b0] sm:$0xff] %v267_v54  ;;  %332 = vst [vmem:[#allocation2 + $0x3b8] sm:$0xff] %v268_v55  ;;  %v270_v57 = vld [vmem:[%s3821_s1 + $0x1c8] sm:$0xff]  ;;  %v271_v58 = vld [vmem:[%s3821_s1 + $0x1d0] sm:$0xff] }
  0x5b   : > { %333 = vst [vmem:[#allocation2 + $0x3c0] sm:$0xff] %v269_v56  ;;  %v272_v59 = vld [vmem:[%s3821_s1 + $0x1d8] sm:$0xff]  ;;  %334 = vst [vmem:[#allocation2 + $0x3c8] sm:$0xff] %v270_v57  ;;  %v273_v60 = vld [vmem:[%s3821_s1 + $0x1e0] sm:$0xff] }
  0x5c   : > { %335 = vst [vmem:[#allocation2 + $0x3d0] sm:$0xff] %v271_v58  ;;  %336 = vst [vmem:[#allocation2 + $0x3d8] sm:$0xff] %v272_v59  ;;  %v274_v61 = vld [vmem:[%s3821_s1 + $0x1e8] sm:$0xff]  ;;  %v275_v62 = vld [vmem:[%s3821_s1 + $0x1f0] sm:$0xff] }
  0x5d   : > { %337 = vst [vmem:[#allocation2 + $0x3e0] sm:$0xff] %v273_v60  ;;  %338 = vst [vmem:[#allocation2 + $0x3e8] sm:$0xff] %v274_v61  ;;  %v276_v63 = vld [vmem:[%s3821_s1 + $0x1f8] sm:$0xff] }
  0x5e   : > { %339 = vst [vmem:[#allocation2 + $0x3f0] sm:$0xff] %v275_v62  ;;  %340 = vst [vmem:[#allocation2 + $0x3f8] sm:$0xff] %v276_v63 }
  0x5f PF: > { %s2147_s26 = sshll.u32 %s3989_s9, 9  ;;  %v417_v0 = vld [vmem:[%s2529_s27 + $0x40] sm:$0xff]  ;;  %v418_v1 = vld [vmem:[%s2529_s27 + $0x48] sm:$0xff]  ;;  %v419_v2 = vld [vmem:[%s2529_s27 + $0x50] sm:$0xff]  ;;  %v3827_v3 = vmov 0.0   ;;  %vm376_vm0 = vcmask 7168  }
  0x60   : > { %637 = vmatprep.subr.mxu0 %v3827_v3  ;;  %862 = vmatprep.subr.mxu1 %v3827_v3  ;;  %v420_v4 = vld [vmem:[%s2529_s27 + $0x58] sm:$0xff]  ;;  %v1191_v5 = vmul.f32 %v417_v0, %v417_v0  ;;  %v1192_v6 = vmul.f32 %v418_v1, %v418_v1  ;;  %v1193_v7 = vmul.f32 %v419_v2, %v419_v2  ;;  %v409_v8 = vld [vmem:[%s2529_s27] sm:$0xff]  ;;  %v410_v9 = vld [vmem:[%s2529_s27 + $0x8] sm:$0xff]  ;;  %s2754_s28 = scalar_lea.vmem [#allocation2], %s2147_s26  ;;  %p1960_p0 = scmp.eq.s32.totalorder %s2412_s13, 2 }
  0x61   : > { %v1183_v13 = vmul.f32 %v409_v8, %v409_v8  ;;  %v1184_v14 = vmul.f32 %v410_v9, %v410_v9  ;;  %701 = vmatprep.mubr.f32.mxu0 %v410_v9  ;;  %v1194_v17 = vmul.f32 %v420_v4, %v420_v4  ;;  %v411_v20 = vld [vmem:[%s2529_s27 + $0x10] sm:$0xff]  ;;  %v412_v21 = vld [vmem:[%s2529_s27 + $0x18] sm:$0xff]  ;;  %v421_v28 = vld [vmem:[%s2529_s27 + $0x60] sm:$0xff]  ;;  %379 = vst.msk [vmem:[#allocation4 + $0x10] sm:$0xff] %vm376_vm0, %v3827_v3  ;;  %s2149_s9 = sshll.u32 %s3991_s21, 9 }
  0x62   : > { %v1321_v18 = vadd.f32 %v1192_v6, %v1191_v5  ;;  %v1185_v24 = vmul.f32 %v411_v20, %v411_v20  ;;  %v1186_v25 = vmul.f32 %v412_v21, %v412_v21  ;;  %v422_v29 = vld [vmem:[%s2529_s27 + $0x68] sm:$0xff]  ;;  %v423_v30 = vld [vmem:[%s2529_s27 + $0x70] sm:$0xff]  ;;  %v424_v33 = vld [vmem:[%s2529_s27 + $0x78] sm:$0xff]  ;;  %v1195_v34 = vmul.f32 %v421_v28, %v421_v28  ;;  %377 = vst.msk [vmem:[#allocation4] sm:$0xff] %vm376_vm0, %v3827_v3 }
  0x63   : > { %v1311_v22 = vadd.f32 %v1184_v14, %v1183_v13  ;;  %v413_v35 = vld [vmem:[%s2529_s27 + $0x20] sm:$0xff]  ;;  %v414_v36 = vld [vmem:[%s2529_s27 + $0x28] sm:$0xff]  ;;  %v1196_v37 = vmul.f32 %v422_v29, %v422_v29  ;;  %v1197_v38 = vmul.f32 %v423_v30, %v423_v30  ;;  %v1198_v39 = vmul.f32 %v424_v33, %v424_v33  ;;  %v415_v40 = vld [vmem:[%s2529_s27 + $0x30] sm:$0xff]  ;;  %378 = vst.msk [vmem:[#allocation4 + $0x8] sm:$0xff] %vm376_vm0, %v3827_v3 }
  0x64   : > { %v1322_v23 = vadd.f32 %v1321_v18, %v1193_v7  ;;  %v416_v41 = vld [vmem:[%s2529_s27 + $0x38] sm:$0xff]  ;;  %v1187_v45 = vmul.f32 %v413_v35, %v413_v35  ;;  %v1188_v46 = vmul.f32 %v414_v36, %v414_v36  ;;  %v1189_v48 = vmul.f32 %v415_v40, %v415_v40  ;;  %v429_v50 = vld [vmem:[%s2529_s27 + $0xa0] sm:$0xff]  ;;  %v430_v51 = vld [vmem:[%s2529_s27 + $0xa8] sm:$0xff]  ;;  %380 = vst.msk [vmem:[#allocation4 + $0x18] sm:$0xff] %vm376_vm0, %v3827_v3 }
  0x65   : > { %v556_v10 = vld [vmem:[%s2754_s28 + $0x78] sm:$0xff]  ;;  %v555_v12 = vld [vmem:[%s2754_s28 + $0x70] sm:$0xff]  ;;  %v554_v16 = vld [vmem:[%s2754_s28 + $0x68] sm:$0xff]  ;;  %v1312_v32 = vadd.f32 %v1311_v22, %v1185_v24  ;;  %v1326_v47 = vadd.f32 %v1196_v37, %v1195_v34  ;;  %v1190_v49 = vmul.f32 %v416_v41, %v416_v41  ;;  %v1203_v57 = vmul.f32 %v429_v50, %v429_v50  ;;  %381 = vst.msk [vmem:[#allocation4 + $0x20] sm:$0xff] %vm376_vm0, %v3827_v3 }
  0x66   : > { %v588_v11 = vld [vmem:[%s2754_s28 + $0x178] sm:$0xff]  ;;  %638 = vmatpush1.msra.mxu0 %v556_v10  ;;  %v587_v15 = vld [vmem:[%s2754_s28 + $0x170] sm:$0xff]  ;;  %v586_v19 = vld [vmem:[%s2754_s28 + $0x168] sm:$0xff]  ;;  %v1323_v31 = vadd.f32 %v1322_v23, %v1194_v17  ;;  %v1316_v53 = vadd.f32 %v1188_v46, %v1187_v45  ;;  %v1204_v58 = vmul.f32 %v430_v51, %v430_v51  ;;  %382 = vst.msk [vmem:[#allocation4 + $0x28] sm:$0xff] %vm376_vm0, %v3827_v3 }
  0x67   : > { %863 = vmatpush1.msra.mxu1 %v588_v11  ;;  %639 = vmatprep.subr.mxu0 %v3827_v3  ;;  %v553_v26 = vld [vmem:[%s2754_s28 + $0x60] sm:$0xff]  ;;  %v1313_v42 = vadd.f32 %v1312_v32, %v1186_v25  ;;  %v552_v43 = vld [vmem:[%s2754_s28 + $0x58] sm:$0xff]  ;;  %v431_v52 = vld [vmem:[%s2529_s27 + $0xb0] sm:$0xff]  ;;  %v1327_v59 = vadd.f32 %v1326_v47, %v1197_v38  ;;  %383 = vst.msk [vmem:[#allocation4 + $0x30] sm:$0xff] %vm376_vm0, %v3827_v3 }
  0x68   : > { %864 = vmatprep.subr.mxu1 %v3827_v3  ;;  %640 = vmatpush1.msra.mxu0 %v555_v12  ;;  %v585_v27 = vld [vmem:[%s2754_s28 + $0x160] sm:$0xff]  ;;  %v584_v44 = vld [vmem:[%s2754_s28 + $0x158] sm:$0xff]  ;;  %v551_v54 = vld [vmem:[%s2754_s28 + $0x50] sm:$0xff]  ;;  %v1205_v61 = vmul.f32 %v431_v52, %v431_v52  ;;  %v1317_v0 = vadd.f32 %v1316_v53, %v1189_v48  ;;  %v1336_v1 = vadd.f32 %v1204_v58, %v1203_v57 }
  0x69   : > { %865 = vmatpush1.msra.mxu1 %v587_v15  ;;  %641 = vmatprep.subr.mxu0 %v3827_v3  ;;  %v583_v55 = vld [vmem:[%s2754_s28 + $0x150] sm:$0xff]  ;;  %v432_v56 = vld [vmem:[%s2529_s27 + $0xb8] sm:$0xff]  ;;  %v550_v60 = vld [vmem:[%s2754_s28 + $0x48] sm:$0xff]  ;;  %v1328_v7 = vadd.f32 %v1327_v59, %v1198_v39  ;;  %384 = vst.msk [vmem:[#allocation4 + $0x38] sm:$0xff] %vm376_vm0, %v3827_v3 }
  0x6a   : > { %866 = vmatprep.subr.mxu1 %v3827_v3  ;;  %642 = vmatpush1.msra.mxu0 %v554_v16  ;;  %v1206_v62 = vmul.f32 %v432_v56, %v432_v56  ;;  %v437_v63 = vld [vmem:[%s2529_s27 + $0xe0] sm:$0xff]  ;;  %v438_v2 = vld [vmem:[%s2529_s27 + $0xe8] sm:$0xff]  ;;  %v439_v4 = vld [vmem:[%s2529_s27 + $0xf0] sm:$0xff]  ;;  %v1318_v12 = vadd.f32 %v1317_v0, %v1190_v49  ;;  %v1337_v13 = vadd.f32 %v1336_v1, %v1205_v61 }
  0x6b   : > { %867 = vmatpush1.msra.mxu1 %v586_v19  ;;  %643 = vmatprep.subr.mxu0 %v3827_v3  ;;  %v440_v5 = vld [vmem:[%s2529_s27 + $0xf8] sm:$0xff]  ;;  %v1211_v6 = vmul.f32 %v437_v63, %v437_v63  ;;  %v582_v8 = vld [vmem:[%s2754_s28 + $0x148] sm:$0xff]  ;;  %v549_v9 = vld [vmem:[%s2754_s28 + $0x40] sm:$0xff]  ;;  %v1212_v10 = vmul.f32 %v438_v2, %v438_v2  ;;  %v1213_v11 = vmul.f32 %v439_v4, %v439_v4 }
  0x6c   : > { %868 = vmatprep.subr.mxu1 %v3827_v3  ;;  %1324 = vadd.xlane.f32.xlu1 %v1323_v31  ;;  %v581_v14 = vld [vmem:[%s2754_s28 + $0x140] sm:$0xff]  ;;  %v1214_v15 = vmul.f32 %v440_v5, %v440_v5  ;;  %v446_v17 = vld [vmem:[%s2529_s27 + $0x128] sm:$0xff]  ;;  %v447_v19 = vld [vmem:[%s2529_s27 + $0x130] sm:$0xff]  ;;  %v1338_v24 = vadd.f32 %v1337_v13, %v1206_v62  ;;  %385 = vst.msk [vmem:[#allocation4 + $0x40] sm:$0xff] %vm376_vm0, %v3827_v3 }
  0x6d   : > { %644 = vmatpush1.msra.mxu0 %v553_v26  ;;  %869 = vmatpush1.msra.mxu1 %v585_v27  ;;  %v445_v16 = vld [vmem:[%s2529_s27 + $0x120] sm:$0xff]  ;;  %v1346_v18 = vadd.f32 %v1212_v10, %v1211_v6  ;;  %v448_v20 = vld [vmem:[%s2529_s27 + $0x138] sm:$0xff]  ;;  %v1220_v22 = vmul.f32 %v446_v17, %v446_v17  ;;  %v1221_v25 = vmul.f32 %v447_v19, %v447_v19  ;;  %v2808_v27 = vld [vmem:[%s2529_s27 + $0x88] sm:$0xff] }
  0x6e   : > { %645 = vmatprep.subr.mxu0 %v3827_v3  ;;  %1314 = vadd.xlane.f32.xlu0 %v1313_v42  ;;  %v1219_v21 = vmul.f32 %v445_v16, %v445_v16  ;;  %v425_v23 = vld [vmem:[%s2529_s27 + $0x80] sm:$0xff]  ;;  %v1222_v26 = vmul.f32 %v448_v20, %v448_v20  ;;  %v2811_v28 = vld [vmem:[%s2529_s27 + $0x90] sm:$0xff]  ;;  %v2814_v29 = vld [vmem:[%s2529_s27 + $0x98] sm:$0xff]  ;;  %v1200_v35 = vmul.f32 %v2808_v27, %v2808_v27 }
  0x6f   : > { %870 = vmatprep.subr.mxu1 %v3827_v3  ;;  %646 = vmatpush1.msra.mxu0 %v552_v43  ;;  %v548_v30 = vld [vmem:[%s2754_s28 + $0x38] sm:$0xff]  ;;  %v1347_v31 = vadd.f32 %v1346_v18, %v1213_v11  ;;  %v1199_v33 = vmul.f32 %v425_v23, %v425_v23  ;;  %v1201_v36 = vmul.f32 %v2811_v28, %v2811_v28  ;;  %v453_v38 = vld [vmem:[%s2529_s27 + $0x160] sm:$0xff]  ;;  %v454_v39 = vld [vmem:[%s2529_s27 + $0x168] sm:$0xff] }
  0x70   : > { %871 = vmatpush1.msra.mxu1 %v584_v44  ;;  %647 = vmatprep.subr.mxu0 %v3827_v3  ;;  %v1356_v32 = vadd.f32 %v1220_v22, %v1219_v21  ;;  %v580_v34 = vld [vmem:[%s2754_s28 + $0x138] sm:$0xff]  ;;  %v1202_v37 = vmul.f32 %v2814_v29, %v2814_v29  ;;  %v547_v41 = vld [vmem:[%s2754_s28 + $0x30] sm:$0xff]  ;;  %v1227_v44 = vmul.f32 %v453_v38, %v453_v38  ;;  %v2834_v46 = vld [vmem:[%s2754_s28 + $0x28] sm:$0xff] }
  0x71   : > { %872 = vmatprep.subr.mxu1 %v3827_v3  ;;  %648 = vmatpush1.msra.mxu0 %v551_v54  ;;  %v1348_v40 = vadd.f32 %v1347_v31, %v1214_v15  ;;  %v455_v43 = vld [vmem:[%s2529_s27 + $0x170] sm:$0xff]  ;;  %v1331_v47 = vadd.f32 %v1200_v35, %v1199_v33  ;;  %v2837_v48 = vld [vmem:[%s2529_s27 + $0x178] sm:$0xff]  ;;  %v1228_v49 = vmul.f32 %v454_v39, %v454_v39  ;;  %v2843_v52 = vld [vmem:[%s2529_s27 + $0x1a0] sm:$0xff] }
  0x72   : > { %873 = vmatpush1.msra.mxu1 %v583_v55  ;;  %649 = vmatprep.subr.mxu0 %v3827_v3  ;;  %v1357_v42 = vadd.f32 %v1356_v32, %v1221_v25  ;;  %v579_v45 = vld [vmem:[%s2754_s28 + $0x130] sm:$0xff]  ;;  %v1229_v50 = vmul.f32 %v455_v43, %v455_v43  ;;  %v2846_v53 = vld [vmem:[%s2529_s27 + $0x1a8] sm:$0xff]  ;;  %v1235_v58 = vmul.f32 %v2843_v52, %v2843_v52  ;;  %v2856_v59 = vld [vmem:[%s2529_s27 + $0xc0] sm:$0xff] }
  0x73   : > { %874 = vmatprep.subr.mxu1 %v3827_v3  ;;  %1329 = vadd.xlane.f32.xlu1 %v1328_v7  ;;  %v2849_v54 = vld [vmem:[%s2529_s27 + $0x1b0] sm:$0xff]  ;;  %v578_v55 = vld [vmem:[%s2754_s28 + $0x128] sm:$0xff]  ;;  %v1332_v56 = vadd.f32 %v1331_v47, %v1201_v36  ;;  %v1366_v57 = vadd.f32 %v1228_v49, %v1227_v44  ;;  %v2863_v61 = vmul.f32 %v2837_v48, %v2837_v48  ;;  %v2866_v62 = vld [vmem:[%s2529_s27 + $0x1b8] sm:$0xff] }
  0x74   : > { %650 = vmatpush1.msra.mxu0 %v550_v60  ;;  %1319 = vadd.xlane.f32.xlu0 %v1318_v12  ;;  %v2840_v51 = vadd.f32 %v1357_v42, %v1222_v26  ;;  %v2859_v60 = vld [vmem:[%s2529_s27 + $0xc8] sm:$0xff]  ;;  %v1236_v63 = vmul.f32 %v2846_v53, %v2846_v53  ;;  %v1237_v0 = vmul.f32 %v2849_v54, %v2849_v54  ;;  %v2873_v1 = vld [vmem:[%s2529_s27 + $0xd0] sm:$0xff]  ;;  %v545_v4 = vld [vmem:[%s2754_s28 + $0x20] sm:$0xff] }
  0x75   : > { %875 = vmatpush1.msra.mxu1 %v582_v8  ;;  %651 = vmatprep.subr.mxu0 %v3827_v3  ;;  %v1333_v2 = vadd.f32 %v1332_v56, %v1202_v37  ;;  %v577_v5 = vld [vmem:[%s2754_s28 + $0x120] sm:$0xff]  ;;  %v1367_v6 = vadd.f32 %v1366_v57, %v1229_v50  ;;  %v1207_v7 = vmul.f32 %v2856_v59, %v2856_v59  ;;  %v2954_v12 = vld [vmem:[%s2529_s27 + $0x1e8] sm:$0xff]  ;;  %v2957_v13 = vld [vmem:[%s2529_s27 + $0x1f0] sm:$0xff] }
  0x76   : > { %876 = vmatprep.subr.mxu1 %v3827_v3  ;;  %652 = vmatpush1.msra.mxu0 %v549_v9  ;;  %386 = vst.msk [vmem:[#allocation4 + $0x48] sm:$0xff] %vm376_vm0, %v3827_v3  ;;  %387 = vst.msk [vmem:[#allocation4 + $0x50] sm:$0xff] %vm376_vm0, %v3827_v3  ;;  %v1376_v8 = vadd.f32 %v1236_v63, %v1235_v58  ;;  %v1208_v9 = vmul.f32 %v2859_v60, %v2859_v60  ;;  %v2951_v11 = vld [vmem:[%s2529_s27 + $0x1e0] sm:$0xff]  ;;  %v2965_v16 = vld [vmem:[%s2529_s27 + $0xd8] sm:$0xff] }
  0x77   : > { %877 = vmatpush1.msra.mxu1 %v581_v14  ;;  %1339 = vadd.xlane.f32.xlu1 %v1338_v24  ;;  %388 = vst.msk [vmem:[#allocation4 + $0x58] sm:$0xff] %vm376_vm0, %v3827_v3  ;;  %389 = vst.msk [vmem:[#allocation4 + $0x60] sm:$0xff] %vm376_vm0, %v3827_v3  ;;  %v1209_v10 = vmul.f32 %v2873_v1, %v2873_v1  ;;  %v544_v14 = vld [vmem:[%s2754_s28 + $0x18] sm:$0xff]  ;;  %v1238_v15 = vmul.f32 %v2866_v62, %v2866_v62  ;;  %v2977_v23 = vld [vmem:[%s2529_s27 + $0x220] sm:$0xff] }
  0x78   : > { %653 = vmatprep.subr.mxu0 %v3827_v3  ;;  %878 = vmatprep.subr.mxu1 %v3827_v3  ;;  %390 = vst.msk [vmem:[#allocation4 + $0x68] sm:$0xff] %vm376_vm0, %v3827_v3  ;;  %391 = vst.msk [vmem:[#allocation4 + $0x70] sm:$0xff] %vm376_vm0, %v3827_v3  ;;  %v1243_v17 = vmul.f32 %v2951_v11, %v2951_v11  ;;  %v576_v18 = vld [vmem:[%s2754_s28 + $0x118] sm:$0xff]  ;;  %v1377_v19 = vadd.f32 %v1376_v8, %v1237_v0  ;;  %v2983_v26 = vld [vmem:[%s2529_s27 + $0x228] sm:$0xff] }
  0x79   : > { %654 = vmatpush1.msra.mxu0 %v548_v30  ;;  %879 = vmatpush1.msra.mxu1 %v580_v34  ;;  %392 = vst.msk [vmem:[#allocation4 + $0x78] sm:$0xff] %vm376_vm0, %v3827_v3  ;;  %393 = vst.msk [vmem:[#allocation4 + $0x80] sm:$0xff] %vm376_vm0, %v3827_v3  ;;  %v1341_v20 = vadd.f32 %v1208_v9, %v1207_v7  ;;  %v2972_v21 = vld [vmem:[%s2529_s27 + $0x1f8] sm:$0xff]  ;;  %v1244_v22 = vmul.f32 %v2954_v12, %v2954_v12  ;;  %v2986_v30 = vld [vmem:[%s2529_s27 + $0x230] sm:$0xff] }
  0x7a   : > { %655 = vmatprep.subr.mxu0 %v3827_v3  ;;  %880 = vmatprep.subr.mxu1 %v3827_v3  ;;  %394 = vst.msk [vmem:[#allocation4 + $0x88] sm:$0xff] %vm376_vm0, %v3827_v3  ;;  %395 = vst.msk [vmem:[#allocation4 + $0x90] sm:$0xff] %vm376_vm0, %v3827_v3  ;;  %v1368_v24 = vadd.f32 %v1367_v6, %v2863_v61  ;;  %v1245_v25 = vmul.f32 %v2957_v13, %v2957_v13  ;;  %v543_v32 = vld [vmem:[%s2754_s28 + $0x10] sm:$0xff]  ;;  %v2996_v36 = vld [vmem:[%s2529_s27 + $0x100] sm:$0xff] }
  0x7b   : > { %656 = vmatpush1.msra.mxu0 %v547_v41  ;;  %1349 = vadd.xlane.f32.xlu1 %v1348_v40  ;;  %396 = vst.msk [vmem:[#allocation4 + $0x98] sm:$0xff] %vm376_vm0, %v3827_v3  ;;  %397 = vst.msk [vmem:[#allocation4 + $0xa0] sm:$0xff] %vm376_vm0, %v3827_v3  ;;  %v1251_v31 = vmul.f32 %v2977_v23, %v2977_v23  ;;  %v1210_v33 = vmul.f32 %v2965_v16, %v2965_v16  ;;  %v2999_v37 = vld [vmem:[%s2529_s27 + $0x108] sm:$0xff]  ;;  %v575_v38 = vld [vmem:[%s2754_s28 + $0x110] sm:$0xff] }
  0x7c   : > { %881 = vmatpush1.msra.mxu1 %v579_v45  ;;  %657 = vmatprep.subr.mxu0 %v3827_v3  ;;  %398 = vst.msk [vmem:[#allocation4 + $0xa8] sm:$0xff] %vm376_vm0, %v3827_v3  ;;  %399 = vst.msk [vmem:[#allocation4 + $0xb0] sm:$0xff] %vm376_vm0, %v3827_v3  ;;  %v1342_v34 = vadd.f32 %v1341_v20, %v1209_v10  ;;  %v1386_v35 = vadd.f32 %v1244_v22, %v1243_v17  ;;  %v542_v41 = vld [vmem:[%s2754_s28 + $0x8] sm:$0xff]  ;;  %v3012_v44 = vld [vmem:[%s2529_s27 + $0x110] sm:$0xff] }
  0x7d   : > { %882 = vmatprep.subr.mxu1 %v3827_v3  ;;  %400 = vst.msk [vmem:[#allocation4 + $0xb8] sm:$0xff] %vm376_vm0, %v3827_v3  ;;  %401 = vst.msk [vmem:[#allocation4 + $0xc0] sm:$0xff] %vm376_vm0, %v3827_v3  ;;  %658 = vmatpush1.msra.mxu0 %v2834_v46  ;;  %v1246_v39 = vmul.f32 %v2972_v21, %v2972_v21  ;;  %v1252_v40 = vmul.f32 %v2983_v26, %v2983_v26  ;;  %v3017_v46 = vld [vmem:[%s2529_s27 + $0x260] sm:$0xff]  ;;  %v574_v47 = vld [vmem:[%s2754_s28 + $0x108] sm:$0xff] }
  0x7e   : > { %402 = vst.msk [vmem:[#allocation4 + $0xc8] sm:$0xff] %vm376_vm0, %v3827_v3  ;;  %403 = vst.msk [vmem:[#allocation4 + $0xd0] sm:$0xff] %vm376_vm0, %v3827_v3  ;;  %883 = vmatpush1.msra.mxu1 %v578_v55  ;;  %659 = vmatprep.subr.mxu0 %v3827_v3  ;;  %v1378_v42 = vadd.f32 %v1377_v19, %v1238_v15  ;;  %v1253_v43 = vmul.f32 %v2986_v30, %v2986_v30  ;;  %v3023_v55 = vld [vmem:[%s2529_s27 + $0x268] sm:$0xff]  ;;  %v3027_v57 = vld [vmem:[%s2529_s27 + $0x238] sm:$0xff] }
  0x7f   : > { %404 = vst.msk [vmem:[#allocation4 + $0xd8] sm:$0xff] %vm376_vm0, %v3827_v3  ;;  %405 = vst.msk [vmem:[#allocation4 + $0xe0] sm:$0xff] %vm376_vm0, %v3827_v3  ;;  %884 = vmatprep.subr.mxu1 %v3827_v3  ;;  %1359 = vadd.xlane.f32.xlu1 %v2840_v51  ;;  %v1215_v45 = vmul.f32 %v2996_v36, %v2996_v36  ;;  %v1387_v49 = vadd.f32 %v1386_v35, %v1245_v25  ;;  %v3032_v61 = vld [vmem:[%s2529_s27 + $0x140] sm:$0xff]  ;;  %v3044_v6 = vld [vmem:[%s2529_s27 + $0x148] sm:$0xff] }
  0x80   : > { %406 = vst.msk [vmem:[#allocation4 + $0xe8] sm:$0xff] %vm376_vm0, %v3827_v3  ;;  %407 = vst.msk [vmem:[#allocation4 + $0xf0] sm:$0xff] %vm376_vm0, %v3827_v3  ;;  %1334 = vadd.xlane.f32.xlu0 %v1333_v2  ;;  %660 = vmatpush1.msra.mxu0 %v545_v4  ;;  %v1396_v50 = vadd.f32 %v1252_v40, %v1251_v31  ;;  %v1216_v51 = vmul.f32 %v2999_v37, %v2999_v37  ;;  %v541_v63 = vld [vmem:[%s2754_s28] sm:$0xff]  ;;  %v3039_v4 = vld [vmem:[%s2529_s27 + $0x270] sm:$0xff] }
  0x81   : > { %408 = vst.msk [vmem:[#allocation4 + $0xf8] sm:$0xff] %vm376_vm0, %v3827_v3  ;;  %3876 = vst [vmem:[#allocation8_spill] sm:$0xff] %v2977_v23  ;;  %885 = vmatpush1.msra.mxu1 %v577_v5  ;;  %661 = vmatprep.subr.mxu0 %v3827_v3  ;;  %v1343_v56 = vadd.f32 %v1342_v34, %v1210_v33  ;;  %v1259_v58 = vmul.f32 %v3017_v46, %v3017_v46  ;;  %v573_v7 = vld [vmem:[%s2754_s28 + $0x100] sm:$0xff]  ;;  %v3049_v8 = vld [vmem:[%s2529_s27 + $0x118] sm:$0xff] }
  0x82   : > { %3877 = vst [vmem:[#allocation9_spill] sm:$0xff] %v2983_v26  ;;  %3878 = vst [vmem:[#allocation10_spill] sm:$0xff] %v2986_v30  ;;  %886 = vmatprep.subr.mxu1 %v3827_v3  ;;  %662 = vmatpush1.msra.mxu0 %v544_v14  ;;  %v1217_v0 = vmul.f32 %v3012_v44, %v3012_v44  ;;  %v1351_v2 = vadd.f32 %v1216_v51, %v1215_v45  ;;  %v3054_v10 = vld [vmem:[%s2529_s27 + $0x2a0] sm:$0xff]  ;;  %v572_v14 = vld [vmem:[%s2754_s28 + $0xf8] sm:$0xff] }
  0x83   : > { %887 = vmatpush1.msra.mxu1 %v576_v18  ;;  %663 = vmatprep.subr.mxu0 %v3827_v3  ;;  %3879 = vst [vmem:[#allocation11_spill] sm:$0xff] %v3017_v46  ;;  %3880 = vst [vmem:[#allocation12_spill] sm:$0xff] %v3023_v55  ;;  %v1260_v5 = vmul.f32 %v3023_v55, %v3023_v55  ;;  %v1223_v9 = vmul.f32 %v3032_v61, %v3032_v61  ;;  %v3061_v19 = vld [vmem:[%s2529_s27 + $0x150] sm:$0xff]  ;;  %v3064_v20 = vld [vmem:[%s2529_s27 + $0x2a8] sm:$0xff] }
  0x84   : > { %888 = vmatprep.subr.mxu1 %v3827_v3  ;;  %1369 = vadd.xlane.f32.xlu1 %v1368_v24  ;;  %3881 = vst [vmem:[#allocation13_spill] sm:$0xff] %v3027_v57  ;;  %3882 = vst [vmem:[#allocation14_spill] sm:$0xff] %v3039_v4  ;;  %v1388_v15 = vadd.f32 %v1387_v49, %v1246_v39  ;;  %v1254_v17 = vmul.f32 %v3027_v57, %v3027_v57  ;;  %v604_v22 = vld [vmem:[%s2754_s28 + $0x1f8] sm:$0xff]  ;;  %v3075_v33 = vld [vmem:[%s2529_s27 + $0x180] sm:$0xff] }
  0x85   : > { %664 = vmatpush1.msra.mxu0 %v543_v32  ;;  %889 = vmatpush1.msra.mxu1 %v575_v38  ;;  %3883 = vst [vmem:[#allocation15_spill] sm:$0xff] %v3054_v10  ;;  %v1397_v18 = vadd.f32 %v1396_v50, %v1253_v43  ;;  %3884 = vst [vmem:[#allocation16_spill] sm:$0xff] %v3064_v20  ;;  %v3068_v24 = vld [vmem:[%s2529_s27 + $0x278] sm:$0xff]  ;;  %v1261_v25 = vmul.f32 %v3039_v4, %v3039_v4  ;;  %v3086_v40 = vld [vmem:[%s2529_s27 + $0x188] sm:$0xff] }
  0x86   : > { %665 = vmatprep.subr.mxu0 %v3827_v3  ;;  %890 = vmatprep.subr.mxu1 %v3827_v3  ;;  %3885 = vst [vmem:[#allocation17_spill] sm:$0xff] %v3068_v24  ;;  %v1406_v31 = vadd.f32 %v1260_v5, %v1259_v58  ;;  %v1224_v32 = vmul.f32 %v3044_v6, %v3044_v6  ;;  %v3081_v38 = vld [vmem:[%s2529_s27 + $0x158] sm:$0xff]  ;;  %v570_v50 = vld [vmem:[%s2754_s28 + $0xe8] sm:$0xff]  ;;  %v3103_v58 = vld [vmem:[%s2529_s27 + $0x190] sm:$0xff] }
  0x87   : > { %666 = vmatpush1.msra.mxu0 %v542_v41  ;;  %891 = vmatpush1.msra.mxu1 %v574_v47  ;;  %v1218_v34 = vmul.f32 %v3049_v8, %v3049_v8  ;;  %v1352_v35 = vadd.f32 %v1351_v2, %v1217_v0  ;;  %v1267_v39 = vmul.f32 %v3054_v10, %v3054_v10  ;;  %v571_v41 = vld [vmem:[%s2754_s28 + $0xf0] sm:$0xff]  ;;  %v602_v0 = vld [vmem:[%s2754_s28 + $0x1e8] sm:$0xff]  ;;  %v3178_v46 = vld [vmem:[%s2529_s27 + $0x1d8] sm:$0xff] }
  0x88   : > { %667 = vmatprep.subr.mxu0 %v3827_v3  ;;  %892 = vmatprep.subr.mxu1 %v3827_v3  ;;  %v1225_v43 = vmul.f32 %v3061_v19, %v3061_v19  ;;  %v1361_v45 = vadd.f32 %v1224_v32, %v1223_v9  ;;  %v3094_v47 = vld [vmem:[%s2529_s27 + $0x2b0] sm:$0xff]  ;;  %v1268_v49 = vmul.f32 %v3064_v20, %v3064_v20  ;;  %v3114_v9 = vld [vmem:[%s2529_s27 + $0x2e0] sm:$0xff]  ;;  %v3130_v32 = vld [vmem:[%s2529_s27 + $0x198] sm:$0xff] }
  0x89   : > { %1379 = vadd.xlane.f32.xlu1 %v1378_v42  ;;  %1344 = vadd.xlane.f32.xlu0 %v1343_v56  ;;  %v603_v42 = vld [vmem:[%s2754_s28 + $0x1f0] sm:$0xff]  ;;  %3886 = vst [vmem:[#allocation18_spill] sm:$0xff] %v3094_v47  ;;  %v1398_v51 = vadd.f32 %v1397_v18, %v1254_v17  ;;  %v1262_v56 = vmul.f32 %v3068_v24, %v3068_v24  ;;  %3887 = vst [vmem:[#allocation19_spill] sm:$0xff] %v3114_v9  ;;  %v3171_v20 = vld [vmem:[%s2529_s27 + $0x2f8] sm:$0xff] }
  0x8a   : > { %668 = vmatpush1.msra.mxu0 %v541_v63  ;;  %893 = vmatpush1.msra.mxu1 %v573_v7  ;;  %v1231_v63 = vmul.f32 %v3075_v33, %v3075_v33  ;;  %v1407_v2 = vadd.f32 %v1406_v31, %v1261_v25  ;;  %v1226_v5 = vmul.f32 %v3081_v38, %v3081_v38  ;;  %v3125_v25 = vld [vmem:[%s2529_s27 + $0x1c0] sm:$0xff]  ;;  %v3213_v23 = vld [vmem:[%s2529_s27 + $0x368] sm:$0xff] }
  0x8b   : > { %669 = vmatprep.subr.mxu0 %v3827_v3  ;;  %894 = vmatprep.subr.mxu1 %v3827_v3  ;;  %v1232_v7 = vmul.f32 %v3086_v40, %v3086_v40  ;;  %v1353_v17 = vadd.f32 %v1352_v35, %v1218_v34  ;;  %v1269_v18 = vmul.f32 %v3094_v47, %v3094_v47  ;;  %v3154_v47 = vld [vmem:[%s2529_s27 + $0x320] sm:$0xff] }
  0x8c   : > { %670 = vmatpush2.msra.mxu0 %v572_v14  ;;  %895 = vmatpush2.msra.mxu1 %v604_v22  ;;  %v3117_v14 = vld [vmem:[%s2529_s27 + $0x2e8] sm:$0xff]  ;;  %v1416_v22 = vadd.f32 %v1268_v49, %v1267_v39  ;;  %v1362_v31 = vadd.f32 %v1361_v45, %v1225_v43  ;;  %v1233_v34 = vmul.f32 %v3103_v58, %v3103_v58  ;;  %v569_v39 = vld [vmem:[%s2754_s28 + $0xe0] sm:$0xff]  ;;  %v3140_v49 = vld [vmem:[%s2529_s27 + $0x2f0] sm:$0xff] }
  0x8d   : > { %671 = vmatprep.subr.mxu0 %v3827_v3  ;;  %896 = vmatprep.subr.mxu1 %v3827_v3  ;;  %3888 = vst [vmem:[#allocation20_spill] sm:$0xff] %v3117_v14  ;;  %v1371_v35 = vadd.f32 %v1232_v7, %v1231_v63  ;;  %3890 = vst [vmem:[#allocation22_spill] sm:$0xff] %v3140_v49  ;;  %v1275_v43 = vmul.f32 %v3114_v9, %v3114_v9  ;;  %v568_v63 = vld [vmem:[%s2754_s28 + $0xd8] sm:$0xff]  ;;  %v3157_v9 = vld [vmem:[%s2529_s27 + $0x328] sm:$0xff] }
  0x8e   : > { %1389 = vadd.xlane.f32.xlu1 %v1388_v15  ;;  %672 = vmatpush2.msra.mxu0 %v571_v41  ;;  %v3120_v15 = vld [vmem:[%s2529_s27 + $0x2b8] sm:$0xff]  ;;  %v3135_v41 = vld [vmem:[%s2529_s27 + $0x1c8] sm:$0xff]  ;;  %v1276_v45 = vmul.f32 %v3117_v14, %v3117_v14  ;;  %v1239_v7 = vmul.f32 %v3125_v25, %v3125_v25  ;;  %3891 = vst [vmem:[#allocation23_spill] sm:$0xff] %v3154_v47  ;;  %3892 = vst [vmem:[#allocation24_spill] sm:$0xff] %v3157_v9 }
  0x8f   : > { %897 = vmatpush2.msra.mxu1 %v603_v42  ;;  %3889 = vst [vmem:[#allocation21_spill] sm:$0xff] %v3120_v15  ;;  %673 = vmatprep.subr.mxu0 %v3827_v3  ;;  %v601_v42 = vld [vmem:[%s2754_s28 + $0x1e0] sm:$0xff]  ;;  %v600_v14 = vld [vmem:[%s2754_s28 + $0x1d8] sm:$0xff]  ;;  %v1417_v10 = vadd.f32 %v1416_v22, %v1269_v18  ;;  %3894 = vst [vmem:[#allocation26_spill] sm:$0xff] %v3171_v20  ;;  %v1277_v18 = vmul.f32 %v3140_v49, %v3140_v49  ;;  %v3895_v22 = vmov 0.0  }
  0x90   : > { %898 = vmatprep.subr.mxu1 %v3827_v3  ;;  %674 = vmatpush2.msra.mxu0 %v570_v50  ;;  %v1408_v50 = vadd.f32 %v1407_v2, %v1262_v56  ;;  %v3163_v56 = vld [vmem:[%s2529_s27 + $0x1d0] sm:$0xff]  ;;  %v1240_v2 = vmul.f32 %v3135_v41, %v3135_v41  ;;  %v1426_v4 = vadd.f32 %v1276_v45, %v1275_v43  ;;  %v3210_v30 = vld [vmem:[%s2529_s27 + $0x360] sm:$0xff] }
  0x91   : > { %899 = vmatpush2.msra.mxu1 %v602_v0  ;;  %675 = vmatprep.subr.mxu0 %v3827_v3  ;;  %v1270_v0 = vmul.f32 %v3120_v15, %v3120_v15  ;;  %v3168_v15 = vld [vmem:[%s2529_s27 + $0x200] sm:$0xff]  ;;  %v3192_v45 = vld [vmem:[%s2529_s27 + $0x330] sm:$0xff]  ;;  %v1278_v49 = vmul.f32 %v3171_v20, %v3171_v20  ;;  %v1242_v24 = vmul.f32 %v3178_v46, %v3178_v46 }
  0x92   : > { %900 = vmatprep.subr.mxu1 %v3827_v3  ;;  %1399 = vadd.xlane.f32.xlu1 %v1398_v51  ;;  %v1234_v3 = vmul.f32 %v3130_v32, %v3130_v32  ;;  %3893 = vst [vmem:[#allocation25_spill] sm:$0xff] %v3168_v15  ;;  %v1363_v51 = vadd.f32 %v1362_v31, %v1226_v5  ;;  %v3185_v31 = vld [vmem:[%s2529_s27 + $0x208] sm:$0xff]  ;;  %3896 = vst [vmem:[#allocation27_spill] sm:$0xff] %v3192_v45  ;;  %v3258_v26 = vld [vmem:[%s2529_s27 + $0x3a0] sm:$0xff] }
  0x93   : > { %1354 = vadd.xlane.f32.xlu0 %v1353_v17  ;;  %676 = vmatpush2.msra.mxu0 %v569_v39  ;;  %v1372_v17 = vadd.f32 %v1371_v35, %v1233_v34  ;;  %v1283_v39 = vmul.f32 %v3154_v47, %v3154_v47  ;;  %v1284_v5 = vmul.f32 %v3157_v9, %v3157_v9  ;;  %v567_v34 = vld [vmem:[%s2754_s28 + $0xd0] sm:$0xff] }
  0x94   : > { %901 = vmatpush2.msra.mxu1 %v601_v42  ;;  %677 = vmatprep.subr.mxu0 %v3895_v22  ;;  %v599_v35 = vld [vmem:[%s2754_s28 + $0x1d0] sm:$0xff]  ;;  %v1241_v42 = vmul.f32 %v3163_v56, %v3163_v56  ;;  %v1381_v43 = vadd.f32 %v1240_v2, %v1239_v7  ;;  %v1247_v47 = vmul.f32 %v3168_v15, %v3168_v15 }
  0x95   : > { %902 = vmatprep.subr.mxu1 %v3895_v22  ;;  %678 = vmatpush2.msra.mxu0 %v568_v63  ;;  %v566_v63 = vld [vmem:[%s2754_s28 + $0xc8] sm:$0xff]  ;;  %v1418_v9 = vadd.f32 %v1417_v10, %v1270_v0  ;;  %v3203_v7 = vld [vmem:[%s2529_s27 + $0x210] sm:$0xff]  ;;  %v1373_v2 = vadd.f32 %v1372_v17, %v1234_v3  ;;  %v1248_v55 = vmul.f32 %v3185_v31, %v3185_v31  ;;  %v3216_v10 = vld [vmem:[%s2529_s27 + $0x240] sm:$0xff] }
  0x96   : > { %903 = vmatpush2.msra.mxu1 %v600_v14  ;;  %679 = vmatprep.subr.mxu0 %v3895_v22  ;;  %v598_v14 = vld [vmem:[%s2754_s28 + $0x1c8] sm:$0xff]  ;;  %3897 = vst [vmem:[#allocation28_spill] sm:$0xff] %v3203_v7  ;;  %3898 = vst [vmem:[#allocation29_spill] sm:$0xff] %v3210_v30  ;;  %v3219_v3 = vld [vmem:[%s2529_s27 + $0x338] sm:$0xff]  ;;  %v1285_v0 = vmul.f32 %v3192_v45, %v3192_v45  ;;  %v1382_v20 = vadd.f32 %v1381_v43, %v1241_v42 }
  0x97   : > { %904 = vmatprep.subr.mxu1 %v3895_v22  ;;  %1409 = vadd.xlane.f32.xlu1 %v1408_v50  ;;  %3899 = vst [vmem:[#allocation30_spill] sm:$0xff] %v3213_v23  ;;  %3900 = vst [vmem:[#allocation31_spill] sm:$0xff] %v3216_v10  ;;  %v1427_v50 = vadd.f32 %v1426_v4, %v1277_v18  ;;  %v3224_v17 = vld [vmem:[%s2529_s27 + $0x248] sm:$0xff]  ;;  %v1249_v4 = vmul.f32 %v3203_v7, %v3203_v7 }
  0x98   : > { %1364 = vadd.xlane.f32.xlu0 %v1363_v51  ;;  %680 = vmatpush2.msra.mxu0 %v567_v34  ;;  %3901 = vst [vmem:[#allocation32_spill] sm:$0xff] %v3219_v3  ;;  %v1436_v51 = vadd.f32 %v1284_v5, %v1283_v39  ;;  %3902 = vst [vmem:[#allocation33_spill] sm:$0xff] %v3224_v17  ;;  %v3229_v34 = vld [vmem:[%s2529_s27 + $0x218] sm:$0xff]  ;;  %v1391_v18 = vadd.f32 %v1248_v55, %v1247_v47  ;;  %v597_v39 = vld [vmem:[%s2754_s28 + $0x1c0] sm:$0xff] }
  0x99   : > { %905 = vmatpush2.msra.mxu1 %v599_v35  ;;  %681 = vmatprep.subr.mxu0 %v3895_v22  ;;  %v565_v35 = vld [vmem:[%s2754_s28 + $0xc0] sm:$0xff]  ;;  %v3236_v5 = vld [vmem:[%s2529_s27 + $0x370] sm:$0xff]  ;;  %v1291_v45 = vmul.f32 %v3210_v30, %v3210_v30  ;;  %v1292_v42 = vmul.f32 %v3213_v23, %v3213_v23  ;;  %v1255_v43 = vmul.f32 %v3216_v10, %v3216_v10  ;;  %v564_v55 = vld [vmem:[%s2754_s28 + $0xb8] sm:$0xff] }
  0x9a   : > { %906 = vmatprep.subr.mxu1 %v3895_v22  ;;  %682 = vmatpush2.msra.mxu0 %v566_v63  ;;  %3903 = vst [vmem:[#allocation34_spill] sm:$0xff] %v3236_v5  ;;  %v1286_v47 = vmul.f32 %v3219_v3, %v3219_v3  ;;  %v3250_v63 = vld [vmem:[%s2529_s27 + $0x250] sm:$0xff]  ;;  %v596_v30 = vld [vmem:[%s2754_s28 + $0x1b8] sm:$0xff]  ;;  %v1428_v23 = vadd.f32 %v1427_v50, %v1278_v49  ;;  %3905 = vst [vmem:[#allocation36_spill] sm:$0xff] %v3258_v26 }
  0x9b   : > { %907 = vmatpush2.msra.mxu1 %v598_v14  ;;  %683 = vmatprep.subr.mxu0 %v3895_v22  ;;  %3904 = vst [vmem:[#allocation35_spill] sm:$0xff] %v3250_v63  ;;  %v1256_v14 = vmul.f32 %v3224_v17, %v3224_v17  ;;  %v1437_v10 = vadd.f32 %v1436_v51, %v1285_v0  ;;  %v3261_v7 = vld [vmem:[%s2529_s27 + $0x3a8] sm:$0xff]  ;;  %v3269_v50 = vld [vmem:[%s2529_s27 + $0x258] sm:$0xff]  ;;  %v3305_v17 = vld [vmem:[%s2529_s27 + $0x290] sm:$0xff] }
  0x9c   : > { %908 = vmatprep.subr.mxu1 %v3895_v22  ;;  %1419 = vadd.xlane.f32.xlu1 %v1418_v9  ;;  %v1250_v57 = vmul.f32 %v3229_v34, %v3229_v34  ;;  %3906 = vst [vmem:[#allocation37_spill] sm:$0xff] %v3261_v7  ;;  %v1383_v3 = vadd.f32 %v1382_v20, %v1242_v24  ;;  %3908 = vst [vmem:[#allocation39_spill] sm:$0xff] %v3269_v50  ;;  %v3276_v20 = vld [vmem:[%s2529_s27 + $0x280] sm:$0xff]  ;;  %v3279_v24 = vld [vmem:[%s2529_s27 + $0x288] sm:$0xff] }
  0x9d   : > { %1374 = vadd.xlane.f32.xlu0 %v1373_v2  ;;  %684 = vmatpush2.msra.mxu0 %v565_v35  ;;  %v1392_v9 = vadd.f32 %v1391_v18, %v1249_v4  ;;  %v3264_v2 = vld [vmem:[%s2529_s27 + $0x378] sm:$0xff]  ;;  %v1293_v49 = vmul.f32 %v3236_v5, %v3236_v5  ;;  %v1446_v0 = vadd.f32 %v1292_v42, %v1291_v45  ;;  %v563_v4 = vld [vmem:[%s2754_s28 + $0xb0] sm:$0xff]  ;;  %v3300_v5 = vld [vmem:[%s2529_s27 + $0x3e8] sm:$0xff] }
  0x9e   : > { %909 = vmatpush2.msra.mxu1 %v597_v39  ;;  %3907 = vst [vmem:[#allocation38_spill] sm:$0xff] %v3264_v2  ;;  %685 = vmatprep.subr.mxu0 %v3895_v22  ;;  %v1257_v51 = vmul.f32 %v3250_v63, %v3250_v63  ;;  %v1401_v35 = vadd.f32 %v1256_v14, %v1255_v43  ;;  %3909 = vst [vmem:[#allocation40_spill] sm:$0xff] %v3276_v20  ;;  %v595_v18 = vld [vmem:[%s2754_s28 + $0x1b0] sm:$0xff]  ;;  %v3297_v14 = vld [vmem:[%s2529_s27 + $0x3e0] sm:$0xff] }
  0x9f   : > { %910 = vmatprep.subr.mxu1 %v3895_v22  ;;  %3910 = vst [vmem:[#allocation41_spill] sm:$0xff] %v3279_v24  ;;  %686 = vmatpush2.msra.mxu0 %v564_v55  ;;  %v3284_v39 = vld [vmem:[%s2529_s27 + $0x3b0] sm:$0xff]  ;;  %v1299_v45 = vmul.f32 %v3258_v26, %v3258_v26  ;;  %v1300_v42 = vmul.f32 %v3261_v7, %v3261_v7  ;;  %3912 = vst [vmem:[#allocation43_spill] sm:$0xff] %v3297_v14  ;;  %v562_v26 = vld [vmem:[%s2754_s28 + $0xa8] sm:$0xff] }
  0xa0   : > { %911 = vmatpush2.msra.mxu1 %v596_v30  ;;  %3911 = vst [vmem:[#allocation42_spill] sm:$0xff] %v3284_v39  ;;  %687 = vmatprep.subr.mxu0 %v3895_v22  ;;  %v1438_v43 = vadd.f32 %v1437_v10, %v1286_v47  ;;  %v1294_v30 = vmul.f32 %v3264_v2, %v3264_v2  ;;  %3913 = vst [vmem:[#allocation44_spill] sm:$0xff] %v3300_v5  ;;  %v594_v7 = vld [vmem:[%s2754_s28 + $0x1a8] sm:$0xff] }
  0xa1   : > { %912 = vmatprep.subr.mxu1 %v3895_v22  ;;  %v1258_v55 = vmul.f32 %v3269_v50, %v3269_v50  ;;  %1429 = vadd.xlane.f32.xlu1 %v1428_v23  ;;  %v1393_v63 = vadd.f32 %v1392_v9, %v1250_v57  ;;  %3914 = vst [vmem:[#allocation45_spill] sm:$0xff] %v3305_v17  ;;  %v3314_v50 = vld [vmem:[%s2529_s27 + $0x2c0] sm:$0xff]  ;;  %v3317_v57 = vld [vmem:[%s2529_s27 + $0x2c8] sm:$0xff]  ;;  %v3322_v9 = vld [vmem:[%s2529_s27 + $0x3b8] sm:$0xff] }
  0xa2   : > { %1384 = vadd.xlane.f32.xlu0 %v1383_v3  ;;  %v1263_v10 = vmul.f32 %v3276_v20, %v3276_v20  ;;  %v1264_v47 = vmul.f32 %v3279_v24, %v3279_v24  ;;  %688 = vmatpush2.msra.mxu0 %v563_v4  ;;  %v1447_v2 = vadd.f32 %v1446_v0, %v1293_v49  ;;  %v592_v20 = vld [vmem:[%s2754_s28 + $0x198] sm:$0xff] }
  0xa3   : > { %913 = vmatpush2.msra.mxu1 %v595_v18  ;;  %v1402_v23 = vadd.f32 %v1401_v35, %v1257_v51  ;;  %v1301_v3 = vmul.f32 %v3284_v39, %v3284_v39  ;;  %3915 = vst [vmem:[#allocation46_spill] sm:$0xff] %v3314_v50  ;;  %3916 = vst [vmem:[#allocation47_spill] sm:$0xff] %v3317_v57  ;;  %689 = vmatprep.subr.mxu0 %v3895_v22  ;;  %v561_v51 = vld [vmem:[%s2754_s28 + $0xa0] sm:$0xff]  ;;  %v3333_v39 = vld [vmem:[%s2529_s27 + $0x3f0] sm:$0xff] }
  0xa4   : > { %914 = vmatprep.subr.mxu1 %v3895_v22  ;;  %3917 = vst [vmem:[#allocation48_spill] sm:$0xff] %v3322_v9  ;;  %v1456_v4 = vadd.f32 %v1300_v42, %v1299_v45  ;;  %v1307_v49 = vmul.f32 %v3297_v14, %v3297_v14  ;;  %v1308_v0 = vmul.f32 %v3300_v5, %v3300_v5  ;;  %v593_v35 = vld [vmem:[%s2754_s28 + $0x1a0] sm:$0xff]  ;;  %3918 = vst [vmem:[#allocation49_spill] sm:$0xff] %v3333_v39  ;;  %v3338_v45 = vld [vmem:[%s2529_s27 + $0x298] sm:$0xff] }
  0xa5   : > { %690 = vmatpush2.msra.mxu0 %v562_v26  ;;  %915 = vmatpush2.msra.mxu1 %v594_v7  ;;  %v1265_v18 = vmul.f32 %v3305_v17, %v3305_v17  ;;  %v1411_v42 = vadd.f32 %v1264_v47, %v1263_v10  ;;  %v1271_v26 = vmul.f32 %v3314_v50, %v3314_v50  ;;  %v3345_v14 = vld [vmem:[%s2529_s27 + $0x300] sm:$0xff]  ;;  %v3348_v5 = vld [vmem:[%s2529_s27 + $0x308] sm:$0xff]  ;;  %v560_v17 = vld [vmem:[%s2754_s28 + $0x98] sm:$0xff] }
  0xa6   : > { %691 = vmatprep.subr.mxu0 %v3895_v22  ;;  %916 = vmatprep.subr.mxu1 %v3895_v22  ;;  %v1272_v7 = vmul.f32 %v3317_v57, %v3317_v57  ;;  %3919 = vst [vmem:[#allocation50_spill] sm:$0xff] %v3345_v14  ;;  %v1448_v24 = vadd.f32 %v1447_v2, %v1294_v30  ;;  %v3355_v47 = vld [vmem:[%s2529_s27 + $0x2d0] sm:$0xff]  ;;  %v3358_v57 = vld [vmem:[%s2529_s27 + $0x3f8] sm:$0xff] }
  0xa7   : > { %1439 = vadd.xlane.f32.xlu1 %v1438_v43  ;;  %1394 = vadd.xlane.f32.xlu0 %v1393_v63  ;;  %v1403_v15 = vadd.f32 %v1402_v23, %v1258_v55  ;;  %v1302_v10 = vmul.f32 %v3322_v9, %v3322_v9  ;;  %v1457_v50 = vadd.f32 %v1456_v4, %v1301_v3  ;;  %v559_v2 = vld [vmem:[%s2754_s28 + $0x90] sm:$0xff] }
  0xa8   : > { %692 = vmatpush2.msra.mxu0 %v561_v51  ;;  %917 = vmatpush2.msra.mxu1 %v593_v35  ;;  %3920 = vst [vmem:[#allocation51_spill] sm:$0xff] %v3358_v57  ;;  %v1309_v63 = vmul.f32 %v3333_v39, %v3333_v39  ;;  %v1466_v43 = vadd.f32 %v1308_v0, %v1307_v49  ;;  %v3368_v55 = vld [vmem:[%s2529_s27 + $0x310] sm:$0xff]  ;;  %v3378_v35 = vld [vmem:[%s2529_s27 + $0x340] sm:$0xff]  ;;  %v3381_v39 = vld [vmem:[%s2529_s27 + $0x348] sm:$0xff] }
  0xa9   : > { %693 = vmatprep.subr.mxu0 %v3895_v22  ;;  %918 = vmatprep.subr.mxu1 %v3895_v22  ;;  %v1266_v30 = vmul.f32 %v3338_v45, %v3338_v45  ;;  %v1279_v23 = vmul.f32 %v3345_v14, %v3345_v14  ;;  %v1280_v3 = vmul.f32 %v3348_v5, %v3348_v5  ;;  %v591_v4 = vld [vmem:[%s2754_s28 + $0x190] sm:$0xff]  ;;  %v3395_v14 = vld [vmem:[%s2529_s27 + $0x318] sm:$0xff] }
  0xaa   : > { %694 = vmatpush2.msra.mxu0 %v560_v17  ;;  %919 = vmatpush2.msra.mxu1 %v592_v20  ;;  %v1412_v49 = vadd.f32 %v1411_v42, %v1265_v18  ;;  %v1273_v0 = vmul.f32 %v3355_v47, %v3355_v47  ;;  %v1421_v51 = vadd.f32 %v1272_v7, %v1271_v26  ;;  %v3388_v17 = vld [vmem:[%s2529_s27 + $0x2d8] sm:$0xff]  ;;  %v558_v20 = vld [vmem:[%s2754_s28 + $0x88] sm:$0xff] }
  0xab   : > { %695 = vmatprep.subr.mxu0 %v3895_v22  ;;  %920 = vmatprep.subr.mxu1 %v3895_v22  ;;  %v1310_v9 = vmul.f32 %v3358_v57, %v3358_v57  ;;  %v590_v18 = vld [vmem:[%s2754_s28 + $0x188] sm:$0xff]  ;;  %v1458_v42 = vadd.f32 %v1457_v50, %v1302_v10  ;;  %v1467_v26 = vadd.f32 %v1466_v43, %v1309_v63  ;;  %v3406_v43 = vld [vmem:[%s2529_s27 + $0x350] sm:$0xff] }
  0xac   : > { %1449 = vadd.xlane.f32.xlu1 %v1448_v24  ;;  %1404 = vadd.xlane.f32.xlu0 %v1403_v15  ;;  %v1281_v7 = vmul.f32 %v3368_v55, %v3368_v55  ;;  %v1431_v57 = vadd.f32 %v1280_v3, %v1279_v23  ;;  %v1287_v15 = vmul.f32 %v3378_v35, %v3378_v35  ;;  %v3410_v23 = vld [vmem:[%s2529_s27 + $0x380] sm:$0xff]  ;;  %v3413_v3 = vld [vmem:[%s2529_s27 + $0x388] sm:$0xff] }
  0xad   : > { %696 = vmatpush2.msra.mxu0 %v559_v2  ;;  %921 = vmatpush2.msra.mxu1 %v591_v4  ;;  %v1288_v24 = vmul.f32 %v3381_v39, %v3381_v39  ;;  %v1413_v50 = vadd.f32 %v1412_v49, %v1266_v30  ;;  %v1274_v10 = vmul.f32 %v3388_v17, %v3388_v17  ;;  %v557_v2 = vld [vmem:[%s2754_s28 + $0x80] sm:$0xff] }
  0xae   : > { %697 = vmatprep.subr.mxu0 %v3895_v22  ;;  %922 = vmatprep.subr.mxu1 %v3895_v22  ;;  %v1422_v63 = vadd.f32 %v1421_v51, %v1273_v0  ;;  %3921 = vst [vmem:[#allocation52_spill] sm:$0xff] %v3406_v43  ;;  %3922 = vst [vmem:[#allocation53_spill] sm:$0xff] %v3410_v23  ;;  %v589_v30 = vld [vmem:[%s2754_s28 + $0x180] sm:$0xff]  ;;  %v1468_v4 = vadd.f32 %v1467_v26, %v1310_v9  ;;  %v2299_v0 = vld [vmem:[%s2529_s27 + $0x18] sm:$0xff] }
  0xaf   : > { %698 = vmatpush2.msra.mxu0 %v558_v20  ;;  %923 = vmatpush2.msra.mxu1 %v590_v18  ;;  %v1282_v49 = vmul.f32 %v3395_v14, %v3395_v14  ;;  %v1432_v51 = vadd.f32 %v1431_v57, %v1281_v7  ;;  %v3422_v20 = vld [vmem:[%s2529_s27 + $0x358] sm:$0xff]  ;;  %v1289_v18 = vmul.f32 %v3406_v43, %v3406_v43  ;;  %v3427_v26 = vld [vmem:[%s2529_s27 + $0x390] sm:$0xff]  ;;  %v2300_v57 = vld [vmem:[%s2529_s27] sm:$0xff] }
  0xb0   : > { %699 = vmatprep.subr.mxu0 %v3895_v22  ;;  %924 = vmatprep.subr.mxu1 %v3895_v22  ;;  %v1441_v22 = vadd.f32 %v1288_v24, %v1287_v15  ;;  %v1423_v9 = vadd.f32 %v1422_v63, %v1274_v10  ;;  %v3435_v7 = vld [vmem:[%s2529_s27 + $0x3c0] sm:$0xff]  ;;  %v3438_v43 = vld [vmem:[%s2529_s27 + $0x3c8] sm:$0xff]  ;;  %v2301_v15 = vld [vmem:[%s2529_s27 + $0x10] sm:$0xff] }
  0xb1   : > { %1459 = vadd.xlane.f32.xlu1 %v1458_v42  ;;  %926 = vmatprep.mubr.f32.mxu1 %v2299_v0  ;;  %v1295_v42 = vmul.f32 %v3410_v23, %v3410_v23  ;;  %v1296_v0 = vmul.f32 %v3413_v3, %v3413_v3  ;;  %3923 = vst [vmem:[#allocation54_spill] sm:$0xff] %v3435_v7  ;;  %3924 = vst [vmem:[#allocation55_spill] sm:$0xff] %v3438_v43  ;;  %v2302_v24 = vld [vmem:[%s2529_s27 + $0x28] sm:$0xff]  ;;  %v2303_v10 = vld [vmem:[%s2529_s27 + $0x38] sm:$0xff]  ;;  %v2430_v23 = vmov 0  }
  0xb2   : > { %1414 = vadd.xlane.f32.xlu0 %v1413_v50  ;;  %700 = vmatpush2.msra.mxu0 %v557_v2  ;;  %v1290_v50 = vmul.f32 %v3422_v20, %v3422_v20  ;;  %v1433_v63 = vadd.f32 %v1432_v51, %v1282_v49  ;;  %v1442_v2 = vadd.f32 %v1441_v22, %v1289_v18  ;;  %v3456_v49 = vld [vmem:[%s2529_s27 + $0x3d0] sm:$0xff]  ;;  %v2306_v18 = vld [vmem:[%s2529_s27 + $0x48] sm:$0xff]  ;;  %v2307_v22 = vld [vmem:[%s2529_s27 + $0x58] sm:$0xff] }
  0xb3   : > { %925 = vmatpush2.msra.mxu1 %v589_v30  ;;  %702 = vmatmul.mubr.f32.vlgmr.msra.gmra.mxu0 %v2300_v57  ;;  %v1297_v30 = vmul.f32 %v3427_v26, %v3427_v26  ;;  %v3448_v57 = vld [vmem:[%s2529_s27 + $0x398] sm:$0xff]  ;;  %v2305_v51 = vld [vmem:[%s2529_s27 + $0x30] sm:$0xff] }
  0xb4   : > { %927 = vmatmul.mubr.f32.vlgmr.msra.gmra.mxu1 %v2301_v15  ;;  %706 = vmatprep.mubr.f32.mxu0 %v2302_v24  ;;  %v1451_v15 = vadd.f32 %v1296_v0, %v1295_v42  ;;  %v1303_v24 = vmul.f32 %v3435_v7, %v3435_v7  ;;  %v1443_v42 = vadd.f32 %v1442_v2, %v1290_v50  ;;  %v2308_v7 = vld [vmem:[%s2529_s27 + $0x40] sm:$0xff] }
  0xb5   : > { %1469 = vadd.xlane.f32.xlu1 %v1468_v4  ;;  %931 = vmatprep.mubr.f32.mxu1 %v2303_v10  ;;  %v1304_v4 = vmul.f32 %v3438_v43, %v3438_v43  ;;  %v2304_v10 = vld [vmem:[%s2529_s27 + $0x20] sm:$0xff]  ;;  %v2310_v43 = vld [vmem:[%s2529_s27 + $0x68] sm:$0xff] }
  0xb6   : > { %1424 = vadd.xlane.f32.xlu0 %v1423_v9  ;;  %2234 = vset.pattern.permute.xlu1 %v2430_v23  ;;  %v1298_v9 = vmul.f32 %v3448_v57, %v3448_v57  ;;  %v1452_v0 = vadd.f32 %v1451_v15, %v1297_v30  ;;  %v2312_v30 = vld [vmem:[%s2529_s27 + $0x60] sm:$0xff] }
  0xb7   : > { %707 = vmatmul.mubr.f32.gmra.mxu0 %v2304_v10  ;;  %2233 = vset.pattern.permute.xlu0 %v2430_v23  ;;  %v1305_v10 = vmul.f32 %v3456_v49, %v3456_v49  ;;  %v1461_v23 = vadd.f32 %v1304_v4, %v1303_v24  ;;  %v2314_v15 = vld [vmem:[%s2529_s27 + $0x80] sm:$0xff]  ;;  %v2315_v24 = vld [vmem:[%s2529_s27 + $0xa8] sm:$0xff]  ;;  %v2316_v4 = vld [vmem:[%s2529_s27 + $0xb8] sm:$0xff] }
  0xb8   : > { %932 = vmatmul.mubr.f32.gmra.mxu1 %v2305_v51  ;;  %711 = vmatprep.mubr.f32.mxu0 %v2306_v18  ;;  %v3467_v51 = vld [vmem:[%s2529_s27 + $0x3d8] sm:$0xff]  ;;  %v2309_v18 = vld [vmem:[%s2529_s27 + $0x50] sm:$0xff]  ;;  %v1453_v50 = vadd.f32 %v1452_v0, %v1298_v9  ;;  %v2317_v9 = vld [vmem:[%s2529_s27 + $0xa0] sm:$0xff] }
  0xb9   : > { %936 = vmatprep.mubr.f32.mxu1 %v2307_v22  ;;  %v2311_v22 = vld [vmem:[%s2529_s27 + $0x78] sm:$0xff]  ;;  %v1462_v2 = vadd.f32 %v1461_v23, %v1305_v10  ;;  %v2322_v0 = vld [vmem:[%s2529_s27 + $0xf0] sm:$0xff]  ;;  %v1156_v23 = vld [vmem:[#allocation4 + $0x28] sm:$0xff] }
  0xba   : > { %1434 = vadd.xlane.f32.xlu0 %v1433_v63  ;;  %v1306_v63 = vmul.f32 %v3467_v51, %v3467_v51 }
  0xbb   : > { %712 = vmatmul.mubr.f32.gmra.mxu0 %v2308_v7  ;;  %v2313_v7 = vld [vmem:[%s2529_s27 + $0x70] sm:$0xff] }
  0xbc   : > { %937 = vmatmul.mubr.f32.gmra.mxu1 %v2309_v18  ;;  %716 = vmatprep.mubr.f32.mxu0 %v2310_v43  ;;  %v1463_v43 = vadd.f32 %v1462_v2, %v1306_v63  ;;  %v3938_v18 = vld [vmem:[#allocation14_spill] sm:$0xff] }
  0xbd   : > { %941 = vmatprep.mubr.f32.mxu1 %v2311_v22  ;;  %v3939_v22 = vld [vmem:[#allocation41_spill] sm:$0xff] }
  0xbe   : > { %1444 = vadd.xlane.f32.xlu0 %v1443_v42  ;;  %v2321_v42 = vld [vmem:[%s2529_s27 + $0xe0] sm:$0xff] }
  0xbf   : > { %717 = vmatmul.mubr.f32.gmra.mxu0 %v2312_v30  ;;  %v3940_v30 = vld [vmem:[#allocation40_spill] sm:$0xff] }
  0xc0   : > { %942 = vmatmul.mubr.f32.gmra.mxu1 %v2313_v7  ;;  %721 = vmatprep.mubr.f32.mxu0 %v2808_v27  ;;  %v2318_v27 = vld [vmem:[%s2529_s27 + $0xb0] sm:$0xff]  ;;  %v1158_v7 = vld [vmem:[#allocation4 + $0x38] sm:$0xff] }
  0xc1   : > { %946 = vmatprep.mubr.f32.mxu1 %v2814_v29  ;;  %v2320_v29 = vld [vmem:[%s2529_s27 + $0xf8] sm:$0xff] }
  0xc2   : > { %1454 = vadd.xlane.f32.xlu0 %v1453_v50 }
  0xc3   : > { %722 = vmatmul.mubr.f32.gmra.mxu0 %v2314_v15  ;;  %v3941_v15 = vld [vmem:[#allocation45_spill] sm:$0xff] }
  0xc4   : > { %947 = vmatmul.mubr.f32.gmra.mxu1 %v2811_v28  ;;  %726 = vmatprep.mubr.f32.mxu0 %v2315_v24  ;;  %v2319_v28 = vld [vmem:[%s2529_s27 + $0xe8] sm:$0xff]  ;;  %v3942_v24 = vld [vmem:[#allocation16_spill] sm:$0xff] }
  0xc5   : > { %951 = vmatprep.mubr.f32.mxu1 %v2316_v4  ;;  %v3943_v4 = vld [vmem:[#allocation21_spill] sm:$0xff] }
  0xc6   : > { %1464 = vadd.xlane.f32.xlu0 %v1463_v43 }
  0xc7   : > { %727 = vmatmul.mubr.f32.gmra.mxu0 %v2317_v9 }
  0xc8   : > { %952 = vmatmul.mubr.f32.gmra.mxu1 %v2318_v27  ;;  %731 = vmatprep.mubr.f32.mxu0 %v2859_v60  ;;  %v2324_v60 = vld [vmem:[%s2529_s27 + $0x138] sm:$0xff] }
  0xc9   : > { %956 = vmatprep.mubr.f32.mxu1 %v2965_v16  ;;  %v2326_v16 = vld [vmem:[%s2529_s27 + $0x130] sm:$0xff] }
  0xcb   : > { %732 = vmatmul.mubr.f32.gmra.mxu0 %v2856_v59  ;;  %v2323_v59 = vld [vmem:[%s2529_s27 + $0x128] sm:$0xff] }
  0xcc   : > { %957 = vmatmul.mubr.f32.gmra.mxu1 %v2873_v1  ;;  %736 = vmatprep.mubr.f32.mxu0 %v2319_v28  ;;  %v2325_v1 = vld [vmem:[%s2529_s27 + $0x120] sm:$0xff]  ;;  %v3944_v28 = vld [vmem:[#allocation15_spill] sm:$0xff] }
  0xcd   : > { %961 = vmatprep.mubr.f32.mxu1 %v2320_v29  ;;  %v1160_v29 = vld [vmem:[#allocation4 + $0x48] sm:$0xff] }
  0xcf   : > { %737 = vmatmul.mubr.f32.gmra.mxu0 %v2321_v42  ;;  %v1155_v42 = vld [vmem:[#allocation4 + $0x20] sm:$0xff] }
  0xd0   : > { %962 = vmatmul.mubr.f32.gmra.mxu1 %v2322_v0  ;;  %741 = vmatprep.mubr.f32.mxu0 %v2999_v37  ;;  %v2328_v37 = vld [vmem:[%s2529_s27 + $0x160] sm:$0xff]  ;;  %v3945_v0 = vld [vmem:[#allocation18_spill] sm:$0xff] }
  0xd1   : > { %966 = vmatprep.mubr.f32.mxu1 %v3049_v8  ;;  %v3932_v8 = vld [vmem:[#allocation39_spill] sm:$0xff] }
  0xd3   : > { %742 = vmatmul.mubr.f32.gmra.mxu0 %v2996_v36  ;;  %v2327_v36 = vld [vmem:[%s2529_s27 + $0x168] sm:$0xff] }
  0xd4   : > { %967 = vmatmul.mubr.f32.gmra.mxu1 %v3012_v44  ;;  %746 = vmatprep.mubr.f32.mxu0 %v2323_v59  ;;  %v2329_v44 = vld [vmem:[%s2529_s27 + $0x170] sm:$0xff]  ;;  %v3946_v59 = vld [vmem:[#allocation47_spill] sm:$0xff]  ;;  %s2148_s27 = sshll.u32 %s2408_s12, 8 }
  0xd5   : > { %971 = vmatprep.mubr.f32.mxu1 %v2324_v60  ;;  %s3632_s3 = scalar_lea.vmem %s3821_s1, %s2148_s27  ;;  %s1926_s4 = sadd.s32 %s2149_s9, %s2148_s27 }
  0xd6   : > { %s3643_s12 = scalar_lea.vmem [#allocation2], %s1926_s4 }
  0xd7   : > { %747 = vmatmul.mubr.f32.gmra.mxu0 %v2325_v1 }
  0xd8   : > { %972 = vmatmul.mubr.f32.gmra.mxu1 %v2326_v16  ;;  %751 = vmatprep.mubr.f32.mxu0 %v3044_v6 }
  0xd9   : > { %976 = vmatprep.mubr.f32.mxu1 %v3081_v38  ;;  %v1154_v38 = vld [vmem:[#allocation4 + $0x18] sm:$0xff] }
  0xdb   : > { %752 = vmatmul.mubr.f32.gmra.mxu0 %v3032_v61  ;;  %v3930_v61 = vld [vmem:[#allocation10_spill] sm:$0xff] }
  0xdc   : > { %977 = vmatmul.mubr.f32.gmra.mxu1 %v3061_v19  ;;  %756 = vmatprep.mubr.f32.mxu0 %v2327_v36 }
  0xdd   : > { %981 = vmatprep.mubr.f32.mxu1 %v2837_v48  ;;  %v3925_v48 = vld [vmem:[#allocation25_spill] sm:$0xff] }
  0xdf   : > { %757 = vmatmul.mubr.f32.gmra.mxu0 %v2328_v37 }
  0xe0   : > { %982 = vmatmul.mubr.f32.gmra.mxu1 %v2329_v44  ;;  %761 = vmatprep.mubr.f32.mxu0 %v3086_v40  ;;  %v3934_v40 = vld [vmem:[#allocation35_spill] sm:$0xff] }
  0xe1   : > { %986 = vmatprep.mubr.f32.mxu1 %v3130_v32  ;;  %v3936_v32 = vld [vmem:[#allocation17_spill] sm:$0xff] }
  0xe3   : > { %762 = vmatmul.mubr.f32.gmra.mxu0 %v3075_v33  ;;  %v3933_v33 = vld [vmem:[#allocation31_spill] sm:$0xff] }
  0xe4   : > { %987 = vmatmul.mubr.f32.gmra.mxu1 %v3103_v58  ;;  %766 = vmatprep.mubr.f32.mxu0 %v2846_v53  ;;  %v3927_v53 = vld [vmem:[#allocation9_spill] sm:$0xff]  ;;  %v3935_v58 = vld [vmem:[#allocation12_spill] sm:$0xff] }
  0xe5   : > { %991 = vmatprep.mubr.f32.mxu1 %v2866_v62  ;;  %v3928_v62 = vld [vmem:[#allocation13_spill] sm:$0xff] }
  0xe7   : > { %767 = vmatmul.mubr.f32.gmra.mxu0 %v2843_v52  ;;  %v3926_v52 = vld [vmem:[#allocation28_spill] sm:$0xff] }
  0xe8   : > { %992 = vmatmul.mubr.f32.gmra.mxu1 %v2849_v54  ;;  %771 = vmatprep.mubr.f32.mxu0 %v3135_v41  ;;  %v1153_v54 = vld [vmem:[#allocation4 + $0x10] sm:$0xff] }
  0xe9   : > { %996 = vmatprep.mubr.f32.mxu1 %v3178_v46  ;;  %v1151_v46 = vld [vmem:[#allocation4] sm:$0xff] }
  0xeb   : > { %772 = vmatmul.mubr.f32.gmra.mxu0 %v3125_v25  ;;  %v1152_v25 = vld [vmem:[#allocation4 + $0x8] sm:$0xff] }
  0xec   : > { %997 = vmatmul.mubr.f32.gmra.mxu1 %v3163_v56  ;;  %776 = vmatprep.mubr.f32.mxu0 %v2954_v12 }
  0xed   : > { %1001 = vmatprep.mubr.f32.mxu1 %v2972_v21  ;;  %v3929_v21 = vld [vmem:[#allocation8_spill] sm:$0xff] }
  0xef   : > { %777 = vmatmul.mubr.f32.gmra.mxu0 %v2951_v11 }
  0xf0   : > { %1002 = vmatmul.mubr.f32.gmra.mxu1 %v2957_v13  ;;  %781 = vmatprep.mubr.f32.mxu0 %v3185_v31  ;;  %v3931_v13 = vld [vmem:[#allocation33_spill] sm:$0xff] }
  0xf1   : > { %1006 = vmatprep.mubr.f32.mxu1 %v3229_v34  ;;  %v3937_v34 = vld [vmem:[#allocation11_spill] sm:$0xff] }
  0xf3   : > { %782 = vmatmul.mubr.f32.gmra.mxu0 %v3925_v48 }
  0xf4   : > { %1007 = vmatmul.mubr.f32.gmra.mxu1 %v3926_v52  ;;  %786 = vmatprep.mubr.f32.mxu0 %v3927_v53  ;;  %v3947_v53 = vld [vmem:[#allocation46_spill] sm:$0xff] }
  0xf5   : > { %1011 = vmatprep.mubr.f32.mxu1 %v3928_v62  ;;  %v1325_v12 = vpop.xlane.xlu1 %1324  ;;  %v1162_v62 = vld [vmem:[#allocation4 + $0x58] sm:$0xff] }
  0xf6   : > { %v1473_v11 = vadd.f32 %v1325_v12, %v1153_v54  ;;  %v3948_v54 = vld [vmem:[#allocation20_spill] sm:$0xff] }
  0xf7   : > { %787 = vmatmul.mubr.f32.gmra.mxu0 %v3929_v21  ;;  %v1315_v6 = vpop.xlane.xlu0 %1314  ;;  %v3950_v21 = vld [vmem:[#allocation19_spill] sm:$0xff] }
  0xf8   : > { %1012 = vmatmul.mubr.f32.gmra.mxu1 %v3930_v61  ;;  %791 = vmatprep.mubr.f32.mxu0 %v3931_v13  ;;  %1506 = vst.msk [vmem:[#allocation4 + $0x10] sm:$0xff] %vm376_vm0, %v1473_v11  ;;  %v1471_v19 = vadd.f32 %v1315_v6, %v1151_v46  ;;  %v3951_v61 = vld [vmem:[#allocation22_spill] sm:$0xff] }
  0xf9   : > { %1016 = vmatprep.mubr.f32.mxu1 %v3932_v8  ;;  %v1157_v13 = vld [vmem:[#allocation4 + $0x30] sm:$0xff] }
  0xfa   : > { %1504 = vst.msk [vmem:[#allocation4] sm:$0xff] %vm376_vm0, %v1471_v19 }
  0xfb   : > { %792 = vmatmul.mubr.f32.gmra.mxu0 %v3933_v33  ;;  %v3952_v33 = vld [vmem:[#allocation50_spill] sm:$0xff] }
  0xfc   : > { %1017 = vmatmul.mubr.f32.gmra.mxu1 %v3934_v40  ;;  %796 = vmatprep.mubr.f32.mxu0 %v3935_v58  ;;  %v1330_v41 = vpop.xlane.xlu1 %1329 }
  0xfd   : > { %1021 = vmatprep.mubr.f32.mxu1 %v3936_v32  ;;  %v1474_v56 = vadd.f32 %v1330_v41, %v1154_v38  ;;  %v1320_v31 = vpop.xlane.xlu0 %1319 }
  0xfe   : > { %v1472_v10 = vadd.f32 %v1320_v31, %v1152_v25  ;;  %v1166_v31 = vld [vmem:[#allocation4 + $0x78] sm:$0xff] }
  0xff   : > { %797 = vmatmul.mubr.f32.gmra.mxu0 %v3937_v34  ;;  %1507 = vst.msk [vmem:[#allocation4 + $0x18] sm:$0xff] %vm376_vm0, %v1474_v56  ;;  %v1541_v27 = vld [vmem:[#allocation4 + $0x10] sm:$0xff]  ;;  %v3954_v56 = vld [vmem:[#allocation32_spill] sm:$0xff] }
 0x100   : > { %1022 = vmatmul.mubr.f32.gmra.mxu1 %v3938_v18  ;;  %801 = vmatprep.mubr.f32.mxu0 %v3939_v22  ;;  %1505 = vst.msk [vmem:[#allocation4 + $0x8] sm:$0xff] %vm376_vm0, %v1472_v10  ;;  %v1340_v50 = vpop.xlane.xlu1 %1339  ;;  %v1573_v37 = vmax.f32 %v1541_v27, 1e-24  ;;  %v3955_v10 = vld [vmem:[#allocation23_spill] sm:$0xff] }
 0x101   : > { %1026 = vmatprep.mubr.f32.mxu1 %v3338_v45  ;;  %v1476_v63 = vadd.f32 %v1340_v50, %v1156_v23  ;;  %v1539_v2 = vld [vmem:[#allocation4] sm:$0xff] }
 0x102   : > { %v1571_v43 = vmax.f32 %v1539_v2, 1e-24 }
 0x103   : > { %802 = vmatmul.mubr.f32.gmra.mxu0 %v3940_v30  ;;  %1509 = vst.msk [vmem:[#allocation4 + $0x28] sm:$0xff] %vm376_vm0, %v1476_v63  ;;  %v1168_v30 = vld [vmem:[#allocation4 + $0x88] sm:$0xff] }
 0x104   : > { %1027 = vmatmul.mubr.f32.gmra.mxu1 %v3941_v15  ;;  %806 = vmatprep.mubr.f32.mxu0 %v3942_v24  ;;  %v1350_v9 = vpop.xlane.xlu1 %1349  ;;  %2235 = vrsqrt.f32 %v1571_v43  ;;  %v3957_v15 = vld [vmem:[#allocation52_spill] sm:$0xff]  ;;  %v3958_v24 = vld [vmem:[#allocation30_spill] sm:$0xff] }
 0x105   : > { %1031 = vmatprep.mubr.f32.mxu1 %v3943_v4  ;;  %v1478_v45 = vadd.f32 %v1350_v9, %v1158_v7  ;;  %v1159_v7 = vld [vmem:[#allocation4 + $0x40] sm:$0xff] }
 0x106   : > { %v1542_v52 = vld [vmem:[#allocation4 + $0x18] sm:$0xff] }
 0x107   : > { %807 = vmatmul.mubr.f32.gmra.mxu0 %v3944_v28  ;;  %1511 = vst.msk [vmem:[#allocation4 + $0x38] sm:$0xff] %vm376_vm0, %v1478_v45  ;;  %v1540_v60 = vld [vmem:[#allocation4 + $0x8] sm:$0xff]  ;;  %v1574_v12 = vmax.f32 %v1542_v52, 1e-24 }
 0x108   : > { %1032 = vmatmul.mubr.f32.gmra.mxu1 %v3945_v0  ;;  %811 = vmatprep.mubr.f32.mxu0 %v3946_v59  ;;  %v1360_v1 = vpop.xlane.xlu1 %1359  ;;  %v1572_v36 = vmax.f32 %v1540_v60, 1e-24  ;;  %v1170_v60 = vld [vmem:[#allocation4 + $0x98] sm:$0xff] }
 0x109   : > { %1036 = vmatprep.mubr.f32.mxu1 %v3388_v17  ;;  %v1335_v16 = vpop.xlane.xlu0 %1334  ;;  %v1480_v44 = vadd.f32 %v1360_v1, %v1160_v29  ;;  %v3949_v17 = vld [vmem:[#allocation26_spill] sm:$0xff] }
 0x10a   : > { %v1475_v48 = vadd.f32 %v1335_v16, %v1155_v42  ;;  %2237 = vrsqrt.f32 %v1572_v36  ;;  %v1544_v19 = vld [vmem:[#allocation4 + $0x28] sm:$0xff]  ;;  %v1161_v1 = vld [vmem:[#allocation4 + $0x50] sm:$0xff] }
 0x10b   : > { %812 = vmatmul.mubr.f32.gmra.mxu0 %v3947_v53  ;;  %1513 = vst.msk [vmem:[#allocation4 + $0x48] sm:$0xff] %vm376_vm0, %v1480_v44  ;;  %2239 = vrsqrt.f32 %v1573_v37  ;;  %v1576_v34 = vmax.f32 %v1544_v19, 1e-24  ;;  %v3961_v16 = vld [vmem:[#allocation34_spill] sm:$0xff] }
 0x10c   : > { %1037 = vmatmul.mubr.f32.gmra.mxu1 %v3355_v47  ;;  %816 = vmatprep.mubr.f32.mxu0 %v3948_v54  ;;  %1508 = vst.msk [vmem:[#allocation4 + $0x20] sm:$0xff] %vm376_vm0, %v1475_v48  ;;  %v1164_v47 = vld [vmem:[#allocation4 + $0x68] sm:$0xff]  ;;  %2241 = vrsqrt.f32 %v1574_v12 }
 0x10d   : > { %1041 = vmatprep.mubr.f32.mxu1 %v3949_v17  ;;  %v1370_v46 = vpop.xlane.xlu1 %1369  ;;  %v3963_v12 = vld [vmem:[#allocation37_spill] sm:$0xff] }
 0x10e   : > { %v1482_v11 = vadd.f32 %v1370_v46, %v1162_v62  ;;  %v1546_v43 = vld [vmem:[#allocation4 + $0x38] sm:$0xff]  ;;  %v3962_v62 = vld [vmem:[#allocation53_spill] sm:$0xff]  ;;  %v3964_v46 = vld [vmem:[#allocation48_spill] sm:$0xff] }
 0x10f   : > { %817 = vmatmul.mubr.f32.gmra.mxu0 %v3950_v21  ;;  %v1578_v59 = vmax.f32 %v1546_v43, 1e-24 }
 0x110   : > { %1042 = vmatmul.mubr.f32.gmra.mxu1 %v3951_v61  ;;  %821 = vmatprep.mubr.f32.mxu0 %v3348_v5  ;;  %1515 = vst.msk [vmem:[#allocation4 + $0x58] sm:$0xff] %vm376_vm0, %v1482_v11  ;;  %v3953_v5 = vld [vmem:[#allocation24_spill] sm:$0xff] }
 0x111   : > { %1046 = vmatprep.mubr.f32.mxu1 %v3395_v14  ;;  %v2236_v6 = vpop.eup %2235 }
 0x112   : > { %v1380_v8 = vpop.xlane.xlu1 %1379  ;;  %v1345_v40 = vpop.xlane.xlu0 %1344  ;;  %1670 = vperm.xlu0 %2233, %v2236_v6   ;;  %v1548_v25 = vld [vmem:[#allocation4 + $0x48] sm:$0xff]  ;;  %v3965_v6 = vld [vmem:[#allocation36_spill] sm:$0xff] }
 0x113   : > { %822 = vmatmul.mubr.f32.gmra.mxu0 %v3952_v33  ;;  %v1484_v38 = vadd.f32 %v1380_v8, %v1164_v47  ;;  %v1543_v58 = vld [vmem:[#allocation4 + $0x20] sm:$0xff]  ;;  %v1477_v32 = vadd.f32 %v1345_v40, %v1157_v13  ;;  %v1580_v41 = vmax.f32 %v1548_v25, 1e-24  ;;  %v3966_v40 = vld [vmem:[#allocation42_spill] sm:$0xff]  ;;  %v1174_v25 = vld [vmem:[#allocation4 + $0xb8] sm:$0xff] }
 0x114   : > { %1047 = vmatmul.mubr.f32.gmra.mxu1 %v3368_v55  ;;  %826 = vmatprep.mubr.f32.mxu0 %v3953_v5  ;;  %v1575_v14 = vmax.f32 %v1543_v58, 1e-24  ;;  %v3956_v55 = vld [vmem:[#allocation27_spill] sm:$0xff]  ;;  %v1165_v5 = vld [vmem:[#allocation4 + $0x70] sm:$0xff] }
 0x115   : > { %1051 = vmatprep.mubr.f32.mxu1 %v3954_v56  ;;  %1517 = vst.msk [vmem:[#allocation4 + $0x68] sm:$0xff] %vm376_vm0, %v1484_v38  ;;  %1510 = vst.msk [vmem:[#allocation4 + $0x30] sm:$0xff] %vm376_vm0, %v1477_v32  ;;  %v3967_v58 = vld [vmem:[#allocation55_spill] sm:$0xff]  ;;  %v3968_v32 = vld [vmem:[#allocation54_spill] sm:$0xff] }
 0x116   : > { %2243 = vrsqrt.f32 %v1575_v14 }
 0x117   : > { %827 = vmatmul.mubr.f32.gmra.mxu0 %v3955_v10  ;;  %v1390_v23 = vpop.xlane.xlu1 %1389  ;;  %2245 = vrsqrt.f32 %v1580_v41  ;;  %v2238_v18 = vpop.eup %2237  ;;  %v1550_v50 = vld [vmem:[#allocation4 + $0x58] sm:$0xff] }
 0x118   : > { %1052 = vmatmul.mubr.f32.gmra.mxu1 %v3956_v55  ;;  %831 = vmatprep.mubr.f32.mxu0 %v3381_v39  ;;  %v1486_v22 = vadd.f32 %v1390_v23, %v1166_v31  ;;  %2247 = vrsqrt.f32 %v1576_v34  ;;  %v1582_v63 = vmax.f32 %v1550_v50, 1e-24  ;;  %v2240_v2 = vpop.eup %2239  ;;  %v3970_v50 = vld [vmem:[#allocation51_spill] sm:$0xff] }
 0x119   : > { %1056 = vmatprep.mubr.f32.mxu1 %v3422_v20  ;;  %1675 = vperm.xlu1 %2234, %v2238_v18   ;;  %v3959_v20 = vld [vmem:[#allocation38_spill] sm:$0xff]  ;;  %v2242_v42 = vpop.eup %2241 }
 0x11a   : > { %1519 = vst.msk [vmem:[#allocation4 + $0x78] sm:$0xff] %vm376_vm0, %v1486_v22  ;;  %2249 = vrsqrt.f32 %v1582_v63  ;;  %v1176_v63 = vld [vmem:[#allocation4 + $0xc8] sm:$0xff] }
 0x11b   : > { %832 = vmatmul.mubr.f32.gmra.mxu0 %v3378_v35  ;;  %v1400_v39 = vpop.xlane.xlu1 %1399  ;;  %v3960_v35 = vld [vmem:[#allocation29_spill] sm:$0xff] }
 0x11c   : > { %1057 = vmatmul.mubr.f32.gmra.mxu1 %v3957_v15  ;;  %836 = vmatprep.mubr.f32.mxu0 %v3958_v24  ;;  %v1355_v4 = vpop.xlane.xlu0 %1354  ;;  %v1552_v9 = vld [vmem:[#allocation4 + $0x68] sm:$0xff]  ;;  %v1488_v45 = vadd.f32 %v1400_v39, %v1168_v30  ;;  %v1545_v28 = vld [vmem:[#allocation4 + $0x30] sm:$0xff] }
 0x11d   : > { %1061 = vmatprep.mubr.f32.mxu1 %v3959_v20  ;;  %v1479_v27 = vadd.f32 %v1355_v4, %v1159_v7  ;;  %1680 = vperm.xlu1 %2234, %v2240_v2   ;;  %v1584_v29 = vmax.f32 %v1552_v9, 1e-24  ;;  %v1577_v0 = vmax.f32 %v1545_v28, 1e-24  ;;  %v1167_v2 = vld [vmem:[#allocation4 + $0x80] sm:$0xff]  ;;  %v3972_v7 = vld [vmem:[#allocation49_spill] sm:$0xff] }
 0x11e   : > { %1521 = vst.msk [vmem:[#allocation4 + $0x88] sm:$0xff] %vm376_vm0, %v1488_v45  ;;  %v1178_v28 = vld [vmem:[#allocation4 + $0xd8] sm:$0xff] }
 0x11f   : > { %837 = vmatmul.mubr.f32.gmra.mxu0 %v3960_v35  ;;  %1512 = vst.msk [vmem:[#allocation4 + $0x40] sm:$0xff] %vm376_vm0, %v1479_v27  ;;  %2251 = vrsqrt.f32 %v1584_v29  ;;  %v1169_v29 = vld [vmem:[#allocation4 + $0x90] sm:$0xff] }
 0x120   : > { %1062 = vmatmul.mubr.f32.gmra.mxu1 %v3961_v16  ;;  %841 = vmatprep.mubr.f32.mxu0 %v3413_v3  ;;  %2253 = vrsqrt.f32 %v1577_v0  ;;  %v1410_v36 = vpop.xlane.xlu1 %1409  ;;  %v1172_v3 = vld [vmem:[#allocation4 + $0xa8] sm:$0xff] }
 0x121   : > { %1066 = vmatprep.mubr.f32.mxu1 %v3448_v57  ;;  %v1365_v37 = vpop.xlane.xlu0 %1364  ;;  %1685 = vperm.xlu1 %2234, %v2242_v42   ;;  %v1554_v44 = vld [vmem:[#allocation4 + $0x78] sm:$0xff]  ;;  %v1490_v48 = vadd.f32 %v1410_v36, %v1170_v60  ;;  %2255 = vrsqrt.f32 %v1578_v59  ;;  %v1163_v57 = vld [vmem:[#allocation4 + $0x60] sm:$0xff] }
 0x122   : > { %v1481_v52 = vadd.f32 %v1365_v37, %v1161_v1  ;;  %v1586_v53 = vmax.f32 %v1554_v44, 1e-24 }
 0x123   : > { %v2244_v54 = vpop.eup %2243  ;;  %842 = vmatmul.mubr.f32.gmra.mxu0 %v3962_v62  ;;  %1523 = vst.msk [vmem:[#allocation4 + $0x98] sm:$0xff] %vm376_vm0, %v1490_v48  ;;  %v1180_v48 = vld [vmem:[#allocation4 + $0xe8] sm:$0xff] }
 0x124   : > { %v2246_v17 = vpop.eup %2245  ;;  %1067 = vmatmul.mubr.f32.gmra.mxu1 %v3427_v26  ;;  %846 = vmatprep.mubr.f32.mxu0 %v3963_v12  ;;  %1514 = vst.msk [vmem:[#allocation4 + $0x50] sm:$0xff] %vm376_vm0, %v1481_v52  ;;  %2257 = vrsqrt.f32 %v1586_v53  ;;  %v1171_v52 = vld [vmem:[#allocation4 + $0xa0] sm:$0xff] }
 0x125   : > { %1071 = vmatprep.mubr.f32.mxu1 %v3964_v46  ;;  %1690 = vperm.xlu1 %2234, %v2244_v54   ;;  %v2248_v21 = vpop.eup %2247  ;;  %v1420_v11 = vpop.xlane.xlu1 %1419  ;;  %v1556_v13 = vld [vmem:[#allocation4 + $0x88] sm:$0xff] }
 0x126   : > { %v1375_v61 = vpop.xlane.xlu0 %1374  ;;  %1715 = vperm.xlu0 %2233, %v2246_v17   ;;  %v1547_v47 = vld [vmem:[#allocation4 + $0x40] sm:$0xff]  ;;  %v1492_v26 = vadd.f32 %v1420_v11, %v1172_v3  ;;  %v1588_v33 = vmax.f32 %v1556_v13, 1e-24 }
 0x127   : > { %847 = vmatmul.mubr.f32.gmra.mxu0 %v3965_v6  ;;  %v1483_v8 = vadd.f32 %v1375_v61, %v1163_v57  ;;  %v1579_v19 = vmax.f32 %v1547_v47, 1e-24  ;;  %v2250_v38 = vpop.eup %2249  ;;  %v1182_v61 = vld [vmem:[#allocation4 + $0xf8] sm:$0xff]  ;;  %v1173_v47 = vld [vmem:[#allocation4 + $0xb0] sm:$0xff] }
 0x128   : > { %1072 = vmatmul.mubr.f32.gmra.mxu1 %v3966_v40  ;;  %851 = vmatprep.mubr.f32.mxu0 %v3967_v58  ;;  %1525 = vst.msk [vmem:[#allocation4 + $0xa8] sm:$0xff] %vm376_vm0, %v1492_v26 }
 0x129   : > { %1076 = vmatprep.mubr.f32.mxu1 %v3467_v51  ;;  %1516 = vst.msk [vmem:[#allocation4 + $0x60] sm:$0xff] %vm376_vm0, %v1483_v8  ;;  %1695 = vperm.xlu1 %2234, %v2248_v21   ;;  %2259 = vrsqrt.f32 %v1579_v19  ;;  %v3969_v51 = vld [vmem:[#allocation44_spill] sm:$0xff] }
 0x12a   : > { %1725 = vperm.xlu0 %2233, %v2250_v38   ;;  %2261 = vrsqrt.f32 %v1588_v33  ;;  %v1430_v14 = vpop.xlane.xlu1 %1429  ;;  %v1558_v31 = vld [vmem:[#allocation4 + $0x98] sm:$0xff] }
 0x12b   : > { %852 = vmatmul.mubr.f32.gmra.mxu0 %v3968_v32  ;;  %v1385_v41 = vpop.xlane.xlu0 %1384  ;;  %v1549_v56 = vld [vmem:[#allocation4 + $0x50] sm:$0xff]  ;;  %v1494_v10 = vadd.f32 %v1430_v14, %v1174_v25  ;;  %v1590_v55 = vmax.f32 %v1558_v31, 1e-24 }
 0x12c   : > { %v2252_v34 = vpop.eup %2251  ;;  %1077 = vmatmul.mubr.f32.gmra.mxu1 %v3456_v49  ;;  %856 = vmatprep.mubr.f32.mxu0 %v3969_v51  ;;  %v1485_v23 = vadd.f32 %v1385_v41, %v1165_v5  ;;  %v1581_v18 = vmax.f32 %v1549_v56, 1e-24  ;;  %v3971_v49 = vld [vmem:[#allocation43_spill] sm:$0xff]  ;;  %v1175_v5 = vld [vmem:[#allocation4 + $0xc0] sm:$0xff]  ;;  %v1177_v31 = vld [vmem:[#allocation4 + $0xd0] sm:$0xff] }
 0x12d   : > { %v2254_v22 = vpop.eup %2253  ;;  %1081 = vmatprep.mubr.f32.mxu1 %v3970_v50  ;;  %1527 = vst.msk [vmem:[#allocation4 + $0xb8] sm:$0xff] %vm376_vm0, %v1494_v10  ;;  %v1179_v50 = vld [vmem:[#allocation4 + $0xe0] sm:$0xff] }
 0x12e   : > { %1518 = vst.msk [vmem:[#allocation4 + $0x70] sm:$0xff] %vm376_vm0, %v1485_v23  ;;  %1700 = vperm.xlu1 %2234, %v2254_v22   ;;  %1735 = vperm.xlu0 %2233, %v2252_v34   ;;  %2263 = vrsqrt.f32 %v1581_v18  ;;  %v2256_v30 = vpop.eup %2255 }
 0x12f   : > { %857 = vmatmul.mubr.f32.gmra.mxu0 %v3971_v49  ;;  %2265 = vrsqrt.f32 %v1590_v55  ;;  %v1560_v39 = vld [vmem:[#allocation4 + $0xa8] sm:$0xff] }
 0x130   : > { %1082 = vmatmul.mubr.f32.gmra.mxu1 %v3972_v7  ;;  %v1440_v43 = vpop.xlane.xlu1 %1439  ;;  %v1395_v15 = vpop.xlane.xlu0 %1394  ;;  %v1551_v24 = vld [vmem:[#allocation4 + $0x60] sm:$0xff]  ;;  %v1592_v27 = vmax.f32 %v1560_v39, 1e-24 }
 0x131   : > { %v2258_v4 = vpop.eup %2257  ;;  %v1496_v9 = vadd.f32 %v1440_v43, %v1176_v63  ;;  %v1487_v20 = vadd.f32 %v1395_v15, %v1167_v2  ;;  %v1583_v45 = vmax.f32 %v1551_v24, 1e-24  ;;  %v1181_v24 = vld [vmem:[#allocation4 + $0xf0] sm:$0xff] }
 0x132   : > { %1705 = vperm.xlu1 %2234, %v2256_v30   ;;  %1745 = vperm.xlu0 %2233, %v2258_v4  }
 0x133   : > { %1529 = vst.msk [vmem:[#allocation4 + $0xc8] sm:$0xff] %vm376_vm0, %v1496_v9  ;;  %1520 = vst.msk [vmem:[#allocation4 + $0x80] sm:$0xff] %vm376_vm0, %v1487_v20  ;;  %2267 = vrsqrt.f32 %v1583_v45 }
 0x134   : > { %2269 = vrsqrt.f32 %v1592_v27  ;;  %v1562_v35 = vld [vmem:[#allocation4 + $0xb8] sm:$0xff] }
 0x135   : > { %v1450_v42 = vpop.xlane.xlu1 %1449  ;;  %v1405_v0 = vpop.xlane.xlu0 %1404  ;;  %v1553_v59 = vld [vmem:[#allocation4 + $0x70] sm:$0xff]  ;;  %v1594_v37 = vmax.f32 %v1562_v35, 1e-24 }
 0x136   : > { %v2260_v60 = vpop.eup %2259  ;;  %v1498_v1 = vadd.f32 %v1450_v42, %v1178_v28  ;;  %v1489_v16 = vadd.f32 %v1405_v0, %v1169_v29  ;;  %v1585_v36 = vmax.f32 %v1553_v59, 1e-24 }
 0x137   : > { %v2262_v44 = vpop.eup %2261  ;;  %1710 = vperm.xlu1 %2234, %v2260_v60  }
 0x138   : > { %1531 = vst.msk [vmem:[#allocation4 + $0xd8] sm:$0xff] %vm376_vm0, %v1498_v1  ;;  %1522 = vst.msk [vmem:[#allocation4 + $0x90] sm:$0xff] %vm376_vm0, %v1489_v16  ;;  %1755 = vperm.xlu0 %2233, %v2262_v44   ;;  %2271 = vrsqrt.f32 %v1585_v36 }
 0x139   : > { %2273 = vrsqrt.f32 %v1594_v37 }
 0x13a   : > { %v1460_v53 = vpop.xlane.xlu1 %1459  ;;  %v1555_v54 = vld [vmem:[#allocation4 + $0x80] sm:$0xff]  ;;  %v1564_v62 = vld [vmem:[#allocation4 + $0xc8] sm:$0xff] }
 0x13b   : > { %v2264_v17 = vpop.eup %2263  ;;  %v1500_v12 = vadd.f32 %v1460_v53, %v1180_v48  ;;  %v1415_v3 = vpop.xlane.xlu0 %1414  ;;  %v1587_v57 = vmax.f32 %v1555_v54, 1e-24  ;;  %v1596_v46 = vmax.f32 %v1564_v62, 1e-24 }
 0x13c   : > { %v2266_v21 = vpop.eup %2265  ;;  %v1491_v11 = vadd.f32 %v1415_v3, %v1171_v52  ;;  %1720 = vperm.xlu1 %2234, %v2264_v17  }
 0x13d   : > { %1533 = vst.msk [vmem:[#allocation4 + $0xe8] sm:$0xff] %vm376_vm0, %v1500_v12  ;;  %1765 = vperm.xlu0 %2233, %v2266_v21   ;;  %2275 = vrsqrt.f32 %v1587_v57 }
 0x13e   : > { %1524 = vst.msk [vmem:[#allocation4 + $0xa0] sm:$0xff] %vm376_vm0, %v1491_v11  ;;  %v1470_v13 = vpop.xlane.xlu1 %1469  ;;  %2277 = vrsqrt.f32 %v1596_v46 }
 0x13f   : > { %v1502_v6 = vadd.f32 %v1470_v13, %v1182_v61  ;;  %v1425_v26 = vpop.xlane.xlu0 %1424  ;;  %v1557_v8 = vld [vmem:[#allocation4 + $0x90] sm:$0xff]  ;;  %v1566_v19 = vld [vmem:[#allocation4 + $0xd8] sm:$0xff] }
 0x140   : > { %v2268_v33 = vpop.eup %2267  ;;  %v1493_v38 = vadd.f32 %v1425_v26, %v1173_v47  ;;  %v1589_v40 = vmax.f32 %v1557_v8, 1e-24  ;;  %v1598_v58 = vmax.f32 %v1566_v19, 1e-24 }
 0x141   : > { %v2270_v25 = vpop.eup %2269  ;;  %1535 = vst.msk [vmem:[#allocation4 + $0xf8] sm:$0xff] %vm376_vm0, %v1502_v6  ;;  %1730 = vperm.xlu1 %2234, %v2268_v33  }
 0x142   : > { %1526 = vst.msk [vmem:[#allocation4 + $0xb0] sm:$0xff] %vm376_vm0, %v1493_v38  ;;  %1775 = vperm.xlu0 %2233, %v2270_v25   ;;  %2279 = vrsqrt.f32 %v1589_v40 }
 0x143   : > { %v1435_v32 = vpop.xlane.xlu0 %1434  ;;  %2281 = vrsqrt.f32 %v1598_v58 }
 0x144   : > { %v1495_v14 = vadd.f32 %v1435_v32, %v1175_v5  ;;  %v1568_v41 = vld [vmem:[#allocation4 + $0xe8] sm:$0xff] }
 0x145   : > { %v2272_v56 = vpop.eup %2271  ;;  %v1559_v34 = vld [vmem:[#allocation4 + $0xa0] sm:$0xff]  ;;  %v1600_v51 = vmax.f32 %v1568_v41, 1e-24 }
 0x146   : > { %v2274_v10 = vpop.eup %2273  ;;  %1528 = vst.msk [vmem:[#allocation4 + $0xc0] sm:$0xff] %vm376_vm0, %v1495_v14  ;;  %1740 = vperm.xlu1 %2234, %v2272_v56   ;;  %v1591_v23 = vmax.f32 %v1559_v34, 1e-24 }
 0x147   : > { %v1445_v18 = vpop.xlane.xlu0 %1444  ;;  %1785 = vperm.xlu0 %2233, %v2274_v10   ;;  %2283 = vrsqrt.f32 %v1600_v51  ;;  %v1861_v51 = vld [vmem:[%s3632_s3] sm:$0xff] }
 0x148   : > { %v1497_v55 = vadd.f32 %v1445_v18, %v1177_v31  ;;  %2285 = vrsqrt.f32 %v1591_v23  ;;  %v1570_v22 = vld [vmem:[#allocation4 + $0xf8] sm:$0xff] }
 0x149   : > { %v1561_v63 = vld [vmem:[#allocation4 + $0xb0] sm:$0xff]  ;;  %v1602_v2 = vmax.f32 %v1570_v22, 1e-24 }
 0x14a   : > { %v2276_v30 = vpop.eup %2275  ;;  %1530 = vst.msk [vmem:[#allocation4 + $0xd0] sm:$0xff] %vm376_vm0, %v1497_v55  ;;  %v1593_v49 = vmax.f32 %v1561_v63, 1e-24 }
 0x14b   : > { %v2278_v7 = vpop.eup %2277  ;;  %v1455_v43 = vpop.xlane.xlu0 %1454  ;;  %1750 = vperm.xlu1 %2234, %v2276_v30   ;;  %2287 = vrsqrt.f32 %v1602_v2 }
 0x14c   : > { %v1499_v15 = vadd.f32 %v1455_v43, %v1179_v50  ;;  %1795 = vperm.xlu0 %2233, %v2278_v7   ;;  %2289 = vrsqrt.f32 %v1593_v49  ;;  %v1862_v7 = vld [vmem:[%s3632_s3 + $0x8] sm:$0xff] }
 0x14d   : > { %v1563_v39 = vld [vmem:[#allocation4 + $0xc0] sm:$0xff] }
 0x14e   : > { %1532 = vst.msk [vmem:[#allocation4 + $0xe0] sm:$0xff] %vm376_vm0, %v1499_v15  ;;  %v1595_v4 = vmax.f32 %v1563_v39, 1e-24 }
 0x14f   : > { %v2280_v9 = vpop.eup %2279  ;;  %v1465_v20 = vpop.xlane.xlu0 %1464 }
 0x150   : > { %v2282_v45 = vpop.eup %2281  ;;  %v1501_v27 = vadd.f32 %v1465_v20, %v1181_v24  ;;  %1760 = vperm.xlu1 %2234, %v2280_v9   ;;  %2291 = vrsqrt.f32 %v1595_v4 }
 0x151   : > { %1805 = vperm.xlu0 %2233, %v2282_v45   ;;  %v1565_v28 = vld [vmem:[#allocation4 + $0xd0] sm:$0xff] }
 0x152   : > { %1534 = vst.msk [vmem:[#allocation4 + $0xf0] sm:$0xff] %vm376_vm0, %v1501_v27  ;;  %v1597_v29 = vmax.f32 %v1565_v28, 1e-24  ;;  %v1863_v27 = vld [vmem:[%s3632_s3 + $0x10] sm:$0xff] }
 0x154   : > { %v2284_v42 = vpop.eup %2283  ;;  %2293 = vrsqrt.f32 %v1597_v29 }
 0x155   : > { %v2286_v0 = vpop.eup %2285  ;;  %1815 = vperm.xlu0 %2233, %v2284_v42   ;;  %v1567_v59 = vld [vmem:[#allocation4 + $0xe0] sm:$0xff] }
 0x156   : > { %1770 = vperm.xlu1 %2234, %v2286_v0   ;;  %v1599_v35 = vmax.f32 %v1567_v59, 1e-24 }
 0x158   : > { %v2288_v60 = vpop.eup %2287  ;;  %2295 = vrsqrt.f32 %v1599_v35 }
 0x159   : > { %v2290_v1 = vpop.eup %2289  ;;  %1825 = vperm.xlu0 %2233, %v2288_v60   ;;  %v1569_v16 = vld [vmem:[#allocation4 + $0xf0] sm:$0xff] }
 0x15a   : > { %1780 = vperm.xlu1 %2234, %v2290_v1   ;;  %v1601_v36 = vmax.f32 %v1569_v16, 1e-24  ;;  %v1864_v16 = vld [vmem:[%s3632_s3 + $0x18] sm:$0xff] }
 0x15c   : > { %2297 = vrsqrt.f32 %v1601_v36 }
 0x15d   : > { %v2292_v37 = vpop.eup %2291 }
 0x15e   : > { %1790 = vperm.xlu1 %2234, %v2292_v37  }
 0x161   : > { %v2294_v44 = vpop.eup %2293 }
 0x162   : > { %1800 = vperm.xlu1 %2234, %v2294_v44  }
 0x165   : > { %v2296_v48 = vpop.eup %2295 }
 0x166   : > { %1810 = vperm.xlu1 %2234, %v2296_v48  }
 0x169   : > { %v2298_v52 = vpop.eup %2297 }
 0x16a   : > { %1820 = vperm.xlu1 %2234, %v2298_v52  }
 0x173   : > { %v703_v53 = vpop.f32.mrf.mxu0 }
 0x174   : > { %v928_v54 = vpop.f32.mrf.mxu1 }
 0x175   : > { %v705_v62 = vpop.f32.mrf.mxu0  ;;  %v929_v56 = vadd.f32 %v928_v54, %v703_v53 }
 0x176   : > { %v930_v17 = vpop.f32.mrf.mxu1 }
 0x177   : > { %v708_v12 = vpop.f32.mrf.mxu0 }
 0x178   : > { %v933_v3 = vpop.f32.mrf.mxu1 }
 0x179   : > { %v710_v57 = vpop.f32.mrf.mxu0  ;;  %v934_v2 = vadd.f32 %v933_v3, %v708_v12  ;;  %v1865_v12 = vld [vmem:[%s3632_s3 + $0x20] sm:$0xff] }
 0x17a   : > { %v935_v46 = vpop.f32.mrf.mxu1 }
 0x17b   : > { %v713_v21 = vpop.f32.mrf.mxu0 }
 0x17c   : > { %v938_v11 = vpop.f32.mrf.mxu1 }
 0x17d   : > { %v715_v61 = vpop.f32.mrf.mxu0  ;;  %v939_v4 = vadd.f32 %v938_v11, %v713_v21  ;;  %v1870_v21 = vld [vmem:[%s3632_s3 + $0x48] sm:$0xff] }
 0x17e   : > { %v940_v47 = vpop.f32.mrf.mxu1 }
 0x17f   : > { %v718_v13 = vpop.f32.mrf.mxu0 }
 0x180   : > { %v943_v6 = vpop.f32.mrf.mxu1 }
 0x181   : > { %v720_v26 = vpop.f32.mrf.mxu0  ;;  %v944_v59 = vadd.f32 %v943_v6, %v718_v13 }
 0x182   : > { %v945_v8 = vpop.f32.mrf.mxu1 }
 0x183   : > { %v723_v19 = vpop.f32.mrf.mxu0 }
 0x184   : > { %v948_v33 = vpop.f32.mrf.mxu1 }
 0x185   : > { %v725_v38 = vpop.f32.mrf.mxu0  ;;  %v949_v52 = vadd.f32 %v948_v33, %v723_v19 }
 0x186   : > { %v950_v40 = vpop.f32.mrf.mxu1  ;;  %v1866_v38 = vld [vmem:[%s3632_s3 + $0x28] sm:$0xff] }
 0x187   : > { %v3621_v58 = vpop.f32.mrf.mxu0 }
 0x188   : > { %v3623_v25 = vpop.f32.mrf.mxu1 }
 0x189   : > { %v730_v5 = vpop.f32.mrf.mxu0  ;;  %v954_v13 = vadd.f32 %v3623_v25, %v3621_v58 }
 0x18a   : > { %v955_v32 = vpop.f32.mrf.mxu1 }
 0x18b   : > { %v3627_v14 = vpop.f32.mrf.mxu0 }
 0x18c   : > { %v3634_v41 = vpop.f32.mrf.mxu1 }
 0x18d   : > { %v735_v31 = vpop.f32.mrf.mxu0  ;;  %v1671_v10 = vpop.permute.xlu0 %1670 }
 0x18e   : > { %v960_v34 = vpop.f32.mrf.mxu1  ;;  %v1828_v18 = vmul.f32 %v1671_v10, %v929_v56  ;;  %v1872_v56 = vld [vmem:[%s3632_s3 + $0x58] sm:$0xff]  ;;  %v959_v10 = vadd.f32 %v3634_v41, %v3627_v14 }
 0x18f   : > { %v3637_v23 = vpop.f32.mrf.mxu0 }
 0x190   : > { %v3639_v55 = vpop.f32.mrf.mxu1  ;;  %v1893_v50 = vadd.f32 %v1861_v51, %v1828_v18 }
 0x191   : > { %v740_v22 = vpop.f32.mrf.mxu0  ;;  %v964_v14 = vadd.f32 %v3639_v55, %v3637_v23 }
 0x192   : > { %v965_v63 = vpop.f32.mrf.mxu1  ;;  %1928 = vst [vmem:[%s3643_s12] sm:$0xff] %v1893_v50 }
 0x193   : > { %v3641_v30 = vpop.f32.mrf.mxu0 }
 0x194   : > { %v3646_v49 = vpop.f32.mrf.mxu1  ;;  %v1676_v43 = vpop.permute.xlu1 %1675 }
 0x195   : > { %v745_v15 = vpop.f32.mrf.mxu0  ;;  %v1829_v24 = vmul.f32 %v1676_v43, %v934_v2  ;;  %v1867_v2 = vld [vmem:[%s3632_s3 + $0x30] sm:$0xff]  ;;  %v969_v23 = vadd.f32 %v3646_v49, %v3641_v30 }
 0x196   : > { %v970_v39 = vpop.f32.mrf.mxu1 }
 0x197   : > { %v748_v9 = vpop.f32.mrf.mxu0  ;;  %v1894_v20 = vadd.f32 %v1862_v7, %v1829_v24  ;;  %v1874_v24 = vld [vmem:[%s3632_s3 + $0x68] sm:$0xff] }
 0x198   : > { %v973_v45 = vpop.f32.mrf.mxu1  ;;  %v1681_v28 = vpop.permute.xlu1 %1680 }
 0x199   : > { %v750_v29 = vpop.f32.mrf.mxu0  ;;  %1929 = vst [vmem:[%s3643_s12 + $0x8] sm:$0xff] %v1894_v20  ;;  %v1830_v42 = vmul.f32 %v1681_v28, %v939_v4  ;;  %v974_v62 = vadd.f32 %v973_v45, %v748_v9  ;;  %v1868_v28 = vld [vmem:[%s3632_s3 + $0x38] sm:$0xff] }
 0x19a   : > { %v975_v0 = vpop.f32.mrf.mxu1 }
 0x19b   : > { %v3651_v35 = vpop.f32.mrf.mxu0  ;;  %v1895_v60 = vadd.f32 %v1863_v27, %v1830_v42 }
 0x19c   : > { %v3653_v1 = vpop.f32.mrf.mxu1  ;;  %v1686_v36 = vpop.permute.xlu1 %1685 }
 0x19d   : > { %v755_v37 = vpop.f32.mrf.mxu0  ;;  %1930 = vst [vmem:[%s3643_s12 + $0x10] sm:$0xff] %v1895_v60  ;;  %v1831_v44 = vmul.f32 %v1686_v36, %v944_v59  ;;  %v979_v30 = vadd.f32 %v3653_v1, %v3651_v35 }
 0x19e   : > { %v980_v48 = vpop.f32.mrf.mxu1 }
 0x19f   : > { %v758_v53 = vpop.f32.mrf.mxu0  ;;  %v1896_v54 = vadd.f32 %v1864_v16, %v1831_v44  ;;  %v1876_v48 = vld [vmem:[%s3632_s3 + $0x78] sm:$0xff] }
 0x1a0   : > { %v983_v17 = vpop.f32.mrf.mxu1  ;;  %v1691_v3 = vpop.permute.xlu1 %1690 }
 0x1a1   : > { %v760_v57 = vpop.f32.mrf.mxu0  ;;  %1931 = vst [vmem:[%s3643_s12 + $0x18] sm:$0xff] %v1896_v54  ;;  %v1832_v46 = vmul.f32 %v1691_v3, %v949_v52  ;;  %v1716_v11 = vpop.permute.xlu0 %1715  ;;  %v984_v8 = vadd.f32 %v983_v17, %v758_v53  ;;  %v1869_v52 = vld [vmem:[%s3632_s3 + $0x40] sm:$0xff] }
 0x1a2   : > { %v985_v61 = vpop.f32.mrf.mxu1  ;;  %v1837_v47 = vmul.f32 %v1716_v11, %v974_v62  ;;  %v1871_v11 = vld [vmem:[%s3632_s3 + $0x50] sm:$0xff] }
 0x1a3   : > { %v3662_v6 = vpop.f32.mrf.mxu0  ;;  %v1897_v26 = vadd.f32 %v1865_v12, %v1832_v46 }
 0x1a4   : > { %v3664_v19 = vpop.f32.mrf.mxu1  ;;  %v1902_v33 = vadd.f32 %v1870_v21, %v1837_v47  ;;  %v1696_v40 = vpop.permute.xlu1 %1695 }
 0x1a5   : > { %v765_v5 = vpop.f32.mrf.mxu0  ;;  %1932 = vst [vmem:[%s3643_s12 + $0x20] sm:$0xff] %v1897_v26  ;;  %v1833_v32 = vmul.f32 %v1696_v40, %v954_v13  ;;  %v1726_v31 = vpop.permute.xlu0 %1725  ;;  %v1878_v40 = vld [vmem:[%s3632_s3 + $0x88] sm:$0xff]  ;;  %v989_v35 = vadd.f32 %v3664_v19, %v3662_v6  ;;  %v1875_v19 = vld [vmem:[%s3632_s3 + $0x70] sm:$0xff] }
 0x1a6   : > { %v990_v34 = vpop.f32.mrf.mxu1  ;;  %1937 = vst [vmem:[%s3643_s12 + $0x48] sm:$0xff] %v1902_v33  ;;  %v1839_v58 = vmul.f32 %v1726_v31, %v984_v8  ;;  %v1873_v31 = vld [vmem:[%s3632_s3 + $0x60] sm:$0xff] }
 0x1a7   : > { %v768_v25 = vpop.f32.mrf.mxu0  ;;  %v1898_v51 = vadd.f32 %v1866_v38, %v1833_v32 }
 0x1a8   : > { %v993_v18 = vpop.f32.mrf.mxu1  ;;  %v1904_v22 = vadd.f32 %v1872_v56, %v1839_v58 }
 0x1a9   : > { %v994_v50 = vadd.f32 %v993_v18, %v768_v25  ;;  %v770_v63 = vpop.f32.mrf.mxu0  ;;  %1933 = vst [vmem:[%s3643_s12 + $0x28] sm:$0xff] %v1898_v51  ;;  %v1701_v7 = vpop.permute.xlu1 %1700 }
 0x1aa   : > { %v995_v43 = vpop.f32.mrf.mxu1  ;;  %1939 = vst [vmem:[%s3643_s12 + $0x58] sm:$0xff] %v1904_v22  ;;  %v1834_v15 = vmul.f32 %v1701_v7, %v959_v10  ;;  %v1736_v39 = vpop.permute.xlu0 %1735 }
 0x1ab   : > { %v773_v4 = vpop.f32.mrf.mxu0  ;;  %v1841_v9 = vmul.f32 %v1736_v39, %v994_v50 }
 0x1ac   : > { %v998_v41 = vpop.f32.mrf.mxu1  ;;  %v1899_v20 = vadd.f32 %v1867_v2, %v1834_v15  ;;  %v1880_v15 = vld [vmem:[%s3632_s3 + $0x98] sm:$0xff] }
 0x1ad   : > { %v775_v45 = vpop.f32.mrf.mxu0  ;;  %v1906_v27 = vadd.f32 %v1874_v24, %v1841_v9  ;;  %v1706_v29 = vpop.permute.xlu1 %1705  ;;  %v999_v50 = vadd.f32 %v998_v41, %v773_v4 }
 0x1ae   : > { %v1000_v42 = vpop.f32.mrf.mxu1  ;;  %1934 = vst [vmem:[%s3643_s12 + $0x30] sm:$0xff] %v1899_v20  ;;  %v1835_v0 = vmul.f32 %v1706_v29, %v964_v14  ;;  %v1746_v36 = vpop.permute.xlu0 %1745  ;;  %v1877_v29 = vld [vmem:[%s3632_s3 + $0x80] sm:$0xff] }
 0x1af   : > { %v778_v59 = vpop.f32.mrf.mxu0  ;;  %1941 = vst [vmem:[%s3643_s12 + $0x68] sm:$0xff] %v1906_v27 }
 0x1b0   : > { %v1003_v60 = vpop.f32.mrf.mxu1  ;;  %v1900_v16 = vadd.f32 %v1868_v28, %v1835_v0 }
 0x1b1   : > { %v1004_v55 = vadd.f32 %v1003_v60, %v778_v59  ;;  %v780_v37 = vpop.f32.mrf.mxu0 }
 0x1b2   : > { %v1005_v44 = vpop.f32.mrf.mxu1  ;;  %1935 = vst [vmem:[%s3643_s12 + $0x38] sm:$0xff] %v1900_v16  ;;  %v1711_v53 = vpop.permute.xlu1 %1710 }
 0x1b3   : > { %v783_v54 = vpop.f32.mrf.mxu0  ;;  %v1843_v62 = vmul.f32 %v1746_v36, %v1004_v55  ;;  %v1836_v17 = vmul.f32 %v1711_v53, %v969_v23  ;;  %v1756_v13 = vpop.permute.xlu0 %1755  ;;  %v1882_v44 = vld [vmem:[%s3632_s3 + $0xa8] sm:$0xff] }
 0x1b4   : > { %v1008_v12 = vpop.f32.mrf.mxu1 }
 0x1b5   : > { %v785_v3 = vpop.f32.mrf.mxu0  ;;  %v1908_v57 = vadd.f32 %v1876_v48, %v1843_v62  ;;  %v1901_v46 = vadd.f32 %v1869_v52, %v1836_v17  ;;  %v1009_v27 = vadd.f32 %v1008_v12, %v783_v54  ;;  %v1879_v54 = vld [vmem:[%s3632_s3 + $0x90] sm:$0xff] }
 0x1b6   : > { %v1010_v49 = vpop.f32.mrf.mxu1 }
 0x1b7   : > { %1943 = vst [vmem:[%s3643_s12 + $0x78] sm:$0xff] %v1908_v57  ;;  %v788_v21 = vpop.f32.mrf.mxu0  ;;  %1936 = vst [vmem:[%s3643_s12 + $0x40] sm:$0xff] %v1901_v46  ;;  %v1721_v61 = vpop.permute.xlu1 %1720 }
 0x1b8   : > { %v1013_v47 = vpop.f32.mrf.mxu1  ;;  %v1838_v26 = vmul.f32 %v1721_v61, %v979_v30  ;;  %v1766_v43 = vpop.permute.xlu0 %1765 }
 0x1b9   : > { %v1014_v8 = vadd.f32 %v1013_v47, %v788_v21  ;;  %v790_v33 = vpop.f32.mrf.mxu0 }
 0x1ba   : > { %v1015_v38 = vpop.f32.mrf.mxu1  ;;  %v1903_v5 = vadd.f32 %v1871_v11, %v1838_v26  ;;  %v1884_v33 = vld [vmem:[%s3632_s3 + $0xb8] sm:$0xff] }
 0x1bb   : > { %v1845_v1 = vmul.f32 %v1756_v13, %v1014_v8  ;;  %v793_v32 = vpop.f32.mrf.mxu0  ;;  %v1881_v13 = vld [vmem:[%s3632_s3 + $0xa0] sm:$0xff] }
 0x1bc   : > { %v1018_v56 = vpop.f32.mrf.mxu1  ;;  %1938 = vst [vmem:[%s3643_s12 + $0x50] sm:$0xff] %v1903_v5  ;;  %v1731_v34 = vpop.permute.xlu1 %1730 }
 0x1bd   : > { %v1910_v58 = vadd.f32 %v1878_v40, %v1845_v1  ;;  %v795_v25 = vpop.f32.mrf.mxu0  ;;  %v1840_v51 = vmul.f32 %v1731_v34, %v989_v35  ;;  %v1019_v55 = vadd.f32 %v1018_v56, %v793_v32  ;;  %v1776_v37 = vpop.permute.xlu0 %1775 }
 0x1be   : > { %v1020_v10 = vpop.f32.mrf.mxu1 }
 0x1bf   : > { %1945 = vst [vmem:[%s3643_s12 + $0x88] sm:$0xff] %v1910_v58  ;;  %v798_v18 = vpop.f32.mrf.mxu0  ;;  %v1905_v22 = vadd.f32 %v1873_v31, %v1840_v51  ;;  %v1883_v58 = vld [vmem:[%s3632_s3 + $0xb0] sm:$0xff] }
 0x1c0   : > { %v1023_v63 = vpop.f32.mrf.mxu1 }
 0x1c1   : > { %v1024_v2 = vadd.f32 %v1023_v63, %v798_v18  ;;  %v800_v6 = vpop.f32.mrf.mxu0  ;;  %1940 = vst [vmem:[%s3643_s12 + $0x60] sm:$0xff] %v1905_v22  ;;  %v1741_v7 = vpop.permute.xlu1 %1740 }
 0x1c2   : > { %v1025_v24 = vpop.f32.mrf.mxu1  ;;  %v1842_v39 = vmul.f32 %v1741_v7, %v999_v50  ;;  %v1786_v8 = vpop.permute.xlu0 %1785 }
 0x1c3   : > { %v1847_v9 = vmul.f32 %v1766_v43, %v1024_v2  ;;  %v803_v14 = vpop.f32.mrf.mxu0 }
 0x1c4   : > { %v1028_v20 = vpop.f32.mrf.mxu1  ;;  %v1907_v45 = vadd.f32 %v1875_v19, %v1842_v39  ;;  %v1885_v19 = vld [vmem:[%s3632_s3 + $0xc0] sm:$0xff] }
 0x1c5   : > { %v1912_v4 = vadd.f32 %v1880_v15, %v1847_v9  ;;  %v805_v41 = vpop.f32.mrf.mxu0  ;;  %v1029_v21 = vadd.f32 %v1028_v20, %v803_v14  ;;  %v1886_v15 = vld [vmem:[%s3632_s3 + $0xc8] sm:$0xff] }
 0x1c6   : > { %v1030_v28 = vpop.f32.mrf.mxu1  ;;  %1942 = vst [vmem:[%s3643_s12 + $0x70] sm:$0xff] %v1907_v45  ;;  %v1751_v42 = vpop.permute.xlu1 %1750 }
 0x1c7   : > { %1947 = vst [vmem:[%s3643_s12 + $0x98] sm:$0xff] %v1912_v4  ;;  %v808_v0 = vpop.f32.mrf.mxu0  ;;  %v1844_v59 = vmul.f32 %v1751_v42, %v1009_v27  ;;  %v1796_v43 = vpop.permute.xlu0 %1795  ;;  %v1887_v42 = vld [vmem:[%s3632_s3 + $0xd0] sm:$0xff] }
 0x1c8   : > { %v1033_v60 = vpop.f32.mrf.mxu1 }
 0x1c9   : > { %v1034_v16 = vadd.f32 %v1033_v60, %v808_v0  ;;  %v810_v36 = vpop.f32.mrf.mxu0  ;;  %v1909_v23 = vadd.f32 %v1877_v29, %v1844_v59 }
 0x1ca   : > { %v1035_v48 = vpop.f32.mrf.mxu1 }
 0x1cb   : > { %v1849_v52 = vmul.f32 %v1776_v37, %v1034_v16  ;;  %1944 = vst [vmem:[%s3643_s12 + $0x80] sm:$0xff] %v1909_v23  ;;  %v813_v53 = vpop.f32.mrf.mxu0  ;;  %v1761_v62 = vpop.permute.xlu1 %1760  ;;  %v1888_v37 = vld [vmem:[%s3632_s3 + $0xd8] sm:$0xff] }
 0x1cc   : > { %v1038_v17 = vpop.f32.mrf.mxu1  ;;  %v1846_v12 = vmul.f32 %v1761_v62, %v1019_v55  ;;  %v1806_v55 = vpop.permute.xlu0 %1805 }
 0x1cd   : > { %v1914_v3 = vadd.f32 %v1882_v44, %v1849_v52  ;;  %v815_v57 = vpop.f32.mrf.mxu0  ;;  %v1039_v1 = vadd.f32 %v1038_v17, %v813_v53 }
 0x1ce   : > { %v1040_v46 = vpop.f32.mrf.mxu1  ;;  %v1911_v30 = vadd.f32 %v1879_v54, %v1846_v12 }
 0x1cf   : > { %1949 = vst [vmem:[%s3643_s12 + $0xa8] sm:$0xff] %v1914_v3  ;;  %v818_v49 = vpop.f32.mrf.mxu0  ;;  %v1889_v3 = vld [vmem:[%s3632_s3 + $0xe0] sm:$0xff] }
 0x1d0   : > { %1946 = vst [vmem:[%s3643_s12 + $0x90] sm:$0xff] %v1911_v30  ;;  %v1043_v11 = vpop.f32.mrf.mxu1 }
 0x1d1   : > { %v1044_v61 = vadd.f32 %v1043_v11, %v818_v49  ;;  %v820_v47 = vpop.f32.mrf.mxu0  ;;  %v1771_v26 = vpop.permute.xlu1 %1770 }
 0x1d2   : > { %v1045_v38 = vpop.f32.mrf.mxu1  ;;  %v1848_v40 = vmul.f32 %v1771_v26, %v1029_v21  ;;  %v1816_v47 = vpop.permute.xlu0 %1815 }
 0x1d3   : > { %v1851_v5 = vmul.f32 %v1786_v8, %v1044_v61  ;;  %v823_v35 = vpop.f32.mrf.mxu0 }
 0x1d4   : > { %v1913_v32 = vadd.f32 %v1881_v13, %v1848_v40  ;;  %v1048_v56 = vpop.f32.mrf.mxu1  ;;  %v1890_v13 = vld [vmem:[%s3632_s3 + $0xe8] sm:$0xff] }
 0x1d5   : > { %v1916_v31 = vadd.f32 %v1884_v33, %v1851_v5  ;;  %v825_v34 = vpop.f32.mrf.mxu0  ;;  %v1781_v25 = vpop.permute.xlu1 %1780  ;;  %v1049_v22 = vadd.f32 %v1048_v56, %v823_v35 }
 0x1d6   : > { %1948 = vst [vmem:[%s3643_s12 + $0xa0] sm:$0xff] %v1913_v32  ;;  %v1050_v51 = vpop.f32.mrf.mxu1  ;;  %v1850_v10 = vmul.f32 %v1781_v25, %v1039_v1  ;;  %v1891_v32 = vld [vmem:[%s3632_s3 + $0xf0] sm:$0xff] }
 0x1d7   : > { %1951 = vst [vmem:[%s3643_s12 + $0xb8] sm:$0xff] %v1916_v31  ;;  %v828_v18 = vpop.f32.mrf.mxu0 }
 0x1d8   : > { %v1915_v50 = vadd.f32 %v1883_v58, %v1850_v10  ;;  %v1053_v63 = vpop.f32.mrf.mxu1 }
 0x1d9   : > { %v1054_v2 = vadd.f32 %v1053_v63, %v828_v18  ;;  %v830_v6 = vpop.f32.mrf.mxu0  ;;  %v1791_v7 = vpop.permute.xlu1 %1790 }
 0x1da   : > { %1950 = vst [vmem:[%s3643_s12 + $0xb0] sm:$0xff] %v1915_v50  ;;  %v1055_v24 = vpop.f32.mrf.mxu1  ;;  %v1852_v39 = vmul.f32 %v1791_v7, %v1049_v22  ;;  %v1826_v18 = vpop.permute.xlu0 %1825  ;;  %v1892_v22 = vld [vmem:[%s3632_s3 + $0xf8] sm:$0xff]  ;;  %v1969_v6 = vld [vmem:[%s3643_s12] sm:$0xff] (%p1960_p0)  ;;  %v1971_v7 = vld [vmem:[%s3643_s12 + $0x10] sm:$0xff] (%p1960_p0) }
 0x1db   : > { %v1853_v9 = vmul.f32 %v1796_v43, %v1054_v2  ;;  %v833_v14 = vpop.f32.mrf.mxu0  ;;  %2001 = vst [vmem:[%s2542_s8] sm:$0xff] (%p1960_p0), %v1969_v6  ;;  %2003 = vst [vmem:[%s2542_s8 + $0x10] sm:$0xff] (%p1960_p0), %v1971_v7  ;;  %v1972_v43 = vld [vmem:[%s3643_s12 + $0x18] sm:$0xff] (%p1960_p0)  ;;  %v1974_v24 = vld [vmem:[%s3643_s12 + $0x28] sm:$0xff] (%p1960_p0) }
 0x1dc   : > { %v1917_v20 = vadd.f32 %v1885_v19, %v1852_v39  ;;  %v1058_v45 = vpop.f32.mrf.mxu1  ;;  %v1970_v19 = vld [vmem:[%s3643_s12 + $0x8] sm:$0xff] (%p1960_p0)  ;;  %2004 = vst [vmem:[%s2542_s8 + $0x18] sm:$0xff] (%p1960_p0), %v1972_v43  ;;  %2006 = vst [vmem:[%s2542_s8 + $0x28] sm:$0xff] (%p1960_p0), %v1974_v24  ;;  %v1975_v39 = vld [vmem:[%s3643_s12 + $0x30] sm:$0xff] (%p1960_p0) }
 0x1dd   : > { %v1918_v27 = vadd.f32 %v1886_v15, %v1853_v9  ;;  %v1059_v4 = vadd.f32 %v1058_v45, %v833_v14  ;;  %v835_v41 = vpop.f32.mrf.mxu0  ;;  %v1801_v28 = vpop.permute.xlu1 %1800  ;;  %2002 = vst [vmem:[%s2542_s8 + $0x8] sm:$0xff] (%p1960_p0), %v1970_v19  ;;  %v1973_v15 = vld [vmem:[%s3643_s12 + $0x20] sm:$0xff] (%p1960_p0)  ;;  %v1976_v9 = vld [vmem:[%s3643_s12 + $0x38] sm:$0xff] (%p1960_p0)  ;;  %2007 = vst [vmem:[%s2542_s8 + $0x30] sm:$0xff] (%p1960_p0), %v1975_v39 }
 0x1de   : > { %1952 = vst [vmem:[%s3643_s12 + $0xc0] sm:$0xff] %v1917_v20  ;;  %v1060_v29 = vpop.f32.mrf.mxu1  ;;  %2005 = vst [vmem:[%s2542_s8 + $0x20] sm:$0xff] (%p1960_p0), %v1973_v15  ;;  %v1977_v14 = vld [vmem:[%s3643_s12 + $0x40] sm:$0xff] (%p1960_p0)  ;;  %v1978_v20 = vld [vmem:[%s3643_s12 + $0x48] sm:$0xff] (%p1960_p0) }
 0x1df   : > { %1953 = vst [vmem:[%s3643_s12 + $0xc8] sm:$0xff] %v1918_v27  ;;  %v1854_v0 = vmul.f32 %v1801_v28, %v1059_v4  ;;  %v838_v59 = vpop.f32.mrf.mxu0  ;;  %2008 = vst [vmem:[%s2542_s8 + $0x38] sm:$0xff] (%p1960_p0), %v1976_v9  ;;  %v1979_v45 = vld [vmem:[%s3643_s12 + $0x50] sm:$0xff] (%p1960_p0)  ;;  %v1980_v27 = vld [vmem:[%s3643_s12 + $0x58] sm:$0xff] (%p1960_p0) }
 0x1e0   : > { %v1063_v60 = vpop.f32.mrf.mxu1  ;;  %2009 = vst [vmem:[%s2542_s8 + $0x40] sm:$0xff] (%p1960_p0), %v1977_v14  ;;  %2010 = vst [vmem:[%s2542_s8 + $0x48] sm:$0xff] (%p1960_p0), %v1978_v20  ;;  %v1981_v4 = vld [vmem:[%s3643_s12 + $0x60] sm:$0xff] (%p1960_p0)  ;;  %v1982_v41 = vld [vmem:[%s3643_s12 + $0x68] sm:$0xff] (%p1960_p0) }
 0x1e1   : > { %v1919_v16 = vadd.f32 %v1887_v42, %v1854_v0  ;;  %v1064_v36 = vadd.f32 %v1063_v60, %v838_v59  ;;  %v840_v23 = vpop.f32.mrf.mxu0  ;;  %v1811_v12 = vpop.permute.xlu1 %1810  ;;  %2011 = vst [vmem:[%s2542_s8 + $0x50] sm:$0xff] (%p1960_p0), %v1979_v45  ;;  %2012 = vst [vmem:[%s2542_s8 + $0x58] sm:$0xff] (%p1960_p0), %v1980_v27  ;;  %v1983_v28 = vld [vmem:[%s3643_s12 + $0x70] sm:$0xff] (%p1960_p0)  ;;  %v1984_v29 = vld [vmem:[%s3643_s12 + $0x78] sm:$0xff] (%p1960_p0) }
 0x1e2   : > { %v1065_v44 = vpop.f32.mrf.mxu1  ;;  %2013 = vst [vmem:[%s2542_s8 + $0x60] sm:$0xff] (%p1960_p0), %v1981_v4  ;;  %2014 = vst [vmem:[%s2542_s8 + $0x68] sm:$0xff] (%p1960_p0), %v1982_v41  ;;  %v1985_v42 = vld [vmem:[%s3643_s12 + $0x80] sm:$0xff] (%p1960_p0)  ;;  %v1986_v0 = vld [vmem:[%s3643_s12 + $0x88] sm:$0xff] (%p1960_p0) }
 0x1e3   : > { %1954 = vst [vmem:[%s3643_s12 + $0xd0] sm:$0xff] %v1919_v16  ;;  %v1855_v48 = vmul.f32 %v1806_v55, %v1064_v36  ;;  %v843_v52 = vpop.f32.mrf.mxu0  ;;  %2015 = vst [vmem:[%s2542_s8 + $0x70] sm:$0xff] (%p1960_p0), %v1983_v28  ;;  %v1987_v59 = vld [vmem:[%s3643_s12 + $0x90] sm:$0xff] (%p1960_p0)  ;;  %v1988_v60 = vld [vmem:[%s3643_s12 + $0x98] sm:$0xff] (%p1960_p0) }
 0x1e4   : > { %v1068_v53 = vpop.f32.mrf.mxu1  ;;  %2016 = vst [vmem:[%s2542_s8 + $0x78] sm:$0xff] (%p1960_p0), %v1984_v29  ;;  %2017 = vst [vmem:[%s2542_s8 + $0x80] sm:$0xff] (%p1960_p0), %v1985_v42  ;;  %v1989_v16 = vld [vmem:[%s3643_s12 + $0xa0] sm:$0xff] (%p1960_p0)  ;;  %v1990_v36 = vld [vmem:[%s3643_s12 + $0xa8] sm:$0xff] (%p1960_p0) }
 0x1e5   : > { %v1920_v54 = vadd.f32 %v1888_v37, %v1855_v48  ;;  %v1069_v62 = vadd.f32 %v1068_v53, %v843_v52  ;;  %v845_v17 = vpop.f32.mrf.mxu0  ;;  %v1821_v1 = vpop.permute.xlu1 %1820  ;;  %2018 = vst [vmem:[%s2542_s8 + $0x88] sm:$0xff] (%p1960_p0), %v1986_v0  ;;  %2019 = vst [vmem:[%s2542_s8 + $0x90] sm:$0xff] (%p1960_p0), %v1987_v59  ;;  %v1991_v23 = vld [vmem:[%s3643_s12 + $0xb0] sm:$0xff] (%p1960_p0)  ;;  %v1992_v55 = vld [vmem:[%s3643_s12 + $0xb8] sm:$0xff] (%p1960_p0) }
 0x1e6   : > { %v1070_v57 = vpop.f32.mrf.mxu1  ;;  %2020 = vst [vmem:[%s2542_s8 + $0x98] sm:$0xff] (%p1960_p0), %v1988_v60  ;;  %2021 = vst [vmem:[%s2542_s8 + $0xa0] sm:$0xff] (%p1960_p0), %v1989_v16  ;;  %v1993_v37 = vld [vmem:[%s3643_s12 + $0xc0] sm:$0xff] (%p1960_p0)  ;;  %v1994_v44 = vld [vmem:[%s3643_s12 + $0xc8] sm:$0xff] (%p1960_p0) }
 0x1e7   : > { %1955 = vst [vmem:[%s3643_s12 + $0xd8] sm:$0xff] %v1920_v54  ;;  %v1856_v46 = vmul.f32 %v1811_v12, %v1069_v62  ;;  %v848_v30 = vpop.f32.mrf.mxu0  ;;  %2022 = vst [vmem:[%s2542_s8 + $0xa8] sm:$0xff] (%p1960_p0), %v1990_v36 }
 0x1e8   : > { %v1073_v49 = vpop.f32.mrf.mxu1  ;;  %2023 = vst [vmem:[%s2542_s8 + $0xb0] sm:$0xff] (%p1960_p0), %v1991_v23  ;;  %2024 = vst [vmem:[%s2542_s8 + $0xb8] sm:$0xff] (%p1960_p0), %v1992_v55 }
 0x1e9   : > { %v1921_v21 = vadd.f32 %v1889_v3, %v1856_v46  ;;  %v1074_v11 = vadd.f32 %v1073_v49, %v848_v30  ;;  %v850_v61 = vpop.f32.mrf.mxu0  ;;  %2025 = vst [vmem:[%s2542_s8 + $0xc0] sm:$0xff] (%p1960_p0), %v1993_v37  ;;  %2026 = vst [vmem:[%s2542_s8 + $0xc8] sm:$0xff] (%p1960_p0), %v1994_v44 }
 0x1ea   : > { %v1075_v26 = vpop.f32.mrf.mxu1  ;;  %v1995_v48 = vld [vmem:[%s3643_s12 + $0xd0] sm:$0xff] (%p1960_p0) }
 0x1eb   : > { %1956 = vst [vmem:[%s3643_s12 + $0xe0] sm:$0xff] %v1921_v21  ;;  %v1857_v8 = vmul.f32 %v1816_v47, %v1074_v11  ;;  %v853_v33 = vpop.f32.mrf.mxu0  ;;  %2027 = vst [vmem:[%s2542_s8 + $0xd0] sm:$0xff] (%p1960_p0), %v1995_v48 }
 0x1ec   : > { %v1078_v38 = vpop.f32.mrf.mxu1 }
 0x1ed   : > { %v1922_v40 = vadd.f32 %v1890_v13, %v1857_v8  ;;  %v1079_v5 = vadd.f32 %v1078_v38, %v853_v33  ;;  %v855_v35 = vpop.f32.mrf.mxu0 }
 0x1ee   : > { %v1080_v56 = vpop.f32.mrf.mxu1  ;;  %v1996_v52 = vld [vmem:[%s3643_s12 + $0xd8] sm:$0xff] (%p1960_p0) }
 0x1ef   : > { %1957 = vst [vmem:[%s3643_s12 + $0xe8] sm:$0xff] %v1922_v40  ;;  %v1858_v31 = vmul.f32 %v1821_v1, %v1079_v5  ;;  %v858_v34 = vpop.f32.mrf.mxu0  ;;  %2028 = vst [vmem:[%s2542_s8 + $0xd8] sm:$0xff] (%p1960_p0), %v1996_v52 }
 0x1f0   : > { %v1083_v58 = vpop.f32.mrf.mxu1 }
 0x1f1   : > { %v1923_v25 = vadd.f32 %v1891_v32, %v1858_v31  ;;  %v1084_v51 = vadd.f32 %v1083_v58, %v858_v34  ;;  %v860_v10 = vpop.f32.mrf.mxu0 }
 0x1f2   : > { %v1085_v50 = vpop.f32.mrf.mxu1  ;;  %v1997_v53 = vld [vmem:[%s3643_s12 + $0xe0] sm:$0xff] (%p1960_p0) }
 0x1f3   : > { %1958 = vst [vmem:[%s3643_s12 + $0xf0] sm:$0xff] %v1923_v25  ;;  %v1859_v63 = vmul.f32 %v1826_v18, %v1084_v51  ;;  %1964 = sbr.rel (!%p1960_p0) target bundleno = 512 (0x200), region = 48  ;;  %2029 = vst [vmem:[%s2542_s8 + $0xe0] sm:$0xff] (%p1960_p0), %v1997_v53 }
 0x1f5   : > { %v1924_v2 = vadd.f32 %v1892_v22, %v1859_v63 }
 0x1f6   : > { %v1998_v54 = vld [vmem:[%s3643_s12 + $0xe8] sm:$0xff] (%p1960_p0) }
 0x1f7   : > { %1959 = vst [vmem:[%s3643_s12 + $0xf8] sm:$0xff] %v1924_v2  ;;  %2030 = vst [vmem:[%s2542_s8 + $0xe8] sm:$0xff] (%p1960_p0), %v1998_v54 }
 0x1fa   : > { %v1999_v62 = vld [vmem:[%s3643_s12 + $0xf0] sm:$0xff] }
 0x1fb   : > { %2031 = vst [vmem:[%s2542_s8 + $0xf0] sm:$0xff] %v1999_v62 }
 0x1fe   : > { %v2000_v17 = vld [vmem:[%s3643_s12 + $0xf8] sm:$0xff] }
 0x1ff   : > { %2032 = vst [vmem:[%s2542_s8 + $0xf8] sm:$0xff] %v2000_v17 }
 0x200 PF: > { %s15_s16 = sadd.s32 1, %s2424_s16   ;;  %s3973_s9 = smov %s2400_s10 }
 0x201   : > { %p12_p1 = scmp.ge.s32.totalorder %s15_s16, 8   ;;  %s3974_s10 = smov %s2404_s11 }
 0x202   : > { %s3975_s11 = smov %s2504_s23  ;;  %s3976_s12 = smov %s2416_s14 }
 0x203   : > { %s3977_s13 = smov %s2420_s15  ;;  %s3978_s14 = smov %s3981_s18 }
 0x204   : > { %s3979_s15 = smov %s3985_s19  ;;  %14 = sbr.rel (!%p12_p1) target bundleno = 5 (0x5), region = 88 }
 0x209   :  { %2055 = vsyncpa [#allocation6], 1 }
 0x20a   :  { %2057 = vsyncpa [#allocation6 + $0x1], 1 }

</bundles_post_ra>
